<compile_context>
chip_gen: v5e
topology: v5e:2x2
jax: 0.10.0
libtpu: 0.0.40
codegen_flags: <defaults>
</compile_context>

<pallas_src>
import functools

import jax
import jax.numpy as jnp
from jax import lax
from jax.experimental import pallas as pl
from jax.experimental.pallas import tpu as pltpu

LANE = 128   # output channels are zero-padded to this lane width


# ------------------------------ Pallas kernel ------------------------------- #

def _residual_block_kernel(x_ref, w1s_ref, w1c_ref, b1_ref, w2_ref, b23_ref,
                           o_ref, y1_ref, *, H, W, Wp, GY, SR):
    """Fused ResidualBlock for one image.

    x_ref  : (Rs, 3*Cin) bf16  zero-padded image, flattened to Rs=(H+2)*Wp rows,
                               with the dw=-1/0/+1 neighbours packed in channels.
    w1s_ref: (2, 3*Cin, LANE)  bf16 conv1 taps for dh=0 and dh=2 (bn1 folded).
    w1c_ref: (3*Cin, 2*LANE)   bf16 conv1 dh=1 tap (lanes 0:LANE) fused with the
                               1x1 shortcut conv (lanes LANE:2*LANE, bn3 folded).
    b1_ref : (1, LANE) f32     bn1 bias (zero in padded channels).
    w2_ref : (9, LANE, LANE)   bf16 conv2 taps, bn2 scale folded in.
    b23_ref: (1, LANE) f32     bn2 bias + bn3 bias.
    o_ref  : (L, LANE) bf16    output rows in padded-W layout, L = H*Wp.
    y1_ref : (SR, LANE) bf16   VMEM scratch: y1 plus zero halo/guard rows.
    """
    L = H * Wp
    f32 = jnp.float32

    # ---- conv1: 3 aligned dots (dw packed into channels on the host) -------
    acc1 = jnp.dot(x_ref[0:L, :], w1s_ref[0], preferred_element_type=f32)
    acc1 = acc1 + jnp.dot(x_ref[2 * Wp:2 * Wp + L, :], w1s_ref[1],
                          preferred_element_type=f32)
    # dh=1 tap fused with the 1x1 shortcut: one 2*LANE-wide dot.
    mid = jnp.dot(x_ref[Wp:Wp + L, :], w1c_ref[...], preferred_element_type=f32)
    acc1 = acc1 + mid[:, :LANE]
    acc2 = mid[:, LANE:]                       # shortcut seeds the conv2 acc

    # bn1 bias + ReLU; zero the padded-W columns so conv2 sees a zero ring.
    col = lax.broadcasted_iota(jnp.int32, (L, 1), 0) % Wp
    interior = jnp.logical_and(col >= 1, col <= W)
    y1 = jnp.where(interior, jnp.maximum(acc1 + b1_ref[...], 0.0), 0.0)

    # y1 resident in VMEM as bf16; zero ONLY the halo/guard rows, every step
    # (not @pl.when(step==0): under 'parallel' each core owns its own scratch).
    y1_ref[0:GY + Wp, :] = jnp.zeros((GY + Wp, LANE), y1_ref.dtype)
    y1_ref[GY + Wp + L:SR, :] = jnp.zeros((SR - GY - Wp - L, LANE), y1_ref.dtype)
    y1_ref[GY + Wp:GY + Wp + L, :] = y1.astype(y1_ref.dtype)

    # ---- conv2 (3x3 over y1, bn2 folded) accumulated on top of the shortcut --
    # Centre taps (dw=1) start at 8-aligned rows; dw=+-1 remain unaligned (TODO).
    for dh in range(3):
        for dw in range(3):
            s = GY + dh * Wp + dw - 1
            acc2 = acc2 + jnp.dot(y1_ref[s:s + L, :], w2_ref[dh * 3 + dw],
                                  preferred_element_type=f32)

    # bias + ReLU epilogue in f32, lane-dense bf16 store.
    o_ref[...] = jnp.maximum(acc2 + b23_ref[...], 0.0).astype(o_ref.dtype)


# ------------------------------- host helpers -------------------------------- #

def bn_fold(gamma, beta, mean, var, eps=1e-5):
    """Return (scale, bias) such that BN(y) = y*scale + bias (eval mode)."""
    scale = gamma / jnp.sqrt(var + eps)
    bias = beta - mean * scale
    return scale, bias


def _taps(w_oihw, scale):
    """[Cout, Cin, 3, 3] -> (3, 3*Cin, Cout): per-dh, the dw taps stacked on K."""
    cout, cin = w_oihw.shape[:2]
    w = w_oihw * scale[:, None, None, None]
    w = jnp.transpose(w, (2, 3, 1, 0))                # (dh, dw, Cin, Cout)
    return w.reshape(3, 3 * cin, cout)


def _pad_row(v, lane):
    return jnp.pad(v, (0, lane - v.shape[0])).reshape(1, lane).astype(jnp.float32)


def residual_block_forward(x_nchw, params):
    """Full ResidualBlock forward. x_nchw: [N, Cin, H, W] -> [N, Cout, H, W]."""
    N, Cin, H, W = x_nchw.shape
    Cout = params["w1"].shape[0]
    assert Cout <= LANE

    Wp = ((W + 2 + 7) // 8) * 8      # padded width, multiple of 8 (>= W+2)
    Hp = H + 2
    Rs = Hp * Wp                     # rows of the zero-padded image
    L = H * Wp                       # output rows per image (padded-W layout)
    GY = 8                           # front guard rows of the y1 scratch
    SR = GY + Rs + 8                 # scratch rows (8 tail guard rows)

    # NCHW -> zero-padded NHWC rows; pack the 3 dw neighbours into channels.
    x_nhwc = jnp.transpose(x_nchw, (0, 2, 3, 1)).astype(jnp.float32)
    xf = jnp.pad(x_nhwc, ((0, 0), (1, 1), (1, Wp - W - 1), (0, 0))
                 ).reshape(N, Rs, Cin)
    zrow = jnp.zeros((N, 1, Cin), jnp.float32)
    x_l = jnp.concatenate([zrow, xf[:, :-1]], axis=1)     # [q] = x_full[q-1]
    x_r = jnp.concatenate([xf[:, 1:], zrow], axis=1)      # [q] = x_full[q+1]
    xpack = jnp.concatenate([x_l, xf, x_r], axis=-1).astype(jnp.bfloat16)

    # Fold BN scales into the weights; pad Cout to LANE; cast bf16 for the MXU.
    s1, b1 = bn_fold(*params["bn1"])
    s2, b2 = bn_fold(*params["bn2"])
    s3, b3 = bn_fold(*params["bn3"])

    w1t = jnp.pad(_taps(params["w1"], s1), ((0, 0), (0, 0), (0, LANE - Cout)))
    w1_side = jnp.stack([w1t[0], w1t[2]]).astype(jnp.bfloat16)   # (2, 3*Cin, LANE)

    w3m = (params["w3"].reshape(Cout, Cin) * s3[:, None]).T      # (Cin, Cout)
    w1_mid = jnp.zeros((3 * Cin, 2 * LANE), jnp.float32)
    w1_mid = w1_mid.at[:, :LANE].set(w1t[1])
    w1_mid = w1_mid.at[Cin:2 * Cin, LANE:LANE + Cout].set(w3m)
    w1_mid = w1_mid.astype(jnp.bfloat16)                         # (3*Cin, 2*LANE)

    w2t = _taps(params["w2"], s2).reshape(9, Cout, Cout)
    w2t = jnp.pad(w2t, ((0, 0), (0, LANE - Cout), (0, LANE - Cout))
                  ).astype(jnp.bfloat16)                         # (9, LANE, LANE)

    b1p = _pad_row(b1, LANE)
    b23p = _pad_row(b2 + b3, LANE)

    kernel = functools.partial(_residual_block_kernel,
                               H=H, W=W, Wp=Wp, GY=GY, SR=SR)
    out = pl.pallas_call(
        kernel,
        out_shape=jax.ShapeDtypeStruct((N, L, LANE), jnp.bfloat16),
        grid_spec=pltpu.PrefetchScalarGridSpec(
            num_scalar_prefetch=0,
            grid=(N,),
            in_specs=[
                pl.BlockSpec((None, Rs, 3 * Cin), lambda n: (n, 0, 0)),
                pl.BlockSpec((2, 3 * Cin, LANE), lambda n: (0, 0, 0)),
                pl.BlockSpec((3 * Cin, 2 * LANE), lambda n: (0, 0)),
                pl.BlockSpec((1, LANE), lambda n: (0, 0)),
                pl.BlockSpec((9, LANE, LANE), lambda n: (0, 0, 0)),
                pl.BlockSpec((1, LANE), lambda n: (0, 0)),
            ],
            out_specs=pl.BlockSpec((None, L, LANE), lambda n: (n, 0, 0)),
            scratch_shapes=[pltpu.VMEM((SR, LANE), jnp.bfloat16)],
        ),
        compiler_params=pltpu.CompilerParams(
            dimension_semantics=("parallel",),
            vmem_limit_bytes=32 * 1024 * 1024),
    )(xpack, w1_side, w1_mid, b1p, w2t, b23p)

    # (N, L, LANE) bf16 -> drop padded W columns and padded channels -> f32 NCHW.
    out = out.reshape(N, H, Wp, LANE)[:, :, 1:W + 1, :Cout].astype(jnp.float32)
    return jnp.transpose(out, (0, 3, 1, 2))


# ---------------------------- pure-JAX reference ----------------------------- #

def reference_forward(x_nchw, params):
    def conv(x, w, pad):
        return lax.conv_general_dilated(
            x, w, window_strides=(1, 1), padding=[(pad, pad), (pad, pad)],
            dimension_numbers=("NCHW", "OIHW", "NCHW"))

    def bn(y, g, b, m, v, eps=1e-5):
        g, b, m, v = (t.reshape(1, -1, 1, 1) for t in (g, b, m, v))
        return (y - m) / jnp.sqrt(v + eps) * g + b

    out1 = jnp.maximum(bn(conv(x_nchw, params["w1"], 1), *params["bn1"]), 0.0)
    out1 = bn(conv(out1, params["w2"], 1), *params["bn2"])
    out2 = bn(conv(x_nchw, params["w3"], 0), *params["bn3"])
    return jnp.maximum(out1 + out2, 0.0)


# ---------------------------------- main ------------------------------------- #

if __name__ == "__main__":
    N, Cin, Cout, H, W = 2, 4, 8, 16, 16

    key = jax.random.PRNGKey(0)
    kx, k1, k2, k3, kb1, kb2, kb3 = jax.random.split(key, 7)

    def bn_params(k, c):
        kg, kb, km, kv = jax.random.split(k, 4)
        gamma = 1.0 + 0.1 * jax.random.normal(kg, (c,), jnp.float32)
        beta = 0.1 * jax.random.normal(kb, (c,), jnp.float32)
        mean = 0.1 * jax.random.normal(km, (c,), jnp.float32)
        var = jnp.abs(jax.random.normal(kv, (c,), jnp.float32)) + 0.5
        return gamma, beta, mean, var

    params = {
        "w1": 0.1 * jax.random.normal(k1, (Cout, Cin, 3, 3), jnp.float32),
        "w2": 0.1 * jax.random.normal(k2, (Cout, Cout, 3, 3), jnp.float32),
        "w3": 0.1 * jax.random.normal(k3, (Cout, Cin, 1, 1), jnp.float32),
        "bn1": bn_params(kb1, Cout),
        "bn2": bn_params(kb2, Cout),
        "bn3": bn_params(kb3, Cout),
    }

    x = jax.random.normal(kx, (N, Cin, H, W), jnp.float32)

    out = jax.block_until_ready(residual_block_forward(x, params))
    ref = jax.block_until_ready(reference_forward(x, params))

    assert out.shape == (N, Cout, H, W)
    err = float(jnp.max(jnp.abs(out - ref)))
    # bf16 MXU inputs, bf16 y1 scratch and bf16 HBM output with f32 accumulation
    # -> allow a few 1e-2 of absolute error vs. the f32 reference.
    assert err < 6e-2, f"mismatch vs reference: max abs err {err}"
    print("KERNEL_OK")
</pallas_src>

<mosaic_0001>
module attributes {stable_mosaic.version = 11 : i64} {
  func.func @_residual_block_kernel(%arg0: i32, %arg1: memref<1x432x12xbf16, #tpu.memory_space<vmem>>, %arg2: memref<2x12x128xbf16, #tpu.memory_space<vmem>>, %arg3: memref<12x256xbf16, #tpu.memory_space<vmem>>, %arg4: memref<1x128xf32, #tpu.memory_space<vmem>>, %arg5: memref<9x128x128xbf16, #tpu.memory_space<vmem>>, %arg6: memref<1x128xf32, #tpu.memory_space<vmem>>, %arg7: memref<1x384x128xbf16, #tpu.memory_space<vmem>>, %arg8: memref<448x128xbf16, #tpu.memory_space<vmem>>) attributes {dimension_semantics = [#tpu.dimension_semantics<parallel>], iteration_bounds = array<i64: 2>, scalar_prefetch = 0 : i64, scratch_operands = 1 : i64, tpu.core_type = #tpu.core_type<tc>, window_params = [{transform_indices = @transform_0, window_bounds = array<i64: 1, 432, 12>}, {pipeline_mode = #tpu.pipeline_mode<synchronous>, transform_indices = @transform_1, window_bounds = array<i64: 2, 12, 128>}, {pipeline_mode = #tpu.pipeline_mode<synchronous>, transform_indices = @transform_2, window_bounds = array<i64: 12, 256>}, {pipeline_mode = #tpu.pipeline_mode<synchronous>, transform_indices = @transform_3, window_bounds = array<i64: 1, 128>}, {pipeline_mode = #tpu.pipeline_mode<synchronous>, transform_indices = @transform_4, window_bounds = array<i64: 9, 128, 128>}, {pipeline_mode = #tpu.pipeline_mode<synchronous>, transform_indices = @transform_5, window_bounds = array<i64: 1, 128>}, {transform_indices = @transform_6, window_bounds = array<i64: 1, 384, 128>}]} {
    %c0 = arith.constant 0 : index
    %c0_0 = arith.constant 0 : index
    %c0_1 = arith.constant 0 : index
    %0 = vector.load %arg1[%c0, %c0_0, %c0_1] : memref<1x432x12xbf16, #tpu.memory_space<vmem>>, vector<1x384x12xbf16>
    %1 = vector.shape_cast %0 : vector<1x384x12xbf16> to vector<384x12xbf16>
    %c0_2 = arith.constant 0 : index
    %c0_3 = arith.constant 0 : index
    %c0_4 = arith.constant 0 : index
    %2 = vector.load %arg2[%c0_2, %c0_3, %c0_4] : memref<2x12x128xbf16, #tpu.memory_space<vmem>>, vector<1x12x128xbf16>
    %3 = vector.shape_cast %2 : vector<1x12x128xbf16> to vector<12x128xbf16>
    %cst = arith.constant dense<0.000000e+00> : vector<384x128xf32>
    %4 = tpu.matmul %1, %3, %cst {dimension_numbers = #tpu.dot_dimension_numbers<[1], [0], [0], [1], [0, 0, 1, 1], [], []>} : vector<384x12xbf16>, vector<12x128xbf16>, vector<384x128xf32> -> vector<384x128xf32>
    %c0_5 = arith.constant 0 : index
    %c48 = arith.constant 48 : index
    %c0_6 = arith.constant 0 : index
    %5 = vector.load %arg1[%c0_5, %c48, %c0_6] : memref<1x432x12xbf16, #tpu.memory_space<vmem>>, vector<1x384x12xbf16>
    %6 = vector.shape_cast %5 : vector<1x384x12xbf16> to vector<384x12xbf16>
    %c1 = arith.constant 1 : index
    %c0_7 = arith.constant 0 : index
    %c0_8 = arith.constant 0 : index
    %7 = vector.load %arg2[%c1, %c0_7, %c0_8] : memref<2x12x128xbf16, #tpu.memory_space<vmem>>, vector<1x12x128xbf16>
    %8 = vector.shape_cast %7 : vector<1x12x128xbf16> to vector<12x128xbf16>
    %cst_9 = arith.constant dense<0.000000e+00> : vector<384x128xf32>
    %9 = tpu.matmul %6, %8, %cst_9 {dimension_numbers = #tpu.dot_dimension_numbers<[1], [0], [0], [1], [0, 0, 1, 1], [], []>} : vector<384x12xbf16>, vector<12x128xbf16>, vector<384x128xf32> -> vector<384x128xf32>
    %10 = arith.addf %4, %9 : vector<384x128xf32>
    %c0_10 = arith.constant 0 : index
    %c24 = arith.constant 24 : index
    %c0_11 = arith.constant 0 : index
    %11 = vector.load %arg1[%c0_10, %c24, %c0_11] : memref<1x432x12xbf16, #tpu.memory_space<vmem>>, vector<1x384x12xbf16>
    %12 = vector.shape_cast %11 : vector<1x384x12xbf16> to vector<384x12xbf16>
    %c0_12 = arith.constant 0 : index
    %c0_13 = arith.constant 0 : index
    %13 = vector.load %arg3[%c0_12, %c0_13] : memref<12x256xbf16, #tpu.memory_space<vmem>>, vector<12x256xbf16>
    %cst_14 = arith.constant dense<0.000000e+00> : vector<384x256xf32>
    %14 = tpu.matmul %12, %13, %cst_14 {dimension_numbers = #tpu.dot_dimension_numbers<[1], [0], [0], [1], [0, 0, 1, 1], [], []>} : vector<384x12xbf16>, vector<12x256xbf16>, vector<384x256xf32> -> vector<384x256xf32>
    %15 = vector.extract_strided_slice %14 {offsets = [0, 0], sizes = [384, 128], strides = [1, 1]} : vector<384x256xf32> to vector<384x128xf32>
    %16 = arith.addf %10, %15 : vector<384x128xf32>
    %17 = vector.extract_strided_slice %14 {offsets = [0, 128], sizes = [384, 128], strides = [1, 1]} : vector<384x256xf32> to vector<384x128xf32>
    %18 = tpu.iota {dimensions = array<i32: 0>} : vector<384x1xi32>
    %c24_i32 = arith.constant 24 : i32
    %c0_i32 = arith.constant 0 : i32
    %19 = arith.cmpi eq, %c24_i32, %c0_i32 : i32
    %c1_i32 = arith.constant 1 : i32
    %20 = arith.select %19, %c1_i32, %c24_i32 : i32
    %21 = vector.broadcast %20 : i32 to vector<384x1xi32>
    %22 = arith.remsi %18, %21 : vector<384x1xi32>
    %c0_i32_15 = arith.constant 0 : i32
    %23 = vector.broadcast %c0_i32_15 : i32 to vector<384x1xi32>
    %24 = arith.cmpi ne, %22, %23 : vector<384x1xi32>
    %c0_i32_16 = arith.constant 0 : i32
    %25 = vector.broadcast %c0_i32_16 : i32 to vector<384x1xi32>
    %26 = arith.cmpi slt, %22, %25 : vector<384x1xi32>
    %c0_i32_17 = arith.constant 0 : i32
    %27 = arith.cmpi slt, %20, %c0_i32_17 : i32
    %28 = vector.broadcast %27 : i1 to vector<384x1xi1>
    %29 = vector.broadcast %28 : vector<384x1xi1> to vector<384x1xi1>
    %30 = arith.xori %26, %29 : vector<384x1xi1>
    %31 = arith.andi %30, %24 : vector<384x1xi1>
    %32 = vector.broadcast %20 : i32 to vector<384x1xi32>
    %33 = arith.addi %22, %32 : vector<384x1xi32>
    %34 = arith.select %31, %33, %22 : vector<384x1xi1>, vector<384x1xi32>
    %c1_i32_18 = arith.constant 1 : i32
    %35 = vector.broadcast %c1_i32_18 : i32 to vector<384x1xi32>
    %36 = arith.cmpi sge, %34, %35 : vector<384x1xi32>
    %c16_i32 = arith.constant 16 : i32
    %37 = vector.broadcast %c16_i32 : i32 to vector<384x1xi32>
    %38 = arith.cmpi sle, %34, %37 : vector<384x1xi32>
    %39 = arith.andi %36, %38 : vector<384x1xi1>
    %c0_19 = arith.constant 0 : index
    %c0_20 = arith.constant 0 : index
    %40 = vector.load %arg4[%c0_19, %c0_20] : memref<1x128xf32, #tpu.memory_space<vmem>>, vector<1x128xf32>
    %41 = vector.broadcast %40 : vector<1x128xf32> to vector<384x128xf32>
    %42 = arith.addf %16, %41 : vector<384x128xf32>
    %cst_21 = arith.constant 0.000000e+00 : f32
    %43 = vector.broadcast %cst_21 : f32 to vector<384x128xf32>
    %44 = arith.maximumf %42, %43 : vector<384x128xf32>
    %cst_22 = arith.constant 0.000000e+00 : f32
    %45 = vector.shape_cast %39 : vector<384x1xi1> to vector<384x1xi1>
    %46 = vector.broadcast %45 : vector<384x1xi1> to vector<384x128xi1>
    %47 = vector.broadcast %cst_22 : f32 to vector<384x128xf32>
    %48 = arith.select %46, %44, %47 : vector<384x128xi1>, vector<384x128xf32>
    %cst_23 = arith.constant 0.000000e+00 : bf16
    %49 = vector.broadcast %cst_23 : bf16 to vector<32x128xbf16>
    %c0_24 = arith.constant 0 : index
    %c0_25 = arith.constant 0 : index
    %50 = vector.load %arg8[%c0_24, %c0_25] : memref<448x128xbf16, #tpu.memory_space<vmem>>, vector<32x128xbf16>
    tpu.vector_store %arg8[%c0_24, %c0_25], %49 {strides = array<i32>} : memref<448x128xbf16, #tpu.memory_space<vmem>>, vector<32x128xbf16>,
    %cst_26 = arith.constant 0.000000e+00 : bf16
    %51 = vector.broadcast %cst_26 : bf16 to vector<32x128xbf16>
    %c416 = arith.constant 416 : index
    %c0_27 = arith.constant 0 : index
    %52 = vector.load %arg8[%c416, %c0_27] : memref<448x128xbf16, #tpu.memory_space<vmem>>, vector<32x128xbf16>
    tpu.vector_store %arg8[%c416, %c0_27], %51 {strides = array<i32>} : memref<448x128xbf16, #tpu.memory_space<vmem>>, vector<32x128xbf16>,
    %53 = arith.truncf %48 : vector<384x128xf32> to vector<384x128xbf16>
    %c32 = arith.constant 32 : index
    %c0_28 = arith.constant 0 : index
    %54 = vector.load %arg8[%c32, %c0_28] : memref<448x128xbf16, #tpu.memory_space<vmem>>, vector<384x128xbf16>
    tpu.vector_store %arg8[%c32, %c0_28], %53 {strides = array<i32>} : memref<448x128xbf16, #tpu.memory_space<vmem>>, vector<384x128xbf16>,
    %c7 = arith.constant 7 : index
    %c0_29 = arith.constant 0 : index
    %55 = vector.load %arg8[%c7, %c0_29] : memref<448x128xbf16, #tpu.memory_space<vmem>>, vector<384x128xbf16>
    %c0_30 = arith.constant 0 : index
    %c0_31 = arith.constant 0 : index
    %c0_32 = arith.constant 0 : index
    %56 = vector.load %arg5[%c0_30, %c0_31, %c0_32] : memref<9x128x128xbf16, #tpu.memory_space<vmem>>, vector<1x128x128xbf16>
    %57 = vector.shape_cast %56 : vector<1x128x128xbf16> to vector<128x128xbf16>
    %cst_33 = arith.constant dense<0.000000e+00> : vector<384x128xf32>
    %58 = tpu.matmul %55, %57, %cst_33 {dimension_numbers = #tpu.dot_dimension_numbers<[1], [0], [0], [1], [0, 0, 1, 1], [], []>} : vector<384x128xbf16>, vector<128x128xbf16>, vector<384x128xf32> -> vector<384x128xf32>
    %59 = arith.addf %17, %58 : vector<384x128xf32>
    %c8 = arith.constant 8 : index
    %c0_34 = arith.constant 0 : index
    %60 = vector.load %arg8[%c8, %c0_34] : memref<448x128xbf16, #tpu.memory_space<vmem>>, vector<384x128xbf16>
    %c1_35 = arith.constant 1 : index
    %c0_36 = arith.constant 0 : index
    %c0_37 = arith.constant 0 : index
    %61 = vector.load %arg5[%c1_35, %c0_36, %c0_37] : memref<9x128x128xbf16, #tpu.memory_space<vmem>>, vector<1x128x128xbf16>
    %62 = vector.shape_cast %61 : vector<1x128x128xbf16> to vector<128x128xbf16>
    %cst_38 = arith.constant dense<0.000000e+00> : vector<384x128xf32>
    %63 = tpu.matmul %60, %62, %cst_38 {dimension_numbers = #tpu.dot_dimension_numbers<[1], [0], [0], [1], [0, 0, 1, 1], [], []>} : vector<384x128xbf16>, vector<128x128xbf16>, vector<384x128xf32> -> vector<384x128xf32>
    %64 = arith.addf %59, %63 : vector<384x128xf32>
    %c9 = arith.constant 9 : index
    %c0_39 = arith.constant 0 : index
    %65 = vector.load %arg8[%c9, %c0_39] : memref<448x128xbf16, #tpu.memory_space<vmem>>, vector<384x128xbf16>
    %c2 = arith.constant 2 : index
    %c0_40 = arith.constant 0 : index
    %c0_41 = arith.constant 0 : index
    %66 = vector.load %arg5[%c2, %c0_40, %c0_41] : memref<9x128x128xbf16, #tpu.memory_space<vmem>>, vector<1x128x128xbf16>
    %67 = vector.shape_cast %66 : vector<1x128x128xbf16> to vector<128x128xbf16>
    %cst_42 = arith.constant dense<0.000000e+00> : vector<384x128xf32>
    %68 = tpu.matmul %65, %67, %cst_42 {dimension_numbers = #tpu.dot_dimension_numbers<[1], [0], [0], [1], [0, 0, 1, 1], [], []>} : vector<384x128xbf16>, vector<128x128xbf16>, vector<384x128xf32> -> vector<384x128xf32>
    %69 = arith.addf %64, %68 : vector<384x128xf32>
    %c31 = arith.constant 31 : index
    %c0_43 = arith.constant 0 : index
    %70 = vector.load %arg8[%c31, %c0_43] : memref<448x128xbf16, #tpu.memory_space<vmem>>, vector<384x128xbf16>
    %c3 = arith.constant 3 : index
    %c0_44 = arith.constant 0 : index
    %c0_45 = arith.constant 0 : index
    %71 = vector.load %arg5[%c3, %c0_44, %c0_45] : memref<9x128x128xbf16, #tpu.memory_space<vmem>>, vector<1x128x128xbf16>
    %72 = vector.shape_cast %71 : vector<1x128x128xbf16> to vector<128x128xbf16>
    %cst_46 = arith.constant dense<0.000000e+00> : vector<384x128xf32>
    %73 = tpu.matmul %70, %72, %cst_46 {dimension_numbers = #tpu.dot_dimension_numbers<[1], [0], [0], [1], [0, 0, 1, 1], [], []>} : vector<384x128xbf16>, vector<128x128xbf16>, vector<384x128xf32> -> vector<384x128xf32>
    %74 = arith.addf %69, %73 : vector<384x128xf32>
    %c32_47 = arith.constant 32 : index
    %c0_48 = arith.constant 0 : index
    %75 = vector.load %arg8[%c32_47, %c0_48] : memref<448x128xbf16, #tpu.memory_space<vmem>>, vector<384x128xbf16>
    %c4 = arith.constant 4 : index
    %c0_49 = arith.constant 0 : index
    %c0_50 = arith.constant 0 : index
    %76 = vector.load %arg5[%c4, %c0_49, %c0_50] : memref<9x128x128xbf16, #tpu.memory_space<vmem>>, vector<1x128x128xbf16>
    %77 = vector.shape_cast %76 : vector<1x128x128xbf16> to vector<128x128xbf16>
    %cst_51 = arith.constant dense<0.000000e+00> : vector<384x128xf32>
    %78 = tpu.matmul %75, %77, %cst_51 {dimension_numbers = #tpu.dot_dimension_numbers<[1], [0], [0], [1], [0, 0, 1, 1], [], []>} : vector<384x128xbf16>, vector<128x128xbf16>, vector<384x128xf32> -> vector<384x128xf32>
    %79 = arith.addf %74, %78 : vector<384x128xf32>
    %c33 = arith.constant 33 : index
    %c0_52 = arith.constant 0 : index
    %80 = vector.load %arg8[%c33, %c0_52] : memref<448x128xbf16, #tpu.memory_space<vmem>>, vector<384x128xbf16>
    %c5 = arith.constant 5 : index
    %c0_53 = arith.constant 0 : index
    %c0_54 = arith.constant 0 : index
    %81 = vector.load %arg5[%c5, %c0_53, %c0_54] : memref<9x128x128xbf16, #tpu.memory_space<vmem>>, vector<1x128x128xbf16>
    %82 = vector.shape_cast %81 : vector<1x128x128xbf16> to vector<128x128xbf16>
    %cst_55 = arith.constant dense<0.000000e+00> : vector<384x128xf32>
    %83 = tpu.matmul %80, %82, %cst_55 {dimension_numbers = #tpu.dot_dimension_numbers<[1], [0], [0], [1], [0, 0, 1, 1], [], []>} : vector<384x128xbf16>, vector<128x128xbf16>, vector<384x128xf32> -> vector<384x128xf32>
    %84 = arith.addf %79, %83 : vector<384x128xf32>
    %c55 = arith.constant 55 : index
    %c0_56 = arith.constant 0 : index
    %85 = vector.load %arg8[%c55, %c0_56] : memref<448x128xbf16, #tpu.memory_space<vmem>>, vector<384x128xbf16>
    %c6 = arith.constant 6 : index
    %c0_57 = arith.constant 0 : index
    %c0_58 = arith.constant 0 : index
    %86 = vector.load %arg5[%c6, %c0_57, %c0_58] : memref<9x128x128xbf16, #tpu.memory_space<vmem>>, vector<1x128x128xbf16>
    %87 = vector.shape_cast %86 : vector<1x128x128xbf16> to vector<128x128xbf16>
    %cst_59 = arith.constant dense<0.000000e+00> : vector<384x128xf32>
    %88 = tpu.matmul %85, %87, %cst_59 {dimension_numbers = #tpu.dot_dimension_numbers<[1], [0], [0], [1], [0, 0, 1, 1], [], []>} : vector<384x128xbf16>, vector<128x128xbf16>, vector<384x128xf32> -> vector<384x128xf32>
    %89 = arith.addf %84, %88 : vector<384x128xf32>
    %c56 = arith.constant 56 : index
    %c0_60 = arith.constant 0 : index
    %90 = vector.load %arg8[%c56, %c0_60] : memref<448x128xbf16, #tpu.memory_space<vmem>>, vector<384x128xbf16>
    %c7_61 = arith.constant 7 : index
    %c0_62 = arith.constant 0 : index
    %c0_63 = arith.constant 0 : index
    %91 = vector.load %arg5[%c7_61, %c0_62, %c0_63] : memref<9x128x128xbf16, #tpu.memory_space<vmem>>, vector<1x128x128xbf16>
    %92 = vector.shape_cast %91 : vector<1x128x128xbf16> to vector<128x128xbf16>
    %cst_64 = arith.constant dense<0.000000e+00> : vector<384x128xf32>
    %93 = tpu.matmul %90, %92, %cst_64 {dimension_numbers = #tpu.dot_dimension_numbers<[1], [0], [0], [1], [0, 0, 1, 1], [], []>} : vector<384x128xbf16>, vector<128x128xbf16>, vector<384x128xf32> -> vector<384x128xf32>
    %94 = arith.addf %89, %93 : vector<384x128xf32>
    %c57 = arith.constant 57 : index
    %c0_65 = arith.constant 0 : index
    %95 = vector.load %arg8[%c57, %c0_65] : memref<448x128xbf16, #tpu.memory_space<vmem>>, vector<384x128xbf16>
    %c8_66 = arith.constant 8 : index
    %c0_67 = arith.constant 0 : index
    %c0_68 = arith.constant 0 : index
    %96 = vector.load %arg5[%c8_66, %c0_67, %c0_68] : memref<9x128x128xbf16, #tpu.memory_space<vmem>>, vector<1x128x128xbf16>
    %97 = vector.shape_cast %96 : vector<1x128x128xbf16> to vector<128x128xbf16>
    %cst_69 = arith.constant dense<0.000000e+00> : vector<384x128xf32>
    %98 = tpu.matmul %95, %97, %cst_69 {dimension_numbers = #tpu.dot_dimension_numbers<[1], [0], [0], [1], [0, 0, 1, 1], [], []>} : vector<384x128xbf16>, vector<128x128xbf16>, vector<384x128xf32> -> vector<384x128xf32>
    %99 = arith.addf %94, %98 : vector<384x128xf32>
    %c0_70 = arith.constant 0 : index
    %c0_71 = arith.constant 0 : index
    %100 = vector.load %arg6[%c0_70, %c0_71] : memref<1x128xf32, #tpu.memory_space<vmem>>, vector<1x128xf32>
    %101 = vector.broadcast %100 : vector<1x128xf32> to vector<384x128xf32>
    %102 = arith.addf %99, %101 : vector<384x128xf32>
    %cst_72 = arith.constant 0.000000e+00 : f32
    %103 = vector.broadcast %cst_72 : f32 to vector<384x128xf32>
    %104 = arith.maximumf %102, %103 : vector<384x128xf32>
    %105 = arith.truncf %104 : vector<384x128xf32> to vector<384x128xbf16>
    %c0_73 = arith.constant 0 : index
    %c0_74 = arith.constant 0 : index
    %c0_75 = arith.constant 0 : index
    %106 = vector.load %arg7[%c0_73, %c0_74, %c0_75] : memref<1x384x128xbf16, #tpu.memory_space<vmem>>, vector<1x384x128xbf16>
    %107 = vector.shape_cast %106 : vector<1x384x128xbf16> to vector<384x128xbf16>
    %108 = vector.shape_cast %105 : vector<384x128xbf16> to vector<1x384x128xbf16>
    tpu.vector_store %arg7[%c0_73, %c0_74, %c0_75], %108 {strides = array<i32>} : memref<1x384x128xbf16, #tpu.memory_space<vmem>>, vector<1x384x128xbf16>,
    return
  }
  func.func @transform_0(%arg0: i32) -> (i32, i32, i32) {
    %c0_i32 = arith.constant 0 : i32
    %c0_i32_0 = arith.constant 0 : i32
    %c0_i32_1 = arith.constant 0 : i32
    return %arg0, %c0_i32, %c0_i32_0 : i32, i32, i32
  }
  func.func @transform_1(%arg0: i32) -> (i32, i32, i32) {
    %c0_i32 = arith.constant 0 : i32
    %c0_i32_0 = arith.constant 0 : i32
    %c0_i32_1 = arith.constant 0 : i32
    %c0_i32_2 = arith.constant 0 : i32
    return %c0_i32, %c0_i32_0, %c0_i32_1 : i32, i32, i32
  }
  func.func @transform_2(%arg0: i32) -> (i32, i32) {
    %c0_i32 = arith.constant 0 : i32
    %c0_i32_0 = arith.constant 0 : i32
    %c0_i32_1 = arith.constant 0 : i32
    return %c0_i32, %c0_i32_0 : i32, i32
  }
  func.func @transform_3(%arg0: i32) -> (i32, i32) {
    %c0_i32 = arith.constant 0 : i32
    %c0_i32_0 = arith.constant 0 : i32
    %c0_i32_1 = arith.constant 0 : i32
    return %c0_i32, %c0_i32_0 : i32, i32
  }
  func.func @transform_4(%arg0: i32) -> (i32, i32, i32) {
    %c0_i32 = arith.constant 0 : i32
    %c0_i32_0 = arith.constant 0 : i32
    %c0_i32_1 = arith.constant 0 : i32
    %c0_i32_2 = arith.constant 0 : i32
    return %c0_i32, %c0_i32_0, %c0_i32_1 : i32, i32, i32
  }
  func.func @transform_5(%arg0: i32) -> (i32, i32) {
    %c0_i32 = arith.constant 0 : i32
    %c0_i32_0 = arith.constant 0 : i32
    %c0_i32_1 = arith.constant 0 : i32
    return %c0_i32, %c0_i32_0 : i32, i32
  }
  func.func @transform_6(%arg0: i32) -> (i32, i32, i32) {
    %c0_i32 = arith.constant 0 : i32
    %c0_i32_0 = arith.constant 0 : i32
    %c0_i32_1 = arith.constant 0 : i32
    return %arg0, %c0_i32, %c0_i32_0 : i32, i32, i32
  }
}

</mosaic_0001>

<bundles_post_ra>
// kernel: tpu_custom_call.1
= control target key start
LH: loop header
LB: loop body
LE: loop exit
PB: predicated region body
PF: predicated region fallthrough
CT: control target
= control target key end

     0   :  { %11 = vsyncpa [#allocation4], 0  ;;  %s13899_s0 = inlined_call_operand.vmem [shape: bf16[2,432,12], index: 0, kind: input, shape index: {}]   ;;  %s13900_s1 = inlined_call_operand.vmem [shape: bf16[2,12,128], index: 1, kind: input, shape index: {}]   ;;  %s13901_s2 = inlined_call_operand.vmem [shape: bf16[12,256], index: 2, kind: input, shape index: {}]   ;;  %s13902_s3 = inlined_call_operand.vmem [shape: f32[1,128], index: 3, kind: input, shape index: {}]   ;;  %s13903_s4 = inlined_call_operand.hbm [shape: bf16[9,128,128], index: 4, kind: input, shape index: {}]   ;;  %s13904_s5 = inlined_call_operand.vmem [shape: f32[1,128], index: 5, kind: input, shape index: {}]   ;;  %s13905_s6 = inlined_call_operand.hbm [shape: bf16[2,384,128], index: 6, kind: output, shape index: {}]  }
   0x1   :  { %12 = vsyncpa [#allocation5], 0 }
   0x2   :  { %14 = vsyncpa [#allocation5 + $0x1], 0  ;;  %s11035_s21 = smov 0   ;;  %s11037_s22 = smov 0  }
   0x3   :  { %s11039_s23 = smov 0   ;;  %s11041_s24 = smov 0  }
   0x4 LB: > { %s11056_s25 = sadd.s32 4294967295, %s10992_s24   ;;  %s8599_s26 = sadd.s32 4294967294, %s10992_s24   ;;  %s10992_s24 = sphi %s11041_s24, %s14174_s24   ;;  %s10988_s23 = sphi %s11039_s23, %s14173_s23   ;;  %s10984_s22 = sphi %s11037_s22, %s14172_s22   ;;  %s10980_s21 = sphi %s11035_s21, %s14171_s21  }
   0x5   : > { %s11060_s27 = sadd.s32 1, %s10992_s24   ;;  %s158_s28 = sadd.s32 1, %s10988_s23 }
   0x6   : > { %s155_s29 = ssub.s32 %s10992_s24, %s11060_s27  ;;  %p168_p0 = scmp.ne.s32.totalorder %s10988_s23, %s10984_s22 }
   0x7   : > { %p156_p1 = scmp.eq.s32.totalorder %s155_s29, 0  ;;  %p169_p2 = scmp.eq.s32.totalorder %s11056_s25, 1 }
   0x8   : > { %p174_p3 = scmp.ne.s32.totalorder %s10984_s22, %s10980_s21  ;;  %p175_p4 = scmp.eq.s32.totalorder %s8599_s26, 1 }
   0x9   : > { %s11071_s30 = scalar_select %p156_p1, %s10988_s23, %s158_s28  }
   0xa   : > { %p11073_p5 = por %p169_p2, %p168_p0  ;;  %p11077_p6 = por %p175_p4, %p174_p3 }
   0xb   : > { %p8600_p7 = scmp.ge.s32.totalorder %s10992_s24, 1  ;;  %p182_p8 = scmp.lt.s32.totalorder %s10992_s24, 3 }
   0xc   : > { %p10833_p9 = scmp.eq.s32.totalorder %s11056_s25, 0  ;;  %s202_s11 = sshll.u32 %s13903_s4, 4  ;;  %s203_s11 = int_to_ptr.hbm [resolvable:$true] %s202_s11 }
   0xd   : > { %p183_p10 = pnand %p8600_p7, %p182_p8  ;;  %s10994_s12 = smov [#allocation3]  }
   0xe   : > { %s204_s13 = sshll.u32 %s10994_s12, 4  ;;  %s10995_s14 = smov 64   ;;  %s205_s13 = int_to_ptr.vmem [resolvable:$true] %s204_s13 }
   0xf   : > { %p10825_p11 = pneg %p183_p10  ;;  %s10996_s15 = smov 4  }
  0x10   : > { %231 = sbr.rel (%p183_p10) target bundleno = 1622 (0x656), region = 44 }
  0x11   : > { %p10826_p12 = pnand %p10833_p9, %p10825_p11 }
  0x13   : > { %10828 = dma.hbm_to_vmem [thread:$0]  (!%p10826_p12), %s203_s11, 9216, %s205_s13, [#allocation4], %s10995_s14, %s10995_s14, %s10996_s15  }
  0x15   : > { %10971 = dma.done.wait (%p10833_p9), [#allocation4], 9216  }
  0x16   : > { %10973 = vsyncadd (%p10833_p9), [#allocation4], 4294958080  ;;  %p262_p13 = scmp.lt.s32.totalorder %s11056_s25, 1  ;;  %v8706_v0 = vld [vmem:[%s13900_s1 + $0x8] sm:$0xf]  ;;  %vm525_vm0 = vcmask 1045504  }
  0x17   : > { %v9531_v1 = vld [vmem:[%s13900_s1 + $0x8] sm:$0x30]  ;;  %v8870_v3 = vld [vmem:[%s13901_s2] sm:$0xf]  ;;  %v9557_v4 = vld [vmem:[%s13901_s2 + $0x4] sm:$0x30] }
  0x18   : > { %s263_s16 = scalar_select %p262_p13, %s11056_s25, 1  ;;  %v8707_v2 = vor.u32 %v9531_v1, %v8706_v0  ;;  %v8746_v5 = vld [vmem:[%s13900_s1] sm:$0xf]  ;;  %v9527_v6 = vld [vmem:[%s13900_s1] sm:$0x30]  ;;  %v8871_v10 = vor.u32 %v9557_v4, %v8870_v3  ;;  %vm452_vm1 = vcmask 97280  }
  0x19   : > { %v8747_v11 = vor.u32 %v9527_v6, %v8746_v5  ;;  %v9556_v24 = vld [vmem:[%s13901_s2 + $0x4] sm:$0xf]  ;;  %v8872_v25 = vld [vmem:[%s13901_s2 + $0x8] sm:$0x30]  ;;  %v9565_v42 = vld [vmem:[#allocation3 + $0x38] sm:$0xff]  ;;  %s259_s19 = sand.u32 1, %s10984_s22  }
  0x1a   : > { %s10817_s17 = smul.u32 216, %s263_s16  ;;  %v527_v7 = vsel %vm525_vm0, %v8707_v2, 0  ;;  %v1070_v13 = vsel %vm525_vm0, %v8871_v10, 0  ;;  %v8875_v27 = vor.u32 %v9556_v24, %v8872_v25  ;;  %v9564_v49 = vld [vmem:[#allocation3 + $0x30] sm:$0xff]  ;;  %v9563_v56 = vld [vmem:[#allocation3 + $0x28] sm:$0xff]  ;;  %v9562_v63 = vld [vmem:[#allocation3 + $0x20] sm:$0xff] }
  0x1b   : > { %10766 = vmatpush.bf16.msra.mxu1 %v527_v7  ;;  %10767 = vmatpush.bf16.msra.mxu2 %v527_v7  ;;  %v688_v14 = vsel %vm525_vm0, %v8747_v11, 0  ;;  %v9561_v4 = vld [vmem:[#allocation3 + $0x18] sm:$0xff]  ;;  %v13907_v25 = vmov 0   ;;  %vm3742_vm6 = vsmask.f32 4352  ;;  %s10816_s20 = smul.u32 192, %s259_s19 }
  0x1c   : > { %s11104_s9 = scalar_lea.vmem %s13899_s0, %s10817_s17  ;;  %10768 = vmatpush.bf16.msra.mxu3 %v527_v7  ;;  %536 = vmatpush.bf16.msra.mxu0 %v527_v7  ;;  %v1073_v28 = vsel %vm525_vm0, %v8875_v27, 0  ;;  %3450 = vst [vmem:[#allocation2] sm:$0xf] %v13907_v25  ;;  %s10818_s10 = smul.u32 192, %s11056_s25 }
  0x1d   : > { %v11120_v8 = vld [vmem:[%s11104_s9 + $0x48] sm:$0xff]  ;;  %v9518_v9 = vld [vmem:[%s11104_s9 + $0x78] sm:$0xff]  ;;  %v11131_v15 = vld [vmem:[%s11104_s9 + $0x50] sm:$0xff]  ;;  %3451 = vst [vmem:[#allocation2 + $0x4] sm:$0xf] %v13907_v25  ;;  %s13628_s26 = scalar_lea.vmem [#allocation6], %s10816_s20 }
  0x1e   : > { %v9524_v12 = vld [vmem:[%s11104_s9 + $0xa8] sm:$0xff]  ;;  %8714 = vmatmul.msk.bf16.vlgmr.msra.gmra.mxu1 %vm452_vm1, %v11120_v8  ;;  %8720 = vmatmul.msk.bf16.vlgmr.msra.gmra.mxu2 %vm452_vm1, %v9518_v9  ;;  %v9519_v16 = vld [vmem:[%s11104_s9 + $0x80] sm:$0xff]  ;;  %v9525_v17 = vld [vmem:[%s11104_s9 + $0xb0] sm:$0xff]  ;;  %v1381_v9 = vlaneseq  ;;  %3452 = vst [vmem:[#allocation2 + $0x8] sm:$0xf] %v13907_v25  ;;  %s8521_s13 = scalar_lea.hbm %s13905_s6, %s10818_s10  ;;  %s8510_s25 = scalar_lea.sflag [#allocation5], %s259_s19 }
  0x1f   : > { %1082 = vmatpush.bf16.msrb.mxu2 %v1070_v13  ;;  %697 = vmatpush.bf16.msrb.mxu1 %v688_v14  ;;  %v9514_v18 = vld [vmem:[%s11104_s9 + $0x58] sm:$0xff]  ;;  %v9520_v19 = vld [vmem:[%s11104_s9 + $0x88] sm:$0xff]  ;;  %v9515_v21 = vld [vmem:[%s11104_s9 + $0x60] sm:$0xff]  ;;  %3453 = vst [vmem:[#allocation2 + $0xc] sm:$0xf] %v13907_v25  ;;  %s8524_s14 = sshll.u32 %s8521_s13, 4  ;;  %s8525_s14 = int_to_ptr.hbm [resolvable:$true] %s8524_s14 }
  0x20   : > { %8726 = vmatmul.msk.bf16.vlgmr.msra.gmra.mxu3 %vm452_vm1, %v9524_v12  ;;  %v9526_v20 = vld [vmem:[%s11104_s9 + $0xb8] sm:$0xff]  ;;  %v9521_v22 = vld [vmem:[%s11104_s9 + $0x90] sm:$0xff]  ;;  %v9528_v23 = vld [vmem:[%s11104_s9 + $0xc0] sm:$0xff]  ;;  %4039 = vmatpush.bf16.msrb.mxu0 %v9565_v42  ;;  %v11253_v11 = vshrl.u32 %v1381_v9, 7  ;;  %3454 = vst [vmem:[#allocation2 + $0xd0] sm:$0xf] %v13907_v25 }
  0x21   : > { %v9506_v26 = vld [vmem:[%s11104_s9 + $0x18] sm:$0xff]  ;;  %1211 = vmatpush.bf16.msrb.mxu3 %v1073_v28  ;;  %v9516_v29 = vld [vmem:[%s11104_s9 + $0x68] sm:$0xff]  ;;  %v9507_v32 = vld [vmem:[%s11104_s9 + $0x20] sm:$0xff]  ;;  %3455 = vst [vmem:[#allocation2 + $0xd4] sm:$0xf] %v13907_v25  ;;  %s10940_s15 = sshra.s32 %s8525_s14, 4  ;;  %s10941_s15 = int_to_ptr.hbm [resolvable:$true] %s10940_s15 }
  0x22   : > { %8708 = vmatmul.msk.bf16.vlgmr.msra.gmra.mxu0 %vm452_vm1, %v9506_v26  ;;  %v9522_v30 = vld [vmem:[%s11104_s9 + $0x98] sm:$0xff]  ;;  %v9529_v31 = vld [vmem:[%s11104_s9 + $0xc8] sm:$0xff]  ;;  %v9517_v33 = vld [vmem:[%s11104_s9 + $0x70] sm:$0xff]  ;;  %v1433_v12 = vand.u32 65535, %v11253_v11  ;;  %v1434_v13 = vshrl.u32 %v11253_v11, 16  ;;  %v11269_v28 = vadd.s32 8, %v11253_v11  ;;  %p10947_p3 = scmp.lt.s32.totalorder %s10941_s15, %s13905_s6 }
  0x23   : > { %v9523_v34 = vld [vmem:[%s11104_s9 + $0xa0] sm:$0xff]  ;;  %v9530_v35 = vld [vmem:[%s11104_s9 + $0xd0] sm:$0xff]  ;;  %v9508_v38 = vld [vmem:[%s11104_s9 + $0x28] sm:$0xff]  ;;  %3456 = vst [vmem:[#allocation2 + $0xd8] sm:$0xf] %v13907_v25  ;;  %s10942_s16 = scalar_lea.hbm %s10941_s15, 192 }
  0x24   : > { %v9503_v36 = vld [vmem:[%s11104_s9] sm:$0xff]  ;;  %v9532_v37 = vld [vmem:[%s11104_s9 + $0xc] sm:$0xff]  ;;  %v9533_v40 = vld [vmem:[%s11104_s9 + $0x14] sm:$0xff]  ;;  %4040 = vmatpush.bf16.msrb.mxu0 %v9564_v49  ;;  %v1437_v14 = vmul.u32 43690, %v1433_v12  ;;  %3457 = vst [vmem:[#allocation2 + $0xdc] sm:$0xf] %v13907_v25  ;;  %p10943_p0 = scmp.ne.s32.totalorder %s10941_s15, %s10942_s16 }
  0x25   : > { %v9504_v39 = vld [vmem:[%s11104_s9 + $0x8] sm:$0xff]  ;;  %v11184_v41 = vld [vmem:[%s11104_s9 + $0x30] sm:$0xff]  ;;  %v9534_v44 = vld [vmem:[%s11104_s9 + $0x1c] sm:$0xff]  ;;  %s10946_s20 = scalar_lea.hbm %s13905_s6, 384 }
  0x26   : > { %v9505_v43 = vld [vmem:[%s11104_s9 + $0x10] sm:$0xff]  ;;  %v11196_v46 = vld [vmem:[%s11104_s9 + $0x38] sm:$0xff]  ;;  %v9535_v53 = vld [vmem:[%s11104_s9 + $0x24] sm:$0xff]  ;;  %p10944_p1 = pnand %p10943_p0, %p11073_p5  ;;  %p10948_p4 = scmp.lt.s32.totalorder %s10946_s20, %s10942_s16 }
  0x27   : > { %v11217_v55 = vld [vmem:[%s11104_s9 + $0x40] sm:$0xff]  ;;  %v9536_v62 = vld [vmem:[%s11104_s9 + $0x2c] sm:$0xff]  ;;  %v9537_v7 = vld [vmem:[%s11104_s9 + $0x34] sm:$0xff] }
  0x28   : > { %4041 = vmatpush.bf16.msrb.mxu0 %v9563_v56  ;;  %v9559_v9 = vld [vmem:[#allocation3 + $0x8] sm:$0xff]  ;;  %p10945_p2 = pneg %p10944_p1  ;;  %p10949_p7 = por %p10948_p4, %p10947_p3 }
  0x2a   : > { %p10950_p8 = pnand %p10949_p7, %p10945_p2 }
  0x2c   : > { %4042 = vmatpush.bf16.msrb.mxu0 %v9562_v63 }
  0x2e   : > { %8715 = vmatmul.msk.bf16.gmra.mxu1 %vm452_vm1, %v11131_v15  ;;  %8721 = vmatmul.msk.bf16.gmra.mxu2 %vm452_vm1, %v9519_v16 }
  0x30   : > { %8727 = vmatmul.msk.bf16.gmra.mxu3 %vm452_vm1, %v9525_v17  ;;  %4043 = vmatpush.bf16.msrb.mxu0 %v9561_v4 }
  0x32   : > { %8709 = vmatmul.msk.bf16.gmra.mxu0 %vm452_vm1, %v9507_v32 }
  0x3e   : > { %8716 = vmatmul.msk.bf16.gmra.mxu1 %vm452_vm1, %v9514_v18  ;;  %8722 = vmatmul.msk.bf16.gmra.mxu2 %vm452_vm1, %v9520_v19  ;;  %v9560_v18 = vld [vmem:[#allocation3 + $0x10] sm:$0xff]  ;;  %v1436_v19 = vmul.u32 43691, %v1433_v12 }
  0x3f   : > { %4044 = vmatpush.bf16.msrb.mxu0 %v9560_v18  ;;  %v11300_v18 = vld [vmem:[#allocation2 + $0x4] sm:$0xf] }
  0x40   : > { %8728 = vmatmul.msk.bf16.gmra.mxu3 %vm452_vm1, %v9526_v20  ;;  %v1438_v20 = vmul.u32 43691, %v1434_v13 }
  0x42   : > { %8710 = vmatmul.msk.bf16.gmra.mxu0 %vm452_vm1, %v9508_v38  ;;  %v1442_v24 = vshll.u32 %v1438_v20, 16 }
  0x43   : > { %4045 = vmatpush.bf16.msrb.mxu0 %v9559_v9 }
  0x4e   : > { %8717 = vmatmul.msk.bf16.gmra.mxu1 %vm452_vm1, %v9515_v21  ;;  %8723 = vmatmul.msk.bf16.gmra.mxu2 %vm452_vm1, %v9521_v22  ;;  %v1440_v21 = vshll.u32 %v1437_v14, 16 }
  0x50   : > { %8729 = vmatmul.msk.bf16.gmra.mxu3 %vm452_vm1, %v9528_v23  ;;  %v1439_v23 = vmul.u32 43690, %v1434_v13  ;;  %vm1444_vm2 = vc.u32 %v1436_v19, %v1440_v21  ;;  %v1446_v27 = vadd.s32 %v1440_v21, %v1436_v19 }
  0x52   : > { %8711 = vmatmul.msk.bf16.gmra.mxu0 %vm452_vm1, %v11184_v41  ;;  %vm1448_vm3 = vc.u32 %v1446_v27, %v1442_v24 }
  0x5e   : > { %8718 = vmatmul.msk.bf16.gmra.mxu1 %vm452_vm1, %v9516_v29  ;;  %8724 = vmatmul.msk.bf16.gmra.mxu2 %vm452_vm1, %v9522_v30  ;;  %v1462_v30 = vand.u32 65535, %v11269_v28 }
  0x60   : > { %8730 = vmatmul.msk.bf16.gmra.mxu3 %vm452_vm1, %v9529_v31  ;;  %v1441_v31 = vshrl.u32 %v1437_v14, 16  ;;  %v3554_v14 = vld [vmem:[#allocation2] sm:$0x8] }
  0x62   : > { %8712 = vmatmul.msk.bf16.gmra.mxu0 %vm452_vm1, %v11196_v46 }
  0x6e   : > { %8719 = vmatmul.msk.bf16.gmra.mxu1 %vm452_vm1, %v9517_v33  ;;  %8725 = vmatmul.msk.bf16.gmra.mxu2 %vm452_vm1, %v9523_v34  ;;  %v1463_v33 = vshrl.u32 %v11269_v28, 16 }
  0x70   : > { %8731 = vmatmul.msk.bf16.gmra.mxu3 %vm452_vm1, %v9530_v35 }
  0x72   : > { %8713 = vmatmul.msk.bf16.gmra.mxu0 %vm452_vm1, %v11217_v55 }
  0x7e   : > { %8748 = vmatmul.msk.bf16.vlgmr.msrb.gmra.mxu1 %vm452_vm1, %v9503_v36  ;;  %8876 = vmatmul.msk.bf16.vlgmr.msrb.gmra.mxu2 %vm452_vm1, %v9532_v37  ;;  %v1466_v36 = vmul.u32 43690, %v1462_v30 }
  0x80   : > { %8900 = vmatmul.msk.bf16.vlgmr.msrb.gmra.mxu3 %vm452_vm1, %v9532_v37  ;;  %v1469_v49 = vshll.u32 %v1466_v36, 16 }
  0x8e   : > { %8749 = vmatmul.msk.bf16.gmra.mxu1 %vm452_vm1, %v9504_v39  ;;  %8877 = vmatmul.msk.bf16.gmra.mxu2 %vm452_vm1, %v9533_v40  ;;  %v1465_v39 = vmul.u32 43691, %v1462_v30 }
  0x90   : > { %8901 = vmatmul.msk.bf16.gmra.mxu3 %vm452_vm1, %v9533_v40  ;;  %v11284_v40 = vmul.u32 43691, %v1463_v33  ;;  %vm1473_vm4 = vc.u32 %v1465_v39, %v1469_v49  ;;  %v1475_v63 = vadd.s32 %v1469_v49, %v1465_v39 }
  0x91   : > { %v1474_v4 = vsel %vm1473_vm4, 1, %v13907_v25 }
  0x92   : > { %v1471_v56 = vshll.u32 %v11284_v40, 16 }
  0x94   : > { %vm1477_vm5 = vc.u32 %v1475_v63, %v1471_v56  ;;  %v9558_v56 = vld [vmem:[#allocation3] sm:$0xff] }
  0x95   : > { %v1478_v19 = vsel %vm1477_vm5, 1, %v13907_v25  ;;  %4046 = vmatpush.bf16.msrb.mxu0 %v9558_v56 }
  0x9b   : > { %v11193_v45 = vpop.f32.mrf.mxu1 }
  0x9e   : > { %8750 = vmatmul.msk.bf16.gmra.mxu1 %vm452_vm1, %v9505_v43  ;;  %8878 = vmatmul.msk.bf16.gmra.mxu2 %vm452_vm1, %v9534_v44  ;;  %v1443_v43 = vshrl.u32 %v1438_v20, 16  ;;  %v3668_v20 = vunpack.c.l.b16 %v3554_v14 }
  0xa0   : > { %8902 = vmatmul.msk.bf16.gmra.mxu3 %vm452_vm1, %v9534_v44 }
  0xa1   : > { %v11203_v47 = vpop.f32.mrf.mxu2 }
  0xa3   : > { %v11205_v48 = vpop.f32.mrf.mxu3  ;;  %v11207_v50 = vpop.f32.mrf.mxu1 }
  0xa4   : > { %13912 = vst [vmem:[#allocation9_spill] sm:$0xff] %v11205_v48 }
  0xa9   : > { %v11209_v51 = vpop.f32.mrf.mxu2 }
  0xab   : > { %v11211_v52 = vpop.f32.mrf.mxu3  ;;  %v11214_v54 = vpop.f32.mrf.mxu1 }
  0xac   : > { %13913 = vst [vmem:[#allocation10_spill] sm:$0xff] %v11211_v52 }
  0xae   : > { %8751 = vmatmul.msk.bf16.gmra.mxu1 %vm452_vm1, %v9506_v26  ;;  %8879 = vmatmul.msk.bf16.gmra.mxu2 %vm452_vm1, %v9535_v53  ;;  %v1445_v26 = vsel %vm1444_vm2, 1, %v13907_v25 }
  0xaf   : > { %v1447_v29 = vadd.s32 %v1445_v26, %v1439_v23 }
  0xb0   : > { %8903 = vmatmul.msk.bf16.gmra.mxu3 %vm452_vm1, %v9535_v53  ;;  %v1468_v53 = vmul.u32 43690, %v1463_v33  ;;  %v10246_v33 = vld [vmem:[#allocation2 + $0x8] sm:$0xff]  }
  0xb1   : > { %v11224_v57 = vpop.f32.mrf.mxu2 }
  0xb2   : > { %v1476_v13 = vadd.s32 %v1474_v4, %v1468_v53 }
  0xb3   : > { %v11226_v58 = vpop.f32.mrf.mxu3  ;;  %v11228_v59 = vpop.f32.mrf.mxu1 }
  0xb4   : > { %13914 = vst [vmem:[#allocation11_spill] sm:$0xff] %v11226_v58 }
  0xb9   : > { %v11230_v60 = vpop.f32.mrf.mxu2 }
  0xbb   : > { %v11232_v61 = vpop.f32.mrf.mxu3  ;;  %v11235_v0 = vpop.f32.mrf.mxu1 }
  0xbc   : > { %13915 = vst [vmem:[#allocation12_spill] sm:$0xff] %v11232_v61  ;;  %v13923_v61 = vmov 0  }
  0xbe   : > { %8752 = vmatmul.msk.bf16.gmra.mxu1 %vm452_vm1, %v9507_v32  ;;  %8880 = vmatmul.msk.bf16.gmra.mxu2 %vm452_vm1, %v9536_v62  ;;  %v1449_v32 = vsel %vm1448_vm3, 1, %v13907_v25 }
  0xbf   : > { %v1451_v35 = vadd.s32 %v1449_v32, %v1447_v29  ;;  %v1480_v32 = vadd.s32 %v1478_v19, %v1476_v13 }
  0xc0   : > { %8904 = vmatmul.msk.bf16.gmra.mxu3 %vm452_vm1, %v9536_v62  ;;  %v11292_v62 = vadd.s32 16, %v11253_v11 }
  0xc1   : > { %v11240_v1 = vpop.f32.mrf.mxu2  ;;  %v1452_v44 = vadd.s32 %v1451_v35, %v1441_v31  ;;  %v1470_v31 = vshrl.u32 %v1466_v36, 16  ;;  %v1472_v36 = vshrl.u32 %v11284_v40, 16 }
  0xc2   : > { %v1492_v23 = vshrl.u32 %v11292_v62, 16 }
  0xc3   : > { %v11242_v2 = vpop.f32.mrf.mxu3  ;;  %v11244_v3 = vpop.f32.mrf.mxu1  ;;  %v1453_v12 = vadd.s32 %v1452_v44, %v1443_v43  ;;  %v3752_v43 = vshrl.u32 %v10246_v33, 16  ;;  %v3755_v44 = vshll.u32 %v10246_v33, 16  ;;  %v1481_v13 = vadd.s32 %v1480_v32, %v1470_v31 }
  0xc4   : > { %13916 = vst [vmem:[#allocation13_spill] sm:$0xff] %v11242_v2  ;;  %v1496_v35 = vmul.u32 43691, %v1492_v23 }
  0xc5   : > { %v1454_v30 = vshrl.u32 %v1453_v12, 4  ;;  %v3754_v9 = vrot.slane %v3752_v43, 3  ;;  %v3757_v14 = vrot.slane %v3755_v44, 4  ;;  %v1497_v12 = vmul.u32 43690, %v1492_v23 }
  0xc6   : > { %v1500_v33 = vshll.u32 %v1496_v35, 16  ;;  %v11332_v44 = vadd.s32 24, %v11253_v11  ;;  %v1482_v56 = vadd.s32 %v1481_v13, %v1472_v36 }
  0xc9   : > { %v11246_v5 = vpop.f32.mrf.mxu2 }
  0xcb   : > { %v11248_v6 = vpop.f32.mrf.mxu3  ;;  %v11251_v10 = vpop.f32.mrf.mxu1 }
  0xcc   : > { %13917 = vst [vmem:[#allocation14_spill] sm:$0xff] %v11248_v6 }
  0xce   : > { %8753 = vmatmul.msk.bf16.gmra.mxu1 %vm452_vm1, %v9508_v38  ;;  %8881 = vmatmul.msk.bf16.gmra.mxu2 %vm452_vm1, %v9537_v7  ;;  %v9538_v38 = vld [vmem:[%s11104_s9 + $0x3c] sm:$0xff] }
  0xd0   : > { %8905 = vmatmul.msk.bf16.gmra.mxu3 %vm452_vm1, %v9537_v7  ;;  %v1491_v7 = vand.u32 65535, %v11292_v62 }
  0xd1   : > { %v11260_v16 = vpop.f32.mrf.mxu2 }
  0xd2   : > { %v1495_v24 = vmul.u32 43690, %v1491_v7  ;;  %v1494_v49 = vmul.u32 43691, %v1491_v7 }
  0xd3   : > { %v11262_v17 = vpop.f32.mrf.mxu3  ;;  %v11264_v22 = vpop.f32.mrf.mxu1 }
  0xd4   : > { %13918 = vst [vmem:[#allocation15_spill] sm:$0xff] %v11262_v17  ;;  %v1498_v53 = vshll.u32 %v1495_v24, 16 }
  0xd6   : > { %vm1502_vm7 = vc.u32 %v1494_v49, %v1498_v53  ;;  %v1504_v40 = vadd.s32 %v1498_v53, %v1494_v49  ;;  %v1520_v49 = vand.u32 65535, %v11332_v44  ;;  %v1521_v53 = vshrl.u32 %v11332_v44, 16 }
  0xd8   : > { %vm1506_vm8 = vc.u32 %v1504_v40, %v1500_v33  ;;  %v1525_v33 = vmul.u32 43691, %v1521_v53 }
  0xd9   : > { %v11277_v34 = vpop.f32.mrf.mxu2 }
  0xdb   : > { %v11280_v37 = vpop.f32.mrf.mxu3  ;;  %v11286_v42 = vpop.f32.mrf.mxu1 }
  0xdc   : > { %13919 = vst [vmem:[#allocation16_spill] sm:$0xff] %v11280_v37 }
  0xde   : > { %8754 = vmatmul.msk.bf16.gmra.mxu1 %vm452_vm1, %v11184_v41  ;;  %8882 = vmatmul.msk.bf16.gmra.mxu2 %vm452_vm1, %v9538_v38  ;;  %v13906_v41 = vunpack.c.l.b16 %v11300_v18 }
  0xe0   : > { %8906 = vmatmul.msk.bf16.gmra.mxu3 %vm452_vm1, %v9538_v38  ;;  %v3717_v27 = vpack.c.b16 %v13906_v41, %v3668_v20  ;;  %v11313_v20 = vpop.f32.mrf.mxu0  ;;  %v1455_v41 = vmul.u32 24, %v1454_v30  ;;  %v1503_v30 = vsel %vm1502_vm7, 1, %v13907_v25 }
  0xe1   : > { %v11304_v21 = vpop.f32.mrf.mxu2  ;;  %v1505_v32 = vadd.s32 %v1503_v30, %v1497_v12 }
  0xe2   : > { %v3744_v38 = vshrl.u32 %v3717_v27, 16  ;;  %v3747_v39 = vshll.u32 %v3717_v27, 16  ;;  %v11316_v27 = vor.u32 %v3757_v14, %v3754_v9  ;;  %v11329_v31 = vsub.s32 %v11253_v11, %v1455_v41 }
  0xe3   : > { %v11307_v26 = vpop.f32.mrf.mxu3  ;;  %v11311_v29 = vpop.f32.mrf.mxu1  ;;  %v1501_v9 = vshrl.u32 %v1496_v35, 16  ;;  %v1507_v14 = vsel %vm1506_vm8, 1, %v13907_v25 }
  0xe4   : > { %13920 = vst [vmem:[#allocation17_spill] sm:$0xff] %v11307_v26  ;;  %v3746_v63 = vrot.slane %v3744_v38, 3  ;;  %v3749_v4 = vrot.slane %v3747_v39, 4  ;;  %v9539_v39 = vld [vmem:[%s11104_s9 + $0x44] sm:$0xff]  ;;  %v1509_v41 = vadd.s32 %v1507_v14, %v1505_v32  ;;  %vm2822_vm9 = vcmp.ne.s32.totalorder %v11329_v31, 0 }
  0xe5   : > { %vm2870_vm10 = vcmp.lt.s32.totalorder %v11329_v31, 0  ;;  %v1526_v32 = vmul.u32 43690, %v1521_v53  ;;  %v11358_v53 = vadd.s32 40, %v11253_v11 }
  0xe6   : > { %v3750_v19 = vor.u32 %v3749_v4, %v3746_v63  ;;  %v1499_v63 = vshrl.u32 %v1495_v24, 16  ;;  %v11335_v4 = vadd.s32 32, %v11253_v11  ;;  %v1483_v24 = vshrl.u32 %v1482_v56, 4  ;;  %v9605_v56 = vld [vmem:[#allocation3 + $0xb8] sm:$0xff]  ;;  %vm2918_vm15 = vmand %vm2870_vm10, %vm2822_vm9 }
  0xe7   : > { %4964 = vmatpush.bf16.msra.mxu2 %v9605_v56  ;;  %v9621_v56 = vld [vmem:[#allocation3 + $0x138] sm:$0xff]  ;;  %v1578_v48 = vand.u32 65535, %v11358_v53 }
  0xe8   : > { %v3759_v43 = vsel %vm3742_vm6, %v3750_v19, %v11316_v27  ;;  %v1549_v36 = vand.u32 65535, %v11335_v4  ;;  %v1510_v35 = vadd.s32 %v1509_v41, %v1499_v63  ;;  %v11348_v13 = vpop.f32.mrf.mxu0  ;;  %v1524_v19 = vmul.u32 43690, %v1520_v49  ;;  %v9613_v63 = vld [vmem:[#allocation3 + $0xf8] sm:$0xff]  ;;  %5916 = vmatpush.bf16.msra.mxu0 %v9621_v56 }
  0xe9   : > { %v11318_v7 = vpop.f32.mrf.mxu2  ;;  %4047 = vmatmul.bf16.vlgmr.msrb.gmra.mxu0 %v3759_v43  ;;  %v1550_v43 = vshrl.u32 %v11335_v4, 16  ;;  %v9573_v41 = vld [vmem:[#allocation3 + $0x78] sm:$0xff]  ;;  %v1484_v37 = vmul.u32 24, %v1483_v24  ;;  %5626 = vmatpush.bf16.msra.mxu3 %v9613_v63 }
  0xea   : > { %v1511_v40 = vadd.s32 %v1510_v35, %v1501_v9  ;;  %v1527_v25 = vshll.u32 %v1524_v19, 16  ;;  %v1552_v26 = vmul.u32 43691, %v1549_v36  ;;  %4329 = vmatpush.bf16.msra.mxu1 %v9573_v41  ;;  %v1528_v2 = vshrl.u32 %v1524_v19, 16 }
  0xeb   : > { %v11320_v38 = vpop.f32.mrf.mxu3  ;;  %v11326_v23 = vpop.f32.mrf.mxu1  ;;  %v1554_v17 = vmul.u32 43691, %v1550_v43  ;;  %v1555_v6 = vmul.u32 43690, %v1550_v43  ;;  %v11362_v43 = vsub.s32 %v11269_v28, %v1484_v37 }
  0xec   : > { %13921 = vst [vmem:[#allocation18_spill] sm:$0xff] %v11320_v38  ;;  %v1529_v38 = vshll.u32 %v1525_v33, 16  ;;  %v1512_v35 = vshrl.u32 %v1511_v40, 4 }
  0xed   : > { %v1558_v52 = vshll.u32 %v1554_v17, 16  ;;  %vm2823_vm0 = vcmp.ne.s32.totalorder %v11362_v43, 0  ;;  %vm2871_vm2 = vcmp.lt.s32.totalorder %v11362_v43, 0 }
  0xee   : > { %8755 = vmatmul.msk.bf16.gmra.mxu1 %vm452_vm1, %v11196_v46  ;;  %8883 = vmatmul.msk.bf16.gmra.mxu2 %vm452_vm1, %v9539_v39  ;;  %v1523_v46 = vmul.u32 43691, %v1520_v49  ;;  %v2966_v49 = vadd.s32 24, %v11329_v31  ;;  %vm2919_vm5 = vmand %vm2871_vm2, %vm2823_vm0 }
  0xf0   : > { %8907 = vmatmul.msk.bf16.gmra.mxu3 %vm452_vm1, %v9539_v39  ;;  %v1553_v39 = vmul.u32 43690, %v1549_v36  ;;  %vm1531_vm11 = vc.u32 %v1523_v46, %v1527_v25 }
  0xf1   : > { %v11346_v12 = vpop.f32.mrf.mxu2  ;;  %v1532_v58 = vsel %vm1531_vm11, 1, %v13923_v61 }
  0xf2   : > { %v1556_v9 = vshll.u32 %v1553_v39, 16  ;;  %v1534_v36 = vadd.s32 %v1532_v58, %v1526_v32  ;;  %v1557_v28 = vshrl.u32 %v1553_v39, 16  ;;  %v1559_v32 = vshrl.u32 %v1554_v17, 16 }
  0xf3   : > { %v11351_v30 = vpop.f32.mrf.mxu3  ;;  %v11354_v14 = vpop.f32.mrf.mxu1  ;;  %v11388_v17 = vadd.s32 48, %v11253_v11 }
  0xf4   : > { %13922 = vst [vmem:[#allocation19_spill] sm:$0xff] %v11351_v30  ;;  %v1533_v30 = vadd.s32 %v1527_v25, %v1523_v46  ;;  %vm1560_vm13 = vc.u32 %v1552_v26, %v1556_v9  ;;  %v1562_v24 = vadd.s32 %v1556_v9, %v1552_v26  ;;  %v1530_v25 = vshrl.u32 %v1525_v33, 16  ;;  %v11376_v26 = vpop.f32.mrf.mxu0 }
  0xf5   : > { %v1561_v63 = vsel %vm1560_vm13, 1, %v13923_v61  ;;  %v1513_v33 = vmul.u32 24, %v1512_v35 }
  0xf6   : > { %vm1535_vm12 = vc.u32 %v1533_v30, %v1529_v38  ;;  %v1563_v40 = vadd.s32 %v1561_v63, %v1555_v6  ;;  %vm1564_vm14 = vc.u32 %v1562_v24, %v1558_v52  ;;  %v9540_v38 = vld [vmem:[%s11104_s9 + $0x4c] sm:$0xff]  ;;  %v1579_v52 = vshrl.u32 %v11358_v53, 16 }
  0xf7   : > { %v1536_v46 = vsel %vm1535_vm12, 1, %v13923_v61  ;;  %v1565_v6 = vsel %vm1564_vm14, 1, %v13923_v61  ;;  %v1582_v24 = vmul.u32 43690, %v1578_v48 }
  0xf8   : > { %v1538_v19 = vadd.s32 %v1536_v46, %v1534_v36  ;;  %v1567_v9 = vadd.s32 %v1565_v6, %v1563_v40  ;;  %v1581_v36 = vmul.u32 43691, %v1578_v48  ;;  %v11381_v46 = vsel %vm2918_vm15, %v2966_v49, %v11329_v31 }
  0xf9   : > { %v11366_v41 = vpop.f32.mrf.mxu2  ;;  %v1583_v39 = vmul.u32 43691, %v1579_v52  ;;  %v1584_v35 = vmul.u32 43690, %v1579_v52  ;;  %v1585_v63 = vshll.u32 %v1582_v24, 16  ;;  %vm3062_vm4 = vcmp.ge.s32.totalorder %v11381_v46, 1 }
  0xfa   : > { %13924 = vst [vmem:[#allocation20_spill] sm:$0xff] %v11366_v41  ;;  %v1539_v30 = vadd.s32 %v1538_v19, %v1528_v2  ;;  %v1568_v2 = vadd.s32 %v1567_v9, %v1557_v28  ;;  %v2967_v28 = vadd.s32 24, %v11362_v43  ;;  %v1608_v52 = vshrl.u32 %v11388_v17, 16  ;;  %v11406_v9 = vld [vmem:[%s13902_s3] ss:$0 sm:$0xff] }
  0xfb   : > { %v11369_v58 = vpop.f32.mrf.mxu3  ;;  %v699_v37 = vpop.f32.mrf.mxu1  ;;  %v1587_v49 = vshll.u32 %v1583_v39, 16  ;;  %vm1589_vm3 = vc.u32 %v1581_v36, %v1585_v63  ;;  %vm3110_vm12 = vcmp.le.s32.totalorder %v11381_v46, 16 }
  0xfc   : > { %13925 = vst [vmem:[#allocation21_spill] sm:$0xff] %v11369_v58  ;;  %v1540_v56 = vadd.s32 %v1539_v30, %v1530_v25  ;;  %v700_v48 = vadd.f32 %v699_v37, %v11313_v20  ;;  %v1514_v25 = vsub.s32 %v11292_v62, %v1513_v33  ;;  %v1569_v19 = vadd.s32 %v1568_v2, %v1559_v32 }
  0xfd   : > { %v1590_v6 = vsel %vm1589_vm3, 1, %v13923_v61  ;;  %v1607_v20 = vand.u32 65535, %v11388_v17  ;;  %v1586_v62 = vshrl.u32 %v1582_v24, 16  ;;  %v11415_v58 = vmul.u32 43691, %v1608_v52  ;;  %vm11448_vm3 = vmand %vm3062_vm4, %vm3110_vm12 }
  0xfe   : > { %8756 = vmatmul.msk.bf16.gmra.mxu1 %vm452_vm1, %v11217_v55  ;;  %8884 = vmatmul.msk.bf16.gmra.mxu2 %vm452_vm1, %v9540_v38  ;;  %v1541_v31 = vshrl.u32 %v1540_v56, 4  ;;  %v1591_v55 = vadd.s32 %v1585_v63, %v1581_v36  ;;  %v1570_v37 = vshrl.u32 %v1569_v19, 4  ;;  %v1592_v33 = vadd.s32 %v1590_v6, %v1584_v35 }
  0xff   : > { %v11409_v2 = vmul.u32 43690, %v1607_v20  ;;  %vm2824_vm8 = vcmp.ne.s32.totalorder %v1514_v25, 0  ;;  %vm2872_vm9 = vcmp.lt.s32.totalorder %v1514_v25, 0  ;;  %v3015_v35 = vsel %vm2919_vm5, %v2967_v28, %v11362_v43 }
 0x100   : > { %8908 = vmatmul.msk.bf16.gmra.mxu3 %vm452_vm1, %v9540_v38  ;;  %v1542_v30 = vmul.u32 24, %v1541_v31  ;;  %vm1593_vm7 = vc.u32 %v1591_v55, %v1587_v49  ;;  %v1571_v63 = vmul.u32 24, %v1570_v37  ;;  %v2968_v31 = vadd.s32 24, %v1514_v25  ;;  %vm11420_vm13 = vmand %vm2872_vm9, %vm2824_vm8 }
 0x101   : > { %v1084_v40 = vpop.f32.mrf.mxu2  ;;  %v1594_v24 = vsel %vm1593_vm7, 1, %v13923_v61  ;;  %v1588_v19 = vshrl.u32 %v1583_v39, 16  ;;  %v1610_v6 = vmul.u32 43691, %v1607_v20  ;;  %v1614_v55 = vshll.u32 %v11409_v2, 16 }
 0x102   : > { %v1333_v32 = vadd.f32 %v1084_v40, %v700_v48  ;;  %v1543_v56 = vsub.s32 %v11332_v44, %v1542_v30  ;;  %v11413_v48 = vpop.f32.mrf.mxu0  ;;  %v1596_v40 = vadd.s32 %v1594_v24, %v1592_v33  ;;  %vm3063_vm14 = vcmp.ge.s32.totalorder %v3015_v35, 1 }
 0x103   : > { %v11398_v38 = vpop.f32.mrf.mxu3  ;;  %v701_v36 = vpop.f32.mrf.mxu1  ;;  %v1572_v30 = vsub.s32 %v11335_v4, %v1571_v63  ;;  %vm3111_vm15 = vcmp.le.s32.totalorder %v3015_v35, 16  ;;  %v11433_v24 = vadd.s32 56, %v11253_v11  ;;  %v1616_v4 = vshll.u32 %v11415_v58, 16 }
 0x104   : > { %13926 = vst [vmem:[#allocation22_spill] sm:$0xff] %v11398_v38  ;;  %vm2825_vm10 = vcmp.ne.s32.totalorder %v1543_v56, 0  ;;  %vm2873_vm11 = vcmp.lt.s32.totalorder %v1543_v56, 0  ;;  %v3210_v44 = vadd.f32 %v11406_v9, %v1333_v32  ;;  %v1597_v43 = vadd.s32 %v1596_v40, %v1586_v62  ;;  %vm11459_vm8 = vmand %vm3063_vm14, %vm3111_vm15 }
 0x105   : > { %v702_v39 = vadd.f32 %v701_v36, %v11348_v13  ;;  %v2969_v28 = vadd.s32 24, %v1543_v56  ;;  %vm11428_vm0 = vmand %vm2873_vm11, %vm2825_vm10  ;;  %v1613_v32 = vmul.u32 43690, %v1608_v52  ;;  %v9541_v13 = vld [vmem:[%s11104_s9 + $0x54] sm:$0xff]  ;;  %v11440_v36 = vsel %vm11420_vm13, %v2968_v31, %v1514_v25 }
 0x106   : > { %v1598_v33 = vadd.s32 %v1597_v43, %v1588_v19  ;;  %vm1618_vm2 = vc.u32 %v1610_v6, %v1614_v55  ;;  %v3258_v63 = vmax.f32 %v3210_v44, 0.0  ;;  %v1620_v52 = vadd.s32 %v1614_v55, %v1610_v6 }
 0x107   : > { %v1619_v19 = vsel %vm1618_vm2, 1, %v13923_v61  ;;  %v11455_v31 = vsel %vm11428_vm0, %v2969_v28, %v1543_v56  ;;  %vm2826_vm5 = vcmp.ne.s32.totalorder %v1572_v30, 0  ;;  %vm2874_vm7 = vcmp.lt.s32.totalorder %v1572_v30, 0 }
 0x108   : > { %v1599_v41 = vshrl.u32 %v1598_v33, 4  ;;  %v1615_v46 = vshrl.u32 %v11409_v2, 16  ;;  %v1621_v44 = vadd.s32 %v1619_v19, %v1613_v32  ;;  %vm1622_vm4 = vc.u32 %v1620_v52, %v1616_v4  ;;  %vm11482_vm9 = vmand %vm2874_vm7, %vm2826_vm5 }
 0x109   : > { %v1086_v20 = vpop.f32.mrf.mxu2  ;;  %v1636_v49 = vand.u32 65535, %v11433_v24  ;;  %v1623_v56 = vsel %vm1622_vm4, 1, %v13923_v61  ;;  %v1637_v35 = vshrl.u32 %v11433_v24, 16  ;;  %v2970_v2 = vadd.s32 24, %v1572_v30 }
 0x10a   : > { %v1334_v62 = vadd.f32 %v1086_v20, %v702_v39  ;;  %v11472_v28 = vpop.f32.mrf.mxu0  ;;  %v1600_v20 = vmul.u32 24, %v1599_v41  ;;  %v1625_v37 = vadd.s32 %v1623_v56, %v1621_v44  ;;  %vm3064_vm10 = vcmp.ge.s32.totalorder %v11440_v36, 1 }
 0x10b   : > { %v11435_v40 = vpop.f32.mrf.mxu3  ;;  %v704_v38 = vpop.f32.mrf.mxu1  ;;  %v11474_v33 = vmul.u32 43690, %v1636_v49  ;;  %v11486_v32 = vmul.u32 43691, %v1637_v35  ;;  %vm3112_vm11 = vcmp.le.s32.totalorder %v11440_v36, 16  ;;  %v1617_v4 = vshrl.u32 %v11415_v58, 16 }
 0x10c   : > { %v3211_v25 = vadd.f32 %v11406_v9, %v1334_v62  ;;  %v705_v39 = vadd.f32 %v704_v38, %v11376_v26  ;;  %v3402_v26 = vsel %vm11448_vm3, %v3258_v63, 0.0  ;;  %v11489_v62 = vadd.s32 64, %v11253_v11  ;;  %vm11529_vm0 = vmand %vm3064_vm10, %vm3112_vm11 }
 0x10d   : > { %vm3065_vm12 = vcmp.ge.s32.totalorder %v11455_v31, 1  ;;  %vm3113_vm13 = vcmp.le.s32.totalorder %v11455_v31, 16  ;;  %v1626_v52 = vadd.s32 %v1625_v37, %v1615_v46  ;;  %v1639_v43 = vmul.u32 43691, %v1636_v49 }
 0x10e   : > { %v3259_v55 = vmax.f32 %v3211_v25, 0.0  ;;  %8757 = vmatmul.msk.bf16.gmra.mxu1 %vm452_vm1, %v11120_v8  ;;  %8885 = vmatmul.msk.bf16.gmra.mxu2 %vm452_vm1, %v9541_v13  ;;  %v1643_v25 = vshll.u32 %v11474_v33, 16  ;;  %v11501_v44 = vsel %vm11482_vm9, %v2970_v2, %v1572_v30  ;;  %v11504_v58 = vsub.s32 %v11358_v53, %v1600_v20  ;;  %vm3161_vm7 = vmand %vm3065_vm12, %vm3113_vm13 }
 0x10f   : > { %v1665_v46 = vand.u32 65535, %v11489_v62  ;;  %v1666_v38 = vshrl.u32 %v11489_v62, 16  ;;  %vm3066_vm12 = vcmp.ge.s32.totalorder %v11501_v44, 1  ;;  %vm3114_vm13 = vcmp.le.s32.totalorder %v11501_v44, 16 }
 0x110   : > { %8909 = vmatmul.msk.bf16.gmra.mxu3 %vm452_vm1, %v9541_v13  ;;  %v3403_v8 = vsel %vm11459_vm8, %v3259_v55, 0.0  ;;  %vm1647_vm14 = vc.u32 %v1639_v43, %v1643_v25  ;;  %v1649_v2 = vadd.s32 %v1643_v25, %v1639_v43  ;;  %vm2827_vm2 = vcmp.ne.s32.totalorder %v11504_v58, 0 }
 0x111   : > { %v9705_v41 = vpack.c.bf16 %v3403_v8, %v3402_v26  ;;  %v1089_v13 = vpop.f32.mrf.mxu2  ;;  %v1642_v26 = vmul.u32 43690, %v1637_v35  ;;  %v1645_v8 = vshll.u32 %v11486_v32, 16  ;;  %v11523_v25 = vmul.u32 43691, %v1666_v38 }
 0x112   : > { %v1335_v63 = vadd.f32 %v1089_v13, %v705_v39  ;;  %v1627_v13 = vadd.s32 %v1626_v52, %v1617_v4  ;;  %vm2875_vm3 = vcmp.lt.s32.totalorder %v11504_v58, 0 }
 0x113   : > { %v11494_v19 = vpop.f32.mrf.mxu3  ;;  %10222 = vst [vmem:[#allocation2 + $0x10] sm:$0xff] %v9705_v41   ;;  %v706_v6 = vpop.f32.mrf.mxu1  ;;  %v3761_v55 = vshrl.u32 %v9705_v41, 16  ;;  %v3764_v56 = vshll.u32 %v9705_v41, 16  ;;  %v1648_v41 = vsel %vm1647_vm14, 1, %v13923_v61  ;;  %vm1651_vm15 = vc.u32 %v1649_v2, %v1645_v8  ;;  %v9542_v8 = vld [vmem:[%s11104_s9 + $0x5c] sm:$0xff]  ;;  %vm11564_vm9 = vmand %vm2875_vm3, %vm2827_vm2 }
 0x114   : > { %13937 = vst [vmem:[#allocation23_spill] sm:$0xff] %v11494_v19  ;;  %v3212_v39 = vadd.f32 %v11406_v9, %v1335_v63  ;;  %v1644_v19 = vshrl.u32 %v11474_v33, 16  ;;  %v707_v30 = vadd.f32 %v706_v6, %v11413_v48  ;;  %v1628_v35 = vshrl.u32 %v1627_v13, 4  ;;  %v11520_v33 = vpop.f32.mrf.mxu0 }
 0x115   : > { %v3763_v49 = vrot.slane %v3761_v55, 3  ;;  %v3766_v37 = vrot.slane %v3764_v56, 4  ;;  %v1650_v63 = vadd.s32 %v1648_v41, %v1642_v26  ;;  %v1668_v55 = vmul.u32 43691, %v1665_v46 }
 0x116   : > { %v3260_v53 = vmax.f32 %v3212_v39, 0.0  ;;  %v11515_v56 = vmul.u32 43690, %v1665_v46  ;;  %v1629_v52 = vmul.u32 24, %v1628_v35  ;;  %v1652_v43 = vsel %vm1651_vm15, 1, %v13923_v61 }
 0x117   : > { %v11512_v20 = vor.u32 %v3766_v37, %v3763_v49  ;;  %v1654_v46 = vadd.s32 %v1652_v43, %v1650_v63  ;;  %v1671_v13 = vmul.u32 43690, %v1666_v38  ;;  %v1674_v63 = vshll.u32 %v11523_v25, 16 }
 0x118   : > { %v1672_v49 = vshll.u32 %v11515_v56, 16  ;;  %v1630_v36 = vsub.s32 %v11388_v17, %v1629_v52  ;;  %v1673_v41 = vshrl.u32 %v11515_v56, 16  ;;  %v11558_v56 = vadd.s32 72, %v11253_v11 }
 0x119   : > { %v1091_v4 = vpop.f32.mrf.mxu2  ;;  %v3768_v48 = vsel %vm3742_vm6, %v11316_v27, %v11512_v20  ;;  %v1646_v27 = vshrl.u32 %v11486_v32, 16  ;;  %v1655_v35 = vadd.s32 %v1654_v46, %v1644_v19  ;;  %v3404_v32 = vsel %vm11529_vm0, %v3260_v53, 0.0  ;;  %vm11607_vm0 = vmand %vm3066_vm12, %vm3114_vm13 }
 0x11a   : > { %v1336_v39 = vadd.f32 %v1091_v4, %v707_v30  ;;  %4052 = vmatmul.bf16.gmra.mxu0 %v3768_v48  ;;  %v2971_v30 = vadd.s32 24, %v11504_v58  ;;  %vm1676_vm5 = vc.u32 %v1668_v55, %v1672_v49  ;;  %v1678_v53 = vadd.s32 %v1672_v49, %v1668_v55  ;;  %v9543_v49 = vld [vmem:[%s11104_s9 + $0x64] sm:$0xff] }
 0x11b   : > { %v11533_v26 = vpop.f32.mrf.mxu3  ;;  %v709_v37 = vpop.f32.mrf.mxu1  ;;  %v1677_v17 = vsel %vm1676_vm5, 1, %v13923_v61  ;;  %v1656_v19 = vadd.s32 %v1655_v35, %v1646_v27  ;;  %vm2828_vm8 = vcmp.ne.s32.totalorder %v1630_v36, 0  ;;  %vm2876_vm4 = vcmp.lt.s32.totalorder %v1630_v36, 0 }
 0x11c   : > { %v3213_v2 = vadd.f32 %v11406_v9, %v1336_v39  ;;  %v710_v4 = vadd.f32 %v709_v37, %v11472_v28  ;;  %v1679_v31 = vadd.s32 %v1677_v17, %v1671_v13  ;;  %v1675_v55 = vshrl.u32 %v11523_v25, 16  ;;  %vm11577_vm11 = vmand %vm2876_vm4, %vm2828_vm8 }
 0x11d   : > { %v1657_v52 = vshrl.u32 %v1656_v19, 4  ;;  %vm1680_vm10 = vc.u32 %v1678_v53, %v1674_v63  ;;  %v1694_v39 = vand.u32 65535, %v11558_v56  ;;  %v1695_v13 = vshrl.u32 %v11558_v56, 16  ;;  %v9572_v19 = vld [vmem:[#allocation3 + $0x70] sm:$0xff] }
 0x11e   : > { %v3261_v38 = vmax.f32 %v3213_v2, 0.0  ;;  %8758 = vmatmul.msk.bf16.gmra.mxu1 %vm452_vm1, %v11131_v15  ;;  %8886 = vmatmul.msk.bf16.gmra.mxu2 %vm452_vm1, %v9542_v8  ;;  %v2972_v15 = vadd.s32 24, %v1630_v36  ;;  %v1681_v25 = vsel %vm1680_vm10, 1, %v13923_v61  ;;  %v3019_v35 = vsel %vm11564_vm9, %v2971_v30, %v11504_v58 }
 0x11f   : > { %v1658_v37 = vmul.u32 24, %v1657_v52  ;;  %v1683_v53 = vadd.s32 %v1681_v25, %v1679_v31  ;;  %v11590_v30 = vmul.u32 43690, %v1694_v39  ;;  %vm3067_vm14 = vcmp.ge.s32.totalorder %v3019_v35, 1  ;;  %4330 = vmatpush.bf16.msra.mxu1 %v9572_v19 }
 0x120   : > { %8910 = vmatmul.msk.bf16.gmra.mxu3 %vm452_vm1, %v9542_v8  ;;  %v3405_v48 = vsel %vm3161_vm7, %v3261_v38, 0.0  ;;  %v11571_v8 = vadd.s32 80, %v11253_v11  ;;  %v9604_v38 = vld [vmem:[#allocation3 + $0xb0] sm:$0xff]  ;;  %vm3115_vm15 = vcmp.le.s32.totalorder %v3019_v35, 16  ;;  %v11594_v31 = vsel %vm11577_vm11, %v2972_v15, %v1630_v36 }
 0x121   : > { %v9710_v43 = vpack.c.bf16 %v3405_v48, %v3404_v32  ;;  %v1094_v6 = vpop.f32.mrf.mxu2  ;;  %v553_v32 = vpop.f32.mrf.mxu0  ;;  %v1659_v52 = vsub.s32 %v11433_v24, %v1658_v37  ;;  %4965 = vmatpush.bf16.msra.mxu2 %v9604_v38  ;;  %v1684_v58 = vadd.s32 %v1683_v53, %v1673_v41  ;;  %v1697_v28 = vmul.u32 43691, %v1694_v39  ;;  %vm11632_vm8 = vmand %vm3067_vm14, %vm3115_vm15 }
 0x122   : > { %v1337_v27 = vadd.f32 %v1094_v6, %v710_v4  ;;  %v9612_v4 = vld [vmem:[#allocation3 + $0xf0] sm:$0xff]  ;;  %v11598_v24 = vmul.u32 43691, %v1695_v13  ;;  %v1723_v37 = vand.u32 65535, %v11571_v8  ;;  %v1701_v38 = vshll.u32 %v11590_v30, 16 }
 0x123   : > { %v11573_v46 = vpop.f32.mrf.mxu3  ;;  %10223 = vst [vmem:[#allocation2 + $0x18] sm:$0xff] %v9710_v43   ;;  %v711_v2 = vpop.f32.mrf.mxu1  ;;  %v3770_v63 = vshrl.u32 %v9710_v43, 16  ;;  %v3773_v17 = vshll.u32 %v9710_v43, 16  ;;  %5627 = vmatpush.bf16.msra.mxu3 %v9612_v4  ;;  %vm2829_vm2 = vcmp.ne.s32.totalorder %v1659_v52, 0  ;;  %vm2877_vm3 = vcmp.lt.s32.totalorder %v1659_v52, 0 }
 0x124   : > { %13942 = vst [vmem:[#allocation24_spill] sm:$0xff] %v11573_v46  ;;  %v3214_v48 = vadd.f32 %v11406_v9, %v1337_v27  ;;  %v1685_v27 = vadd.s32 %v1684_v58, %v1675_v55  ;;  %v712_v41 = vadd.f32 %v711_v2, %v11520_v33  ;;  %v1703_v44 = vshll.u32 %v11598_v24, 16  ;;  %vm11625_vm7 = vmand %vm2877_vm3, %vm2829_vm2 }
 0x125   : > { %v3772_v6 = vrot.slane %v3770_v63, 3  ;;  %v3775_v46 = vrot.slane %v3773_v17, 4  ;;  %v9620_v63 = vld [vmem:[#allocation3 + $0x130] sm:$0xff]  ;;  %v1700_v17 = vmul.u32 43690, %v1695_v13  ;;  %v2973_v13 = vadd.s32 24, %v1659_v52 }
 0x126   : > { %v3262_v25 = vmax.f32 %v3214_v48, 0.0  ;;  %v1686_v33 = vshrl.u32 %v1685_v27, 4  ;;  %vm1705_vm5 = vc.u32 %v1697_v28, %v1701_v38  ;;  %5917 = vmatpush.bf16.msra.mxu0 %v9620_v63  ;;  %v1707_v53 = vadd.s32 %v1701_v38, %v1697_v28 }
 0x127   : > { %v11596_v43 = vor.u32 %v3775_v46, %v3772_v6  ;;  %v1706_v19 = vsel %vm1705_vm5, 1, %v13923_v61  ;;  %v1702_v27 = vshrl.u32 %v11590_v30, 16  ;;  %v11637_v36 = vmul.u32 43690, %v1723_v37 }
 0x128   : > { %v1687_v4 = vmul.u32 24, %v1686_v33  ;;  %v3406_v48 = vsel %vm11607_vm0, %v3262_v25, 0.0  ;;  %vm1709_vm4 = vc.u32 %v1707_v53, %v1703_v44  ;;  %v1726_v35 = vmul.u32 43691, %v1723_v37 }
 0x129   : > { %v1096_v15 = vpop.f32.mrf.mxu2  ;;  %v3777_v55 = vsel %vm3742_vm6, %v11512_v20, %v11596_v43  ;;  %v1724_v20 = vshrl.u32 %v11571_v8, 16  ;;  %v555_v38 = vpop.f32.mrf.mxu0  ;;  %v1710_v30 = vsel %vm1709_vm4, 1, %v13923_v61  ;;  %vm3068_vm9 = vcmp.ge.s32.totalorder %v11594_v31, 1 }
 0x12a   : > { %v1338_v39 = vadd.f32 %v1096_v15, %v712_v41  ;;  %4057 = vmatmul.bf16.gmra.mxu0 %v3777_v55  ;;  %v1708_v41 = vadd.s32 %v1706_v19, %v1700_v17  ;;  %v1688_v25 = vsub.s32 %v11489_v62, %v1687_v4  ;;  %v10876_v55 = vld [vmem:[%s11104_s9 + $0x58] sm:$0xff]  ;;  %v11649_v62 = vsel %vm11625_vm7, %v2973_v13, %v1659_v52 }
 0x12b   : > { %v11614_v46 = vpop.f32.mrf.mxu3  ;;  %v714_v2 = vpop.f32.mrf.mxu1  ;;  %v11643_v17 = vmul.u32 43691, %v1724_v20  ;;  %v1730_v37 = vshll.u32 %v11637_v36, 16  ;;  %vm3116_vm12 = vcmp.le.s32.totalorder %v11594_v31, 16  ;;  %v11657_v19 = vadd.s32 88, %v11253_v11 }
 0x12c   : > { %v3215_v6 = vadd.f32 %v11406_v9, %v1338_v39  ;;  %v715_v63 = vadd.f32 %v714_v2, %v553_v32  ;;  %v1704_v32 = vshrl.u32 %v11598_v24, 16  ;;  %v1712_v33 = vadd.s32 %v1710_v30, %v1708_v41  ;;  %vm11692_vm3 = vmand %vm3068_vm9, %vm3116_vm12 }
 0x12d   : > { %v1729_v39 = vmul.u32 43690, %v1724_v20  ;;  %vm2830_vm10 = vcmp.ne.s32.totalorder %v1688_v25, 0  ;;  %vm2878_vm11 = vcmp.lt.s32.totalorder %v1688_v25, 0  ;;  %vm3069_vm13 = vcmp.ge.s32.totalorder %v11649_v62, 1 }
 0x12e   : > { %v3263_v15 = vmax.f32 %v3215_v6, 0.0  ;;  %8759 = vmatmul.msk.bf16.gmra.mxu1 %vm452_vm1, %v10876_v55  ;;  %8887 = vmatmul.msk.bf16.gmra.mxu2 %vm452_vm1, %v9543_v49  ;;  %vm3117_vm14 = vcmp.le.s32.totalorder %v11649_v62, 16  ;;  %v2974_v24 = vadd.s32 24, %v1688_v25  ;;  %v1732_v53 = vshll.u32 %v11643_v17, 16  ;;  %vm2926_vm0 = vmand %vm2878_vm11, %vm2830_vm10 }
 0x12f   : > { %vm1734_vm15 = vc.u32 %v1726_v35, %v1730_v37  ;;  %v1731_v28 = vshrl.u32 %v11637_v36, 16  ;;  %vm11713_vm4 = vmand %vm3069_vm13, %vm3117_vm14 }
 0x130   : > { %8911 = vmatmul.msk.bf16.gmra.mxu3 %vm452_vm1, %v9543_v49  ;;  %v3407_v44 = vsel %vm11632_vm8, %v3263_v15, 0.0  ;;  %v1713_v49 = vadd.s32 %v1712_v33, %v1702_v27  ;;  %v1735_v27 = vsel %vm1734_vm15, 1, %v13923_v61 }
 0x131   : > { %v9715_v2 = vpack.c.bf16 %v3407_v44, %v3406_v48  ;;  %v1099_v4 = vpop.f32.mrf.mxu2  ;;  %v1737_v15 = vadd.s32 %v1735_v27, %v1729_v39  ;;  %v1752_v44 = vand.u32 65535, %v11657_v19 }
 0x132   : > { %v1339_v52 = vadd.f32 %v1099_v4, %v715_v63  ;;  %v1714_v58 = vadd.s32 %v1713_v49, %v1704_v32  ;;  %v1736_v63 = vadd.s32 %v1730_v37, %v1726_v35  ;;  %v11670_v4 = vsel %vm2926_vm0, %v2974_v24, %v1688_v25 }
 0x133   : > { %v11659_v13 = vpop.f32.mrf.mxu3  ;;  %10224 = vst [vmem:[#allocation2 + $0x20] sm:$0xff] %v9715_v2   ;;  %v716_v20 = vpop.f32.mrf.mxu1  ;;  %v3779_v48 = vshrl.u32 %v9715_v2, 16  ;;  %v3782_v6 = vshll.u32 %v9715_v2, 16  ;;  %v11674_v32 = vadd.s32 96, %v11253_v11  ;;  %v1733_v35 = vshrl.u32 %v11643_v17, 16 }
 0x134   : > { %13951 = vst [vmem:[#allocation25_spill] sm:$0xff] %v11659_v13  ;;  %v3216_v41 = vadd.f32 %v11406_v9, %v1339_v52  ;;  %v1715_v33 = vshrl.u32 %v1714_v58, 4  ;;  %vm1738_vm2 = vc.u32 %v1736_v63, %v1732_v53  ;;  %v1753_v13 = vshrl.u32 %v11657_v19, 16  ;;  %v558_v2 = vpop.f32.mrf.mxu0 }
 0x135   : > { %v3781_v55 = vrot.slane %v3779_v48, 3  ;;  %v3784_v30 = vrot.slane %v3782_v6, 4  ;;  %v1739_v39 = vsel %vm1738_vm2, 1, %v13923_v61  ;;  %v717_v37 = vadd.f32 %v716_v20, %v555_v38 }
 0x136   : > { %v1716_v36 = vmul.u32 24, %v1715_v33  ;;  %v1741_v52 = vadd.s32 %v1739_v39, %v1737_v15  ;;  %v11680_v48 = vmul.u32 43690, %v1752_v44  ;;  %v11682_v25 = vmul.u32 43691, %v1753_v13 }
 0x137   : > { %v11676_v49 = vor.u32 %v3784_v30, %v3781_v55  ;;  %v3264_v24 = vmax.f32 %v3216_v41, 0.0  ;;  %v1755_v27 = vmul.u32 43691, %v1752_v44  ;;  %v9544_v41 = vld [vmem:[%s11104_s9 + $0x6c] sm:$0xff]  ;;  %vm3070_vm9 = vcmp.ge.s32.totalorder %v11670_v4, 1 }
 0x138   : > { %v1717_v58 = vsub.s32 %v11558_v56, %v1716_v36  ;;  %v1742_v63 = vadd.s32 %v1741_v52, %v1731_v28  ;;  %v1759_v15 = vshll.u32 %v11680_v48, 16  ;;  %v1761_v31 = vshll.u32 %v11682_v25, 16 }
 0x139   : > { %v1101_v53 = vpop.f32.mrf.mxu2  ;;  %v3786_v6 = vsel %vm3742_vm6, %v11596_v43, %v11676_v49  ;;  %v1781_v43 = vand.u32 65535, %v11674_v32  ;;  %v1758_v36 = vmul.u32 43690, %v1753_v13  ;;  %v3408_v28 = vsel %vm11692_vm3, %v3264_v24, 0.0 }
 0x13a   : > { %v1340_v17 = vadd.f32 %v1101_v53, %v717_v37  ;;  %4062 = vmatmul.bf16.gmra.mxu0 %v3786_v6  ;;  %vm2831_vm5 = vcmp.ne.s32.totalorder %v1717_v58, 0  ;;  %vm2879_vm7 = vcmp.lt.s32.totalorder %v1717_v58, 0  ;;  %v2975_v55 = vadd.s32 24, %v1717_v58  ;;  %v10877_v53 = vld [vmem:[%s11104_s9 + $0x60] sm:$0xff] }
 0x13b   : > { %v11696_v20 = vpop.f32.mrf.mxu3  ;;  %v719_v56 = vpop.f32.mrf.mxu1  ;;  %vm11703_vm8 = vmand %vm2879_vm7, %vm2831_vm5  ;;  %v1743_v44 = vadd.s32 %v1742_v63, %v1733_v35  ;;  %vm3118_vm10 = vcmp.le.s32.totalorder %v11670_v4, 16  ;;  %vm1763_vm11 = vc.u32 %v1755_v27, %v1759_v15  ;;  %v1765_v37 = vadd.s32 %v1759_v15, %v1755_v27 }
 0x13c   : > { %v3217_v30 = vadd.f32 %v11406_v9, %v1340_v17  ;;  %v1782_v35 = vshrl.u32 %v11674_v32, 16  ;;  %v720_v52 = vadd.f32 %v719_v56, %v558_v2  ;;  %v1760_v24 = vshrl.u32 %v11680_v48, 16  ;;  %vm11756_vm5 = vmand %vm3070_vm9, %vm3118_vm10 }
 0x13d   : > { %v1744_v62 = vshrl.u32 %v1743_v44, 4  ;;  %v11727_v6 = vsel %vm11703_vm8, %v2975_v55, %v1717_v58  ;;  %v1764_v27 = vsel %vm1763_vm11, 1, %v13923_v61  ;;  %vm1767_vm12 = vc.u32 %v1765_v37, %v1761_v31 }
 0x13e   : > { %v3265_v13 = vmax.f32 %v3217_v30, 0.0  ;;  %8760 = vmatmul.msk.bf16.gmra.mxu1 %vm452_vm1, %v10877_v53  ;;  %8888 = vmatmul.msk.bf16.gmra.mxu2 %vm452_vm1, %v9544_v41  ;;  %v11730_v38 = vmul.u32 43690, %v1781_v43  ;;  %v1766_v63 = vadd.s32 %v1764_v27, %v1758_v36  ;;  %v1768_v15 = vsel %vm1767_vm12, 1, %v13923_v61  ;;  %v560_v30 = vpop.f32.mrf.mxu0 }
 0x13f   : > { %v1745_v17 = vmul.u32 24, %v1744_v62  ;;  %v1784_v33 = vmul.u32 43691, %v1781_v43  ;;  %v11736_v58 = vmul.u32 43691, %v1782_v35  ;;  %vm3071_vm13 = vcmp.ge.s32.totalorder %v11727_v6, 1 }
 0x140   : > { %8912 = vmatmul.msk.bf16.gmra.mxu3 %vm452_vm1, %v9544_v41  ;;  %v3409_v2 = vsel %vm11713_vm4, %v3265_v13, 0.0  ;;  %v1762_v41 = vshrl.u32 %v11682_v25, 16  ;;  %v1770_v37 = vadd.s32 %v1768_v15, %v1766_v63  ;;  %v1788_v39 = vshll.u32 %v11730_v38, 16 }
 0x141   : > { %v9720_v56 = vpack.c.bf16 %v3409_v2, %v3408_v28  ;;  %v1104_v48 = vpop.f32.mrf.mxu2  ;;  %v1746_v31 = vsub.s32 %v11571_v8, %v1745_v17  ;;  %v1787_v53 = vmul.u32 43690, %v1782_v35  ;;  %v1790_v43 = vshll.u32 %v11736_v58, 16 }
 0x142   : > { %v1341_v55 = vadd.f32 %v1104_v48, %v720_v52  ;;  %v1771_v27 = vadd.s32 %v1770_v37, %v1760_v24  ;;  %vm3119_vm2 = vcmp.le.s32.totalorder %v11727_v6, 16  ;;  %vm1792_vm3 = vc.u32 %v1784_v33, %v1788_v39 }
 0x143   : > { %v11738_v44 = vpop.f32.mrf.mxu3  ;;  %10225 = vst [vmem:[#allocation2 + $0x28] sm:$0xff] %v9720_v56   ;;  %v721_v36 = vpop.f32.mrf.mxu1  ;;  %v3788_v28 = vshrl.u32 %v9720_v56, 16  ;;  %v3791_v13 = vshll.u32 %v9720_v56, 16  ;;  %vm2832_vm14 = vcmp.ne.s32.totalorder %v1746_v31, 0  ;;  %vm2880_vm15 = vcmp.lt.s32.totalorder %v1746_v31, 0  ;;  %vm11785_vm4 = vmand %vm3071_vm13, %vm3119_vm2 }
 0x144   : > { %v3218_v25 = vadd.f32 %v11406_v9, %v1341_v55  ;;  %vm2928_vm0 = vmand %vm2880_vm15, %vm2832_vm14  ;;  %v2976_v52 = vadd.s32 24, %v1746_v31  ;;  %v1794_v2 = vadd.s32 %v1788_v39, %v1784_v33  ;;  %v11747_v17 = vadd.s32 104, %v11253_v11 }
 0x145   : > { %v3790_v62 = vrot.slane %v3788_v28, 3  ;;  %v3793_v8 = vrot.slane %v3791_v13, 4  ;;  %v1772_v15 = vadd.s32 %v1771_v27, %v1762_v41  ;;  %v1793_v56 = vsel %vm1792_vm3, 1, %v13923_v61 }
 0x146   : > { %v3266_v63 = vmax.f32 %v3218_v25, 0.0  ;;  %v722_v48 = vadd.f32 %v721_v36, %v560_v30  ;;  %v11760_v33 = vsel %vm2928_vm0, %v2976_v52, %v1746_v31  ;;  %v1789_v55 = vshrl.u32 %v11730_v38, 16 }
 0x147   : > { %v11749_v35 = vor.u32 %v3793_v8, %v3790_v62  ;;  %v1795_v37 = vadd.s32 %v1793_v56, %v1787_v53  ;;  %v1773_v28 = vshrl.u32 %v1772_v15, 4  ;;  %vm1796_vm7 = vc.u32 %v1794_v2, %v1790_v43  ;;  %v9545_v62 = vld [vmem:[%s11104_s9 + $0x74] sm:$0xff]  ;;  %v563_v53 = vpop.f32.mrf.mxu0 }
 0x148   : > { %v1810_v13 = vand.u32 65535, %v11747_v17  ;;  %v1791_v30 = vshrl.u32 %v11736_v58, 16  ;;  %v1797_v31 = vsel %vm1796_vm7, 1, %v13923_v61  ;;  %v1811_v38 = vshrl.u32 %v11747_v17, 16 }
 0x149   : > { %v1106_v39 = vpop.f32.mrf.mxu2  ;;  %v3795_v41 = vsel %vm3742_vm6, %v11676_v49, %v11749_v35  ;;  %v3410_v36 = vsel %vm11756_vm5, %v3266_v63, 0.0  ;;  %v1774_v43 = vmul.u32 24, %v1773_v28  ;;  %v1799_v52 = vadd.s32 %v1797_v31, %v1795_v37 }
 0x14a   : > { %v1342_v4 = vadd.f32 %v1106_v39, %v722_v48  ;;  %4067 = vmatmul.bf16.gmra.mxu0 %v3795_v41  ;;  %v11775_v8 = vmul.u32 43690, %v1810_v13  ;;  %vm3072_vm8 = vcmp.ge.s32.totalorder %v11760_v33, 1  ;;  %v1813_v2 = vmul.u32 43691, %v1810_v13  ;;  %v10878_v41 = vld [vmem:[%s11104_s9 + $0x68] sm:$0xff] }
 0x14b   : > { %v11767_v25 = vpop.f32.mrf.mxu3  ;;  %v724_v49 = vpop.f32.mrf.mxu1  ;;  %v11779_v58 = vmul.u32 43691, %v1811_v38  ;;  %v1775_v15 = vsub.s32 %v11657_v19, %v1774_v43  ;;  %v1800_v56 = vadd.s32 %v1799_v52, %v1789_v55  ;;  %v11792_v48 = vadd.s32 112, %v11253_v11 }
 0x14c   : > { %13960 = vst [vmem:[#allocation26_spill] sm:$0xff] %v11767_v25  ;;  %v3219_v27 = vadd.f32 %v11406_v9, %v1342_v4  ;;  %v1817_v24 = vshll.u32 %v11775_v8, 16  ;;  %v725_v39 = vadd.f32 %v724_v49, %v563_v53  ;;  %v1816_v6 = vmul.u32 43690, %v1811_v38 }
 0x14d   : > { %v1819_v28 = vshll.u32 %v11779_v58, 16  ;;  %vm2833_vm9 = vcmp.ne.s32.totalorder %v1775_v15, 0  ;;  %vm2881_vm10 = vcmp.lt.s32.totalorder %v1775_v15, 0  ;;  %v2977_v19 = vadd.s32 24, %v1775_v15 }
 0x14e   : > { %v3267_v37 = vmax.f32 %v3219_v27, 0.0  ;;  %8761 = vmatmul.msk.bf16.gmra.mxu1 %vm452_vm1, %v10878_v41  ;;  %8889 = vmatmul.msk.bf16.gmra.mxu2 %vm452_vm1, %v9545_v62  ;;  %v1801_v55 = vadd.s32 %v1800_v56, %v1791_v30  ;;  %vm3120_vm11 = vcmp.le.s32.totalorder %v11760_v33, 16  ;;  %vm2929_vm12 = vmand %vm2881_vm10, %vm2833_vm9  ;;  %vm1821_vm13 = vc.u32 %v1813_v2, %v1817_v24 }
 0x14f   : > { %v1823_v4 = vadd.s32 %v1817_v24, %v1813_v2  ;;  %v1822_v38 = vsel %vm1821_vm13, 1, %v13923_v61  ;;  %v1839_v43 = vand.u32 65535, %v11792_v48  ;;  %v3025_v27 = vsel %vm2929_vm12, %v2977_v19, %v1775_v15  ;;  %v9611_v2 = vld [vmem:[#allocation3 + $0xe8] sm:$0xff]  ;;  %vm11818_vm0 = vmand %vm3072_vm8, %vm3120_vm11 }
 0x150   : > { %8913 = vmatmul.msk.bf16.gmra.mxu3 %vm452_vm1, %v9545_v62  ;;  %v3411_v13 = vsel %vm11785_vm4, %v3267_v37, 0.0  ;;  %v1802_v49 = vshrl.u32 %v1801_v55, 4  ;;  %v1824_v30 = vadd.s32 %v1822_v38, %v1816_v6  ;;  %v1840_v63 = vshrl.u32 %v11792_v48, 16  ;;  %v9571_v15 = vld [vmem:[#allocation3 + $0x68] sm:$0xff]  ;;  %v565_v6 = vpop.f32.mrf.mxu0 }
 0x151   : > { %v9725_v31 = vpack.c.bf16 %v3411_v13, %v3410_v36  ;;  %v1109_v53 = vpop.f32.mrf.mxu2  ;;  %vm1825_vm14 = vc.u32 %v1823_v4, %v1819_v28  ;;  %v9603_v36 = vld [vmem:[#allocation3 + $0xa8] sm:$0xff]  ;;  %v1818_v55 = vshrl.u32 %v11775_v8, 16  ;;  %5628 = vmatpush.bf16.msra.mxu3 %v9611_v2  ;;  %vm3073_vm15 = vcmp.ge.s32.totalorder %v3025_v27, 1  ;;  %4331 = vmatpush.bf16.msra.mxu1 %v9571_v15  ;;  %v9546_v15 = vld [vmem:[%s11104_s9 + $0x7c] sm:$0xff] }
 0x152   : > { %v1343_v62 = vadd.f32 %v1109_v53, %v725_v39  ;;  %v1803_v37 = vmul.u32 24, %v1802_v49  ;;  %v1820_v39 = vshrl.u32 %v11779_v58, 16  ;;  %v1826_v13 = vsel %vm1825_vm14, 1, %v13923_v61  ;;  %4966 = vmatpush.bf16.msra.mxu2 %v9603_v36 }
 0x153   : > { %v11804_v52 = vpop.f32.mrf.mxu3  ;;  %10226 = vst [vmem:[#allocation2 + $0x30] sm:$0xff] %v9725_v31   ;;  %v726_v56 = vpop.f32.mrf.mxu1  ;;  %v3797_v41 = vshrl.u32 %v9725_v31, 16  ;;  %v3800_v25 = vshll.u32 %v9725_v31, 16  ;;  %v1828_v49 = vadd.s32 %v1826_v13, %v1824_v30  ;;  %v1843_v4 = vmul.u32 43690, %v1839_v43 }
 0x154   : > { %v3220_v24 = vadd.f32 %v11406_v9, %v1343_v62  ;;  %v1804_v19 = vsub.s32 %v11674_v32, %v1803_v37  ;;  %v11812_v31 = vmul.u32 43691, %v1840_v63  ;;  %v727_v58 = vadd.f32 %v726_v56, %v565_v6 }
 0x155   : > { %v3799_v53 = vrot.slane %v3797_v41, 3  ;;  %v3802_v38 = vrot.slane %v3800_v25, 4  ;;  %v1842_v25 = vmul.u32 43691, %v1839_v43  ;;  %v1829_v30 = vadd.s32 %v1828_v49, %v1818_v55  ;;  %v9619_v41 = vld [vmem:[#allocation3 + $0x128] sm:$0xff] }
 0x156   : > { %v3268_v28 = vmax.f32 %v3220_v24, 0.0  ;;  %vm2834_vm2 = vcmp.ne.s32.totalorder %v1804_v19, 0  ;;  %vm2882_vm3 = vcmp.lt.s32.totalorder %v1804_v19, 0  ;;  %v2978_v62 = vadd.s32 24, %v1804_v19  ;;  %5918 = vmatpush.bf16.msra.mxu0 %v9619_v41  ;;  %v10879_v41 = vld [vmem:[%s11104_s9 + $0x70] sm:$0xff] }
 0x157   : > { %v11822_v32 = vor.u32 %v3802_v38, %v3799_v53  ;;  %v1846_v37 = vshll.u32 %v1843_v4, 16  ;;  %vm3121_vm5 = vcmp.le.s32.totalorder %v3025_v27, 16  ;;  %vm11824_vm7 = vmand %vm2882_vm3, %vm2834_vm2  ;;  %v1845_v24 = vmul.u32 43690, %v1840_v63 }
 0x158   : > { %v1848_v13 = vshll.u32 %v11812_v31, 16  ;;  %v3412_v43 = vsel %vm11818_vm0, %v3268_v28, 0.0  ;;  %v1830_v6 = vadd.s32 %v1829_v30, %v1820_v39  ;;  %v1847_v53 = vshrl.u32 %v1843_v4, 16  ;;  %vm11851_vm4 = vmand %vm3073_vm15, %vm3121_vm5 }
 0x159   : > { %v1111_v36 = vpop.f32.mrf.mxu2  ;;  %v3804_v33 = vsel %vm3742_vm6, %v11749_v35, %v11822_v32  ;;  %vm1850_vm8 = vc.u32 %v1842_v25, %v1846_v37  ;;  %v1852_v49 = vadd.s32 %v1846_v37, %v1842_v25  ;;  %v11838_v35 = vadd.s32 120, %v11253_v11 }
 0x15a   : > { %v1344_v56 = vadd.f32 %v1111_v36, %v727_v58  ;;  %4072 = vmatmul.bf16.gmra.mxu0 %v3804_v33  ;;  %v11841_v63 = vadd.s32 128, %v11253_v11  ;;  %v11846_v8 = vsel %vm11824_vm7, %v2978_v62, %v1804_v19  ;;  %v1831_v58 = vshrl.u32 %v1830_v6, 4 }
 0x15b   : > { %v11834_v55 = vpop.f32.mrf.mxu3  ;;  %v729_v38 = vpop.f32.mrf.mxu1  ;;  %v1851_v39 = vsel %vm1850_vm8, 1, %v13923_v61  ;;  %vm1854_vm9 = vc.u32 %v1852_v49, %v1848_v13  ;;  %v1868_v30 = vand.u32 65535, %v11838_v35  ;;  %v1869_v37 = vshrl.u32 %v11838_v35, 16 }
 0x15c   : > { %v3221_v28 = vadd.f32 %v11406_v9, %v1344_v56  ;;  %v1853_v25 = vadd.s32 %v1851_v39, %v1845_v24  ;;  %v1832_v19 = vmul.u32 24, %v1831_v58  ;;  %v1849_v62 = vshrl.u32 %v11812_v31, 16 }
 0x15d   : > { %v1855_v27 = vsel %vm1854_vm9, 1, %v13923_v61  ;;  %v730_v36 = vadd.f32 %v729_v38, %v11193_v45  ;;  %vm3074_vm10 = vcmp.ge.s32.totalorder %v11846_v8, 1  ;;  %vm3122_vm11 = vcmp.le.s32.totalorder %v11846_v8, 16 }
 0x15e   : > { %v3269_v9 = vmax.f32 %v3221_v28, 0.0  ;;  %8762 = vmatmul.msk.bf16.gmra.mxu1 %vm452_vm1, %v10879_v41  ;;  %8890 = vmatmul.msk.bf16.gmra.mxu2 %vm452_vm1, %v9546_v15  ;;  %v1857_v2 = vadd.s32 %v1855_v27, %v1853_v25  ;;  %v11866_v33 = vmul.u32 43690, %v1868_v30  ;;  %v1897_v24 = vand.u32 65535, %v11841_v63  ;;  %vm11901_vm5 = vmand %vm3074_vm10, %vm3122_vm11 }
 0x15f   : > { %v1833_v31 = vsub.s32 %v11747_v17, %v1832_v19  ;;  %v1871_v56 = vmul.u32 43691, %v1868_v30  ;;  %v11872_v6 = vmul.u32 43691, %v1869_v37  ;;  %v1874_v49 = vmul.u32 43690, %v1869_v37 }
 0x160   : > { %8914 = vmatmul.msk.bf16.gmra.mxu3 %vm452_vm1, %v9546_v15  ;;  %v3413_v13 = vsel %vm11851_vm4, %v3269_v9, 0.0  ;;  %v1858_v15 = vadd.s32 %v1857_v2, %v1847_v53  ;;  %v1875_v28 = vshll.u32 %v11866_v33, 16  ;;  %v1898_v41 = vshrl.u32 %v11841_v63, 16 }
 0x161   : > { %v9730_v45 = vpack.c.bf16 %v3413_v13, %v3412_v43  ;;  %v1114_v38 = vpop.f32.mrf.mxu2  ;;  %vm2835_vm12 = vcmp.ne.s32.totalorder %v1833_v31, 0  ;;  %vm2883_vm13 = vcmp.lt.s32.totalorder %v1833_v31, 0  ;;  %v2979_v25 = vadd.s32 24, %v1833_v31  ;;  %v11881_v43 = vld [vmem:[%s13902_s3] ss:$0 sm:$0xff] }
 0x162   : > { %v1345_v58 = vadd.f32 %v1114_v38, %v730_v36  ;;  %vm2931_vm14 = vmand %vm2883_vm13, %vm2835_vm12  ;;  %v1859_v9 = vadd.s32 %v1858_v15, %v1849_v62  ;;  %v1876_v19 = vshrl.u32 %v11866_v33, 16  ;;  %v1877_v27 = vshll.u32 %v11872_v6, 16 }
 0x163   : > { %v11875_v39 = vpop.f32.mrf.mxu3  ;;  %10227 = vst [vmem:[#allocation2 + $0x38] sm:$0xff] %v9730_v45   ;;  %v731_v4 = vpop.f32.mrf.mxu1  ;;  %v3806_v17 = vshrl.u32 %v9730_v45, 16  ;;  %v3809_v30 = vshll.u32 %v9730_v45, 16  ;;  %v3027_v37 = vsel %vm2931_vm14, %v2979_v25, %v1833_v31  ;;  %v1878_v13 = vshrl.u32 %v11872_v6, 16 }
 0x164   : > { %13969 = vst [vmem:[#allocation27_spill] sm:$0xff] %v11875_v39  ;;  %v3222_v53 = vadd.f32 %v11881_v43, %v1345_v58  ;;  %v732_v36 = vadd.f32 %v731_v4, %v11207_v50  ;;  %v1860_v2 = vshrl.u32 %v1859_v9, 4  ;;  %vm3075_vm15 = vcmp.ge.s32.totalorder %v3027_v37, 1 }
 0x165   : > { %v3808_v62 = vrot.slane %v3806_v17, 3  ;;  %v3811_v45 = vrot.slane %v3809_v30, 4  ;;  %vm1879_vm0 = vc.u32 %v1871_v56, %v1875_v28  ;;  %v1881_v38 = vadd.s32 %v1875_v28, %v1871_v56 }
 0x166   : > { %vm3123_vm2 = vcmp.le.s32.totalorder %v3027_v37, 16  ;;  %v1861_v15 = vmul.u32 24, %v1860_v2  ;;  %v1880_v58 = vsel %vm1879_vm0, 1, %v13923_v61  ;;  %v11889_v31 = vmul.u32 43690, %v1897_v24 }
 0x167   : > { %v3270_v33 = vmax.f32 %v3222_v53, 0.0  ;;  %v11891_v25 = vor.u32 %v3811_v45, %v3808_v62  ;;  %v1882_v39 = vadd.s32 %v1880_v58, %v1874_v49  ;;  %vm1883_vm3 = vc.u32 %v1881_v38, %v1877_v27  ;;  %v9547_v49 = vld [vmem:[%s11104_s9 + $0x84] sm:$0xff]  ;;  %vm11918_vm9 = vmand %vm3075_vm15, %vm3123_vm2 }
 0x168   : > { %v1862_v4 = vsub.s32 %v11792_v48, %v1861_v15  ;;  %v1884_v6 = vsel %vm1883_vm3, 1, %v13923_v61  ;;  %v1900_v9 = vmul.u32 43691, %v1897_v24  ;;  %v11895_v17 = vmul.u32 43691, %v1898_v41 }
 0x169   : > { %v1116_v50 = vpop.f32.mrf.mxu2  ;;  %v3813_v48 = vsel %vm3742_vm6, %v11822_v32, %v11891_v25  ;;  %v1886_v53 = vadd.s32 %v1884_v6, %v1882_v39  ;;  %v1904_v24 = vshll.u32 %v11889_v31, 16  ;;  %v1903_v62 = vmul.u32 43690, %v1898_v41 }
 0x16a   : > { %v1346_v28 = vadd.f32 %v1116_v50, %v732_v36  ;;  %vm2836_vm7 = vcmp.ne.s32.totalorder %v1862_v4, 0  ;;  %vm2884_vm8 = vcmp.lt.s32.totalorder %v1862_v4, 0  ;;  %v2980_v8 = vadd.s32 24, %v1862_v4  ;;  %4077 = vmatmul.bf16.gmra.mxu0 %v3813_v48 }
 0x16b   : > { %v11905_v30 = vpop.f32.mrf.mxu3  ;;  %v734_v27 = vpop.f32.mrf.mxu1  ;;  %vm2932_vm4 = vmand %vm2884_vm8, %vm2836_vm7  ;;  %v1887_v36 = vadd.s32 %v1886_v53, %v1876_v19  ;;  %v1906_v45 = vshll.u32 %v11895_v17, 16  ;;  %v3414_v38 = vsel %vm11901_vm5, %v3270_v33, 0.0  ;;  %v1905_v39 = vshrl.u32 %v11889_v31, 16  ;;  %v10881_v19 = vld [vmem:[%s11104_s9 + $0x78] sm:$0xff] }
 0x16c   : > { %v3223_v2 = vadd.f32 %v11881_v43, %v1346_v28  ;;  %vm1908_vm10 = vc.u32 %v1900_v9, %v1904_v24  ;;  %v1910_v15 = vadd.s32 %v1904_v24, %v1900_v9  ;;  %v735_v50 = vadd.f32 %v734_v27, %v11214_v54 }
 0x16d   : > { %v3028_v41 = vsel %vm2932_vm4, %v2980_v8, %v1862_v4  ;;  %v1888_v33 = vadd.s32 %v1887_v36, %v1878_v13  ;;  %v1909_v37 = vsel %vm1908_vm10, 1, %v13923_v61  ;;  %v11930_v6 = vadd.s32 136, %v11253_v11 }
 0x16e   : > { %v3271_v58 = vmax.f32 %v3223_v2, 0.0  ;;  %8763 = vmatmul.msk.bf16.gmra.mxu1 %vm452_vm1, %v10881_v19  ;;  %8891 = vmatmul.msk.bf16.gmra.mxu2 %vm452_vm1, %v9547_v49  ;;  %vm1912_vm11 = vc.u32 %v1910_v15, %v1906_v45  ;;  %v11933_v31 = vadd.s32 144, %v11253_v11  ;;  %v1911_v56 = vadd.s32 %v1909_v37, %v1903_v62 }
 0x16f   : > { %v1889_v9 = vshrl.u32 %v1888_v33, 4  ;;  %v1913_v28 = vsel %vm1912_vm11, 1, %v13923_v61  ;;  %v1926_v48 = vand.u32 65535, %v11930_v6  ;;  %v1927_v53 = vshrl.u32 %v11930_v6, 16 }
 0x170   : > { %8915 = vmatmul.msk.bf16.gmra.mxu3 %vm452_vm1, %v9547_v49  ;;  %v3415_v54 = vsel %vm11918_vm9, %v3271_v58, 0.0  ;;  %v1907_v49 = vshrl.u32 %v11895_v17, 16  ;;  %vm3076_vm12 = vcmp.ge.s32.totalorder %v3028_v41, 1  ;;  %v1915_v2 = vadd.s32 %v1913_v28, %v1911_v56 }
 0x171   : > { %v9735_v4 = vpack.c.bf16 %v3415_v54, %v3414_v38  ;;  %v1119_v13 = vpop.f32.mrf.mxu2  ;;  %v1890_v8 = vmul.u32 24, %v1889_v9  ;;  %vm3124_vm13 = vcmp.le.s32.totalorder %v3028_v41, 16  ;;  %v11943_v32 = vmul.u32 43690, %v1926_v48 }
 0x172   : > { %v1347_v24 = vadd.f32 %v1119_v13, %v735_v50  ;;  %v1916_v15 = vadd.s32 %v1915_v2, %v1905_v39  ;;  %v1955_v58 = vand.u32 65535, %v11933_v31  ;;  %v11948_v33 = vmul.u32 43691, %v1927_v53  ;;  %vm11956_vm2 = vmand %vm3076_vm12, %vm3124_vm13 }
 0x173   : > { %v11941_v27 = vpop.f32.mrf.mxu3  ;;  %10228 = vst [vmem:[#allocation2 + $0x40] sm:$0xff] %v9735_v4   ;;  %v736_v36 = vpop.f32.mrf.mxu1  ;;  %v3815_v62 = vshrl.u32 %v9735_v4, 16  ;;  %v3818_v45 = vshll.u32 %v9735_v4, 16  ;;  %v1891_v17 = vsub.s32 %v11838_v35, %v1890_v8  ;;  %v1956_v37 = vshrl.u32 %v11933_v31, 16 }
 0x174   : > { %13974 = vst [vmem:[#allocation28_spill] sm:$0xff] %v11941_v27  ;;  %v3224_v38 = vadd.f32 %v11881_v43, %v1347_v24  ;;  %v1929_v9 = vmul.u32 43691, %v1926_v48  ;;  %v1917_v28 = vadd.s32 %v1916_v15, %v1907_v49  ;;  %v1933_v35 = vshll.u32 %v11943_v32, 16  ;;  %v9548_v15 = vld [vmem:[%s11104_s9 + $0x8c] sm:$0xff] }
 0x175   : > { %v3817_v50 = vrot.slane %v3815_v62, 3  ;;  %v3820_v19 = vrot.slane %v3818_v45, 4  ;;  %vm2837_vm14 = vcmp.ne.s32.totalorder %v1891_v17, 0  ;;  %vm2885_vm15 = vcmp.lt.s32.totalorder %v1891_v17, 0  ;;  %v9616_v27 = vld [vmem:[#allocation3 + $0x110] sm:$0xff] }
 0x176   : > { %v2981_v54 = vadd.s32 24, %v1891_v17  ;;  %v3272_v56 = vmax.f32 %v3224_v38, 0.0  ;;  %vm2933_vm0 = vmand %vm2885_vm15, %vm2837_vm14  ;;  %v737_v13 = vadd.f32 %v736_v36, %v11228_v59  ;;  %v1932_v8 = vmul.u32 43690, %v1927_v53 }
 0x177   : > { %v11951_v4 = vor.u32 %v3820_v19, %v3817_v50  ;;  %v1935_v48 = vshll.u32 %v11948_v33, 16  ;;  %v1918_v49 = vshrl.u32 %v1917_v28, 4  ;;  %v1934_v45 = vshrl.u32 %v11943_v32, 16 }
 0x178   : > { %v3029_v24 = vsel %vm2933_vm0, %v2981_v54, %v1891_v17  ;;  %vm1937_vm7 = vc.u32 %v1929_v9, %v1933_v35  ;;  %v1939_v59 = vadd.s32 %v1933_v35, %v1929_v9  ;;  %v3416_v53 = vsel %vm11956_vm2, %v3272_v56, 0.0 }
 0x179   : > { %v1121_v2 = vpop.f32.mrf.mxu2  ;;  %vm3077_vm3 = vcmp.ge.s32.totalorder %v3029_v24, 1  ;;  %v3822_v62 = vsel %vm3742_vm6, %v11891_v25, %v11951_v4  ;;  %vm3125_vm5 = vcmp.le.s32.totalorder %v3029_v24, 16  ;;  %v1919_v17 = vmul.u32 24, %v1918_v49 }
 0x17a   : > { %v1348_v41 = vadd.f32 %v1121_v2, %v737_v13  ;;  %4082 = vmatmul.bf16.gmra.mxu0 %v3822_v62  ;;  %v1938_v50 = vsel %vm1937_vm7, 1, %v13923_v61  ;;  %v1959_v19 = vmul.u32 43690, %v1955_v58  ;;  %vm1941_vm8 = vc.u32 %v1939_v59, %v1935_v48  ;;  %vm11975_vm4 = vmand %vm3077_vm3, %vm3125_vm5  ;;  %v10882_v2 = vld [vmem:[%s11104_s9 + $0x80] sm:$0xff] }
 0x17b   : > { %v11966_v38 = vpop.f32.mrf.mxu3  ;;  %v739_v36 = vpop.f32.mrf.mxu1  ;;  %v1940_v32 = vadd.s32 %v1938_v50, %v1932_v8  ;;  %v1958_v54 = vmul.u32 43691, %v1955_v58  ;;  %v1920_v9 = vsub.s32 %v11841_v63, %v1919_v17  ;;  %v1936_v56 = vshrl.u32 %v11948_v33, 16 }
 0x17c   : > { %13977 = vst [vmem:[#allocation29_spill] sm:$0xff] %v11966_v38  ;;  %v3225_v25 = vadd.f32 %v11881_v43, %v1348_v41  ;;  %v1942_v35 = vsel %vm1941_vm8, 1, %v13923_v61  ;;  %v1960_v39 = vmul.u32 43691, %v1956_v37  ;;  %v1961_v8 = vmul.u32 43690, %v1956_v37 }
 0x17d   : > { %v1944_v58 = vadd.s32 %v1942_v35, %v1940_v32  ;;  %v1962_v24 = vshll.u32 %v1959_v19, 16  ;;  %vm2838_vm9 = vcmp.ne.s32.totalorder %v1920_v9, 0  ;;  %vm2886_vm10 = vcmp.lt.s32.totalorder %v1920_v9, 0 }
 0x17e   : > { %v3273_v13 = vmax.f32 %v3225_v25, 0.0  ;;  %8764 = vmatmul.msk.bf16.gmra.mxu1 %vm452_vm1, %v10882_v2  ;;  %8892 = vmatmul.msk.bf16.gmra.mxu2 %vm452_vm1, %v9548_v15  ;;  %v2982_v48 = vadd.s32 24, %v1920_v9  ;;  %v1964_v63 = vshll.u32 %v1960_v39, 16  ;;  %v740_v49 = vadd.f32 %v739_v36, %v11235_v0  ;;  %vm2934_vm11 = vmand %vm2886_vm10, %vm2838_vm9  ;;  %v11993_v36 = vpop.f32.mrf.mxu0 }
 0x17f   : > { %v1945_v62 = vadd.s32 %v1944_v58, %v1934_v45  ;;  %vm1966_vm12 = vc.u32 %v1958_v54, %v1962_v24  ;;  %v1968_v37 = vadd.s32 %v1962_v24, %v1958_v54  ;;  %v1963_v32 = vshrl.u32 %v1959_v19, 16 }
 0x180   : > { %8916 = vmatmul.msk.bf16.gmra.mxu3 %vm452_vm1, %v9548_v15  ;;  %v3417_v33 = vsel %vm11975_vm4, %v3273_v13, 0.0  ;;  %v1967_v17 = vsel %vm1966_vm12, 1, %v13923_v61  ;;  %v3030_v35 = vsel %vm2934_vm11, %v2982_v48, %v1920_v9  ;;  %v12000_v9 = vadd.s32 160, %v11253_v11 }
 0x181   : > { %v9740_v41 = vpack.c.bf16 %v3417_v33, %v3416_v53  ;;  %v1124_v59 = vpop.f32.mrf.mxu2  ;;  %v1946_v15 = vadd.s32 %v1945_v62, %v1936_v56  ;;  %v1969_v28 = vadd.s32 %v1967_v17, %v1961_v8  ;;  %vm1970_vm13 = vc.u32 %v1968_v37, %v1964_v63 }
 0x182   : > { %v1349_v50 = vadd.f32 %v1124_v59, %v740_v49  ;;  %v1965_v53 = vshrl.u32 %v1960_v39, 16  ;;  %v1971_v58 = vsel %vm1970_vm13, 1, %v13923_v61  ;;  %v11997_v56 = vadd.s32 152, %v11253_v11 }
 0x183   : > { %v11990_v25 = vpop.f32.mrf.mxu3  ;;  %10229 = vst [vmem:[#allocation2 + $0x48] sm:$0xff] %v9740_v41   ;;  %v741_v2 = vpop.f32.mrf.mxu1  ;;  %v3824_v13 = vshrl.u32 %v9740_v41, 16  ;;  %v1947_v45 = vshrl.u32 %v1946_v15, 4  ;;  %v1973_v54 = vadd.s32 %v1971_v58, %v1969_v28  ;;  %v3827_v33 = vshll.u32 %v9740_v41, 16  ;;  %v9618_v58 = vld [vmem:[#allocation3 + $0x120] sm:$0xff] }
 0x184   : > { %13980 = vst [vmem:[#allocation30_spill] sm:$0xff] %v11990_v25  ;;  %v3226_v0 = vadd.f32 %v11881_v43, %v1349_v50  ;;  %vm3078_vm14 = vcmp.ge.s32.totalorder %v3030_v35, 1  ;;  %vm3126_vm15 = vcmp.le.s32.totalorder %v3030_v35, 16  ;;  %v1984_v63 = vand.u32 65535, %v11997_v56  ;;  %5919 = vmatpush.bf16.msra.mxu0 %v9618_v58 }
 0x185   : > { %v3826_v24 = vrot.slane %v3824_v13, 3  ;;  %v1948_v19 = vmul.u32 24, %v1947_v45  ;;  %v1974_v8 = vadd.s32 %v1973_v54, %v1963_v32  ;;  %v3829_v48 = vrot.slane %v3827_v33, 4  ;;  %v9602_v32 = vld [vmem:[#allocation3 + $0xa0] sm:$0xff]  ;;  %vm12013_vm0 = vmand %vm3078_vm14, %vm3126_vm15 }
 0x186   : > { %v1985_v39 = vshrl.u32 %v11997_v56, 16  ;;  %v3274_v49 = vmax.f32 %v3226_v0, 0.0  ;;  %v742_v62 = vadd.f32 %v741_v2, %v11244_v3  ;;  %v2013_v59 = vand.u32 65535, %v12000_v9  ;;  %v9610_v13 = vld [vmem:[#allocation3 + $0xe0] sm:$0xff]  ;;  %4967 = vmatpush.bf16.msra.mxu2 %v9602_v32 }
 0x187   : > { %v1949_v41 = vsub.s32 %v11930_v6, %v1948_v19  ;;  %v1975_v37 = vadd.s32 %v1974_v8, %v1965_v53  ;;  %v12007_v50 = vor.u32 %v3829_v48, %v3826_v24  ;;  %v1987_v15 = vmul.u32 43691, %v1984_v63  ;;  %v9570_v45 = vld [vmem:[#allocation3 + $0x60] sm:$0xff]  ;;  %v9549_v53 = vld [vmem:[%s11104_s9 + $0x94] sm:$0xff]  ;;  %5629 = vmatpush.bf16.msra.mxu3 %v9610_v13  ;;  %v10883_v13 = vld [vmem:[%s11104_s9 + $0x88] sm:$0xff] }
 0x188   : > { %v12009_v28 = vmul.u32 43690, %v1984_v63  ;;  %v12023_v35 = vmul.u32 43691, %v1985_v39  ;;  %v2014_v19 = vshrl.u32 %v12000_v9, 16  ;;  %v1990_v63 = vmul.u32 43690, %v1985_v39  ;;  %4332 = vmatpush.bf16.msra.mxu1 %v9570_v45  ;;  %v12034_v39 = vpop.f32.mrf.mxu0 }
 0x189   : > { %v1126_v17 = vpop.f32.mrf.mxu2  ;;  %vm2839_vm2 = vcmp.ne.s32.totalorder %v1949_v41, 0  ;;  %vm2887_vm3 = vcmp.lt.s32.totalorder %v1949_v41, 0  ;;  %v2983_v6 = vadd.s32 24, %v1949_v41  ;;  %v1976_v24 = vshrl.u32 %v1975_v37, 4 }
 0x18a   : > { %v1350_v3 = vadd.f32 %v1126_v17, %v742_v62  ;;  %vm2935_vm5 = vmand %vm2887_vm3, %vm2839_vm2  ;;  %v3831_v33 = vsel %vm3742_vm6, %v11951_v4, %v12007_v50  ;;  %v1991_v62 = vshll.u32 %v12009_v28, 16  ;;  %v3418_v17 = vsel %vm12013_vm0, %v3274_v49, 0.0 }
 0x18b   : > { %v12017_v2 = vpop.f32.mrf.mxu3  ;;  %v744_v54 = vpop.f32.mrf.mxu1  ;;  %v3031_v8 = vsel %vm2935_vm5, %v2983_v6, %v1949_v41  ;;  %4087 = vmatmul.bf16.gmra.mxu0 %v3831_v33  ;;  %v1977_v4 = vmul.u32 24, %v1976_v24  ;;  %v1993_v41 = vshll.u32 %v12023_v35, 16  ;;  %v2017_v58 = vmul.u32 43690, %v2013_v59 }
 0x18c   : > { %13983 = vst [vmem:[#allocation31_spill] sm:$0xff] %v12017_v2  ;;  %v3227_v48 = vadd.f32 %v11881_v43, %v1350_v3  ;;  %vm3079_vm7 = vcmp.ge.s32.totalorder %v3031_v8, 1  ;;  %vm3127_vm8 = vcmp.le.s32.totalorder %v3031_v8, 16  ;;  %v745_v32 = vadd.f32 %v744_v54, %v11251_v10 }
 0x18d   : > { %vm3175_vm4 = vmand %vm3079_vm7, %vm3127_vm8  ;;  %vm1995_vm9 = vc.u32 %v1987_v15, %v1991_v62  ;;  %v1978_v49 = vsub.s32 %v11933_v31, %v1977_v4  ;;  %v1997_v0 = vadd.s32 %v1991_v62, %v1987_v15  ;;  %v2016_v3 = vmul.u32 43691, %v2013_v59 }
 0x18e   : > { %v3275_v37 = vmax.f32 %v3227_v48, 0.0  ;;  %8765 = vmatmul.msk.bf16.gmra.mxu1 %vm452_vm1, %v10883_v13  ;;  %8893 = vmatmul.msk.bf16.gmra.mxu2 %vm452_vm1, %v9549_v53  ;;  %v1996_v45 = vsel %vm1995_vm9, 1, %v13923_v61  ;;  %v2018_v54 = vmul.u32 43691, %v2014_v19  ;;  %v12043_v31 = vadd.s32 168, %v11253_v11 }
 0x18f   : > { %v1998_v10 = vadd.s32 %v1996_v45, %v1990_v63  ;;  %vm2840_vm10 = vcmp.ne.s32.totalorder %v1978_v49, 0  ;;  %vm2888_vm11 = vcmp.lt.s32.totalorder %v1978_v49, 0  ;;  %v2984_v8 = vadd.s32 24, %v1978_v49 }
 0x190   : > { %8917 = vmatmul.msk.bf16.gmra.mxu3 %vm452_vm1, %v9549_v53  ;;  %v3419_v6 = vsel %vm3175_vm4, %v3275_v37, 0.0  ;;  %vm2936_vm12 = vmand %vm2888_vm11, %vm2840_vm10  ;;  %vm1999_vm13 = vc.u32 %v1997_v0, %v1993_v41  ;;  %v2020_v53 = vshll.u32 %v2017_v58, 16  ;;  %v1992_v63 = vshrl.u32 %v12009_v28, 16 }
 0x191   : > { %v9745_v24 = vpack.c.bf16 %v3419_v6, %v3418_v17  ;;  %v1129_v33 = vpop.f32.mrf.mxu2  ;;  %v2000_v59 = vsel %vm1999_vm13, 1, %v13923_v61  ;;  %v2019_v62 = vmul.u32 43690, %v2014_v19  ;;  %v2022_v17 = vshll.u32 %v2018_v54, 16 }
 0x192   : > { %v1351_v48 = vadd.f32 %v1129_v33, %v745_v32  ;;  %v12047_v4 = vsel %vm2936_vm12, %v2984_v8, %v1978_v49  ;;  %v1994_v37 = vshrl.u32 %v12023_v35, 16  ;;  %v2002_v32 = vadd.s32 %v2000_v59, %v1998_v10 }
 0x193   : > { %v12040_v13 = vpop.f32.mrf.mxu3  ;;  %10230 = vst [vmem:[#allocation2 + $0x50] sm:$0xff] %v9745_v24   ;;  %v746_v15 = vpop.f32.mrf.mxu1  ;;  %v2021_v45 = vshrl.u32 %v2017_v58, 16  ;;  %vm2024_vm14 = vc.u32 %v2016_v3, %v2020_v53  ;;  %v2026_v41 = vadd.s32 %v2020_v53, %v2016_v3  ;;  %v3833_v33 = vshrl.u32 %v9745_v24, 16 }
 0x194   : > { %13984 = vst [vmem:[#allocation32_spill] sm:$0xff] %v12040_v13  ;;  %v12051_v0 = vadd.f32 %v11881_v43, %v1351_v48  ;;  %v2025_v6 = vsel %vm2024_vm14, 1, %v13923_v61  ;;  %v3836_v2 = vshll.u32 %v9745_v24, 16  ;;  %v2003_v28 = vadd.s32 %v2002_v32, %v1992_v63 }
 0x195   : > { %v2027_v13 = vadd.s32 %v2025_v6, %v2019_v62  ;;  %vm2028_vm15 = vc.u32 %v2026_v41, %v2022_v17  ;;  %v2042_v19 = vand.u32 65535, %v12043_v31  ;;  %v747_v49 = vadd.f32 %v746_v15, %v11264_v22  ;;  %v9550_v17 = vld [vmem:[%s11104_s9 + $0x9c] sm:$0xff] }
 0x196   : > { %v2023_v10 = vshrl.u32 %v2018_v54, 16  ;;  %v2029_v3 = vsel %vm2028_vm15, 1, %v13923_v61  ;;  %v3835_v58 = vrot.slane %v3833_v33, 3  ;;  %v2004_v48 = vadd.s32 %v2003_v28, %v1994_v37 }
 0x197   : > { %v12056_v35 = vpop.f32.mrf.mxu0  ;;  %v2031_v53 = vadd.s32 %v2029_v3, %v2027_v13  ;;  %v3838_v59 = vrot.slane %v3836_v2, 4  ;;  %v2043_v24 = vshrl.u32 %v12043_v31, 16  ;;  %vm3080_vm0 = vcmp.ge.s32.totalorder %v12047_v4, 1 }
 0x198   : > { %v2045_v32 = vmul.u32 43691, %v2042_v19  ;;  %v12064_v22 = vmul.u32 43690, %v2042_v19  ;;  %v2005_v54 = vshrl.u32 %v2004_v48, 4  ;;  %vm3128_vm2 = vcmp.le.s32.totalorder %v12047_v4, 16 }
 0x199   : > { %v1131_v8 = vpop.f32.mrf.mxu2  ;;  %v2032_v41 = vadd.s32 %v2031_v53, %v2021_v45  ;;  %v12066_v6 = vor.u32 %v3838_v59, %v3835_v58  ;;  %v12068_v37 = vmul.u32 43691, %v2043_v24  ;;  %v2048_v2 = vmul.u32 43690, %v2043_v24  ;;  %vm3176_vm9 = vmand %vm3080_vm0, %vm3128_vm2 }
 0x19a   : > { %v1352_v63 = vadd.f32 %v1131_v8, %v747_v49  ;;  %v2049_v13 = vshll.u32 %v12064_v22, 16  ;;  %v12073_v33 = vadd.s32 176, %v11253_v11  ;;  %v3276_v28 = vmax.f32 %v12051_v0, 0.0  ;;  %v10884_v8 = vld [vmem:[%s11104_s9 + $0x90] sm:$0xff] }
 0x19b   : > { %v12061_v62 = vpop.f32.mrf.mxu3  ;;  %v749_v15 = vpop.f32.mrf.mxu1  ;;  %v2006_v19 = vmul.u32 24, %v2005_v54  ;;  %v2033_v49 = vadd.s32 %v2032_v41, %v2023_v10  ;;  %v3840_v45 = vsel %vm3742_vm6, %v12007_v50, %v12066_v6  ;;  %v2051_v48 = vshll.u32 %v12068_v37, 16 }
 0x19c   : > { %13985 = vst [vmem:[#allocation33_spill] sm:$0xff] %v12061_v62  ;;  %v3229_v3 = vadd.f32 %v11881_v43, %v1352_v63  ;;  %v750_v58 = vadd.f32 %v749_v15, %v11286_v42  ;;  %vm2053_vm3 = vc.u32 %v2045_v32, %v2049_v13  ;;  %4092 = vmatmul.bf16.gmra.mxu0 %v3840_v45  ;;  %v2050_v59 = vshrl.u32 %v12064_v22, 16 }
 0x19d   : > { %v2007_v0 = vsub.s32 %v11997_v56, %v2006_v19  ;;  %v2034_v10 = vshrl.u32 %v2033_v49, 4  ;;  %v2054_v50 = vsel %vm2053_vm3, 1, %v13923_v61  ;;  %v2055_v53 = vadd.s32 %v2049_v13, %v2045_v32 }
 0x19e   : > { %8766 = vmatmul.msk.bf16.gmra.mxu1 %vm452_vm1, %v10884_v8  ;;  %8894 = vmatmul.msk.bf16.gmra.mxu2 %vm452_vm1, %v9550_v17  ;;  %v2056_v42 = vadd.s32 %v2054_v50, %v2048_v2  ;;  %v2071_v24 = vand.u32 65535, %v12073_v33  ;;  %v2072_v63 = vshrl.u32 %v12073_v33, 16  ;;  %v3277_v56 = vmax.f32 %v3229_v3, 0.0 }
 0x19f   : > { %vm2841_vm5 = vcmp.ne.s32.totalorder %v2007_v0, 0  ;;  %vm2889_vm7 = vcmp.lt.s32.totalorder %v2007_v0, 0  ;;  %v2985_v54 = vadd.s32 24, %v2007_v0  ;;  %v2035_v41 = vmul.u32 24, %v2034_v10  ;;  %v12093_v19 = vpop.f32.mrf.mxu0 }
 0x1a0   : > { %8918 = vmatmul.msk.bf16.gmra.mxu3 %vm452_vm1, %v9550_v17  ;;  %vm2937_vm8 = vmand %vm2889_vm7, %vm2841_vm5  ;;  %v2052_v32 = vshrl.u32 %v12068_v37, 16  ;;  %vm2057_vm4 = vc.u32 %v2055_v53, %v2051_v48  ;;  %v2075_v22 = vmul.u32 43690, %v2071_v24  ;;  %v2074_v8 = vmul.u32 43691, %v2071_v24 }
 0x1a1   : > { %v1134_v15 = vpop.f32.mrf.mxu2  ;;  %v3033_v2 = vsel %vm2937_vm8, %v2985_v54, %v2007_v0  ;;  %v2036_v49 = vsub.s32 %v12000_v9, %v2035_v41  ;;  %v2058_v3 = vsel %vm2057_vm4, 1, %v13923_v61  ;;  %v2076_v10 = vmul.u32 43691, %v2072_v63 }
 0x1a2   : > { %v1353_v13 = vadd.f32 %v1134_v15, %v750_v58  ;;  %vm3081_vm10 = vcmp.ge.s32.totalorder %v3033_v2, 1  ;;  %vm3129_vm11 = vcmp.le.s32.totalorder %v3033_v2, 16  ;;  %v2060_v48 = vadd.s32 %v2058_v3, %v2056_v42 }
 0x1a3   : > { %v12091_v17 = vpop.f32.mrf.mxu3  ;;  %v751_v45 = vpop.f32.mrf.mxu1  ;;  %vm3177_vm12 = vmand %vm3081_vm10, %vm3129_vm11  ;;  %vm2842_vm13 = vcmp.ne.s32.totalorder %v2036_v49, 0  ;;  %vm2890_vm14 = vcmp.lt.s32.totalorder %v2036_v49, 0  ;;  %v2986_v37 = vadd.s32 24, %v2036_v49  ;;  %v3420_v50 = vsel %vm3176_vm9, %v3276_v28, 0.0 }
 0x1a4   : > { %13986 = vst [vmem:[#allocation34_spill] sm:$0xff] %v12091_v17  ;;  %v3421_v53 = vsel %vm3177_vm12, %v3277_v56, 0.0  ;;  %vm2938_vm15 = vmand %vm2890_vm14, %vm2842_vm13  ;;  %v2078_v4 = vshll.u32 %v2075_v22, 16  ;;  %v2061_v0 = vadd.s32 %v2060_v48, %v2050_v59  ;;  %v2077_v9 = vmul.u32 43690, %v2072_v63  ;;  %v9551_v56 = vld [vmem:[%s11104_s9 + $0xa4] sm:$0xff] }
 0x1a5   : > { %v9750_v58 = vpack.c.bf16 %v3421_v53, %v3420_v50  ;;  %v12103_v54 = vadd.f32 %v11881_v43, %v1353_v13  ;;  %v752_v15 = vadd.f32 %v751_v45, %v11311_v29  ;;  %v2080_v24 = vshll.u32 %v2076_v10, 16 }
 0x1a6   : > { %v3034_v41 = vsel %vm2938_vm15, %v2986_v37, %v2036_v49  ;;  %v2062_v62 = vadd.s32 %v2061_v0, %v2052_v32  ;;  %vm2082_vm0 = vc.u32 %v2074_v8, %v2078_v4  ;;  %v2084_v42 = vadd.s32 %v2078_v4, %v2074_v8 }
 0x1a7   : > { %10231 = vst [vmem:[#allocation2 + $0x58] sm:$0xff] %v9750_v58   ;;  %v2079_v3 = vshrl.u32 %v2075_v22, 16  ;;  %v2083_v17 = vsel %vm2082_vm0, 1, %v13923_v61  ;;  %v3842_v50 = vshrl.u32 %v9750_v58, 16  ;;  %v3845_v29 = vshll.u32 %v9750_v58, 16  ;;  %v12110_v45 = vpop.f32.mrf.mxu0 }
 0x1a8   : > { %v2063_v59 = vshrl.u32 %v2062_v62, 4  ;;  %v2085_v48 = vadd.s32 %v2083_v17, %v2077_v9  ;;  %vm2086_vm2 = vc.u32 %v2084_v42, %v2080_v24  ;;  %v2081_v49 = vshrl.u32 %v2076_v10, 16  ;;  %v10885_v17 = vld [vmem:[%s11104_s9 + $0x98] sm:$0xff] }
 0x1a9   : > { %v1136_v2 = vpop.f32.mrf.mxu2  ;;  %v2087_v32 = vsel %vm2086_vm2, 1, %v13923_v61  ;;  %v3844_v8 = vrot.slane %v3842_v50, 3  ;;  %v3847_v22 = vrot.slane %v3845_v29, 4  ;;  %v12114_v4 = vadd.s32 184, %v11253_v11 }
 0x1aa   : > { %v1354_v28 = vadd.f32 %v1136_v2, %v752_v15  ;;  %v2064_v37 = vmul.u32 24, %v2063_v59  ;;  %v2089_v53 = vadd.s32 %v2087_v32, %v2085_v48  ;;  %vm3082_vm3 = vcmp.ge.s32.totalorder %v3034_v41, 1 }
 0x1ab   : > { %v12108_v63 = vpop.f32.mrf.mxu3  ;;  %v754_v13 = vpop.f32.mrf.mxu1  ;;  %v3278_v62 = vmax.f32 %v12103_v54, 0.0  ;;  %v12123_v9 = vor.u32 %v3847_v22, %v3844_v8  ;;  %v2100_v15 = vand.u32 65535, %v12114_v4  ;;  %vm3130_vm5 = vcmp.le.s32.totalorder %v3034_v41, 16 }
 0x1ac   : > { %13987 = vst [vmem:[#allocation35_spill] sm:$0xff] %v12108_v63  ;;  %v3231_v0 = vadd.f32 %v11881_v43, %v1354_v28  ;;  %v2065_v10 = vsub.s32 %v12043_v31, %v2064_v37  ;;  %v2090_v58 = vadd.s32 %v2089_v53, %v2079_v3  ;;  %v755_v24 = vadd.f32 %v754_v13, %v11326_v23  ;;  %vm12135_vm9 = vmand %vm3082_vm3, %vm3130_vm5 }
 0x1ad   : > { %v2101_v54 = vshrl.u32 %v12114_v4, 16  ;;  %v12129_v2 = vadd.s32 192, %v11253_v11  ;;  %v3849_v50 = vsel %vm3742_vm6, %v12066_v6, %v12123_v9  ;;  %v2104_v59 = vmul.u32 43690, %v2100_v15 }
 0x1ae   : > { %8767 = vmatmul.msk.bf16.gmra.mxu1 %vm452_vm1, %v10885_v17  ;;  %8895 = vmatmul.msk.bf16.gmra.mxu2 %vm452_vm1, %v9551_v56  ;;  %vm2843_vm7 = vcmp.ne.s32.totalorder %v2065_v10, 0  ;;  %vm2891_vm8 = vcmp.lt.s32.totalorder %v2065_v10, 0  ;;  %v2987_v42 = vadd.s32 24, %v2065_v10  ;;  %v2091_v31 = vadd.s32 %v2090_v58, %v2081_v49 }
 0x1af   : > { %vm2939_vm4 = vmand %vm2891_vm8, %vm2843_vm7  ;;  %4097 = vmatmul.bf16.gmra.mxu0 %v3849_v50  ;;  %v2103_v32 = vmul.u32 43691, %v2100_v15  ;;  %v2105_v8 = vmul.u32 43691, %v2101_v54  ;;  %v2129_v49 = vand.u32 65535, %v12129_v2  ;;  %v2130_v37 = vshrl.u32 %v12129_v2, 16  ;;  %v12148_v58 = vpop.f32.mrf.mxu0 }
 0x1b0   : > { %8919 = vmatmul.msk.bf16.gmra.mxu3 %vm452_vm1, %v9551_v56  ;;  %v3279_v56 = vmax.f32 %v3231_v0, 0.0  ;;  %v3035_v13 = vsel %vm2939_vm4, %v2987_v42, %v2065_v10  ;;  %v2092_v48 = vshrl.u32 %v2091_v31, 4  ;;  %v2106_v41 = vmul.u32 43690, %v2101_v54 }
 0x1b1   : > { %v1139_v28 = vpop.f32.mrf.mxu2  ;;  %vm3083_vm10 = vcmp.ge.s32.totalorder %v3035_v13, 1  ;;  %vm3131_vm11 = vcmp.le.s32.totalorder %v3035_v13, 16  ;;  %v2107_v22 = vshll.u32 %v2104_v59, 16  ;;  %v3422_v0 = vsel %vm12135_vm9, %v3278_v62, 0.0 }
 0x1b2   : > { %v1355_v3 = vadd.f32 %v1139_v28, %v755_v24  ;;  %vm3179_vm12 = vmand %vm3083_vm10, %vm3131_vm11  ;;  %v2093_v6 = vmul.u32 24, %v2092_v48  ;;  %v2109_v15 = vshll.u32 %v2105_v8, 16  ;;  %v2132_v54 = vmul.u32 43691, %v2129_v49 }
 0x1b3   : > { %v756_v29 = vpop.f32.mrf.mxu1  ;;  %v12141_v53 = vpop.f32.mrf.mxu3  ;;  %v3423_v17 = vsel %vm3179_vm12, %v3279_v56, 0.0  ;;  %vm2111_vm13 = vc.u32 %v2103_v32, %v2107_v22  ;;  %v2113_v28 = vadd.s32 %v2107_v22, %v2103_v32  ;;  %v2133_v50 = vmul.u32 43690, %v2129_v49 }
 0x1b4   : > { %13990 = vst [vmem:[#allocation36_spill] sm:$0xff] %v12141_v53  ;;  %v12146_v10 = vadd.f32 %v11881_v43, %v1355_v3  ;;  %v9755_v24 = vpack.c.bf16 %v3423_v17, %v3422_v0  ;;  %v2094_v42 = vsub.s32 %v12073_v33, %v2093_v6  ;;  %v2112_v31 = vsel %vm2111_vm13, 1, %v13923_v61  ;;  %v9552_v33 = vld [vmem:[%s11104_s9 + $0xac] sm:$0xff] }
 0x1b5   : > { %v12152_v13 = vmul.u32 43691, %v2130_v37  ;;  %v2114_v3 = vadd.s32 %v2112_v31, %v2106_v41  ;;  %v757_v23 = vadd.f32 %v756_v29, %v11354_v14  ;;  %v2108_v48 = vshrl.u32 %v2104_v59, 16 }
 0x1b6   : > { %10232 = vst [vmem:[#allocation2 + $0x60] sm:$0xff] %v9755_v24   ;;  %vm2844_vm14 = vcmp.ne.s32.totalorder %v2094_v42, 0  ;;  %vm2892_vm15 = vcmp.lt.s32.totalorder %v2094_v42, 0  ;;  %v2988_v62 = vadd.s32 24, %v2094_v42  ;;  %vm2115_vm2 = vc.u32 %v2113_v28, %v2109_v15 }
 0x1b7   : > { %vm2940_vm0 = vmand %vm2892_vm15, %vm2844_vm14  ;;  %v2136_v6 = vshll.u32 %v2133_v50, 16  ;;  %v2116_v22 = vsel %vm2115_vm2, 1, %v13923_v61  ;;  %v2135_v0 = vmul.u32 43690, %v2130_v37  ;;  %v2138_v17 = vshll.u32 %v12152_v13, 16 }
 0x1b8   : > { %v3036_v32 = vsel %vm2940_vm0, %v2988_v62, %v2094_v42  ;;  %v3280_v63 = vmax.f32 %v12146_v10, 0.0  ;;  %v2110_v53 = vshrl.u32 %v2105_v8, 16  ;;  %v2118_v25 = vadd.s32 %v2116_v22, %v2114_v3  ;;  %v10886_v42 = vld [vmem:[%s11104_s9 + $0xa0] sm:$0xff]  ;;  %v9601_v3 = vld [vmem:[#allocation3 + $0x98] sm:$0xff] }
 0x1b9   : > { %v1141_v56 = vpop.f32.mrf.mxu2  ;;  %v12160_v41 = vadd.s32 200, %v11253_v11  ;;  %v2137_v59 = vshrl.u32 %v2133_v50, 16  ;;  %vm2140_vm3 = vc.u32 %v2132_v54, %v2136_v6  ;;  %v2142_v29 = vadd.s32 %v2136_v6, %v2132_v54  ;;  %v12169_v54 = vpop.f32.mrf.mxu0  ;;  %4968 = vmatpush.bf16.msra.mxu2 %v9601_v3 }
 0x1ba   : > { %v1356_v14 = vadd.f32 %v1141_v56, %v757_v23  ;;  %vm3084_vm5 = vcmp.ge.s32.totalorder %v3036_v32, 1  ;;  %vm3132_vm7 = vcmp.le.s32.totalorder %v3036_v32, 16  ;;  %v2119_v15 = vadd.s32 %v2118_v25, %v2108_v48  ;;  %v9609_v23 = vld [vmem:[#allocation3 + $0xd8] sm:$0xff] }
 0x1bb   : > { %v759_v49 = vpop.f32.mrf.mxu1  ;;  %v2141_v37 = vsel %vm2140_vm3, 1, %v13923_v61  ;;  %v12166_v10 = vpop.f32.mrf.mxu3  ;;  %vm2144_vm8 = vc.u32 %v2142_v29, %v2138_v17  ;;  %v3851_v28 = vshrl.u32 %v9755_v24, 16  ;;  %v3854_v31 = vshll.u32 %v9755_v24, 16  ;;  %v9569_v48 = vld [vmem:[#allocation3 + $0x58] sm:$0xff]  ;;  %5630 = vmatpush.bf16.msra.mxu3 %v9609_v23  ;;  %vm3180_vm4 = vmand %vm3084_vm5, %vm3132_vm7 }
 0x1bc   : > { %13991 = vst [vmem:[#allocation37_spill] sm:$0xff] %v12166_v10  ;;  %v2143_v8 = vadd.s32 %v2141_v37, %v2135_v0  ;;  %v2120_v50 = vadd.s32 %v2119_v15, %v2110_v53  ;;  %v2139_v25 = vshrl.u32 %v12152_v13, 16  ;;  %v2145_v62 = vsel %vm2144_vm8, 1, %v13923_v61  ;;  %4333 = vmatpush.bf16.msra.mxu1 %v9569_v48  ;;  %v9617_v48 = vld [vmem:[#allocation3 + $0x118] sm:$0xff] }
 0x1bd   : > { %v2158_v56 = vand.u32 65535, %v12160_v41  ;;  %v2159_v0 = vshrl.u32 %v12160_v41, 16  ;;  %v3233_v53 = vadd.f32 %v11881_v43, %v1356_v14  ;;  %5920 = vmatpush.bf16.msra.mxu0 %v9617_v48 }
 0x1be   : > { %8768 = vmatmul.msk.bf16.gmra.mxu1 %vm452_vm1, %v10886_v42  ;;  %8896 = vmatmul.msk.bf16.gmra.mxu2 %vm452_vm1, %v9552_v33  ;;  %v2147_v22 = vadd.s32 %v2145_v62, %v2143_v8  ;;  %v3853_v42 = vrot.slane %v3851_v28, 3  ;;  %v2121_v17 = vshrl.u32 %v2120_v50, 4  ;;  %v12185_v28 = vadd.s32 208, %v11253_v11 }
 0x1bf   : > { %v2161_v24 = vmul.u32 43691, %v2158_v56  ;;  %v12176_v29 = vmul.u32 43690, %v2158_v56  ;;  %v12182_v8 = vmul.u32 43691, %v2159_v0  ;;  %v2164_v43 = vmul.u32 43690, %v2159_v0 }
 0x1c0   : > { %8920 = vmatmul.msk.bf16.gmra.mxu3 %vm452_vm1, %v9552_v33  ;;  %v3856_v33 = vrot.slane %v3854_v31, 4  ;;  %v2148_v13 = vadd.s32 %v2147_v22, %v2137_v59  ;;  %v2122_v31 = vmul.u32 24, %v2121_v17  ;;  %v760_v50 = vadd.f32 %v759_v49, %v11203_v47 }
 0x1c1   : > { %v1144_v6 = vpop.f32.mrf.mxu2  ;;  %v2165_v14 = vshll.u32 %v12176_v29, 16  ;;  %v2167_v59 = vshll.u32 %v12182_v8, 16  ;;  %v3424_v56 = vsel %vm3180_vm4, %v3280_v63, 0.0  ;;  %v3281_v23 = vmax.f32 %v3233_v53, 0.0  ;;  %5921 = vmatpush.bf16.msra.mxu0 %v9616_v27 }
 0x1c2   : > { %v12180_v15 = vor.u32 %v3856_v33, %v3853_v42  ;;  %v2149_v62 = vadd.s32 %v2148_v13, %v2139_v25  ;;  %v2123_v3 = vsub.s32 %v12114_v4, %v2122_v31  ;;  %v2187_v47 = vand.u32 65535, %v12185_v28  ;;  %v12200_v13 = vpop.f32.mrf.mxu0 }
 0x1c3   : > { %v761_v37 = vpop.f32.mrf.mxu1  ;;  %vm2169_vm9 = vc.u32 %v2161_v24, %v2165_v14  ;;  %v2171_v33 = vadd.s32 %v2165_v14, %v2161_v24  ;;  %v1357_v63 = vadd.f32 %v1144_v6, %v760_v50  ;;  %v12196_v4 = vpop.f32.mrf.mxu3  ;;  %v2188_v17 = vshrl.u32 %v12185_v28, 16 }
 0x1c4   : > { %v3858_v32 = vsel %vm3742_vm6, %v12123_v9, %v12180_v15  ;;  %v2150_v22 = vshrl.u32 %v2149_v62, 4  ;;  %v2170_v42 = vsel %vm2169_vm9, 1, %v13923_v61  ;;  %vm2845_vm10 = vcmp.ne.s32.totalorder %v2123_v3, 0  ;;  %13992 = vst [vmem:[#allocation38_spill] sm:$0xff] %v12196_v4 }
 0x1c5   : > { %4102 = vmatmul.bf16.gmra.mxu0 %v3858_v32  ;;  %vm2893_vm11 = vcmp.lt.s32.totalorder %v2123_v3, 0  ;;  %v2989_v49 = vadd.s32 24, %v2123_v3  ;;  %v2172_v9 = vadd.s32 %v2170_v42, %v2164_v43  ;;  %vm2173_vm13 = vc.u32 %v2171_v33, %v2167_v59  ;;  %v9553_v43 = vld [vmem:[%s11104_s9 + $0xb4] sm:$0xff]  ;;  %v10887_v33 = vld [vmem:[%s11104_s9 + $0xa8] sm:$0xff] }
 0x1c6   : > { %vm2941_vm12 = vmand %vm2893_vm11, %vm2845_vm10  ;;  %v2151_v25 = vmul.u32 24, %v2150_v22  ;;  %v762_v24 = vadd.f32 %v761_v37, %v11209_v51  ;;  %v2166_v31 = vshrl.u32 %v12176_v29, 16  ;;  %v2174_v14 = vsel %vm2173_vm13, 1, %v13923_v61 }
 0x1c7   : > { %v3037_v53 = vsel %vm2941_vm12, %v2989_v49, %v2123_v3  ;;  %v2176_v50 = vadd.s32 %v2174_v14, %v2172_v9  ;;  %v2168_v62 = vshrl.u32 %v12182_v8, 16  ;;  %v2190_v32 = vmul.u32 43691, %v2187_v47  ;;  %v12214_v49 = vld [vmem:[%s13902_s3] ss:$0 sm:$0xff] }
 0x1c8   : > { %vm3085_vm14 = vcmp.ge.s32.totalorder %v3037_v53, 1  ;;  %vm3133_vm15 = vcmp.le.s32.totalorder %v3037_v53, 16  ;;  %v2152_v6 = vsub.s32 %v12129_v2, %v2151_v25  ;;  %v2191_v59 = vmul.u32 43690, %v2187_v47 }
 0x1c9   : > { %v1146_v0 = vpop.f32.mrf.mxu2  ;;  %vm3181_vm0 = vmand %vm3085_vm14, %vm3133_vm15  ;;  %v2192_v3 = vmul.u32 43691, %v2188_v17  ;;  %v2177_v42 = vadd.s32 %v2176_v50, %v2166_v31  ;;  %v2193_v2 = vmul.u32 43690, %v2188_v17 }
 0x1ca   : > { %v3425_v51 = vsel %vm3181_vm0, %v3281_v23, 0.0  ;;  %vm2846_vm2 = vcmp.ne.s32.totalorder %v2152_v6, 0  ;;  %vm2894_vm3 = vcmp.lt.s32.totalorder %v2152_v6, 0  ;;  %v2990_v37 = vadd.s32 24, %v2152_v6 }
 0x1cb   : > { %v764_v29 = vpop.f32.mrf.mxu1  ;;  %v9760_v48 = vpack.c.bf16 %v3425_v51, %v3424_v56  ;;  %vm2942_vm5 = vmand %vm2894_vm3, %vm2846_vm2  ;;  %v1358_v22 = vadd.f32 %v1146_v0, %v762_v24  ;;  %v2194_v8 = vshll.u32 %v2191_v59, 16  ;;  %v2196_v47 = vshll.u32 %v2192_v3, 16 }
 0x1cc   : > { %v3038_v23 = vsel %vm2942_vm5, %v2990_v37, %v2152_v6  ;;  %v3234_v56 = vadd.f32 %v12214_v49, %v1357_v63  ;;  %v2178_v9 = vadd.s32 %v2177_v42, %v2168_v62  ;;  %v2195_v14 = vshrl.u32 %v2191_v59, 16  ;;  %v12219_v6 = vpop.f32.mrf.mxu3  ;;  %v12221_v62 = vpop.f32.mrf.mxu0 }
 0x1cd   : > { %10233 = vst [vmem:[#allocation2 + $0x68] sm:$0xff] %v9760_v48   ;;  %vm2198_vm7 = vc.u32 %v2190_v32, %v2194_v8  ;;  %v2200_v0 = vadd.s32 %v2194_v8, %v2190_v32  ;;  %v3860_v53 = vshrl.u32 %v9760_v48, 16  ;;  %v3863_v24 = vshll.u32 %v9760_v48, 16 }
 0x1ce   : > { %8769 = vmatmul.msk.bf16.gmra.mxu1 %vm452_vm1, %v10887_v33  ;;  %8897 = vmatmul.msk.bf16.gmra.mxu2 %vm452_vm1, %v9553_v43  ;;  %v2179_v31 = vshrl.u32 %v2178_v9, 4  ;;  %v3235_v17 = vadd.f32 %v12214_v49, %v1358_v22  ;;  %13993 = vst [vmem:[#allocation39_spill] sm:$0xff] %v12219_v6  ;;  %vm3086_vm4 = vcmp.ge.s32.totalorder %v3038_v23, 1  ;;  %vm3134_vm9 = vcmp.le.s32.totalorder %v3038_v23, 16 }
 0x1cf   : > { %vm2202_vm8 = vc.u32 %v2200_v0, %v2196_v47  ;;  %v3862_v51 = vrot.slane %v3860_v53, 3  ;;  %v3865_v37 = vrot.slane %v3863_v24, 4  ;;  %v2197_v48 = vshrl.u32 %v2192_v3, 16  ;;  %vm12231_vm10 = vmand %vm3086_vm4, %vm3134_vm9 }
 0x1d0   : > { %8921 = vmatmul.msk.bf16.gmra.mxu3 %vm452_vm1, %v9553_v43  ;;  %v2199_v43 = vsel %vm2198_vm7, 1, %v13923_v61  ;;  %v2180_v63 = vmul.u32 24, %v2179_v31  ;;  %v2203_v32 = vsel %vm2202_vm8, 1, %v13923_v61  ;;  %v12227_v59 = vadd.s32 216, %v11253_v11 }
 0x1d1   : > { %v1149_v25 = vpop.f32.mrf.mxu2  ;;  %v2201_v50 = vadd.s32 %v2199_v43, %v2193_v2  ;;  %v12224_v33 = vor.u32 %v3865_v37, %v3862_v51  ;;  %v3282_v22 = vmax.f32 %v3234_v56, 0.0  ;;  %v3283_v8 = vmax.f32 %v3235_v17, 0.0  ;;  %v9554_v37 = vld [vmem:[%s11104_s9 + $0xbc] sm:$0xff] }
 0x1d2   : > { %v2181_v2 = vsub.s32 %v12160_v41, %v2180_v63  ;;  %v765_v47 = vadd.f32 %v764_v29, %v11224_v57  ;;  %v2216_v53 = vand.u32 65535, %v12227_v59  ;;  %v2217_v24 = vshrl.u32 %v12227_v59, 16 }
 0x1d3   : > { %v2205_v42 = vadd.s32 %v2203_v32, %v2201_v50  ;;  %v3867_v3 = vsel %vm3742_vm6, %v12180_v15, %v12224_v33  ;;  %v766_v0 = vpop.f32.mrf.mxu1  ;;  %v12241_v57 = vadd.s32 224, %v11253_v11  ;;  %v3426_v15 = vsel %vm12231_vm10, %v3282_v22, 0.0 }
 0x1d4   : > { %vm2847_vm11 = vcmp.ne.s32.totalorder %v2181_v2, 0  ;;  %vm2895_vm12 = vcmp.lt.s32.totalorder %v2181_v2, 0  ;;  %v2991_v41 = vadd.s32 24, %v2181_v2  ;;  %v2219_v31 = vmul.u32 43691, %v2216_v53  ;;  %v12248_v23 = vpop.f32.mrf.mxu3 }
 0x1d5   : > { %v2206_v9 = vadd.s32 %v2205_v42, %v2195_v14  ;;  %4107 = vmatmul.bf16.gmra.mxu0 %v3867_v3  ;;  %vm2943_vm13 = vmand %vm2895_vm12, %vm2847_vm11  ;;  %v2220_v17 = vmul.u32 43690, %v2216_v53  ;;  %v2221_v14 = vmul.u32 43691, %v2217_v24  ;;  %v767_v50 = vadd.f32 %v766_v0, %v11230_v60  ;;  %13996 = vst [vmem:[#allocation40_spill] sm:$0xff] %v12248_v23 }
 0x1d6   : > { %v3039_v43 = vsel %vm2943_vm13, %v2991_v41, %v2181_v2  ;;  %v2222_v51 = vmul.u32 43690, %v2217_v24  ;;  %v1359_v42 = vadd.f32 %v1149_v25, %v765_v47  ;;  %v2245_v3 = vand.u32 65535, %v12241_v57  ;;  %v12250_v2 = vpop.f32.mrf.mxu0  ;;  %v10889_v41 = vld [vmem:[%s11104_s9 + $0xb0] sm:$0xff] }
 0x1d7   : > { %v2207_v29 = vadd.s32 %v2206_v9, %v2197_v48  ;;  %vm3087_vm14 = vcmp.ge.s32.totalorder %v3039_v43, 1  ;;  %vm3135_vm15 = vcmp.le.s32.totalorder %v3039_v43, 16  ;;  %v2223_v32 = vshll.u32 %v2220_v17, 16 }
 0x1d8   : > { %vm3183_vm0 = vmand %vm3087_vm14, %vm3135_vm15  ;;  %v2225_v9 = vshll.u32 %v2221_v14, 16  ;;  %v2224_v0 = vshrl.u32 %v2220_v17, 16  ;;  %v2249_v17 = vmul.u32 43690, %v2245_v3 }
 0x1d9   : > { %v1151_v56 = vpop.f32.mrf.mxu2  ;;  %v2208_v63 = vshrl.u32 %v2207_v29, 4  ;;  %v3427_v53 = vsel %vm3183_vm0, %v3283_v8, 0.0  ;;  %vm2227_vm2 = vc.u32 %v2219_v31, %v2223_v32  ;;  %v2229_v22 = vadd.s32 %v2223_v32, %v2219_v31 }
 0x1da   : > { %v1360_v48 = vadd.f32 %v1151_v56, %v767_v50  ;;  %v9765_v60 = vpack.c.bf16 %v3427_v53, %v3426_v15  ;;  %v2228_v24 = vsel %vm2227_vm2, 1, %v13923_v61  ;;  %v2246_v8 = vshrl.u32 %v12241_v57, 16 }
 0x1db   : > { %v2209_v6 = vmul.u32 24, %v2208_v63  ;;  %v2230_v47 = vadd.s32 %v2228_v24, %v2222_v51  ;;  %vm2231_vm3 = vc.u32 %v2229_v22, %v2225_v9  ;;  %v12260_v29 = vadd.f32 %v12214_v49, %v1359_v42  ;;  %v769_v50 = vpop.f32.mrf.mxu1 }
 0x1dc   : > { %10234 = vst [vmem:[#allocation2 + $0x70] sm:$0xff] %v9765_v60   ;;  %v2226_v56 = vshrl.u32 %v2221_v14, 16  ;;  %v2232_v31 = vsel %vm2231_vm3, 1, %v13923_v61  ;;  %v12264_v43 = vadd.f32 %v12214_v49, %v1360_v48  ;;  %v2250_v51 = vmul.u32 43691, %v2246_v8  ;;  %v9608_v48 = vld [vmem:[#allocation3 + $0xd0] sm:$0xff] }
 0x1dd   : > { %v2210_v25 = vsub.s32 %v12185_v28, %v2209_v6  ;;  %v2234_v15 = vadd.s32 %v2232_v31, %v2230_v47  ;;  %v2248_v28 = vmul.u32 43691, %v2245_v3  ;;  %v3869_v6 = vshrl.u32 %v9765_v60, 16  ;;  %5631 = vmatpush.bf16.msra.mxu3 %v9608_v48 }
 0x1de   : > { %8770 = vmatmul.msk.bf16.gmra.mxu1 %vm452_vm1, %v10889_v41  ;;  %8898 = vmatmul.msk.bf16.gmra.mxu2 %vm452_vm1, %v9554_v37  ;;  %v2251_v32 = vmul.u32 43690, %v2246_v8  ;;  %v2254_v14 = vshll.u32 %v2250_v51, 16  ;;  %v12268_v53 = vadd.s32 232, %v11253_v11  ;;  %v770_v24 = vadd.f32 %v769_v50, %v11240_v1  ;;  %v9568_v50 = vld [vmem:[#allocation3 + $0x50] sm:$0xff] }
 0x1df   : > { %vm2848_vm5 = vcmp.ne.s32.totalorder %v2210_v25, 0  ;;  %vm2896_vm7 = vcmp.lt.s32.totalorder %v2210_v25, 0  ;;  %v2235_v63 = vadd.s32 %v2234_v15, %v2224_v0  ;;  %v2992_v9 = vadd.s32 24, %v2210_v25  ;;  %v12273_v15 = vpop.f32.mrf.mxu3  ;;  %4334 = vmatpush.bf16.msra.mxu1 %v9568_v50 }
 0x1e0   : > { %8922 = vmatmul.msk.bf16.gmra.mxu3 %vm452_vm1, %v9554_v37  ;;  %v2252_v37 = vshll.u32 %v2249_v17, 16  ;;  %vm2944_vm8 = vmand %vm2896_vm7, %vm2848_vm5  ;;  %v3871_v0 = vrot.slane %v3869_v6, 3  ;;  %v3872_v8 = vshll.u32 %v9765_v60, 16  ;;  %13997 = vst [vmem:[#allocation41_spill] sm:$0xff] %v12273_v15  ;;  %v2253_v42 = vshrl.u32 %v2249_v17, 16 }
 0x1e1   : > { %v2236_v22 = vadd.s32 %v2235_v63, %v2226_v56  ;;  %v1154_v41 = vpop.f32.mrf.mxu2  ;;  %v3040_v10 = vsel %vm2944_vm8, %v2992_v9, %v2210_v25  ;;  %v12275_v56 = vpop.f32.mrf.mxu0  ;;  %v2274_v1 = vand.u32 65535, %v12268_v53  ;;  %v2255_v60 = vshrl.u32 %v2250_v51, 16 }
 0x1e2   : > { %vm2256_vm4 = vc.u32 %v2248_v28, %v2252_v37  ;;  %v2258_v3 = vadd.s32 %v2252_v37, %v2248_v28  ;;  %v3874_v28 = vrot.slane %v3872_v8, 4  ;;  %v9600_v37 = vld [vmem:[#allocation3 + $0x90] sm:$0xff]  ;;  %v2275_v15 = vshrl.u32 %v12268_v53, 16 }
 0x1e3   : > { %v2257_v47 = vsel %vm2256_vm4, 1, %v13923_v61  ;;  %v2237_v31 = vshrl.u32 %v2236_v22, 4  ;;  %v1361_v17 = vadd.f32 %v1154_v41, %v770_v24  ;;  %v2277_v25 = vmul.u32 43691, %v2274_v1  ;;  %4969 = vmatpush.bf16.msra.mxu2 %v9600_v37  ;;  %v771_v8 = vpop.f32.mrf.mxu1  ;;  %v9567_v41 = vld [vmem:[#allocation3 + $0x48] sm:$0xff] }
 0x1e4   : > { %v2259_v23 = vadd.s32 %v2257_v47, %v2251_v32  ;;  %vm2260_vm9 = vc.u32 %v2258_v3, %v2254_v14  ;;  %v12280_v32 = vor.u32 %v3874_v28, %v3871_v0  ;;  %v12282_v9 = vmul.u32 43690, %v2274_v1  ;;  %v9555_v14 = vld [vmem:[%s11104_s9 + $0xc4] sm:$0xff]  ;;  %v10890_v28 = vld [vmem:[%s11104_s9 + $0xb8] sm:$0xff]  ;;  %4335 = vmatpush.bf16.msra.mxu1 %v9567_v41  ;;  %s8522_s9 = sshll.u32 %s13628_s26, 4  ;;  %s8523_s9 = int_to_ptr.vmem [resolvable:$true] %s8522_s9 }
 0x1e5   : > { %v2261_v63 = vsel %vm2260_vm9, 1, %v13923_v61  ;;  %v2238_v6 = vmul.u32 24, %v2237_v31  ;;  %vm3088_vm10 = vcmp.ge.s32.totalorder %v3040_v10, 1  ;;  %v12286_v4 = vmul.u32 43691, %v2275_v15  ;;  %v9599_v0 = vld [vmem:[#allocation3 + $0x88] sm:$0xff] }
 0x1e6   : > { %v2263_v22 = vadd.s32 %v2261_v63, %v2259_v23  ;;  %vm3136_vm11 = vcmp.le.s32.totalorder %v3040_v10, 16  ;;  %v3876_v23 = vsel %vm3742_vm6, %v12224_v33, %v12280_v32  ;;  %v2280_v51 = vmul.u32 43690, %v2275_v15  ;;  %v9607_v31 = vld [vmem:[#allocation3 + $0xc8] sm:$0xff]  ;;  %v9566_v10 = vld [vmem:[#allocation3 + $0x40] sm:$0xff] }
 0x1e7   : > { %v2239_v3 = vsub.s32 %v12227_v59, %v2238_v6  ;;  %v2281_v24 = vshll.u32 %v12282_v9, 16  ;;  %4112 = vmatmul.bf16.gmra.mxu0 %v3876_v23  ;;  %v12293_v48 = vadd.f32 %v12214_v49, %v1361_v17  ;;  %v2283_v63 = vshll.u32 %v12286_v4, 16  ;;  %vm12301_vm0 = vmand %vm3088_vm10, %vm3136_vm11  ;;  %4970 = vmatpush.bf16.msra.mxu2 %v9599_v0  ;;  %v9598_v17 = vld [vmem:[#allocation3 + $0x80] sm:$0xff] }
 0x1e8   : > { %v2264_v47 = vadd.s32 %v2263_v22, %v2253_v42  ;;  %v2282_v37 = vshrl.u32 %v12282_v9, 16  ;;  %5632 = vmatpush.bf16.msra.mxu3 %v9607_v31  ;;  %v772_v9 = vadd.f32 %v771_v8, %v11246_v5  ;;  %v14002_v41 = vmax.f32 %v12264_v43, 0.0  ;;  %4336 = vmatpush.bf16.msra.mxu1 %v9566_v10 }
 0x1e9   : > { %vm2849_vm12 = vcmp.ne.s32.totalorder %v2239_v3, 0  ;;  %vm2897_vm13 = vcmp.lt.s32.totalorder %v2239_v3, 0  ;;  %v2993_v59 = vadd.s32 24, %v2239_v3  ;;  %vm2285_vm15 = vc.u32 %v2277_v25, %v2281_v24  ;;  %v12321_v31 = vpop.f32.mrf.mxu0 }
 0x1ea   : > { %v2265_v42 = vadd.s32 %v2264_v47, %v2255_v60  ;;  %vm2945_vm14 = vmand %vm2897_vm13, %vm2849_vm12  ;;  %v2287_v33 = vadd.s32 %v2281_v24, %v2277_v25  ;;  %v2286_v6 = vsel %vm2285_vm15, 1, %v13923_v61  ;;  %v1156_v60 = vpop.f32.mrf.mxu2  ;;  %v9606_v25 = vld [vmem:[#allocation3 + $0xc0] sm:$0xff]  ;;  %v12308_v47 = vpop.f32.mrf.mxu3  ;;  %v14001_v24 = vmax.f32 %v12260_v29, 0.0 }
 0x1eb   : > { %v3041_v1 = vsel %vm2945_vm14, %v2993_v59, %v2239_v3  ;;  %v2288_v22 = vadd.s32 %v2286_v6, %v2280_v51  ;;  %14000 = vst [vmem:[#allocation42_spill] sm:$0xff] %v12308_v47  ;;  %v2284_v59 = vshrl.u32 %v12286_v4, 16  ;;  %v1362_v8 = vadd.f32 %v1156_v60, %v772_v9  ;;  %4971 = vmatpush.bf16.msra.mxu2 %v9598_v17 }
 0x1ec   : > { %v2266_v50 = vshrl.u32 %v2265_v42, 4  ;;  %vm3089_vm2 = vcmp.ge.s32.totalorder %v3041_v1, 1  ;;  %vm3137_vm3 = vcmp.le.s32.totalorder %v3041_v1, 16  ;;  %vm2289_vm5 = vc.u32 %v2287_v33, %v2283_v63  ;;  %5633 = vmatpush.bf16.msra.mxu3 %v9606_v25 }
 0x1ed   : > { %vm3185_vm7 = vmand %vm3089_vm2, %vm3137_vm3  ;;  %v2290_v23 = vsel %vm2289_vm5, 1, %v13923_v61  ;;  %v3428_v51 = vsel %vm12301_vm0, %v14001_v24, 0.0  ;;  %v3286_v15 = vmax.f32 %v12293_v48, 0.0  ;;  %vm4695_vm2 = vsmask.f32 7424 }
 0x1ee   : > { %8771 = vmatmul.msk.bf16.gmra.mxu1 %vm452_vm1, %v10890_v28  ;;  %8899 = vmatmul.msk.bf16.gmra.mxu2 %vm452_vm1, %v9555_v14  ;;  %v2267_v3 = vmul.u32 24, %v2266_v50  ;;  %v3429_v0 = vsel %vm3185_vm7, %v14002_v41, 0.0  ;;  %v2292_v42 = vadd.s32 %v2290_v23, %v2288_v22  ;;  %v12326_v28 = vld [vmem:[#allocation2 + $0x8] sm:$0xff]   ;;  %v12332_v50 = vadd.s32 248, %v11253_v11 }
 0x1ef   : > { %v9770_v63 = vpack.c.bf16 %v3429_v0, %v3428_v51 }
 0x1f0   : > { %8923 = vmatmul.msk.bf16.gmra.mxu3 %vm452_vm1, %v9555_v14  ;;  %v12313_v14 = vadd.s32 240, %v11253_v11  ;;  %v2268_v5 = vsub.s32 %v12241_v57, %v2267_v3  ;;  %v2293_v43 = vadd.s32 %v2292_v42, %v2282_v37  ;;  %v774_v57 = vpop.f32.mrf.mxu1  ;;  %v3239_v37 = vadd.f32 %v12214_v49, %v1362_v8 }
 0x1f1   : > { %10235 = vst [vmem:[#allocation2 + $0x78] sm:$0xff] %v9770_v63   ;;  %v3878_v9 = vshrl.u32 %v9770_v63, 16  ;;  %v3881_v23 = vshll.u32 %v9770_v63, 16  ;;  %v775_v25 = vadd.f32 %v774_v57, %v11260_v16  ;;  %v2332_v0 = vand.u32 65535, %v12332_v50 }
 0x1f2   : > { %v2303_v33 = vand.u32 65535, %v12313_v14  ;;  %v2304_v1 = vshrl.u32 %v12313_v14, 16  ;;  %vm2850_vm1 = vcmp.ne.s32.totalorder %v2268_v5, 0  ;;  %vm2898_vm8 = vcmp.lt.s32.totalorder %v2268_v5, 0  ;;  %v1159_v57 = vpop.f32.mrf.mxu2 }
 0x1f3   : > { %v2994_v4 = vadd.s32 24, %v2268_v5  ;;  %vm2946_vm4 = vmand %vm2898_vm8, %vm2850_vm1  ;;  %v2294_v6 = vadd.s32 %v2293_v43, %v2284_v59  ;;  %v12337_v43 = vpop.f32.mrf.mxu3  ;;  %v3880_v63 = vrot.slane %v3878_v9, 3  ;;  %v2333_v29 = vshrl.u32 %v12332_v50, 16 }
 0x1f4   : > { %v2306_v60 = vmul.u32 43691, %v2303_v33  ;;  %v2307_v22 = vmul.u32 43690, %v2303_v33  ;;  %v2308_v10 = vmul.u32 43691, %v2304_v1  ;;  %v2309_v24 = vmul.u32 43690, %v2304_v1  ;;  %14003 = vst [vmem:[#allocation43_spill] sm:$0xff] %v12337_v43  ;;  %v12341_v1 = vpop.f32.mrf.mxu0 }
 0x1f5   : > { %v3042_v3 = vsel %vm2946_vm4, %v2994_v4, %v2268_v5  ;;  %v2295_v17 = vshrl.u32 %v2294_v6, 4  ;;  %v3883_v4 = vrot.slane %v3881_v23, 4  ;;  %v3287_v23 = vmax.f32 %v3239_v37, 0.0 }
 0x1f6   : > { %v2310_v51 = vshll.u32 %v2307_v22, 16  ;;  %vm3090_vm9 = vcmp.ge.s32.totalorder %v3042_v3, 1  ;;  %vm3138_vm10 = vcmp.le.s32.totalorder %v3042_v3, 16  ;;  %v2312_v41 = vshll.u32 %v2308_v10, 16 }
 0x1f7   : > { %v2296_v42 = vmul.u32 24, %v2295_v17  ;;  %v2311_v59 = vshrl.u32 %v2307_v22, 16  ;;  %v2313_v5 = vshrl.u32 %v2308_v10, 16  ;;  %v12345_v17 = vor.u32 %v3883_v4, %v3880_v63  ;;  %vm12349_vm13 = vmand %vm3090_vm9, %vm3138_vm10  ;;  %v9574_v4 = vld [vmem:[#allocation2 + $0x4] sm:$0xff] }
 0x1f8   : > { %vm2314_vm11 = vc.u32 %v2306_v60, %v2310_v51  ;;  %v2316_v33 = vadd.s32 %v2310_v51, %v2306_v60  ;;  %v2335_v60 = vmul.u32 43691, %v2332_v0  ;;  %v2336_v51 = vmul.u32 43690, %v2332_v0 }
 0x1f9   : > { %v2315_v8 = vsel %vm2314_vm11, 1, %v13923_v61  ;;  %v2297_v16 = vsub.s32 %v12268_v53, %v2296_v42  ;;  %v12356_v0 = vadd.f32 %v1159_v57, %v775_v25  ;;  %v3430_v63 = vsel %vm12349_vm13, %v3286_v15, 0.0  ;;  %v10605_v57 = vld [vmem:[#allocation2 + $0xc] sm:$0x8] }
 0x1fa   : > { %v2317_v6 = vadd.s32 %v2315_v8, %v2309_v24  ;;  %vm2318_vm12 = vc.u32 %v2316_v33, %v2312_v41  ;;  %v3885_v24 = vsel %vm3742_vm6, %v12280_v32, %v12345_v17  ;;  %v2337_v41 = vmul.u32 43691, %v2333_v29 }
 0x1fb   : > { %v2319_v22 = vsel %vm2318_vm12, 1, %v13923_v61  ;;  %vm2851_vm14 = vcmp.ne.s32.totalorder %v2297_v16, 0  ;;  %vm2899_vm15 = vcmp.lt.s32.totalorder %v2297_v16, 0  ;;  %v2995_v53 = vadd.s32 24, %v2297_v16  ;;  %4117 = vmatmul.bf16.gmra.mxu0 %v3885_v24  ;;  %v10770_v24 = vld [vmem:[#allocation2 + $0xc] sm:$0xf0]  }
 0x1fc   : > { %v2321_v9 = vadd.s32 %v2319_v22, %v2317_v6  ;;  %vm2947_vm0 = vmand %vm2899_vm15, %vm2851_vm14  ;;  %v2339_v42 = vshll.u32 %v2336_v51, 16  ;;  %v2338_v8 = vmul.u32 43690, %v2333_v29  ;;  %v2341_v37 = vshll.u32 %v2337_v41, 16  ;;  %v12362_v6 = vld [vmem:[#allocation2 + $0xc] sm:$0xff]  ;;  %v10772_v29 = vld [vmem:[#allocation2 + $0x14] sm:$0xff]  }
 0x1fd   : > { %v3043_v33 = vsel %vm2947_vm0, %v2995_v53, %v2297_v16  ;;  %v776_v16 = vpop.f32.mrf.mxu1  ;;  %v2340_v25 = vshrl.u32 %v2336_v51, 16  ;;  %v2342_v53 = vshrl.u32 %v2337_v41, 16  ;;  %v14006_v15 = vunpack.c.l.b16 %v11300_v18  ;;  %v12371_v51 = vpop.f32.mrf.mxu3 }
 0x1fe   : > { %v2322_v3 = vadd.s32 %v2321_v9, %v2311_v59  ;;  %vm3091_vm3 = vcmp.ge.s32.totalorder %v3043_v33, 1  ;;  %vm3139_vm5 = vcmp.le.s32.totalorder %v3043_v33, 16  ;;  %vm2343_vm1 = vc.u32 %v2335_v60, %v2339_v42  ;;  %14008 = vst [vmem:[#allocation44_spill] sm:$0xff] %v12371_v51 }
 0x1ff   : > { %vm3187_vm7 = vmand %vm3091_vm3, %vm3139_vm5  ;;  %v2345_v59 = vadd.s32 %v2339_v42, %v2335_v60  ;;  %v2344_v48 = vsel %vm2343_vm1, 1, %v13923_v61  ;;  %v14007_v10 = vunpack.c.l.b16 %v12326_v28  ;;  %v4699_v41 = vshll.u32 %v9574_v4, 16  ;;  %v12376_v28 = vpop.f32.mrf.mxu0 }
 0x200   : > { %v2323_v32 = vadd.s32 %v2322_v3, %v2313_v5  ;;  %v3431_v22 = vsel %vm3187_vm7, %v3287_v23, 0.0  ;;  %v2346_v5 = vadd.s32 %v2344_v48, %v2338_v8  ;;  %v4697_v23 = vshrl.u32 %v9574_v4, 16  ;;  %v1161_v3 = vpop.f32.mrf.mxu2 }
 0x201   : > { %v4233_v9 = vpack.c.b16 %v14007_v10, %v14006_v15  ;;  %v12369_v33 = vpack.c.bf16 %v3431_v22, %v3430_v63  ;;  %vm2347_vm8 = vc.u32 %v2345_v59, %v2341_v37  ;;  %v4704_v42 = vshll.u32 %v12362_v6, 16 }
 0x202   : > { %v2324_v43 = vshrl.u32 %v2323_v32, 4  ;;  %v2348_v60 = vsel %vm2347_vm8, 1, %v13923_v61  ;;  %v10606_v22 = vor.u32 %v10770_v24, %v10605_v57  ;;  %v5339_v32 = vshrl.u32 %v10772_v29, 16 }
 0x203   : > { %4337 = vmatmul.bf16.vlgmr.msra.gmra.mxu1 %v4233_v9  ;;  %10236 = vst [vmem:[#allocation2 + $0x80] sm:$0xff] %v12369_v33   ;;  %v2350_v63 = vadd.s32 %v2348_v60, %v2346_v5  ;;  %v777_v8 = vadd.f32 %v776_v16, %v11277_v34  ;;  %v4701_v37 = vrot.slane %v4699_v41, 1  ;;  %v12379_v59 = vrot.slane %v4704_v42, 1 }
 0x204   : > { %v2325_v18 = vmul.u32 24, %v2324_v43  ;;  %v5342_v48 = vshll.u32 %v10772_v29, 16  ;;  %v5331_v10 = vshrl.u32 %v10606_v22, 16  ;;  %v5334_v9 = vshll.u32 %v10606_v22, 16 }
 0x205   : > { %v2351_v4 = vadd.s32 %v2350_v63, %v2340_v25  ;;  %v1364_v51 = vadd.f32 %v1161_v3, %v777_v8  ;;  %v4702_v47 = vor.u32 %v4701_v37, %v4697_v23  ;;  %v5341_v43 = vrot.slane %v5339_v32, 3  ;;  %v779_v25 = vpop.f32.mrf.mxu1  ;;  %v12395_v3 = vpop.f32.mrf.mxu3 }
 0x206   : > { %v2326_v15 = vsub.s32 %v12313_v14, %v2325_v18  ;;  %v5344_v38 = vrot.slane %v5342_v48, 4  ;;  %v5333_v16 = vrot.slane %v5331_v10, 3  ;;  %v5336_v29 = vrot.slane %v5334_v9, 4  ;;  %14009 = vst [vmem:[#allocation45_spill] sm:$0xff] %v12395_v3 }
 0x207   : > { %v2352_v24 = vadd.s32 %v2351_v4, %v2342_v53  ;;  %v4707_v34 = vsel %vm4695_vm2, %v4702_v47, %v12379_v59  ;;  %v12387_v60 = vadd.s32 256, %v11253_v11  ;;  %v3240_v23 = vadd.f32 %v12214_v49, %v12356_v0  ;;  %v12401_v8 = vpop.f32.mrf.mxu0 }
 0x208   : > { %vm2852_vm4 = vcmp.ne.s32.totalorder %v2326_v15, 0  ;;  %vm2900_vm9 = vcmp.lt.s32.totalorder %v2326_v15, 0  ;;  %v2996_v57 = vadd.s32 24, %v2326_v15  ;;  %v12384_v5 = vor.u32 %v5344_v38, %v5341_v43  ;;  %4972 = vmatmul.bf16.vlgmr.msra.gmra.mxu2 %v4707_v34  ;;  %v1164_v37 = vpop.f32.mrf.mxu2  ;;  %v10561_v34 = vld [vmem:[#allocation2 + $0xc] sm:$0xff]  }
 0x209   : > { %vm2948_vm10 = vmand %vm2900_vm9, %vm2852_vm4  ;;  %v2353_v14 = vshrl.u32 %v2352_v24, 4  ;;  %v5337_v41 = vor.u32 %v5336_v29, %v5333_v16  ;;  %v3887_v53 = vshrl.u32 %v12369_v33, 16  ;;  %v2361_v47 = vand.u32 65535, %v12387_v60 }
 0x20a   : > { %v3044_v42 = vsel %vm2948_vm10, %v2996_v57, %v2326_v15  ;;  %v2362_v38 = vshrl.u32 %v12387_v60, 16  ;;  %v3241_v27 = vadd.f32 %v12214_v49, %v1364_v51  ;;  %v3890_v32 = vshll.u32 %v12369_v33, 16 }
 0x20b   : > { %v2354_v18 = vmul.u32 24, %v2353_v14  ;;  %v5346_v63 = vsel %vm3742_vm6, %v5337_v41, %v12384_v5  ;;  %v3889_v22 = vrot.slane %v3887_v53, 3  ;;  %v2364_v48 = vmul.u32 43691, %v2361_v47 }
 0x20c   : > { %5634 = vmatmul.bf16.vlgmr.msra.gmra.mxu3 %v5346_v63  ;;  %v2365_v15 = vmul.u32 43690, %v2361_v47  ;;  %v2366_v4 = vmul.u32 43691, %v2362_v38  ;;  %vm3092_vm11 = vcmp.ge.s32.totalorder %v3044_v42, 1  ;;  %vm3140_vm12 = vcmp.le.s32.totalorder %v3044_v42, 16  ;;  %v12414_v42 = vld [vmem:[#allocation2 + $0x14] sm:$0xff] }
 0x20d   : > { %v2355_v0 = vsub.s32 %v12332_v50, %v2354_v18  ;;  %v2367_v51 = vmul.u32 43690, %v2362_v38  ;;  %v3892_v10 = vrot.slane %v3890_v32, 4  ;;  %v3288_v57 = vmax.f32 %v3240_v23, 0.0  ;;  %vm12405_vm0 = vmand %vm3092_vm11, %vm3140_vm12  ;;  %v10774_v18 = vld [vmem:[#allocation2 + $0x1c] sm:$0xff]  }
 0x20e   : > { %v2368_v43 = vshll.u32 %v2365_v15, 16  ;;  %v3289_v33 = vmax.f32 %v3241_v27, 0.0  ;;  %v2370_v24 = vshll.u32 %v2366_v4, 16  ;;  %v780_v14 = vadd.f32 %v779_v25, %v11304_v21  ;;  %v781_v21 = vpop.f32.mrf.mxu1 }
 0x20f   : > { %vm2853_vm13 = vcmp.ne.s32.totalorder %v2355_v0, 0  ;;  %vm2901_vm14 = vcmp.lt.s32.totalorder %v2355_v0, 0  ;;  %v2997_v9 = vadd.s32 24, %v2355_v0  ;;  %v12403_v50 = vor.u32 %v3892_v10, %v3889_v22  ;;  %v12426_v10 = vpop.f32.mrf.mxu3 }
 0x210   : > { %vm2949_vm15 = vmand %vm2901_vm14, %vm2853_vm13  ;;  %vm2372_vm3 = vc.u32 %v2364_v48, %v2368_v43  ;;  %v2374_v41 = vadd.s32 %v2368_v43, %v2364_v48  ;;  %v2369_v47 = vshrl.u32 %v2365_v15, 16  ;;  %v12417_v25 = vadd.s32 264, %v11253_v11  ;;  %14012 = vst [vmem:[#allocation46_spill] sm:$0xff] %v12426_v10 }
 0x211   : > { %v3045_v29 = vsel %vm2949_vm15, %v2997_v9, %v2355_v0  ;;  %v2373_v53 = vsel %vm2372_vm3, 1, %v13923_v61  ;;  %v3894_v23 = vsel %vm3742_vm6, %v12345_v17, %v12403_v50  ;;  %v3432_v27 = vsel %vm12405_vm0, %v3288_v57, 0.0  ;;  %v12431_v57 = vpop.f32.mrf.mxu0 }
 0x212   : > { %vm3093_vm5 = vcmp.ge.s32.totalorder %v3045_v29, 1  ;;  %vm3141_vm7 = vcmp.le.s32.totalorder %v3045_v29, 16  ;;  %v2375_v38 = vadd.s32 %v2373_v53, %v2367_v51  ;;  %vm2376_vm8 = vc.u32 %v2374_v41, %v2370_v24  ;;  %4122 = vmatmul.bf16.gmra.mxu0 %v3894_v23 }
 0x213   : > { %4342 = vmatmul.bf16.gmra.mxu1 %v10561_v34  ;;  %vm3189_vm1 = vmand %vm3093_vm5, %vm3141_vm7  ;;  %v2371_v22 = vshrl.u32 %v2366_v4, 16  ;;  %v2377_v17 = vsel %vm2376_vm8, 1, %v13923_v61  ;;  %v2390_v48 = vand.u32 65535, %v12417_v25  ;;  %v2391_v15 = vshrl.u32 %v12417_v25, 16 }
 0x214   : > { %v3433_v63 = vsel %vm3189_vm1, %v3289_v33, 0.0  ;;  %v2379_v0 = vadd.s32 %v2377_v17, %v2375_v38  ;;  %v1365_v51 = vadd.f32 %v1164_v37, %v780_v14  ;;  %v4708_v9 = vshrl.u32 %v12362_v6, 16  ;;  %v1166_v33 = vpop.f32.mrf.mxu2 }
 0x215   : > { %v12422_v32 = vpack.c.bf16 %v3433_v63, %v3432_v27  ;;  %v4712_v43 = vshll.u32 %v12414_v42, 16  ;;  %v5348_v24 = vshrl.u32 %v10774_v18, 16  ;;  %v2393_v34 = vmul.u32 43691, %v2390_v48 }
 0x216   : > { %v2380_v4 = vadd.s32 %v2379_v0, %v2369_v47  ;;  %v2394_v16 = vmul.u32 43690, %v2390_v48  ;;  %v2395_v29 = vmul.u32 43691, %v2391_v15  ;;  %v4710_v41 = vor.u32 %v4708_v9, %v12379_v59 }
 0x217   : > { %10237 = vst [vmem:[#allocation2 + $0x88] sm:$0xff] %v12422_v32   ;;  %v12434_v53 = vrot.slane %v4712_v43, 1  ;;  %v5350_v37 = vrot.slane %v5348_v24, 3  ;;  %v5351_v14 = vshll.u32 %v10774_v18, 16  ;;  %v2396_v6 = vmul.u32 43690, %v2391_v15  ;;  %v784_v24 = vpop.f32.mrf.mxu1 }
 0x218   : > { %v2381_v23 = vadd.s32 %v2380_v4, %v2371_v22  ;;  %v2397_v38 = vshll.u32 %v2394_v16, 16  ;;  %v2399_v27 = vshll.u32 %v2395_v29, 16  ;;  %v782_v63 = vadd.f32 %v781_v21, %v11318_v7 }
 0x219   : > { %v4715_v47 = vsel %vm4695_vm2, %v4710_v41, %v12434_v53  ;;  %v5353_v17 = vrot.slane %v5351_v14, 4  ;;  %v12440_v48 = vadd.f32 %v12214_v49, %v1365_v51  ;;  %v12446_v15 = vadd.s32 272, %v11253_v11 }
 0x21a   : > { %v2382_v0 = vshrl.u32 %v2381_v23, 4  ;;  %vm2401_vm4 = vc.u32 %v2393_v34, %v2397_v38  ;;  %v2403_v59 = vadd.s32 %v2397_v38, %v2393_v34  ;;  %4977 = vmatmul.bf16.gmra.mxu2 %v4715_v47  ;;  %v1366_v9 = vadd.f32 %v1166_v33, %v782_v63 }
 0x21b   : > { %v2402_v18 = vsel %vm2401_vm4, 1, %v13923_v61  ;;  %v12443_v22 = vor.u32 %v5353_v17, %v5350_v37  ;;  %v2398_v21 = vshrl.u32 %v2394_v16, 16  ;;  %v2419_v33 = vand.u32 65535, %v12446_v15 }
 0x21c   : > { %v2383_v7 = vmul.u32 24, %v2382_v0  ;;  %v2404_v43 = vadd.s32 %v2402_v18, %v2396_v6  ;;  %vm2405_vm9 = vc.u32 %v2403_v59, %v2399_v27  ;;  %v2420_v34 = vshrl.u32 %v12446_v15, 16  ;;  %v12459_v6 = vpop.f32.mrf.mxu3  ;;  %v12461_v0 = vpop.f32.mrf.mxu0 }
 0x21d   : > { %v2406_v4 = vsel %vm2405_vm9, 1, %v13923_v61  ;;  %v5355_v51 = vsel %vm3742_vm6, %v12384_v5, %v12443_v22  ;;  %v2400_v37 = vshrl.u32 %v2395_v29, 16  ;;  %v3896_v16 = vshrl.u32 %v12422_v32, 16  ;;  %14013 = vst [vmem:[#allocation47_spill] sm:$0xff] %v12459_v6  ;;  %v10563_v5 = vld [vmem:[#allocation2 + $0x14] sm:$0xff]  }
 0x21e   : > { %v2384_v41 = vsub.s32 %v12387_v60, %v2383_v7  ;;  %v2408_v14 = vadd.s32 %v2406_v4, %v2404_v43  ;;  %5639 = vmatmul.bf16.gmra.mxu3 %v5355_v51  ;;  %v12457_v23 = vadd.f32 %v12214_v49, %v1366_v9  ;;  %v2422_v38 = vmul.u32 43691, %v2419_v33  ;;  %v1169_v60 = vpop.f32.mrf.mxu2 }
 0x21f   : > { %v2423_v27 = vmul.u32 43690, %v2419_v33  ;;  %v2424_v63 = vmul.u32 43691, %v2420_v34  ;;  %v3290_v29 = vmax.f32 %v12440_v48, 0.0  ;;  %v2425_v59 = vmul.u32 43690, %v2420_v34 }
 0x220   : > { %vm2854_vm10 = vcmp.ne.s32.totalorder %v2384_v41, 0  ;;  %vm2902_vm11 = vcmp.lt.s32.totalorder %v2384_v41, 0  ;;  %v2998_v47 = vadd.s32 24, %v2384_v41  ;;  %v2409_v17 = vadd.s32 %v2408_v14, %v2398_v21  ;;  %v12467_v14 = vld [vmem:[#allocation2 + $0x1c] sm:$0xff] }
 0x221   : > { %vm2950_vm12 = vmand %vm2902_vm11, %vm2854_vm10  ;;  %v2426_v18 = vshll.u32 %v2423_v27, 16  ;;  %v2428_v49 = vshll.u32 %v2424_v63, 16  ;;  %v3898_v43 = vrot.slane %v3896_v16, 3  ;;  %v3899_v4 = vshll.u32 %v12422_v32, 16 }
 0x222   : > { %v3046_v9 = vsel %vm2950_vm12, %v2998_v47, %v2384_v41  ;;  %v2410_v7 = vadd.s32 %v2409_v17, %v2400_v37  ;;  %v3291_v51 = vmax.f32 %v12457_v23, 0.0  ;;  %v785_v33 = vadd.f32 %v784_v24, %v11346_v12  ;;  %v786_v23 = vpop.f32.mrf.mxu1 }
 0x223   : > { %4347 = vmatmul.bf16.gmra.mxu1 %v10563_v5  ;;  %vm2430_vm13 = vc.u32 %v2422_v38, %v2426_v18  ;;  %v2432_v21 = vadd.s32 %v2426_v18, %v2422_v38  ;;  %v2427_v3 = vshrl.u32 %v2423_v27, 16  ;;  %v3901_v34 = vrot.slane %v3899_v4, 4 }
 0x224   : > { %v2411_v6 = vshrl.u32 %v2410_v7, 4  ;;  %v2431_v48 = vsel %vm2430_vm13, 1, %v13923_v61  ;;  %vm3094_vm14 = vcmp.ge.s32.totalorder %v3046_v9, 1  ;;  %v2429_v5 = vshrl.u32 %v2424_v63, 16  ;;  %v12484_v7 = vpop.f32.mrf.mxu3 }
 0x225   : > { %v2433_v41 = vadd.s32 %v2431_v48, %v2425_v59  ;;  %vm2434_vm15 = vc.u32 %v2432_v21, %v2428_v49  ;;  %v12471_v16 = vor.u32 %v3901_v34, %v3898_v43  ;;  %v12474_v12 = vadd.s32 280, %v11253_v11  ;;  %v10776_v59 = vld [vmem:[#allocation2 + $0x24] sm:$0xff]   ;;  %14014 = vst [vmem:[#allocation48_spill] sm:$0xff] %v12484_v7  ;;  %v14015_v43 = vld [vmem:[#allocation20_spill] sm:$0xff]  ;;  %v12494_v21 = vpop.f32.mrf.mxu0 }
 0x226   : > { %v2412_v37 = vmul.u32 24, %v2411_v6  ;;  %v2435_v32 = vsel %vm2434_vm15, 1, %v13923_v61  ;;  %vm3142_vm0 = vcmp.le.s32.totalorder %v3046_v9, 16  ;;  %v4716_v38 = vshrl.u32 %v12414_v42, 16  ;;  %14018 = vst [vmem:[#allocation20_spill] sm:$0xff] %v12494_v21 }
 0x227   : > { %v2437_v24 = vadd.s32 %v2435_v32, %v2433_v41  ;;  %v4720_v27 = vshll.u32 %v12467_v14, 16  ;;  %v3903_v6 = vsel %vm3742_vm6, %v12403_v50, %v12471_v16  ;;  %v2448_v63 = vand.u32 65535, %v12474_v12  ;;  %vm12490_vm3 = vmand %vm3094_vm14, %vm3142_vm0 }
 0x228   : > { %v2413_v47 = vsub.s32 %v12417_v25, %v2412_v37  ;;  %v2449_v17 = vshrl.u32 %v12474_v12, 16  ;;  %v1367_v18 = vadd.f32 %v1169_v60, %v785_v33  ;;  %4127 = vmatmul.bf16.gmra.mxu0 %v3903_v6  ;;  %v787_v42 = vadd.f32 %v786_v23, %v14015_v43  ;;  %v1171_v60 = vpop.f32.mrf.mxu2 }
 0x229   : > { %v2438_v49 = vadd.s32 %v2437_v24, %v2427_v3  ;;  %v4718_v4 = vor.u32 %v4716_v38, %v12434_v53  ;;  %v2451_v3 = vmul.u32 43691, %v2448_v63  ;;  %v2452_v48 = vmul.u32 43690, %v2448_v63 }
 0x22a   : > { %vm2855_vm5 = vcmp.ne.s32.totalorder %v2413_v47, 0  ;;  %vm2903_vm7 = vcmp.lt.s32.totalorder %v2413_v47, 0  ;;  %v2999_v50 = vadd.s32 24, %v2413_v47  ;;  %v2453_v34 = vmul.u32 43691, %v2449_v17 }
 0x22b   : > { %vm2951_vm1 = vmand %vm2903_vm7, %vm2855_vm5  ;;  %v2439_v33 = vadd.s32 %v2438_v49, %v2429_v5  ;;  %v2454_v41 = vmul.u32 43690, %v2449_v17  ;;  %v12496_v53 = vrot.slane %v4720_v27, 1  ;;  %v5357_v9 = vshrl.u32 %v10776_v59, 16 }
 0x22c   : > { %v3047_v37 = vsel %vm2951_vm1, %v2999_v50, %v2413_v47  ;;  %v5360_v32 = vshll.u32 %v10776_v59, 16  ;;  %v2455_v24 = vshll.u32 %v2452_v48, 16  ;;  %v3434_v38 = vsel %vm12490_vm3, %v3290_v29, 0.0  ;;  %v10565_v47 = vld [vmem:[#allocation2 + $0x1c] sm:$0xff]  }
 0x22d   : > { %vm3095_vm8 = vcmp.ge.s32.totalorder %v3047_v37, 1  ;;  %vm3143_vm4 = vcmp.le.s32.totalorder %v3047_v37, 16  ;;  %v2440_v23 = vshrl.u32 %v2439_v33, 4  ;;  %v1368_v6 = vadd.f32 %v1171_v60, %v787_v42  ;;  %v789_v42 = vpop.f32.mrf.mxu1 }
 0x22e   : > { %vm3191_vm9 = vmand %vm3095_vm8, %vm3143_vm4  ;;  %v2457_v43 = vshll.u32 %v2453_v34, 16  ;;  %v4723_v5 = vsel %vm4695_vm2, %v4718_v4, %v12496_v53  ;;  %vm2459_vm10 = vc.u32 %v2451_v3, %v2455_v24  ;;  %v2461_v27 = vadd.s32 %v2455_v24, %v2451_v3 }
 0x22f   : > { %v3435_v63 = vsel %vm3191_vm9, %v3291_v51, 0.0  ;;  %v2441_v17 = vmul.u32 24, %v2440_v23  ;;  %4982 = vmatmul.bf16.gmra.mxu2 %v4723_v5  ;;  %v2460_v49 = vsel %vm2459_vm10, 1, %v13923_v61  ;;  %v5359_v50 = vrot.slane %v5357_v9, 3  ;;  %v12510_v23 = vpop.f32.mrf.mxu3 }
 0x230   : > { %v9785_v59 = vpack.c.bf16 %v3435_v63, %v3434_v38  ;;  %v5362_v33 = vrot.slane %v5360_v32, 4  ;;  %v2456_v29 = vshrl.u32 %v2452_v48, 16  ;;  %v2462_v37 = vadd.s32 %v2460_v49, %v2454_v41  ;;  %14019 = vst [vmem:[#allocation49_spill] sm:$0xff] %v12510_v23  ;;  %v12521_v41 = vpop.f32.mrf.mxu0  ;;  %v1174_v24 = vpop.f32.mrf.mxu2 }
 0x231   : > { %v2442_v25 = vsub.s32 %v12446_v15, %v2441_v17  ;;  %vm2463_vm11 = vc.u32 %v2461_v27, %v2457_v43  ;;  %v2458_v4 = vshrl.u32 %v2453_v34, 16  ;;  %v12508_v3 = vadd.s32 288, %v11253_v11  ;;  %v12515_v15 = vld [vmem:[%s13902_s3] ss:$0 sm:$0xff]  ;;  %14020 = vst [vmem:[#allocation50_spill] sm:$0xff] %v12521_v41 }
 0x232   : > { %10238 = vst [vmem:[#allocation2 + $0x90] sm:$0xff] %v9785_v59   ;;  %v2464_v51 = vsel %vm2463_vm11, 1, %v13923_v61  ;;  %v12505_v60 = vor.u32 %v5362_v33, %v5359_v50  ;;  %v3244_v48 = vadd.f32 %v12515_v15, %v1367_v18  ;;  %v3905_v17 = vshrl.u32 %v9785_v59, 16 }
 0x233   : > { %4352 = vmatmul.bf16.gmra.mxu1 %v10565_v47  ;;  %vm2856_vm12 = vcmp.ne.s32.totalorder %v2442_v25, 0  ;;  %vm2904_vm13 = vcmp.lt.s32.totalorder %v2442_v25, 0  ;;  %v3000_v9 = vadd.s32 24, %v2442_v25  ;;  %v2466_v32 = vadd.s32 %v2464_v51, %v2462_v37 }
 0x234   : > { %vm2952_vm14 = vmand %vm2904_vm13, %vm2856_vm12  ;;  %v5364_v34 = vsel %vm3742_vm6, %v12443_v22, %v12505_v60  ;;  %v2477_v38 = vand.u32 65535, %v12508_v3  ;;  %v2478_v43 = vshrl.u32 %v12508_v3, 16  ;;  %v3908_v27 = vshll.u32 %v9785_v59, 16 }
 0x235   : > { %v3048_v5 = vsel %vm2952_vm14, %v3000_v9, %v2442_v25  ;;  %v2467_v63 = vadd.s32 %v2466_v32, %v2456_v29  ;;  %5644 = vmatmul.bf16.gmra.mxu3 %v5364_v34  ;;  %v12526_v47 = vadd.f32 %v12515_v15, %v1368_v6  ;;  %v3907_v51 = vrot.slane %v3905_v17, 3  ;;  %v14021_v9 = vld [vmem:[#allocation9_spill] sm:$0xff] }
 0x236   : > { %v2480_v18 = vmul.u32 43691, %v2477_v38  ;;  %v2481_v49 = vmul.u32 43690, %v2477_v38  ;;  %vm3096_vm15 = vcmp.ge.s32.totalorder %v3048_v5, 1  ;;  %v2482_v22 = vmul.u32 43691, %v2478_v43 }
 0x237   : > { %v2468_v50 = vadd.s32 %v2467_v63, %v2458_v4  ;;  %vm3144_vm0 = vcmp.le.s32.totalorder %v3048_v5, 16  ;;  %v2483_v33 = vmul.u32 43690, %v2478_v43  ;;  %v3292_v23 = vmax.f32 %v3244_v48, 0.0  ;;  %v791_v48 = vpop.f32.mrf.mxu1 }
 0x238   : > { %v2484_v37 = vshll.u32 %v2481_v49, 16  ;;  %v2486_v10 = vshll.u32 %v2482_v22, 16  ;;  %v3910_v25 = vrot.slane %v3908_v27, 4  ;;  %v3293_v29 = vmax.f32 %v12526_v47, 0.0  ;;  %vm12531_vm5 = vmand %vm3096_vm15, %vm3144_vm0  ;;  %v12545_v47 = vpop.f32.mrf.mxu3 }
 0x239   : > { %v2469_v7 = vshrl.u32 %v2468_v50, 4  ;;  %v790_v59 = vadd.f32 %v789_v42, %v14021_v9  ;;  %v12539_v43 = vadd.s32 296, %v11253_v11  ;;  %v2485_v17 = vshrl.u32 %v2481_v49, 16  ;;  %14024 = vst [vmem:[#allocation9_spill] sm:$0xff] %v12545_v47  ;;  %v12551_v50 = vld [vmem:[#allocation2 + $0x24] sm:$0xff] }
 0x23a   : > { %vm2488_vm3 = vc.u32 %v2480_v18, %v2484_v37  ;;  %v2490_v6 = vadd.s32 %v2484_v37, %v2480_v18  ;;  %v12536_v38 = vor.u32 %v3910_v25, %v3907_v51  ;;  %v2487_v49 = vshrl.u32 %v2482_v22, 16  ;;  %v14026_v25 = vld [vmem:[#allocation10_spill] sm:$0xff] }
 0x23b   : > { %v2470_v4 = vmul.u32 24, %v2469_v7  ;;  %v2489_v34 = vsel %vm2488_vm3, 1, %v13923_v61  ;;  %v12541_v63 = vadd.f32 %v1174_v24, %v790_v59  ;;  %v2506_v18 = vand.u32 65535, %v12539_v43  ;;  %v10567_v9 = vld [vmem:[#allocation2 + $0x24] sm:$0xff]  }
 0x23c   : > { %v2491_v42 = vadd.s32 %v2489_v34, %v2483_v33  ;;  %vm2492_vm7 = vc.u32 %v2490_v6, %v2486_v10  ;;  %v3912_v7 = vsel %vm3742_vm6, %v12471_v16, %v12536_v38  ;;  %v3436_v24 = vsel %vm12531_vm5, %v3292_v23, 0.0  ;;  %v12555_v10 = vpop.f32.mrf.mxu0 }
 0x23d   : > { %v2471_v5 = vsub.s32 %v12474_v12, %v2470_v4  ;;  %v2493_v27 = vsel %vm2492_vm7, 1, %v13923_v61  ;;  %4132 = vmatmul.bf16.gmra.mxu0 %v3912_v7  ;;  %14025 = vst [vmem:[#allocation51_spill] sm:$0xff] %v12555_v10  ;;  %v1176_v12 = vpop.f32.mrf.mxu2  ;;  %v2507_v37 = vshrl.u32 %v12539_v43, 16  ;;  %v792_v16 = vadd.f32 %v791_v48, %v14026_v25 }
 0x23e   : > { %v2495_v33 = vadd.s32 %v2493_v27, %v2491_v42  ;;  %v2509_v6 = vmul.u32 43691, %v2506_v18  ;;  %v2510_v4 = vmul.u32 43690, %v2506_v18  ;;  %v4724_v34 = vshrl.u32 %v12467_v14, 16  ;;  %v10778_v27 = vld [vmem:[#allocation2 + $0x2c] sm:$0xff]  }
 0x23f   : > { %vm2857_vm1 = vcmp.ne.s32.totalorder %v2471_v5, 0  ;;  %vm2905_vm8 = vcmp.lt.s32.totalorder %v2471_v5, 0  ;;  %v3001_v51 = vadd.s32 24, %v2471_v5  ;;  %v2511_v32 = vmul.u32 43691, %v2507_v37  ;;  %v794_v10 = vpop.f32.mrf.mxu1 }
 0x240   : > { %vm2953_vm4 = vmand %vm2905_vm8, %vm2857_vm1  ;;  %v2496_v59 = vadd.s32 %v2495_v33, %v2485_v17  ;;  %v2512_v22 = vmul.u32 43690, %v2507_v37  ;;  %v4728_v42 = vshll.u32 %v12551_v50, 16  ;;  %v2513_v47 = vshll.u32 %v2510_v4, 16 }
 0x241   : > { %v3049_v23 = vsel %vm2953_vm4, %v3001_v51, %v2471_v5  ;;  %v2514_v48 = vshrl.u32 %v2510_v4, 16  ;;  %v2515_v25 = vshll.u32 %v2511_v32, 16  ;;  %v4726_v17 = vor.u32 %v4724_v34, %v12496_v53 }
 0x242   : > { %vm3097_vm9 = vcmp.ge.s32.totalorder %v3049_v23, 1  ;;  %vm3145_vm10 = vcmp.le.s32.totalorder %v3049_v23, 16  ;;  %v2497_v7 = vadd.s32 %v2496_v59, %v2487_v49  ;;  %v12562_v33 = vrot.slane %v4728_v42, 1  ;;  %v12568_v42 = vpop.f32.mrf.mxu3 }
 0x243   : > { %4357 = vmatmul.bf16.gmra.mxu1 %v10567_v9  ;;  %vm3193_vm11 = vmand %vm3097_vm9, %vm3145_vm10  ;;  %vm2517_vm12 = vc.u32 %v2509_v6, %v2513_v47  ;;  %v2519_v37 = vadd.s32 %v2513_v47, %v2509_v6  ;;  %v5366_v49 = vshrl.u32 %v10778_v27, 16  ;;  %v5369_v4 = vshll.u32 %v10778_v27, 16  ;;  %14027 = vst [vmem:[#allocation10_spill] sm:$0xff] %v12568_v42 }
 0x244   : > { %v3437_v18 = vsel %vm3193_vm11, %v3293_v29, 0.0  ;;  %v2498_v5 = vshrl.u32 %v2497_v7, 4  ;;  %v2518_v51 = vsel %vm2517_vm12, 1, %v13923_v61  ;;  %v4731_v9 = vsel %vm4695_vm2, %v4726_v17, %v12562_v33 }
 0x245   : > { %v9790_v14 = vpack.c.bf16 %v3437_v18, %v3436_v24  ;;  %v2520_v23 = vadd.s32 %v2518_v51, %v2512_v22  ;;  %vm2521_vm13 = vc.u32 %v2519_v37, %v2515_v25  ;;  %4987 = vmatmul.bf16.gmra.mxu2 %v4731_v9  ;;  %v1370_v53 = vadd.f32 %v1176_v12, %v792_v16  ;;  %v12571_v18 = vpop.f32.mrf.mxu0  ;;  %v1179_v17 = vpop.f32.mrf.mxu2  ;;  %v9615_v25 = vld [vmem:[#allocation3 + $0x108] sm:$0xff] }
 0x246   : > { %v2499_v59 = vmul.u32 24, %v2498_v5  ;;  %v2516_v34 = vshrl.u32 %v2511_v32, 16  ;;  %v2522_v29 = vsel %vm2521_vm13, 1, %v13923_v61  ;;  %v5368_v47 = vrot.slane %v5366_v49, 3  ;;  %14028 = vst [vmem:[#allocation52_spill] sm:$0xff] %v12571_v18  ;;  %5922 = vmatpush.bf16.msra.mxu0 %v9615_v25 }
 0x247   : > { %10239 = vst [vmem:[#allocation2 + $0x98] sm:$0xff] %v9790_v14   ;;  %v2524_v6 = vadd.s32 %v2522_v29, %v2520_v23  ;;  %v5371_v7 = vrot.slane %v5369_v4, 4  ;;  %v12574_v22 = vadd.s32 304, %v11253_v11  ;;  %v12578_v12 = vadd.f32 %v12515_v15, %v12541_v63 }
 0x248   : > { %v2500_v24 = vsub.s32 %v12508_v3, %v2499_v59  ;;  %v3914_v16 = vshrl.u32 %v9790_v14, 16  ;;  %v3917_v32 = vshll.u32 %v9790_v14, 16  ;;  %v12581_v3 = vadd.f32 %v12515_v15, %v1370_v53  ;;  %v14029_v14 = vld [vmem:[#allocation11_spill] sm:$0xff] }
 0x249   : > { %v2525_v5 = vadd.s32 %v2524_v6, %v2514_v48  ;;  %v12583_v37 = vor.u32 %v5371_v7, %v5368_v47  ;;  %v2535_v51 = vand.u32 65535, %v12574_v22  ;;  %v2536_v9 = vshrl.u32 %v12574_v22, 16 }
 0x24a   : > { %vm2858_vm14 = vcmp.ne.s32.totalorder %v2500_v24, 0  ;;  %vm2906_vm15 = vcmp.lt.s32.totalorder %v2500_v24, 0  ;;  %v3002_v27 = vadd.s32 24, %v2500_v24  ;;  %v3916_v63 = vrot.slane %v3914_v16, 3  ;;  %v10569_v16 = vld [vmem:[#allocation2 + $0x2c] sm:$0xff]  }
 0x24b   : > { %vm2954_vm0 = vmand %vm2906_vm15, %vm2858_vm14  ;;  %v2526_v49 = vadd.s32 %v2525_v5, %v2516_v34  ;;  %v3919_v59 = vrot.slane %v3917_v32, 4  ;;  %v795_v4 = vadd.f32 %v794_v10, %v14029_v14  ;;  %v5373_v48 = vsel %vm3742_vm6, %v12505_v60, %v12583_v37  ;;  %v12597_v5 = vpop.f32.mrf.mxu3 }
 0x24c   : > { %v3050_v23 = vsel %vm2954_vm0, %v3002_v27, %v2500_v24  ;;  %5649 = vmatmul.bf16.gmra.mxu3 %v5373_v48  ;;  %v2538_v53 = vmul.u32 43691, %v2535_v51  ;;  %v2539_v6 = vmul.u32 43690, %v2535_v51  ;;  %v2540_v47 = vmul.u32 43691, %v2536_v9  ;;  %v796_v24 = vpop.f32.mrf.mxu1  ;;  %14030 = vst [vmem:[#allocation11_spill] sm:$0xff] %v12597_v5  ;;  %v12623_v5 = vld [vmem:[#allocation2 + $0x2c] sm:$0xff] }
 0x24d   : > { %v2527_v29 = vshrl.u32 %v2526_v49, 4  ;;  %v3294_v7 = vmax.f32 %v12578_v12, 0.0  ;;  %v3295_v25 = vmax.f32 %v12581_v3, 0.0  ;;  %v12593_v42 = vadd.f32 %v1179_v17, %v795_v4  ;;  %v14031_v49 = vld [vmem:[#allocation12_spill] sm:$0xff] }
 0x24e   : > { %v12595_v34 = vor.u32 %v3919_v59, %v3916_v63  ;;  %vm3098_vm3 = vcmp.ge.s32.totalorder %v3050_v23, 1  ;;  %v2541_v32 = vmul.u32 43690, %v2536_v9  ;;  %v2542_v27 = vshll.u32 %v2539_v6, 16  ;;  %v12609_v63 = vpop.f32.mrf.mxu0  ;;  %v12611_v59 = vpop.f32.mrf.mxu2 }
 0x24f   : > { %v2528_v10 = vmul.u32 24, %v2527_v29  ;;  %vm3146_vm5 = vcmp.le.s32.totalorder %v3050_v23, 16  ;;  %v2544_v60 = vshll.u32 %v2540_v47, 16  ;;  %v12603_v3 = vadd.s32 312, %v11253_v11  ;;  %14032 = vst [vmem:[#allocation12_spill] sm:$0xff] %v12609_v63  ;;  %v10780_v23 = vld [vmem:[#allocation2 + $0x34] sm:$0xff]  }
 0x250   : > { %v3921_v12 = vsel %vm3742_vm6, %v12536_v38, %v12595_v34  ;;  %vm2546_vm7 = vc.u32 %v2538_v53, %v2542_v27  ;;  %v2548_v51 = vadd.s32 %v2542_v27, %v2538_v53  ;;  %v12607_v9 = vadd.f32 %v796_v24, %v14031_v49  ;;  %vm12618_vm1 = vmand %vm3098_vm3, %vm3146_vm5 }
 0x251   : > { %v2529_v17 = vsub.s32 %v12539_v43, %v2528_v10  ;;  %4137 = vmatmul.bf16.gmra.mxu0 %v3921_v12  ;;  %v2543_v14 = vshrl.u32 %v2539_v6, 16  ;;  %v2547_v4 = vsel %vm2546_vm7, 1, %v13923_v61  ;;  %v2564_v38 = vand.u32 65535, %v12603_v3 }
 0x252   : > { %v2565_v48 = vshrl.u32 %v12603_v3, 16  ;;  %v2549_v53 = vadd.s32 %v2547_v4, %v2541_v32  ;;  %vm2550_vm10 = vc.u32 %v2548_v51, %v2544_v60  ;;  %v2545_v27 = vshrl.u32 %v2540_v47, 16 }
 0x253   : > { %4362 = vmatmul.bf16.gmra.mxu1 %v10569_v16  ;;  %vm2859_vm8 = vcmp.ne.s32.totalorder %v2529_v17, 0  ;;  %vm2907_vm4 = vcmp.lt.s32.totalorder %v2529_v17, 0  ;;  %v3003_v29 = vadd.s32 24, %v2529_v17  ;;  %v2567_v24 = vmul.u32 43691, %v2564_v38  ;;  %v12630_v43 = vpop.f32.mrf.mxu3 }
 0x254   : > { %vm2955_vm9 = vmand %vm2907_vm4, %vm2859_vm8  ;;  %v2568_v6 = vmul.u32 43690, %v2564_v38  ;;  %v2569_v16 = vmul.u32 43691, %v2565_v48  ;;  %v2551_v12 = vsel %vm2550_vm10, 1, %v13923_v61  ;;  %v2570_v49 = vmul.u32 43690, %v2565_v48  ;;  %14035 = vst [vmem:[#allocation53_spill] sm:$0xff] %v12630_v43 }
 0x255   : > { %v3051_v10 = vsel %vm2955_vm9, %v3003_v29, %v2529_v17  ;;  %v2553_v63 = vadd.s32 %v2551_v12, %v2549_v53  ;;  %v3438_v32 = vsel %vm12618_vm1, %v3294_v7, 0.0  ;;  %v4732_v4 = vshrl.u32 %v12551_v50, 16  ;;  %v799_v7 = vpop.f32.mrf.mxu1 }
 0x256   : > { %vm3099_vm11 = vcmp.ge.s32.totalorder %v3051_v10, 1  ;;  %vm3147_vm12 = vcmp.le.s32.totalorder %v3051_v10, 16  ;;  %v2571_v18 = vshll.u32 %v2568_v6, 16  ;;  %v2572_v60 = vshrl.u32 %v2568_v6, 16 }
 0x257   : > { %vm3195_vm13 = vmand %vm3099_vm11, %vm3147_vm12  ;;  %v2573_v51 = vshll.u32 %v2569_v16, 16  ;;  %v2554_v47 = vadd.s32 %v2553_v63, %v2543_v14  ;;  %v4736_v21 = vshll.u32 %v12623_v5, 16  ;;  %v5375_v10 = vshrl.u32 %v10780_v23, 16  ;;  %v12636_v14 = vpop.f32.mrf.mxu0 }
 0x258   : > { %v3439_v17 = vsel %vm3195_vm13, %v3295_v25, 0.0  ;;  %vm2575_vm14 = vc.u32 %v2567_v24, %v2571_v18  ;;  %v2577_v38 = vadd.s32 %v2571_v18, %v2567_v24  ;;  %v5378_v6 = vshll.u32 %v10780_v23, 16  ;;  %14036 = vst [vmem:[#allocation54_spill] sm:$0xff] %v12636_v14  ;;  %v12638_v24 = vpop.f32.mrf.mxu2 }
 0x259   : > { %v9795_v48 = vpack.c.bf16 %v3439_v17, %v3438_v32  ;;  %v2576_v29 = vsel %vm2575_vm14, 1, %v13923_v61  ;;  %v2555_v53 = vadd.s32 %v2554_v47, %v2545_v27  ;;  %v4734_v25 = vor.u32 %v4732_v4, %v12562_v33 }
 0x25a   : > { %v2578_v12 = vadd.s32 %v2576_v29, %v2570_v49  ;;  %vm2579_vm15 = vc.u32 %v2577_v38, %v2573_v51  ;;  %v12634_v63 = vrot.slane %v4736_v21, 1  ;;  %v5377_v18 = vrot.slane %v5375_v10, 3  ;;  %v10571_v10 = vld [vmem:[#allocation2 + $0x34] sm:$0xff]  }
 0x25b   : > { %10240 = vst [vmem:[#allocation2 + $0xa0] sm:$0xff] %v9795_v48   ;;  %v2580_v50 = vsel %vm2579_vm15, 1, %v13923_v61  ;;  %v2556_v32 = vshrl.u32 %v2555_v53, 4  ;;  %v2574_v27 = vshrl.u32 %v2569_v16, 16  ;;  %v5380_v51 = vrot.slane %v5378_v6, 4 }
 0x25c   : > { %v2582_v49 = vadd.s32 %v2580_v50, %v2578_v12  ;;  %v4739_v17 = vsel %vm4695_vm2, %v4734_v25, %v12634_v63  ;;  %v12643_v23 = vadd.s32 320, %v11253_v11  ;;  %v3923_v47 = vshrl.u32 %v9795_v48, 16 }
 0x25d   : > { %v3926_v38 = vshll.u32 %v9795_v48, 16  ;;  %v2557_v33 = vmul.u32 24, %v2556_v32  ;;  %v3248_v21 = vadd.f32 %v12515_v15, %v12593_v42  ;;  %4992 = vmatmul.bf16.gmra.mxu2 %v4739_v17  ;;  %v12647_v29 = vor.u32 %v5380_v51, %v5377_v18 }
 0x25e   : > { %v2583_v4 = vadd.s32 %v2582_v49, %v2572_v60  ;;  %v1372_v16 = vadd.f32 %v12611_v59, %v12607_v9  ;;  %v2593_v53 = vand.u32 65535, %v12643_v23  ;;  %v2594_v12 = vshrl.u32 %v12643_v23, 16 }
 0x25f   : > { %v3925_v6 = vrot.slane %v3923_v47, 3  ;;  %v2558_v50 = vsub.s32 %v12574_v22, %v2557_v33  ;;  %v5382_v42 = vsel %vm3742_vm6, %v12583_v37, %v12647_v29  ;;  %v3928_v60 = vrot.slane %v3926_v38, 4  ;;  %v12658_v37 = vpop.f32.mrf.mxu3 }
 0x260   : > { %v2584_v48 = vadd.s32 %v2583_v4, %v2574_v27  ;;  %5654 = vmatmul.bf16.gmra.mxu3 %v5382_v42  ;;  %v2596_v25 = vmul.u32 43691, %v2593_v53  ;;  %v2597_v18 = vmul.u32 43690, %v2593_v53  ;;  %v2598_v32 = vmul.u32 43691, %v2594_v12  ;;  %14037 = vst [vmem:[#allocation55_spill] sm:$0xff] %v12658_v37  ;;  %v801_v4 = vpop.f32.mrf.mxu1  ;;  %v12662_v53 = vpop.f32.mrf.mxu0  ;;  %v10573_v37 = vld [vmem:[#allocation2 + $0x3c] sm:$0xff]  }
 0x261   : > { %vm2860_vm0 = vcmp.ne.s32.totalorder %v2558_v50, 0  ;;  %vm2908_vm3 = vcmp.lt.s32.totalorder %v2558_v50, 0  ;;  %v3004_v9 = vadd.s32 24, %v2558_v50  ;;  %v3249_v49 = vadd.f32 %v12515_v15, %v1372_v16  ;;  %14038 = vst [vmem:[#allocation56_spill] sm:$0xff] %v12662_v53 }
 0x262   : > { %v2585_v59 = vshrl.u32 %v2584_v48, 4  ;;  %vm2956_vm5 = vmand %vm2908_vm3, %vm2860_vm0  ;;  %v2599_v51 = vmul.u32 43690, %v2594_v12  ;;  %v2600_v22 = vshll.u32 %v2597_v18, 16  ;;  %v2602_v27 = vshll.u32 %v2598_v32, 16  ;;  %v1186_v48 = vpop.f32.mrf.mxu2  ;;  %v14039_v12 = vld [vmem:[#allocation13_spill] sm:$0xff] }
 0x263   : > { %4367 = vmatmul.bf16.gmra.mxu1 %v10571_v10  ;;  %v3052_v17 = vsel %vm2956_vm5, %v3004_v9, %v2558_v50  ;;  %v3296_v47 = vmax.f32 %v3248_v21, 0.0  ;;  %v12660_v38 = vor.u32 %v3928_v60, %v3925_v6  ;;  %v800_v42 = vadd.f32 %v799_v7, %v14039_v12  ;;  %v12670_v6 = vld [vmem:[#allocation2 + $0x34] sm:$0xff] }
 0x264   : > { %v2586_v33 = vmul.u32 24, %v2585_v59  ;;  %vm3100_vm7 = vcmp.ge.s32.totalorder %v3052_v17, 1  ;;  %vm3148_vm1 = vcmp.le.s32.totalorder %v3052_v17, 16  ;;  %vm2604_vm8 = vc.u32 %v2596_v25, %v2600_v22 }
 0x265   : > { %v2606_v10 = vadd.s32 %v2600_v22, %v2596_v25  ;;  %v2605_v50 = vsel %vm2604_vm8, 1, %v13923_v61  ;;  %v3930_v21 = vsel %vm3742_vm6, %v12595_v34, %v12660_v38  ;;  %vm12672_vm4 = vmand %vm3100_vm7, %vm3148_vm1  ;;  %v3297_v25 = vmax.f32 %v3249_v49, 0.0  ;;  %v10782_v22 = vld [vmem:[#allocation2 + $0x3c] sm:$0xff]  }
 0x266   : > { %v2587_v16 = vsub.s32 %v12603_v3, %v2586_v33  ;;  %v2601_v9 = vshrl.u32 %v2597_v18, 16  ;;  %v2607_v59 = vadd.s32 %v2605_v50, %v2599_v51  ;;  %4142 = vmatmul.bf16.gmra.mxu0 %v3930_v21  ;;  %v1373_v34 = vadd.f32 %v12638_v24, %v800_v42 }
 0x267   : > { %vm2608_vm9 = vc.u32 %v2606_v10, %v2602_v27  ;;  %v2603_v17 = vshrl.u32 %v2598_v32, 16  ;;  %v12679_v12 = vadd.s32 328, %v11253_v11  ;;  %v3440_v18 = vsel %vm12672_vm4, %v3296_v47, 0.0 }
 0x268   : > { %vm2861_vm10 = vcmp.ne.s32.totalorder %v2587_v16, 0  ;;  %vm2909_vm11 = vcmp.lt.s32.totalorder %v2587_v16, 0  ;;  %v3005_v3 = vadd.s32 24, %v2587_v16  ;;  %v2609_v7 = vsel %vm2608_vm9, 1, %v13923_v61 }
 0x269   : > { %vm2957_vm12 = vmand %vm2909_vm11, %vm2861_vm10  ;;  %v2611_v33 = vadd.s32 %v2609_v7, %v2607_v59  ;;  %v4740_v51 = vshrl.u32 %v12623_v5, 16  ;;  %v4744_v27 = vshll.u32 %v12670_v6, 16  ;;  %v2622_v50 = vand.u32 65535, %v12679_v12 }
 0x26a   : > { %v3053_v49 = vsel %vm2957_vm12, %v3005_v3, %v2587_v16  ;;  %v2623_v24 = vshrl.u32 %v12679_v12, 16  ;;  %v5384_v21 = vshrl.u32 %v10782_v22, 16  ;;  %v14042_v3 = vld [vmem:[#allocation14_spill] sm:$0xff] }
 0x26b   : > { %vm3101_vm13 = vcmp.ge.s32.totalorder %v3053_v49, 1  ;;  %vm3149_vm14 = vcmp.le.s32.totalorder %v3053_v49, 16  ;;  %v2612_v10 = vadd.s32 %v2611_v33, %v2601_v9  ;;  %v4742_v32 = vor.u32 %v4740_v51, %v12634_v63  ;;  %v12693_v9 = vpop.f32.mrf.mxu3  ;;  %v804_v33 = vpop.f32.mrf.mxu1 }
 0x26c   : > { %vm3197_vm15 = vmand %vm3101_vm13, %vm3149_vm14  ;;  %v12688_v42 = vrot.slane %v4744_v27, 1  ;;  %v2625_v16 = vmul.u32 43691, %v2622_v50  ;;  %v2626_v59 = vmul.u32 43690, %v2622_v50  ;;  %v802_v7 = vadd.f32 %v801_v4, %v14042_v3  ;;  %14043 = vst [vmem:[#allocation13_spill] sm:$0xff] %v12693_v9  ;;  %v12700_v27 = vpop.f32.mrf.mxu0 }
 0x26d   : > { %v3441_v60 = vsel %vm3197_vm15, %v3297_v25, 0.0  ;;  %v2613_v47 = vadd.s32 %v2612_v10, %v2603_v17  ;;  %v2627_v49 = vmul.u32 43691, %v2623_v24  ;;  %v12698_v51 = vadd.f32 %v12515_v15, %v1373_v34  ;;  %14044 = vst [vmem:[#allocation14_spill] sm:$0xff] %v12700_v27 }
 0x26e   : > { %v12690_v5 = vpack.c.bf16 %v3441_v60, %v3440_v18  ;;  %v4747_v43 = vsel %vm4695_vm2, %v4742_v32, %v12688_v42  ;;  %v2628_v25 = vmul.u32 43690, %v2623_v24  ;;  %v2629_v17 = vshll.u32 %v2626_v59, 16  ;;  %v1189_v18 = vpop.f32.mrf.mxu2 }
 0x26f   : > { %v2614_v63 = vshrl.u32 %v2613_v47, 4  ;;  %4997 = vmatmul.bf16.gmra.mxu2 %v4747_v43  ;;  %v1374_v4 = vadd.f32 %v1186_v48, %v802_v7  ;;  %v2631_v10 = vshll.u32 %v2627_v49, 16  ;;  %v5386_v50 = vrot.slane %v5384_v21, 3 }
 0x270   : > { %10241 = vst [vmem:[#allocation2 + $0xa8] sm:$0xff] %v12690_v5   ;;  %v5387_v60 = vshll.u32 %v10782_v22, 16  ;;  %v2630_v32 = vshrl.u32 %v2626_v59, 16  ;;  %vm2633_vm0 = vc.u32 %v2625_v16, %v2629_v17  ;;  %v2635_v47 = vadd.s32 %v2629_v17, %v2625_v16 }
 0x271   : > { %v2615_v3 = vmul.u32 24, %v2614_v63  ;;  %v2632_v9 = vshrl.u32 %v2627_v49, 16  ;;  %v2634_v34 = vsel %vm2633_vm0, 1, %v13923_v61  ;;  %v12705_v43 = vadd.s32 336, %v11253_v11 }
 0x272   : > { %v5389_v24 = vrot.slane %v5387_v60, 4  ;;  %v2636_v27 = vadd.s32 %v2634_v34, %v2628_v25  ;;  %vm2637_vm3 = vc.u32 %v2635_v47, %v2631_v10  ;;  %v3932_v48 = vshrl.u32 %v12690_v5, 16 }
 0x273   : > { %4372 = vmatmul.bf16.gmra.mxu1 %v10573_v37  ;;  %v2616_v53 = vsub.s32 %v12643_v23, %v2615_v3  ;;  %v2638_v22 = vsel %vm2637_vm3, 1, %v13923_v61  ;;  %v2651_v21 = vand.u32 65535, %v12705_v43  ;;  %v2652_v16 = vshrl.u32 %v12705_v43, 16  ;;  %v14045_v3 = vld [vmem:[#allocation15_spill] sm:$0xff] }
 0x274   : > { %v12710_v37 = vor.u32 %v5389_v24, %v5386_v50  ;;  %v2640_v7 = vadd.s32 %v2638_v22, %v2636_v27  ;;  %v3298_v10 = vmax.f32 %v12698_v51, 0.0  ;;  %v12719_v60 = vadd.f32 %v12515_v15, %v1374_v4  ;;  %v12722_v24 = vpop.f32.mrf.mxu3  ;;  %v806_v22 = vpop.f32.mrf.mxu1 }
 0x275   : > { %vm2862_vm5 = vcmp.ne.s32.totalorder %v2616_v53, 0  ;;  %vm2910_vm7 = vcmp.lt.s32.totalorder %v2616_v53, 0  ;;  %v3006_v59 = vadd.s32 24, %v2616_v53  ;;  %v2654_v49 = vmul.u32 43691, %v2651_v21  ;;  %14046 = vst [vmem:[#allocation15_spill] sm:$0xff] %v12722_v24  ;;  %v12724_v14 = vpop.f32.mrf.mxu0 }
 0x276   : > { %vm2958_vm1 = vmand %vm2910_vm7, %vm2862_vm5  ;;  %v5391_v23 = vsel %vm3742_vm6, %v12647_v29, %v12710_v37  ;;  %v2655_v63 = vmul.u32 43690, %v2651_v21  ;;  %v2656_v25 = vmul.u32 43691, %v2652_v16  ;;  %v2641_v50 = vadd.s32 %v2640_v7, %v2630_v32  ;;  %14047 = vst [vmem:[#allocation57_spill] sm:$0xff] %v12724_v14 }
 0x277   : > { %v3054_v17 = vsel %vm2958_vm1, %v3006_v59, %v2616_v53  ;;  %5659 = vmatmul.bf16.gmra.mxu3 %v5391_v23  ;;  %v805_v47 = vadd.f32 %v804_v33, %v14045_v3  ;;  %v2657_v34 = vmul.u32 43690, %v2652_v16  ;;  %v12726_v53 = vpop.f32.mrf.mxu2  ;;  %v3934_v32 = vrot.slane %v3932_v48, 3 }
 0x278   : > { %v2658_v27 = vshll.u32 %v2655_v63, 16  ;;  %vm3102_vm8 = vcmp.ge.s32.totalorder %v3054_v17, 1  ;;  %vm3150_vm4 = vcmp.le.s32.totalorder %v3054_v17, 16  ;;  %v2642_v29 = vadd.s32 %v2641_v50, %v2632_v9 }
 0x279   : > { %v2660_v21 = vshll.u32 %v2656_v25, 16  ;;  %v3935_v4 = vshll.u32 %v12690_v5, 16  ;;  %v1375_v33 = vadd.f32 %v1189_v18, %v805_v47  ;;  %v2659_v16 = vshrl.u32 %v2655_v63, 16  ;;  %vm3198_vm10 = vmand %vm3102_vm8, %vm3150_vm4 }
 0x27a   : > { %vm2662_vm9 = vc.u32 %v2654_v49, %v2658_v27  ;;  %v2664_v51 = vadd.s32 %v2658_v27, %v2654_v49  ;;  %v2643_v59 = vshrl.u32 %v2642_v29, 4  ;;  %v12731_v9 = vadd.s32 344, %v11253_v11 }
 0x27b   : > { %v2663_v7 = vsel %vm2662_vm9, 1, %v13923_v61  ;;  %v3937_v17 = vrot.slane %v3935_v4, 4  ;;  %v3299_v3 = vmax.f32 %v12719_v60, 0.0  ;;  %v2661_v24 = vshrl.u32 %v2656_v25, 16 }
 0x27c   : > { %v2665_v23 = vadd.s32 %v2663_v7, %v2657_v34  ;;  %vm2666_vm11 = vc.u32 %v2664_v51, %v2660_v21  ;;  %v2644_v50 = vmul.u32 24, %v2643_v59  ;;  %v2680_v18 = vand.u32 65535, %v12731_v9 }
 0x27d   : > { %v2667_v48 = vsel %vm2666_vm11, 1, %v13923_v61  ;;  %v12735_v5 = vor.u32 %v3937_v17, %v3934_v32  ;;  %v2681_v63 = vshrl.u32 %v12731_v9, 16  ;;  %v3442_v47 = vsel %vm3198_vm10, %v3298_v10, 0.0  ;;  %v12749_v10 = vld [vmem:[#allocation2 + $0x3c] sm:$0xff] }
 0x27e   : > { %v2669_v49 = vadd.s32 %v2667_v48, %v2665_v23  ;;  %v2645_v34 = vsub.s32 %v12679_v12, %v2644_v50  ;;  %v12741_v27 = vadd.f32 %v12515_v15, %v1375_v33  ;;  %v4748_v29 = vshrl.u32 %v12670_v6, 16  ;;  %v10784_v12 = vld [vmem:[#allocation2 + $0x44] sm:$0xff]   ;;  %v14048_v33 = vld [vmem:[#allocation16_spill] sm:$0xff]  ;;  %v12752_v23 = vpop.f32.mrf.mxu3 }
 0x27f   : > { %v3939_v25 = vsel %vm3742_vm6, %v12660_v38, %v12735_v5  ;;  %v2683_v60 = vmul.u32 43691, %v2680_v18  ;;  %v2684_v51 = vmul.u32 43690, %v2680_v18  ;;  %v12747_v4 = vmul.u32 43691, %v2681_v63  ;;  %14049 = vst [vmem:[#allocation16_spill] sm:$0xff] %v12752_v23  ;;  %v809_v38 = vpop.f32.mrf.mxu1  ;;  %v12756_v18 = vpop.f32.mrf.mxu0 }
 0x280   : > { %v2670_v21 = vadd.s32 %v2669_v49, %v2659_v16  ;;  %vm2863_vm12 = vcmp.ne.s32.totalorder %v2645_v34, 0  ;;  %vm2911_vm13 = vcmp.lt.s32.totalorder %v2645_v34, 0  ;;  %v3007_v32 = vadd.s32 24, %v2645_v34  ;;  %4147 = vmatmul.bf16.gmra.mxu0 %v3939_v25  ;;  %14050 = vst [vmem:[#allocation58_spill] sm:$0xff] %v12756_v18  ;;  %v12758_v25 = vpop.f32.mrf.mxu2 }
 0x281   : > { %vm2959_vm14 = vmand %vm2911_vm13, %vm2863_vm12  ;;  %v807_v6 = vadd.f32 %v806_v22, %v14048_v33  ;;  %v2686_v16 = vmul.u32 43690, %v2681_v63  ;;  %v2687_v7 = vshll.u32 %v2684_v51, 16  ;;  %v2688_v50 = vshrl.u32 %v2684_v51, 16  ;;  %v10575_v51 = vld [vmem:[#allocation2 + $0x44] sm:$0xff]  }
 0x282   : > { %v2671_v59 = vadd.s32 %v2670_v21, %v2661_v24  ;;  %v3055_v17 = vsel %vm2959_vm14, %v3007_v32, %v2645_v34  ;;  %v2689_v48 = vshll.u32 %v12747_v4, 16  ;;  %v4750_v49 = vor.u32 %v4748_v29, %v12688_v42 }
 0x283   : > { %vm3103_vm15 = vcmp.ge.s32.totalorder %v3055_v17, 1  ;;  %vm3151_vm0 = vcmp.le.s32.totalorder %v3055_v17, 16  ;;  %vm2691_vm3 = vc.u32 %v2683_v60, %v2687_v7  ;;  %v2693_v63 = vadd.s32 %v2687_v7, %v2683_v60  ;;  %v9614_v17 = vld [vmem:[#allocation3 + $0x100] sm:$0xff]  ;;  %4377 = vmatmul.bf16.gmra.mxu1 %v10575_v51 }
 0x284   : > { %v2672_v24 = vshrl.u32 %v2671_v59, 4  ;;  %vm3199_vm5 = vmand %vm3103_vm15, %vm3151_vm0  ;;  %v2692_v22 = vsel %vm2691_vm3, 1, %v13923_v61  ;;  %v4752_v21 = vshll.u32 %v12749_v10, 16  ;;  %v5393_v34 = vshrl.u32 %v10784_v12, 16  ;;  %5923 = vmatpush.bf16.msra.mxu0 %v9614_v17  ;;  %v14053_v17 = vld [vmem:[#allocation17_spill] sm:$0xff] }
 0x285   : > { %v3443_v32 = vsel %vm3199_vm5, %v3299_v3, 0.0  ;;  %v2694_v23 = vadd.s32 %v2692_v22, %v2686_v16  ;;  %v5396_v42 = vshll.u32 %v10784_v12, 16  ;;  %vm2695_vm7 = vc.u32 %v2693_v63, %v2689_v48 }
 0x286   : > { %v2673_v33 = vmul.u32 24, %v2672_v24  ;;  %v9805_v29 = vpack.c.bf16 %v3443_v32, %v3442_v47  ;;  %v12762_v14 = vrot.slane %v4752_v21, 1  ;;  %v5395_v18 = vrot.slane %v5393_v34, 3 }
 0x287   : > { %v1376_v41 = vadd.f32 %v12726_v53, %v807_v6  ;;  %v2696_v60 = vsel %vm2695_vm7, 1, %v13923_v61  ;;  %v5398_v7 = vrot.slane %v5396_v42, 4  ;;  %v2690_v3 = vshrl.u32 %v12747_v4, 16  ;;  %v811_v21 = vpop.f32.mrf.mxu1 }
 0x288   : > { %v2674_v59 = vsub.s32 %v12705_v43, %v2673_v33  ;;  %10242 = vst [vmem:[#allocation2 + $0xb0] sm:$0xff] %v9805_v29   ;;  %v2698_v24 = vadd.s32 %v2696_v60, %v2694_v23  ;;  %v4755_v47 = vsel %vm4695_vm2, %v4750_v49, %v12762_v14  ;;  %v12771_v12 = vadd.s32 352, %v11253_v11  ;;  %v12783_v49 = vpop.f32.mrf.mxu3  ;;  %v1196_v51 = vpop.f32.mrf.mxu2 }
 0x289   : > { %5002 = vmatmul.bf16.gmra.mxu2 %v4755_v47  ;;  %v12773_v43 = vor.u32 %v5398_v7, %v5395_v18  ;;  %v12778_v23 = vadd.f32 %v12515_v15, %v1376_v41  ;;  %14051 = vst [vmem:[#allocation59_spill] sm:$0xff] %v12783_v49  ;;  %v3941_v22 = vshrl.u32 %v9805_v29, 16  ;;  %v3944_v63 = vshll.u32 %v9805_v29, 16 }
 0x28a   : > { %vm2864_vm1 = vcmp.ne.s32.totalorder %v2674_v59, 0  ;;  %vm2912_vm8 = vcmp.lt.s32.totalorder %v2674_v59, 0  ;;  %v3008_v16 = vadd.s32 24, %v2674_v59  ;;  %v2699_v53 = vadd.s32 %v2698_v24, %v2688_v50  ;;  %v12786_v50 = vpop.f32.mrf.mxu0 }
 0x28b   : > { %vm2960_vm4 = vmand %vm2912_vm8, %vm2864_vm1  ;;  %v2709_v6 = vand.u32 65535, %v12771_v12  ;;  %v2710_v4 = vshrl.u32 %v12771_v12, 16  ;;  %v5400_v48 = vsel %vm3742_vm6, %v12710_v37, %v12773_v43  ;;  %v3300_v18 = vmax.f32 %v12741_v27, 0.0  ;;  %14052 = vst [vmem:[#allocation60_spill] sm:$0xff] %v12786_v50 }
 0x28c   : > { %v2700_v34 = vadd.s32 %v2699_v53, %v2690_v3  ;;  %5664 = vmatmul.bf16.gmra.mxu3 %v5400_v48  ;;  %v3056_v32 = vsel %vm2960_vm4, %v3008_v16, %v2674_v59  ;;  %v810_v60 = vadd.f32 %v809_v38, %v14053_v17  ;;  %v3943_v37 = vrot.slane %v3941_v22, 3 }
 0x28d   : > { %v2712_v33 = vmul.u32 43691, %v2709_v6  ;;  %v2713_v15 = vmul.u32 43690, %v2709_v6  ;;  %v2714_v41 = vmul.u32 43691, %v2710_v4  ;;  %v3946_v7 = vrot.slane %v3944_v63, 4 }
 0x28e   : > { %v2701_v42 = vshrl.u32 %v2700_v34, 4  ;;  %v3301_v24 = vmax.f32 %v12778_v23, 0.0  ;;  %v2715_v29 = vmul.u32 43690, %v2710_v4  ;;  %vm3104_vm9 = vcmp.ge.s32.totalorder %v3056_v32, 1 }
 0x28f   : > { %v2716_v47 = vshll.u32 %v2713_v15, 16  ;;  %v2718_v49 = vshll.u32 %v2714_v41, 16  ;;  %vm3152_vm10 = vcmp.le.s32.totalorder %v3056_v32, 16  ;;  %v12790_v3 = vor.u32 %v3946_v7, %v3943_v37  ;;  %v12813_v17 = vpop.f32.mrf.mxu1  ;;  %v14057_v7 = vld [vmem:[#allocation18_spill] sm:$0xff] }
 0x290   : > { %v2702_v27 = vmul.u32 24, %v2701_v42  ;;  %v2717_v53 = vshrl.u32 %v2713_v15, 16  ;;  %v12793_v16 = vadd.s32 360, %v11253_v11  ;;  %v2719_v6 = vshrl.u32 %v2714_v41, 16  ;;  %vm12804_vm13 = vmand %vm3104_vm9, %vm3152_vm10  ;;  %v12811_v42 = vpop.f32.mrf.mxu3 }
 0x291   : > { %vm2720_vm11 = vc.u32 %v2712_v33, %v2716_v47  ;;  %v2722_v59 = vadd.s32 %v2716_v47, %v2712_v33  ;;  %v3948_v4 = vsel %vm3742_vm6, %v12735_v5, %v12790_v3  ;;  %14056 = vst [vmem:[#allocation17_spill] sm:$0xff] %v12811_v42  ;;  %v1377_v37 = vadd.f32 %v12758_v25, %v810_v60 }
 0x292   : > { %v2703_v38 = vsub.s32 %v12731_v9, %v2702_v27  ;;  %v2721_v48 = vsel %vm2720_vm11, 1, %v13923_v61  ;;  %4152 = vmatmul.bf16.gmra.mxu0 %v3948_v4  ;;  %v2738_v22 = vand.u32 65535, %v12793_v16  ;;  %v2739_v63 = vshrl.u32 %v12793_v16, 16  ;;  %v12817_v27 = vld [vmem:[#allocation2 + $0x44] sm:$0xff] }
 0x293   : > { %v2723_v23 = vadd.s32 %v2721_v48, %v2715_v29  ;;  %vm2724_vm12 = vc.u32 %v2722_v59, %v2718_v49  ;;  %v812_v29 = vadd.f32 %v811_v21, %v14057_v7  ;;  %v12819_v59 = vpop.f32.mrf.mxu0  ;;  %v12821_v48 = vpop.f32.mrf.mxu2  ;;  %v4756_v21 = vshrl.u32 %v12749_v10, 16  ;;  %v10577_v7 = vld [vmem:[#allocation2 + $0x4c] sm:$0xff]  }
 0x294   : > { %vm2865_vm14 = vcmp.ne.s32.totalorder %v2703_v38, 0  ;;  %vm2913_vm15 = vcmp.lt.s32.totalorder %v2703_v38, 0  ;;  %v3009_v9 = vadd.s32 24, %v2703_v38  ;;  %v2725_v33 = vsel %vm2724_vm12, 1, %v13923_v61  ;;  %14058 = vst [vmem:[#allocation18_spill] sm:$0xff] %v12819_v59  ;;  %4382 = vmatmul.bf16.gmra.mxu1 %v10577_v7 }
 0x295   : > { %vm2961_vm0 = vmand %vm2913_vm15, %vm2865_vm14  ;;  %v2727_v5 = vadd.s32 %v2725_v33, %v2723_v23  ;;  %v2741_v15 = vmul.u32 43691, %v2738_v22  ;;  %v2742_v49 = vmul.u32 43690, %v2738_v22  ;;  %v12809_v41 = vmul.u32 43691, %v2739_v63  ;;  %v10786_v22 = vld [vmem:[#allocation2 + $0x4c] sm:$0xff]  }
 0x296   : > { %v3057_v32 = vsel %vm2961_vm0, %v3009_v9, %v2703_v38  ;;  %v2744_v47 = vmul.u32 43690, %v2739_v63  ;;  %v3444_v33 = vsel %vm12804_vm13, %v3300_v18, 0.0  ;;  %v1378_v38 = vadd.f32 %v1196_v51, %v812_v29 }
 0x297   : > { %vm3105_vm3 = vcmp.ge.s32.totalorder %v3057_v32, 1  ;;  %vm3153_vm5 = vcmp.le.s32.totalorder %v3057_v32, 16  ;;  %v2728_v4 = vadd.s32 %v2727_v5, %v2717_v53  ;;  %v2745_v23 = vshll.u32 %v2742_v49, 16 }
 0x298   : > { %vm3201_vm7 = vmand %vm3105_vm3, %vm3153_vm5  ;;  %v2747_v25 = vshll.u32 %v12809_v41, 16  ;;  %v2746_v50 = vshrl.u32 %v2742_v49, 16  ;;  %v4760_v5 = vshll.u32 %v12817_v27, 16  ;;  %v5402_v18 = vshrl.u32 %v10786_v22, 16 }
 0x299   : > { %v3445_v60 = vsel %vm3201_vm7, %v3301_v24, 0.0  ;;  %v2729_v63 = vadd.s32 %v2728_v4, %v2719_v6  ;;  %vm2749_vm1 = vc.u32 %v2741_v15, %v2745_v23  ;;  %v2751_v9 = vadd.s32 %v2745_v23, %v2741_v15 }
 0x29a   : > { %v9810_v42 = vpack.c.bf16 %v3445_v60, %v3444_v33  ;;  %v2750_v53 = vsel %vm2749_vm1, 1, %v13923_v61  ;;  %v4758_v10 = vor.u32 %v4756_v21, %v12762_v14  ;;  %v12831_v24 = vrot.slane %v4760_v5, 1  ;;  %v12851_v60 = vpop.f32.mrf.mxu3 }
 0x29b   : > { %v2730_v32 = vshrl.u32 %v2729_v63, 4  ;;  %v2752_v34 = vadd.s32 %v2750_v53, %v2744_v47  ;;  %vm2753_vm8 = vc.u32 %v2751_v9, %v2747_v25  ;;  %v5405_v6 = vshll.u32 %v10786_v22, 16  ;;  %v12837_v47 = vld [vmem:[%s13902_s3] ss:$0 sm:$0xff]  ;;  %14059 = vst [vmem:[#allocation61_spill] sm:$0xff] %v12851_v60  ;;  %v12853_v9 = vpop.f32.mrf.mxu1 }
 0x29c   : > { %10243 = vst [vmem:[#allocation2 + $0xb8] sm:$0xff] %v9810_v42   ;;  %v2754_v51 = vsel %vm2753_vm8, 1, %v13923_v61  ;;  %v2748_v49 = vshrl.u32 %v12809_v41, 16  ;;  %v5404_v4 = vrot.slane %v5402_v18, 3  ;;  %v12840_v23 = vadd.f32 %v12837_v47, %v1377_v37 }
 0x29d   : > { %v2731_v15 = vmul.u32 24, %v2730_v32  ;;  %v2756_v29 = vadd.s32 %v2754_v51, %v2752_v34  ;;  %v4763_v33 = vsel %vm4695_vm2, %v4758_v10, %v12831_v24  ;;  %v5407_v14 = vrot.slane %v5405_v6, 4  ;;  %v12859_v32 = vpop.f32.mrf.mxu0 }
 0x29e   : > { %v12845_v25 = vadd.s32 368, %v11253_v11  ;;  %v12849_v21 = vadd.f32 %v12837_v47, %v1378_v38  ;;  %5007 = vmatmul.bf16.gmra.mxu2 %v4763_v33  ;;  %v3950_v63 = vshrl.u32 %v9810_v42, 16  ;;  %v3953_v5 = vshll.u32 %v9810_v42, 16  ;;  %14060 = vst [vmem:[#allocation62_spill] sm:$0xff] %v12859_v32 }
 0x29f   : > { %v2732_v22 = vsub.s32 %v12771_v12, %v2731_v15  ;;  %v2757_v41 = vadd.s32 %v2756_v29, %v2746_v50  ;;  %v12855_v37 = vor.u32 %v5407_v14, %v5404_v4  ;;  %v12861_v12 = vpop.f32.mrf.mxu2  ;;  %v14061_v29 = vld [vmem:[#allocation22_spill] sm:$0xff]  ;;  %v3302_v33 = vmax.f32 %v12840_v23, 0.0 }
 0x2a0   : > { %v2767_v7 = vand.u32 65535, %v12845_v25  ;;  %v2768_v53 = vshrl.u32 %v12845_v25, 16  ;;  %v3952_v42 = vrot.slane %v3950_v63, 3  ;;  %v4168_v4 = vadd.f32 %v11993_v36, %v14061_v29  ;;  %v9669_v29 = vld [vmem:[#allocation3 + $0x1f8] sm:$0xff] }
 0x2a1   : > { %vm2866_vm4 = vcmp.ne.s32.totalorder %v2732_v22, 0  ;;  %vm2914_vm9 = vcmp.lt.s32.totalorder %v2732_v22, 0  ;;  %v3010_v50 = vadd.s32 24, %v2732_v22  ;;  %v2758_v38 = vadd.s32 %v2757_v41, %v2748_v49  ;;  %7502 = vmatpush.bf16.msrb.mxu3 %v9669_v29 }
 0x2a2   : > { %vm2962_vm10 = vmand %vm2914_vm9, %vm2866_vm4  ;;  %v5409_v34 = vsel %vm3742_vm6, %v12773_v43, %v12855_v37  ;;  %v2770_v18 = vmul.u32 43691, %v2767_v7  ;;  %v2771_v51 = vmul.u32 43690, %v2767_v7  ;;  %v2772_v10 = vmul.u32 43691, %v2768_v53 }
 0x2a3   : > { %v3058_v6 = vsel %vm2962_vm10, %v3010_v50, %v2732_v22  ;;  %v2759_v15 = vshrl.u32 %v2758_v38, 4  ;;  %5669 = vmatmul.bf16.gmra.mxu3 %v5409_v34  ;;  %v2773_v14 = vmul.u32 43690, %v2768_v53  ;;  %v3303_v41 = vmax.f32 %v12849_v21, 0.0  ;;  %v4338_v38 = vpop.f32.mrf.mxu1 }
 0x2a4   : > { %v2774_v60 = vshll.u32 %v2771_v51, 16  ;;  %v2776_v32 = vshll.u32 %v2772_v10, 16  ;;  %v3955_v59 = vrot.slane %v3953_v5, 4  ;;  %vm3106_vm11 = vcmp.ge.s32.totalorder %v3058_v6, 1  ;;  %v12882_v5 = vpop.f32.mrf.mxu3 }
 0x2a5   : > { %v2760_v49 = vmul.u32 24, %v2759_v15  ;;  %vm3154_vm12 = vcmp.le.s32.totalorder %v3058_v6, 16  ;;  %v2775_v7 = vshrl.u32 %v2771_v51, 16  ;;  %v2777_v36 = vshrl.u32 %v2772_v10, 16  ;;  %14064 = vst [vmem:[#allocation22_spill] sm:$0xff] %v12882_v5  ;;  %v12889_v51 = vld [vmem:[#allocation2 + $0x4c] sm:$0xff]  ;;  %v12891_v10 = vpop.f32.mrf.mxu0 }
 0x2a6   : > { %vm2778_vm13 = vc.u32 %v2770_v18, %v2774_v60  ;;  %v2780_v43 = vadd.s32 %v2774_v60, %v2770_v18  ;;  %v12872_v50 = vor.u32 %v3955_v59, %v3952_v42  ;;  %v12875_v53 = vadd.s32 376, %v11253_v11  ;;  %vm12877_vm15 = vmand %vm3106_vm11, %vm3154_vm12  ;;  %v9661_v59 = vld [vmem:[#allocation3 + $0x1b8] sm:$0xff] }
 0x2a7   : > { %v2761_v22 = vsub.s32 %v12793_v16, %v2760_v49  ;;  %v2779_v63 = vsel %vm2778_vm13, 1, %v13923_v61  ;;  %v4973_v6 = vpop.f32.mrf.mxu2  ;;  %v4458_v42 = vadd.f32 %v4338_v38, %v4168_v4  ;;  %7212 = vmatpush.bf16.msrb.mxu2 %v9661_v59  ;;  %v4169_v49 = vadd.f32 %v12034_v39, %v11435_v40 }
 0x2a8   : > { %v2781_v23 = vadd.s32 %v2779_v63, %v2773_v14  ;;  %vm2782_vm14 = vc.u32 %v2780_v43, %v2776_v32  ;;  %v3957_v11 = vsel %vm3742_vm6, %v12790_v3, %v12872_v50  ;;  %v2796_v32 = vand.u32 65535, %v12875_v53  ;;  %v9653_v14 = vld [vmem:[#allocation3 + $0x178] sm:$0xff] }
 0x2a9   : > { %vm2867_vm0 = vcmp.ne.s32.totalorder %v2761_v22, 0  ;;  %vm2915_vm3 = vcmp.lt.s32.totalorder %v2761_v22, 0  ;;  %v3011_v60 = vadd.s32 24, %v2761_v22  ;;  %v2783_v16 = vsel %vm2782_vm14, 1, %v13923_v61  ;;  %4157 = vmatmul.bf16.gmra.mxu0 %v3957_v11  ;;  %v10788_v43 = vld [vmem:[#allocation2 + $0x54] sm:$0xff]   ;;  %6550 = vmatpush.bf16.msrb.mxu1 %v9653_v14 }
 0x2aa   : > { %vm2963_vm5 = vmand %vm2915_vm3, %vm2867_vm0  ;;  %v2785_v34 = vadd.s32 %v2783_v16, %v2781_v23  ;;  %v2797_v18 = vshrl.u32 %v12875_v53, 16  ;;  %v10579_v63 = vld [vmem:[#allocation2 + $0x54] sm:$0xff]   ;;  %v3446_v23 = vsel %vm12877_vm15, %v3302_v33, 0.0  ;;  %v2799_v16 = vmul.u32 43691, %v2796_v32 }
 0x2ab   : > { %v3059_v15 = vsel %vm2963_vm5, %v3011_v60, %v2761_v22  ;;  %v2800_v5 = vmul.u32 43690, %v2796_v32  ;;  %v4764_v38 = vshrl.u32 %v12817_v27, 16  ;;  %v4768_v40 = vshll.u32 %v12889_v51, 16  ;;  %4387 = vmatmul.bf16.gmra.mxu1 %v10579_v63  ;;  %v4340_v27 = vpop.f32.mrf.mxu1 }
 0x2ac   : > { %vm3107_vm7 = vcmp.ge.s32.totalorder %v3059_v15, 1  ;;  %vm3155_vm1 = vcmp.le.s32.totalorder %v3059_v15, 16  ;;  %v2786_v3 = vadd.s32 %v2785_v34, %v2775_v7  ;;  %v2801_v22 = vmul.u32 43691, %v2797_v18  ;;  %v5635_v29 = vpop.f32.mrf.mxu3 }
 0x2ad   : > { %vm3203_vm8 = vmand %vm3107_vm7, %vm3155_vm1  ;;  %v2802_v7 = vmul.u32 43690, %v2797_v18  ;;  %v2803_v59 = vshll.u32 %v2800_v5, 16  ;;  %v4766_v33 = vor.u32 %v4764_v38, %v12831_v24  ;;  %v12900_v21 = vrot.slane %v4768_v40, 1  ;;  %v9701_v40 = vld [vmem:[#allocation3 + $0x238] sm:$0xff] }
 0x2ae   : > { %v3447_v4 = vsel %vm3203_vm8, %v3303_v41, 0.0  ;;  %v2787_v60 = vadd.s32 %v2786_v3, %v2777_v36  ;;  %v2805_v34 = vshll.u32 %v2801_v22, 16  ;;  %v5411_v32 = vshrl.u32 %v10788_v43, 16  ;;  %8136 = vmatpush.bf16.msrb.mxu0 %v9701_v40 }
 0x2af   : > { %v9815_v39 = vpack.c.bf16 %v3447_v4, %v3446_v23  ;;  %v2804_v15 = vshrl.u32 %v2800_v5, 16  ;;  %vm2807_vm4 = vc.u32 %v2799_v16, %v2803_v59  ;;  %v2809_v41 = vadd.s32 %v2803_v59, %v2799_v16  ;;  %v12905_v23 = vpop.f32.mrf.mxu0  ;;  %v4975_v24 = vpop.f32.mrf.mxu2 }
 0x2b0   : > { %v2788_v11 = vshrl.u32 %v2787_v60, 4  ;;  %v5414_v36 = vshll.u32 %v10788_v43, 16  ;;  %v2808_v3 = vsel %vm2807_vm4, 1, %v13923_v61  ;;  %v4771_v18 = vsel %vm4695_vm2, %v4766_v33, %v12900_v21  ;;  %14065 = vst [vmem:[#allocation63_spill] sm:$0xff] %v12905_v23 }
 0x2b1   : > { %10244 = vst [vmem:[#allocation2 + $0xc0] sm:$0xff] %v9815_v39   ;;  %v5413_v63 = vrot.slane %v5411_v32, 3  ;;  %v2810_v4 = vadd.s32 %v2808_v3, %v2802_v7  ;;  %vm2811_vm9 = vc.u32 %v2809_v41, %v2805_v34  ;;  %5012 = vmatmul.bf16.gmra.mxu2 %v4771_v18  ;;  %v5093_v5 = vadd.f32 %v4973_v6, %v4458_v42  ;;  %v14066_v32 = vld [vmem:[#allocation19_spill] sm:$0xff]  ;;  %v14067_v7 = vld [vmem:[#allocation21_spill] sm:$0xff] }
 0x2b2   : > { %v2789_v14 = vmul.u32 24, %v2788_v11  ;;  %v5416_v60 = vrot.slane %v5414_v36, 4  ;;  %v2812_v43 = vsel %vm2811_vm9, 1, %v13923_v61  ;;  %v4459_v38 = vadd.f32 %v4340_v27, %v4169_v49  ;;  %v12917_v6 = vld [vmem:[#allocation2 + $0x54] sm:$0xff] }
 0x2b3   : > { %v2806_v39 = vshrl.u32 %v2801_v22, 16  ;;  %v2814_v59 = vadd.s32 %v2812_v43, %v2810_v4  ;;  %v12911_v33 = vadd.f32 %v5635_v29, %v5093_v5  ;;  %v815_v23 = vadd.f32 %v12813_v17, %v14066_v32  ;;  %v14068_v49 = vld [vmem:[#allocation23_spill] sm:$0xff]  ;;  %v4343_v18 = vpop.f32.mrf.mxu1 }
 0x2b4   : > { %v2790_v16 = vsub.s32 %v12845_v25, %v2789_v14  ;;  %v12909_v11 = vor.u32 %v5416_v60, %v5413_v63  ;;  %v817_v34 = vadd.f32 %v12853_v9, %v14067_v7  ;;  %v5094_v41 = vadd.f32 %v4975_v24, %v4459_v38  ;;  %v10790_v25 = vld [vmem:[#allocation2 + $0x5c] sm:$0xff]   ;;  %v5637_v3 = vpop.f32.mrf.mxu3 }
 0x2b5   : > { %v2815_v61 = vadd.s32 %v2814_v59, %v2804_v15  ;;  %v4170_v22 = vadd.f32 %v12056_v35, %v14068_v49  ;;  %v1379_v17 = vadd.f32 %v12821_v48, %v815_v23  ;;  %v5420_v24 = vshrl.u32 %v10790_v25, 16  ;;  %v10581_v38 = vld [vmem:[#allocation2 + $0x5c] sm:$0xff]  }
 0x2b6   : > { %vm2868_vm10 = vcmp.ne.s32.totalorder %v2790_v16, 0  ;;  %vm2916_vm11 = vcmp.lt.s32.totalorder %v2790_v16, 0  ;;  %v5418_v42 = vsel %vm3742_vm6, %v12855_v37, %v12909_v11  ;;  %v3012_v9 = vadd.s32 24, %v2790_v16 }
 0x2b7   : > { %5674 = vmatmul.bf16.gmra.mxu3 %v5418_v42  ;;  %v1380_v29 = vadd.f32 %v12861_v12, %v817_v34  ;;  %v2816_v27 = vadd.s32 %v2815_v61, %v2806_v39  ;;  %vm2964_vm12 = vmand %vm2916_vm11, %vm2868_vm10  ;;  %v12928_v15 = vadd.f32 %v5637_v3, %v5094_v41  ;;  %v4460_v63 = vadd.f32 %v4343_v18, %v4170_v22  ;;  %v12931_v35 = vpop.f32.mrf.mxu0  ;;  %v4978_v48 = vpop.f32.mrf.mxu2 }
 0x2b8   : > { %v3602_v36 = vld [vmem:[#allocation2 + $0xc0] sm:$0xf]  ;;  %v4776_v37 = vshll.u32 %v12917_v6, 16  ;;  %v5423_v12 = vshll.u32 %v10790_v25, 16  ;;  %v4171_v60 = vadd.f32 %v12093_v19, %v11533_v26  ;;  %v3256_v5 = vadd.f32 %v12837_v47, %v1379_v17 }
 0x2b9   : > { %v12926_v14 = vunpack.c.l.b16 %v3602_v36  ;;  %v2817_v23 = vshrl.u32 %v2816_v27, 4  ;;  %v5095_v43 = vadd.f32 %v4978_v48, %v4460_v63  ;;  %v3060_v40 = vsel %vm2964_vm12, %v3012_v9, %v2790_v16 }
 0x2ba   : > { %v3257_v7 = vadd.f32 %v12837_v47, %v1380_v29  ;;  %v4772_v34 = vshrl.u32 %v12889_v51, 16  ;;  %v4778_v41 = vrot.slane %v4776_v37, 1  ;;  %v5422_v61 = vrot.slane %v5420_v24, 3 }
 0x2bb   : > { %v3741_v4 = vpack.c.b16 %v12926_v14, %v12926_v14  ;;  %v2818_v39 = vmul.u32 24, %v2817_v23  ;;  %4392 = vmatmul.bf16.gmra.mxu1 %v10581_v38  ;;  %v5425_v26 = vrot.slane %v5423_v12, 4  ;;  %vm3108_vm13 = vcmp.ge.s32.totalorder %v3060_v40, 1  ;;  %v4345_v36 = vpop.f32.mrf.mxu1  ;;  %v12951_v23 = vld [vmem:[#allocation2 + $0x5c] sm:$0xff] }
 0x2bc   : > { %vm3156_vm14 = vcmp.le.s32.totalorder %v3060_v40, 16  ;;  %v3304_v19 = vmax.f32 %v3256_v5, 0.0  ;;  %v4774_v16 = vor.u32 %v4772_v34, %v12900_v21  ;;  %v5640_v47 = vpop.f32.mrf.mxu3  ;;  %v3305_v51 = vmax.f32 %v3257_v7, 0.0  ;;  %v14069_v5 = vld [vmem:[#allocation24_spill] sm:$0xff] }
 0x2bd   : > { %v3959_v59 = vshrl.u32 %v3741_v4, 16  ;;  %v3962_v32 = vshll.u32 %v3741_v4, 16  ;;  %v2819_v25 = vsub.s32 %v12875_v53, %v2818_v39  ;;  %v12943_v29 = vadd.f32 %v5640_v47, %v5095_v43  ;;  %vm3204_vm5 = vmand %vm3108_vm13, %vm3156_vm14 }
 0x2be   : > { %v4779_v9 = vsel %vm4695_vm2, %v4774_v16, %v4778_v41  ;;  %v4461_v53 = vadd.f32 %v4345_v36, %v4171_v60  ;;  %v5426_v63 = vor.u32 %v5425_v26, %v5422_v61  ;;  %v3448_v24 = vsel %vm3204_vm5, %v3304_v19, 0.0  ;;  %v10792_v60 = vld [vmem:[#allocation2 + $0x64] sm:$0xff]  }
 0x2bf   : > { %v3961_v42 = vrot.slane %v3959_v59, 3  ;;  %v3964_v49 = vrot.slane %v3962_v32, 4  ;;  %vm2869_vm15 = vcmp.ne.s32.totalorder %v2819_v25, 0  ;;  %vm2917_vm0 = vcmp.lt.s32.totalorder %v2819_v25, 0  ;;  %v12945_v27 = vpop.f32.mrf.mxu0  ;;  %v4980_v3 = vpop.f32.mrf.mxu2 }
 0x2c0   : > { %v3013_v22 = vadd.s32 24, %v2819_v25  ;;  %vm2965_vm3 = vmand %vm2917_vm0, %vm2869_vm15  ;;  %v5096_v37 = vadd.f32 %v4980_v3, %v4461_v53  ;;  %v5427_v12 = vsel %vm3742_vm6, %v12909_v11, %v5426_v63  ;;  %v4172_v43 = vadd.f32 %v12110_v45, %v14069_v5  ;;  %v10583_v11 = vld [vmem:[#allocation2 + $0x64] sm:$0xff]   ;;  %v10379_v53 = vld [vmem:[#allocation2 + $0x10] sm:$0xff]  }
 0x2c1   : > { %v3965_v17 = vor.u32 %v3964_v49, %v3961_v42  ;;  %5017 = vmatmul.bf16.gmra.mxu2 %v4779_v9  ;;  %v4784_v59 = vshll.u32 %v12951_v23, 16  ;;  %v5429_v34 = vshrl.u32 %v10792_v60, 16  ;;  %v5432_v61 = vshll.u32 %v10792_v60, 16 }
 0x2c2   : > { %v3061_v21 = vsel %vm2965_vm3, %v3013_v22, %v2819_v25  ;;  %v4780_v42 = vshrl.u32 %v12917_v6, 16  ;;  %v4173_v19 = vadd.f32 %v12148_v58, %v11614_v46  ;;  %v10794_v58 = vld [vmem:[#allocation2 + $0x6c] sm:$0xff]  }
 0x2c3   : > { %v3966_v18 = vsel %vm3742_vm6, %v12872_v50, %v3965_v17  ;;  %vm3109_vm7 = vcmp.ge.s32.totalorder %v3061_v21, 1  ;;  %vm3157_vm1 = vcmp.le.s32.totalorder %v3061_v21, 16  ;;  %v4348_v38 = vpop.f32.mrf.mxu1  ;;  %v4786_v49 = vrot.slane %v4784_v59, 1 }
 0x2c4   : > { %4162 = vmatmul.bf16.gmra.mxu0 %v3966_v18  ;;  %vm3205_vm8 = vmand %vm3109_vm7, %vm3157_vm1  ;;  %v5642_v50 = vpop.f32.mrf.mxu3  ;;  %v4462_v39 = vadd.f32 %v4348_v38, %v4172_v43  ;;  %v5431_v45 = vrot.slane %v5429_v34, 3  ;;  %v5434_v26 = vrot.slane %v5432_v61, 4  ;;  %v4782_v16 = vor.u32 %v4780_v42, %v4778_v41  ;;  %v9660_v18 = vld [vmem:[#allocation3 + $0x1b0] sm:$0xff]  ;;  %v14070_v41 = vld [vmem:[#allocation25_spill] sm:$0xff] }
 0x2c5   : > { %v3449_v48 = vsel %vm3205_vm8, %v3305_v51, 0.0  ;;  %v12957_v40 = vadd.f32 %v5642_v50, %v5096_v37  ;;  %v12970_v37 = vld [vmem:[#allocation2 + $0x64] sm:$0xff]  ;;  %7213 = vmatpush.bf16.msrb.mxu2 %v9660_v18  ;;  %v5441_v59 = vshll.u32 %v10794_v58, 16  ;;  %v4788_v34 = vshrl.u32 %v12951_v23, 16 }
 0x2c6   : > { %v9820_v4 = vpack.c.bf16 %v3449_v48, %v3448_v24  ;;  %v4787_v47 = vsel %vm4695_vm2, %v4782_v16, %v4786_v49  ;;  %v5435_v3 = vor.u32 %v5434_v26, %v5431_v45  ;;  %v4174_v24 = vadd.f32 %v12169_v54, %v14070_v41  ;;  %v9668_v48 = vld [vmem:[#allocation3 + $0x1f0] sm:$0xff] }
 0x2c7   : > { %5679 = vmatmul.bf16.gmra.mxu3 %v5427_v12  ;;  %v12960_v32 = vpop.f32.mrf.mxu0  ;;  %v4983_v7 = vpop.f32.mrf.mxu2  ;;  %v4792_v50 = vshll.u32 %v12970_v37, 16  ;;  %v4175_v42 = vadd.f32 %v12200_v13, %v11696_v20  ;;  %v4790_v45 = vor.u32 %v4788_v34, %v4786_v49  ;;  %v10796_v20 = vld [vmem:[#allocation2 + $0x74] sm:$0xff]   ;;  %v4176_v13 = vadd.f32 %v12221_v62, %v11738_v44  ;;  %v14071_v62 = vld [vmem:[#allocation26_spill] sm:$0xff] }
 0x2c8   : > { %10245 = vst [vmem:[#allocation2 + $0xc8] sm:$0xff] %v9820_v4   ;;  %v5097_v25 = vadd.f32 %v4983_v7, %v4462_v39  ;;  %v5436_v46 = vsel %vm3742_vm6, %v5426_v63, %v5435_v3  ;;  %v9652_v4 = vld [vmem:[#allocation3 + $0x170] sm:$0xff]  ;;  %7503 = vmatpush.bf16.msrb.mxu3 %v9668_v48  ;;  %v5438_v39 = vshrl.u32 %v10794_v58, 16 }
 0x2c9   : > { %6551 = vmatpush.bf16.msrb.mxu1 %v9652_v4  ;;  %v10585_v7 = vld [vmem:[#allocation2 + $0x6c] sm:$0xff]   ;;  %v4794_v54 = vrot.slane %v4792_v50, 1  ;;  %v10587_v50 = vld [vmem:[#allocation2 + $0x74] sm:$0xff]  }
 0x2cb   : > { %4397 = vmatmul.bf16.gmra.mxu1 %v10583_v11  ;;  %v4350_v17 = vpop.f32.mrf.mxu1  ;;  %v5443_v11 = vrot.slane %v5441_v59, 4  ;;  %v4795_v16 = vsel %vm4695_vm2, %v4790_v45, %v4794_v54  ;;  %v4177_v59 = vadd.f32 %v12250_v2, %v14071_v62 }
 0x2cc   : > { %v5645_v22 = vpop.f32.mrf.mxu3  ;;  %v4463_v51 = vadd.f32 %v4350_v17, %v4173_v19 }
 0x2cd   : > { %v12966_v36 = vadd.f32 %v5645_v22, %v5097_v25  ;;  %v5440_v25 = vrot.slane %v5438_v39, 3 }
 0x2cf   : > { %v4985_v9 = vpop.f32.mrf.mxu2  ;;  %v12968_v6 = vpop.f32.mrf.mxu0  ;;  %v5444_v23 = vor.u32 %v5443_v11, %v5440_v25 }
 0x2d0   : > { %v5098_v21 = vadd.f32 %v4985_v9, %v4463_v51  ;;  %v10380_v51 = vld [vmem:[#allocation2 + $0x18] sm:$0xff]  }
 0x2d1   : > { %5022 = vmatmul.bf16.gmra.mxu2 %v4787_v47  ;;  %v5445_v18 = vsel %vm3742_vm6, %v5435_v3, %v5444_v23  ;;  %v4796_v3 = vshrl.u32 %v12970_v37, 16 }
 0x2d3   : > { %v4353_v60 = vpop.f32.mrf.mxu1 }
 0x2d4   : > { %5924 = vmatmul.bf16.vlgmr.msra.gmra.mxu0 %v10379_v53  ;;  %v5647_v12 = vpop.f32.mrf.mxu3  ;;  %v4464_v43 = vadd.f32 %v4353_v60, %v4174_v24  ;;  %v9700_v53 = vld [vmem:[#allocation3 + $0x230] sm:$0xff]  ;;  %v5450_v60 = vshll.u32 %v10796_v20, 16 }
 0x2d5   : > { %v12975_v5 = vadd.f32 %v5647_v12, %v5098_v21  ;;  %v9587_v21 = vld [vmem:[#allocation2 + $0x6c] sm:$0xff]  ;;  %8137 = vmatpush.bf16.msrb.mxu0 %v9700_v53  ;;  %v5447_v12 = vshrl.u32 %v10796_v20, 16 }
 0x2d6   : > { %v4800_v48 = vshll.u32 %v9587_v21, 16  ;;  %v5452_v44 = vrot.slane %v5450_v60, 4 }
 0x2d7   : > { %5684 = vmatmul.bf16.gmra.mxu3 %v5436_v46  ;;  %v4988_v38 = vpop.f32.mrf.mxu2  ;;  %v12979_v61 = vpop.f32.mrf.mxu0  ;;  %v5449_v39 = vrot.slane %v5447_v12, 3 }
 0x2d8   : > { %v5099_v63 = vadd.f32 %v4988_v38, %v4464_v43  ;;  %v4802_v38 = vrot.slane %v4800_v48, 1 }
 0x2d9   : > { %v5453_v37 = vor.u32 %v5452_v44, %v5449_v39 }
 0x2db   : > { %4402 = vmatmul.bf16.gmra.mxu1 %v10585_v7  ;;  %v4355_v19 = vpop.f32.mrf.mxu1  ;;  %v5454_v2 = vsel %vm3742_vm6, %v5444_v23, %v5453_v37  ;;  %v4804_v23 = vshrl.u32 %v9587_v21, 16 }
 0x2dc   : > { %v5650_v26 = vpop.f32.mrf.mxu3  ;;  %v4465_v17 = vadd.f32 %v4355_v19, %v4175_v42  ;;  %v10381_v19 = vld [vmem:[#allocation2 + $0x20] sm:$0xff]  }
 0x2dd   : > { %v12984_v22 = vadd.f32 %v5650_v26, %v5099_v63  ;;  %v4798_v63 = vor.u32 %v4796_v3, %v4794_v54  ;;  %v10798_v54 = vld [vmem:[#allocation2 + $0x7c] sm:$0xff]  }
 0x2df   : > { %v4990_v47 = vpop.f32.mrf.mxu2  ;;  %v12989_v49 = vpop.f32.mrf.mxu0  ;;  %v4803_v25 = vsel %vm4695_vm2, %v4798_v63, %v4802_v38  ;;  %v10382_v63 = vld [vmem:[#allocation2 + $0x28] sm:$0xff]  }
 0x2e0   : > { %v5100_v9 = vadd.f32 %v4990_v47, %v4465_v17  ;;  %v13001_v17 = vld [vmem:[#allocation2 + $0x74] sm:$0xff]  ;;  %v4178_v47 = vadd.f32 %v12275_v56, %v11804_v52  ;;  %v4179_v56 = vadd.f32 %v12321_v31, %v11834_v55  ;;  %v10800_v31 = vld [vmem:[#allocation2 + $0x84] sm:$0xff]  }
 0x2e1   : > { %5027 = vmatmul.bf16.gmra.mxu2 %v4795_v16  ;;  %v4808_v20 = vshll.u32 %v13001_v17, 16 }
 0x2e3   : > { %v4358_v58 = vpop.f32.mrf.mxu1  ;;  %v4810_v12 = vrot.slane %v4808_v20, 1  ;;  %v5468_v20 = vshll.u32 %v10800_v31, 16 }
 0x2e4   : > { %5929 = vmatmul.bf16.gmra.mxu0 %v10380_v51  ;;  %v5652_v46 = vpop.f32.mrf.mxu3  ;;  %v4466_v24 = vadd.f32 %v4358_v58, %v4176_v13  ;;  %v5459_v58 = vshll.u32 %v10798_v54, 16 }
 0x2e5   : > { %v12991_v41 = vadd.f32 %v5652_v46, %v5100_v9  ;;  %v5456_v46 = vshrl.u32 %v10798_v54, 16  ;;  %v9651_v54 = vld [vmem:[#allocation3 + $0x168] sm:$0xff] }
 0x2e6   : > { %v5461_v52 = vrot.slane %v5459_v58, 4  ;;  %6552 = vmatpush.bf16.msrb.mxu1 %v9651_v54  ;;  %v4812_v58 = vshrl.u32 %v13001_v17, 16 }
 0x2e7   : > { %5689 = vmatmul.bf16.gmra.mxu3 %v5445_v18  ;;  %v4993_v4 = vpop.f32.mrf.mxu2  ;;  %v12997_v11 = vpop.f32.mrf.mxu0  ;;  %v5458_v60 = vrot.slane %v5456_v46, 3  ;;  %v10591_v46 = vld [vmem:[#allocation2 + $0x84] sm:$0xff]  }
 0x2e8   : > { %v5101_v43 = vadd.f32 %v4993_v4, %v4466_v24  ;;  %v10589_v4 = vld [vmem:[#allocation2 + $0x7c] sm:$0xff]  }
 0x2eb   : > { %4407 = vmatmul.bf16.gmra.mxu1 %v10587_v50  ;;  %v4360_v34 = vpop.f32.mrf.mxu1 }
 0x2ec   : > { %v5655_v7 = vpop.f32.mrf.mxu3  ;;  %v4467_v45 = vadd.f32 %v4360_v34, %v4177_v59  ;;  %v9659_v34 = vld [vmem:[#allocation3 + $0x1a8] sm:$0xff] }
 0x2ed   : > { %v12999_v42 = vadd.f32 %v5655_v7, %v5101_v43  ;;  %v4806_v43 = vor.u32 %v4804_v23, %v4802_v38  ;;  %v5462_v7 = vor.u32 %v5461_v52, %v5458_v60  ;;  %7214 = vmatpush.bf16.msrb.mxu2 %v9659_v34  ;;  %v14072_v38 = vld [vmem:[#allocation27_spill] sm:$0xff]  ;;  %v4814_v60 = vor.u32 %v4812_v58, %v4810_v12  ;;  %v9590_v34 = vld [vmem:[#allocation2 + $0x84] sm:$0xff] }
 0x2ee   : > { %v4181_v52 = vadd.f32 %v12376_v28, %v11905_v30  ;;  %v14073_v30 = vld [vmem:[#allocation28_spill] sm:$0xff] }
 0x2ef   : > { %v4995_v26 = vpop.f32.mrf.mxu2  ;;  %v13009_v24 = vpop.f32.mrf.mxu0  ;;  %v4811_v39 = vsel %vm4695_vm2, %v4806_v43, %v4810_v12  ;;  %v5463_v55 = vsel %vm3742_vm6, %v5453_v37, %v5462_v7  ;;  %v4182_v28 = vadd.f32 %v12401_v8, %v14073_v30 }
 0x2f0   : > { %v5102_v16 = vadd.f32 %v4995_v26, %v4467_v45  ;;  %v9589_v45 = vld [vmem:[#allocation2 + $0x7c] sm:$0xff]  ;;  %v4180_v26 = vadd.f32 %v12341_v1, %v14072_v38 }
 0x2f1   : > { %5032 = vmatmul.bf16.gmra.mxu2 %v4803_v25 }
 0x2f3   : > { %v4363_v9 = vpop.f32.mrf.mxu1 }
 0x2f4   : > { %5934 = vmatmul.bf16.gmra.mxu0 %v10381_v19  ;;  %v5657_v51 = vpop.f32.mrf.mxu3  ;;  %v4468_v18 = vadd.f32 %v4363_v9, %v4178_v47  ;;  %v9667_v19 = vld [vmem:[#allocation3 + $0x1e8] sm:$0xff]  ;;  %v4816_v9 = vshll.u32 %v9589_v45, 16 }
 0x2f5   : > { %v13006_v53 = vadd.f32 %v5657_v51, %v5102_v16  ;;  %7504 = vmatpush.bf16.msrb.mxu3 %v9667_v19 }
 0x2f7   : > { %5694 = vmatmul.bf16.gmra.mxu3 %v5454_v2  ;;  %v4998_v13 = vpop.f32.mrf.mxu2 }
 0x2f8   : > { %v5103_v48 = vadd.f32 %v4998_v13, %v4468_v18  ;;  %v5465_v18 = vshrl.u32 %v10800_v31, 16 }
 0x2fa   : > { %v5467_v1 = vrot.slane %v5465_v18, 3  ;;  %v4820_v18 = vshrl.u32 %v9589_v45, 16  ;;  %v14074_v45 = vld [vmem:[#allocation29_spill] sm:$0xff] }
 0x2fb   : > { %4412 = vmatmul.bf16.gmra.mxu1 %v10589_v4  ;;  %v4365_v3 = vpop.f32.mrf.mxu1  ;;  %v5470_v4 = vrot.slane %v5468_v20, 4 }
 0x2fc   : > { %v5660_v50 = vpop.f32.mrf.mxu3  ;;  %v4469_v62 = vadd.f32 %v4365_v3, %v4179_v56 }
 0x2fd   : > { %v13014_v44 = vadd.f32 %v5660_v50, %v5103_v48  ;;  %v13016_v25 = vpop.f32.mrf.mxu0  ;;  %v4818_v48 = vrot.slane %v4816_v9, 1  ;;  %v10593_v9 = vld [vmem:[#allocation2 + $0x8c] sm:$0xff]  }
 0x2ff   : > { %v5000_v59 = vpop.f32.mrf.mxu2  ;;  %v4819_v50 = vsel %vm4695_vm2, %v4814_v60, %v4818_v48 }
 0x300   : > { %v5104_v21 = vadd.f32 %v5000_v59, %v4469_v62  ;;  %v5471_v62 = vor.u32 %v5470_v4, %v5467_v1  ;;  %v10384_v1 = vld [vmem:[#allocation2 + $0x38] sm:$0xff]  }
 0x301   : > { %5037 = vmatmul.bf16.gmra.mxu2 %v4811_v39  ;;  %v10383_v39 = vld [vmem:[#allocation2 + $0x30] sm:$0xff]  }
 0x302   : > { %v5472_v12 = vsel %vm3742_vm6, %v5462_v7, %v5471_v62 }
 0x303   : > { %v4368_v2 = vpop.f32.mrf.mxu1 }
 0x304   : > { %5939 = vmatmul.bf16.gmra.mxu0 %v10382_v63  ;;  %v5662_v16 = vpop.f32.mrf.mxu3  ;;  %v4470_v51 = vadd.f32 %v4368_v2, %v4180_v26  ;;  %v9699_v63 = vld [vmem:[#allocation3 + $0x228] sm:$0xff] }
 0x305   : > { %v13021_v47 = vadd.f32 %v5662_v16, %v5104_v21  ;;  %v13024_v23 = vpop.f32.mrf.mxu0  ;;  %8138 = vmatpush.bf16.msrb.mxu0 %v9699_v63  ;;  %v4824_v16 = vshll.u32 %v9590_v34, 16 }
 0x307   : > { %5699 = vmatmul.bf16.gmra.mxu3 %v5463_v55  ;;  %v10802_v55 = vld [vmem:[#allocation2 + $0x8c] sm:$0xff]   ;;  %v4826_v20 = vrot.slane %v4824_v16, 1  ;;  %v10595_v16 = vld [vmem:[#allocation2 + $0x94] sm:$0xff]  }
 0x308   : > { %v5474_v54 = vshrl.u32 %v10802_v55, 16 }
 0x30a   : > { %v5476_v7 = vrot.slane %v5474_v54, 3  ;;  %v4828_v54 = vshrl.u32 %v9590_v34, 16 }
 0x30b   : > { %4417 = vmatmul.bf16.gmra.mxu1 %v10591_v46  ;;  %v4370_v43 = vpop.f32.mrf.mxu1  ;;  %v4822_v46 = vor.u32 %v4820_v18, %v4818_v48 }
 0x30c   : > { %v5003_v13 = vpop.f32.mrf.mxu2  ;;  %v4471_v17 = vadd.f32 %v4370_v43, %v4181_v52  ;;  %v13041_v43 = vld [vmem:[#allocation2 + $0x8c] sm:$0xff] }
 0x30d   : > { %v5105_v37 = vadd.f32 %v5003_v13, %v4470_v51  ;;  %v5477_v51 = vshll.u32 %v10802_v55, 16  ;;  %v4827_v8 = vsel %vm4695_vm2, %v4822_v46, %v4826_v20 }
 0x30f   : > { %v5665_v56 = vpop.f32.mrf.mxu3  ;;  %v13036_v2 = vpop.f32.mrf.mxu0  ;;  %v5479_v13 = vrot.slane %v5477_v51, 4 }
 0x310   : > { %v13029_v3 = vadd.f32 %v5665_v56, %v5105_v37 }
 0x311   : > { %5042 = vmatmul.bf16.gmra.mxu2 %v4819_v50  ;;  %v5480_v4 = vor.u32 %v5479_v13, %v5476_v7  ;;  %v4183_v50 = vadd.f32 %v12431_v57, %v14074_v45  ;;  %v4830_v7 = vor.u32 %v4828_v54, %v4826_v20  ;;  %v14076_v45 = vld [vmem:[#allocation32_spill] sm:$0xff] }
 0x313   : > { %v4373_v38 = vpop.f32.mrf.mxu1 }
 0x314   : > { %5944 = vmatmul.bf16.gmra.mxu0 %v10383_v39  ;;  %v5005_v59 = vpop.f32.mrf.mxu2  ;;  %v4472_v19 = vadd.f32 %v4373_v38, %v4182_v28  ;;  %v5481_v39 = vsel %vm3742_vm6, %v5471_v62, %v5480_v4  ;;  %v4832_v28 = vshll.u32 %v13041_v43, 16 }
 0x315   : > { %v5106_v21 = vadd.f32 %v5005_v59, %v4471_v17  ;;  %v10804_v17 = vld [vmem:[#allocation2 + $0x94] sm:$0xff]   ;;  %v14075_v59 = vld [vmem:[#allocation30_spill] sm:$0xff] }
 0x316   : > { %v4184_v63 = vadd.f32 %v12461_v0, %v14075_v59  ;;  %v5483_v38 = vshrl.u32 %v10804_v17, 16  ;;  %v4834_v62 = vrot.slane %v4832_v28, 1  ;;  %v14079_v28 = vld [vmem:[#allocation20_spill] sm:$0xff] }
 0x317   : > { %5704 = vmatmul.bf16.gmra.mxu3 %v5472_v12  ;;  %v5667_v31 = vpop.f32.mrf.mxu3  ;;  %v13039_v52 = vpop.f32.mrf.mxu0 }
 0x318   : > { %v13034_v26 = vadd.f32 %v5667_v31, %v5106_v21  ;;  %v5485_v0 = vrot.slane %v5483_v38, 3  ;;  %v4835_v46 = vsel %vm4695_vm2, %v4830_v7, %v4834_v62 }
 0x31b   : > { %4422 = vmatmul.bf16.gmra.mxu1 %v10593_v9  ;;  %v4375_v37 = vpop.f32.mrf.mxu1 }
 0x31c   : > { %v4473_v21 = vadd.f32 %v4375_v37, %v4183_v50  ;;  %v10385_v37 = vld [vmem:[#allocation2 + $0x40] sm:$0xff]   ;;  %v14077_v50 = vld [vmem:[#allocation50_spill] sm:$0xff] }
 0x321   : > { %v5008_v58 = vpop.f32.mrf.mxu2  ;;  %5047 = vmatmul.bf16.gmra.mxu2 %v4827_v8 }
 0x322   : > { %v5107_v60 = vadd.f32 %v5008_v58, %v4472_v19  ;;  %v5486_v19 = vshll.u32 %v10804_v17, 16 }
 0x323   : > { %v4378_v12 = vpop.f32.mrf.mxu1 }
 0x324   : > { %5949 = vmatmul.bf16.gmra.mxu0 %v10384_v1  ;;  %v4474_v30 = vadd.f32 %v4378_v12, %v4184_v63  ;;  %v5488_v18 = vrot.slane %v5486_v19, 4  ;;  %v13056_v1 = vld [vmem:[#allocation2 + $0x94] sm:$0xff]  ;;  %v9666_v12 = vld [vmem:[#allocation3 + $0x1e0] sm:$0xff] }
 0x325   : > { %v4840_v63 = vshll.u32 %v13056_v1, 16  ;;  %7505 = vmatpush.bf16.msrb.mxu3 %v9666_v12 }
 0x326   : > { %v5670_v56 = vpop.f32.mrf.mxu3  ;;  %v13051_v51 = vpop.f32.mrf.mxu0  ;;  %v5489_v8 = vor.u32 %v5488_v18, %v5485_v0  ;;  %v4836_v18 = vshrl.u32 %v13041_v43, 16 }
 0x327   : > { %v13046_v48 = vadd.f32 %v5670_v56, %v5107_v60  ;;  %5709 = vmatmul.bf16.gmra.mxu3 %v5481_v39  ;;  %v10806_v56 = vld [vmem:[#allocation2 + $0x9c] sm:$0xff]   ;;  %v4186_v39 = vadd.f32 %v14077_v50, %v14076_v45  ;;  %v4842_v7 = vrot.slane %v4840_v63, 1  ;;  %v10386_v50 = vld [vmem:[#allocation2 + $0x48] sm:$0xff]  }
 0x328   : > { %v5490_v34 = vsel %vm3742_vm6, %v5480_v4, %v5489_v8  ;;  %v5492_v19 = vshrl.u32 %v10806_v56, 16  ;;  %v5495_v4 = vshll.u32 %v10806_v56, 16  ;;  %v13074_v63 = vld [vmem:[#allocation2 + $0x9c] sm:$0xff] }
 0x329   : > { %v5010_v55 = vpop.f32.mrf.mxu2 }
 0x32a   : > { %v5108_v31 = vadd.f32 %v5010_v55, %v4473_v21  ;;  %v9658_v21 = vld [vmem:[#allocation3 + $0x1a0] sm:$0xff]  ;;  %v14078_v55 = vld [vmem:[#allocation31_spill] sm:$0xff] }
 0x32b   : > { %4427 = vmatmul.bf16.gmra.mxu1 %v10595_v16  ;;  %v4380_v13 = vpop.f32.mrf.mxu1  ;;  %7215 = vmatpush.bf16.msrb.mxu2 %v9658_v21  ;;  %v9698_v21 = vld [vmem:[#allocation3 + $0x220] sm:$0xff] }
 0x32c   : > { %8139 = vmatpush.bf16.msrb.mxu0 %v9698_v21 }
 0x32e   : > { %v5672_v57 = vpop.f32.mrf.mxu3  ;;  %v13061_v17 = vpop.f32.mrf.mxu0 }
 0x32f   : > { %v13053_v9 = vadd.f32 %v5672_v57, %v5108_v31  ;;  %v4185_v31 = vadd.f32 %v14079_v28, %v14078_v55  ;;  %v10597_v57 = vld [vmem:[#allocation2 + $0x9c] sm:$0xff]   ;;  %v10808_v55 = vld [vmem:[#allocation2 + $0xa4] sm:$0xff]  }
 0x330   : > { %v14080_v28 = vld [vmem:[#allocation34_spill] sm:$0xff] }
 0x331   : > { %5052 = vmatmul.bf16.gmra.mxu2 %v4835_v46  ;;  %v4475_v54 = vadd.f32 %v4380_v13, %v4185_v31  ;;  %v14081_v31 = vld [vmem:[#allocation52_spill] sm:$0xff] }
 0x333   : > { %v4383_v20 = vpop.f32.mrf.mxu1 }
 0x334   : > { %5954 = vmatmul.bf16.gmra.mxu0 %v10385_v37  ;;  %v5013_v58 = vpop.f32.mrf.mxu2  ;;  %v4476_v59 = vadd.f32 %v4383_v20, %v4186_v39  ;;  %v5494_v37 = vrot.slane %v5492_v19, 3 }
 0x335   : > { %v5109_v60 = vadd.f32 %v5013_v58, %v4474_v30  ;;  %v9650_v30 = vld [vmem:[#allocation3 + $0x160] sm:$0xff]  ;;  %v5497_v58 = vrot.slane %v5495_v4, 4 }
 0x336   : > { %6553 = vmatpush.bf16.msrb.mxu1 %v9650_v30 }
 0x337   : > { %5714 = vmatmul.bf16.gmra.mxu3 %v5490_v34  ;;  %v4838_v34 = vor.u32 %v4836_v18, %v4834_v62  ;;  %v5498_v20 = vor.u32 %v5497_v58, %v5494_v37  ;;  %v5501_v37 = vshrl.u32 %v10808_v55, 16  ;;  %v5504_v58 = vshll.u32 %v10808_v55, 16 }
 0x339   : > { %v5499_v12 = vsel %vm3742_vm6, %v5489_v8, %v5498_v20  ;;  %v10599_v8 = vld [vmem:[#allocation2 + $0xa4] sm:$0xff]  }
 0x33a   : > { %v5675_v38 = vpop.f32.mrf.mxu3 }
 0x33b   : > { %v13066_v16 = vadd.f32 %v5675_v38, %v5109_v60  ;;  %4432 = vmatmul.bf16.gmra.mxu1 %v10597_v57  ;;  %v4385_v56 = vpop.f32.mrf.mxu1  ;;  %v4843_v60 = vsel %vm4695_vm2, %v4838_v34, %v4842_v7  ;;  %v4188_v38 = vadd.f32 %v14081_v31, %v14080_v28  ;;  %v4848_v57 = vshll.u32 %v13074_v63, 16 }
 0x33c   : > { %v5015_v0 = vpop.f32.mrf.mxu2 }
 0x33d   : > { %v5110_v46 = vadd.f32 %v5015_v0, %v4475_v54  ;;  %v14082_v54 = vld [vmem:[#allocation33_spill] sm:$0xff]  ;;  %v14083_v0 = vld [vmem:[#allocation51_spill] sm:$0xff] }
 0x33e   : > { %v4187_v18 = vadd.f32 %v14083_v0, %v14082_v54 }
 0x341   : > { %v13069_v45 = vpop.f32.mrf.mxu0  ;;  %5057 = vmatmul.bf16.gmra.mxu2 %v4843_v60 }
 0x342   : > { %v5677_v39 = vpop.f32.mrf.mxu3 }
 0x343   : > { %v13072_v13 = vadd.f32 %v5677_v39, %v5110_v46  ;;  %v4388_v4 = vpop.f32.mrf.mxu1  ;;  %v4850_v39 = vrot.slane %v4848_v57, 1  ;;  %v13093_v57 = vld [vmem:[#allocation2 + $0xa4] sm:$0xff] }
 0x344   : > { %5959 = vmatmul.bf16.gmra.mxu0 %v10386_v50  ;;  %v5018_v43 = vpop.f32.mrf.mxu2  ;;  %v4478_v30 = vadd.f32 %v4388_v4, %v4188_v38  ;;  %v4844_v50 = vshrl.u32 %v13056_v1, 16 }
 0x345   : > { %v5111_v62 = vadd.f32 %v5018_v43, %v4476_v59  ;;  %v4477_v59 = vadd.f32 %v4385_v56, %v4187_v18  ;;  %v5503_v43 = vrot.slane %v5501_v37, 3  ;;  %v14085_v37 = vld [vmem:[#allocation36_spill] sm:$0xff] }
 0x346   : > { %v4846_v28 = vor.u32 %v4844_v50, %v4842_v7 }
 0x347   : > { %5719 = vmatmul.bf16.gmra.mxu3 %v5499_v12  ;;  %v5506_v12 = vrot.slane %v5504_v58, 4  ;;  %v14086_v58 = vld [vmem:[#allocation54_spill] sm:$0xff] }
 0x348   : > { %v4851_v55 = vsel %vm4695_vm2, %v4846_v28, %v4850_v39 }
 0x349   : > { %v13079_v19 = vpop.f32.mrf.mxu0  ;;  %v5507_v56 = vor.u32 %v5506_v12, %v5503_v43  ;;  %v14088_v43 = vld [vmem:[#allocation35_spill] sm:$0xff]  ;;  %v14089_v12 = vld [vmem:[#allocation12_spill] sm:$0xff] }
 0x34a   : > { %v5680_v46 = vpop.f32.mrf.mxu3  ;;  %v4189_v28 = vadd.f32 %v14089_v12, %v14088_v43 }
 0x34b   : > { %v13084_v34 = vadd.f32 %v5680_v46, %v5111_v62  ;;  %4437 = vmatmul.bf16.gmra.mxu1 %v10599_v8  ;;  %v4390_v38 = vpop.f32.mrf.mxu1  ;;  %v10387_v62 = vld [vmem:[#allocation2 + $0x50] sm:$0xff]   ;;  %v5508_v18 = vsel %vm3742_vm6, %v5498_v20, %v5507_v56 }
 0x34c   : > { %v5020_v60 = vpop.f32.mrf.mxu2  ;;  %v10810_v46 = vld [vmem:[#allocation2 + $0xac] sm:$0xff]  }
 0x34d   : > { %v5112_v21 = vadd.f32 %v5020_v60, %v4477_v59  ;;  %v5513_v20 = vshll.u32 %v10810_v46, 16 }
 0x351   : > { %v5925_v31 = vpop.f32.mrf.mxu0  ;;  %5062 = vmatmul.bf16.gmra.mxu2 %v4851_v55  ;;  %v5510_v55 = vshrl.u32 %v10810_v46, 16 }
 0x352   : > { %v13088_v4 = vadd.f32 %v5925_v31, %v12911_v33  ;;  %v5682_v54 = vpop.f32.mrf.mxu3  ;;  %v4190_v33 = vadd.f32 %v14086_v58, %v14085_v37 }
 0x353   : > { %v13091_v0 = vadd.f32 %v5682_v54, %v5112_v21  ;;  %v4393_v59 = vpop.f32.mrf.mxu1  ;;  %v4856_v21 = vshll.u32 %v13093_v57, 16  ;;  %v4479_v54 = vadd.f32 %v4390_v38, %v4189_v28  ;;  %v5512_v58 = vrot.slane %v5510_v55, 3  ;;  %v10812_v55 = vld [vmem:[#allocation2 + $0xb4] sm:$0xff]  }
 0x354   : > { %14084 = vst [vmem:[#allocation19_spill] sm:$0xff] %v13088_v4  ;;  %5964 = vmatmul.bf16.gmra.mxu0 %v10387_v62  ;;  %v5023_v1 = vpop.f32.mrf.mxu2  ;;  %v4480_v50 = vadd.f32 %v4393_v59, %v4190_v33  ;;  %v10601_v62 = vld [vmem:[#allocation2 + $0xac] sm:$0xff]   ;;  %v5515_v33 = vrot.slane %v5513_v20, 4 }
 0x355   : > { %v5113_v7 = vadd.f32 %v5023_v1, %v4478_v30  ;;  %v4858_v37 = vrot.slane %v4856_v21, 1  ;;  %v13113_v21 = vld [vmem:[#allocation2 + $0xac] sm:$0xff] }
 0x356   : > { %v5516_v38 = vor.u32 %v5515_v33, %v5512_v58  ;;  %v14091_v20 = vld [vmem:[#allocation38_spill] sm:$0xff]  ;;  %v9657_v33 = vld [vmem:[#allocation3 + $0x198] sm:$0xff] }
 0x357   : > { %5724 = vmatmul.bf16.gmra.mxu3 %v5508_v18  ;;  %v4852_v18 = vshrl.u32 %v13074_v63, 16  ;;  %7216 = vmatpush.bf16.msrb.mxu2 %v9657_v33  ;;  %v10389_v33 = vld [vmem:[#allocation2 + $0x60] sm:$0xff]  }
 0x359   : > { %v5927_v8 = vpop.f32.mrf.mxu0 }
 0x35a   : > { %v13099_v60 = vadd.f32 %v5927_v8, %v12928_v15  ;;  %v5685_v31 = vpop.f32.mrf.mxu3  ;;  %v4854_v8 = vor.u32 %v4852_v18, %v4850_v39 }
 0x35b   : > { %v13104_v30 = vadd.f32 %v5685_v31, %v5113_v7  ;;  %4442 = vmatmul.bf16.gmra.mxu1 %v10601_v62  ;;  %v10388_v7 = vld [vmem:[#allocation2 + $0x58] sm:$0xff]   ;;  %v5517_v31 = vsel %vm3742_vm6, %v5507_v56, %v5516_v38  ;;  %v14092_v62 = vld [vmem:[#allocation14_spill] sm:$0xff] }
 0x35c   : > { %14087 = vst [vmem:[#allocation21_spill] sm:$0xff] %v13099_v60  ;;  %v5025_v1 = vpop.f32.mrf.mxu2  ;;  %v4395_v60 = vpop.f32.mrf.mxu1  ;;  %v4859_v46 = vsel %vm4695_vm2, %v4854_v8, %v4858_v37  ;;  %v9665_v8 = vld [vmem:[#allocation3 + $0x1d8] sm:$0xff] }
 0x35d   : > { %v5114_v15 = vadd.f32 %v5025_v1, %v4479_v54  ;;  %7506 = vmatpush.bf16.msrb.mxu3 %v9665_v8 }
 0x361   : > { %v5930_v59 = vpop.f32.mrf.mxu0  ;;  %5067 = vmatmul.bf16.gmra.mxu2 %v4859_v46  ;;  %v14095_v46 = vld [vmem:[#allocation56_spill] sm:$0xff] }
 0x362   : > { %v13108_v43 = vadd.f32 %v5930_v59, %v12943_v29  ;;  %v5687_v12 = vpop.f32.mrf.mxu3  ;;  %v4192_v29 = vadd.f32 %v14092_v62, %v14091_v20  ;;  %v14094_v59 = vld [vmem:[#allocation37_spill] sm:$0xff]  ;;  %v4860_v62 = vshrl.u32 %v13093_v57, 16  ;;  %v9697_v57 = vld [vmem:[#allocation3 + $0x218] sm:$0xff] }
 0x363   : > { %v13111_v28 = vadd.f32 %v5687_v12, %v5114_v15  ;;  %v4864_v15 = vshll.u32 %v13113_v21, 16  ;;  %v5522_v12 = vshll.u32 %v10812_v55, 16  ;;  %8140 = vmatpush.bf16.msrb.mxu0 %v9697_v57 }
 0x364   : > { %14090 = vst [vmem:[#allocation23_spill] sm:$0xff] %v13108_v43  ;;  %5969 = vmatmul.bf16.gmra.mxu0 %v10388_v7  ;;  %v5028_v63 = vpop.f32.mrf.mxu2  ;;  %v4398_v1 = vpop.f32.mrf.mxu1  ;;  %v4191_v7 = vadd.f32 %v14095_v46, %v14094_v59  ;;  %v4862_v59 = vor.u32 %v4860_v62, %v4858_v37 }
 0x365   : > { %v5115_v39 = vadd.f32 %v5028_v63, %v4480_v50  ;;  %v4482_v58 = vadd.f32 %v4398_v1, %v4192_v29  ;;  %v5519_v50 = vshrl.u32 %v10812_v55, 16  ;;  %v9649_v63 = vld [vmem:[#allocation3 + $0x158] sm:$0xff]  ;;  %v4866_v29 = vrot.slane %v4864_v15, 1 }
 0x366   : > { %v4481_v20 = vadd.f32 %v4395_v60, %v4191_v7  ;;  %6554 = vmatpush.bf16.msrb.mxu1 %v9649_v63  ;;  %v14098_v63 = vld [vmem:[#allocation58_spill] sm:$0xff] }
 0x367   : > { %5729 = vmatmul.bf16.gmra.mxu3 %v5517_v31  ;;  %v10602_v31 = vld [vmem:[#allocation2 + $0xb4] sm:$0xff]   ;;  %v5521_v1 = vrot.slane %v5519_v50, 3 }
 0x369   : > { %v5932_v54 = vpop.f32.mrf.mxu0 }
 0x36a   : > { %v13119_v18 = vadd.f32 %v5932_v54, %v12957_v40  ;;  %v5690_v56 = vpop.f32.mrf.mxu3 }
 0x36b   : > { %v13124_v43 = vadd.f32 %v5690_v56, %v5115_v39  ;;  %4447 = vmatmul.bf16.gmra.mxu1 %v10602_v31  ;;  %v4867_v39 = vsel %vm4695_vm2, %v4862_v59, %v4866_v29  ;;  %v13133_v56 = vld [vmem:[#allocation2 + $0xb4] sm:$0xff] }
 0x36c   : > { %14093 = vst [vmem:[#allocation24_spill] sm:$0xff] %v13119_v18  ;;  %v5030_v40 = vpop.f32.mrf.mxu2  ;;  %v5524_v18 = vrot.slane %v5522_v12, 4  ;;  %v4400_v4 = vpop.f32.mrf.mxu1  ;;  %v10814_v12 = vld [vmem:[#allocation2 + $0xbc] sm:$0xff]  }
 0x36d   : > { %v5116_v54 = vadd.f32 %v5030_v40, %v4481_v20 }
 0x36e   : > { %v5525_v60 = vor.u32 %v5524_v18, %v5521_v1  ;;  %v10894_v1 = vld [vmem:[#allocation2 + $0xb8] sm:$0xff] }
 0x36f   : > { %v9913_v59 = vunpack.c.h.b16 %v10894_v1 }
 0x370   : > { %v5526_v37 = vsel %vm3742_vm6, %v5516_v38, %v5525_v60 }
 0x371   : > { %v5935_v46 = vpop.f32.mrf.mxu0  ;;  %5072 = vmatmul.bf16.gmra.mxu2 %v4867_v39  ;;  %v14101_v39 = vld [vmem:[#allocation57_spill] sm:$0xff] }
 0x372   : > { %v13128_v55 = vadd.f32 %v5935_v46, %v12966_v36  ;;  %v5692_v8 = vpop.f32.mrf.mxu3  ;;  %v14097_v36 = vld [vmem:[#allocation40_spill] sm:$0xff]  ;;  %v14100_v46 = vld [vmem:[#allocation39_spill] sm:$0xff] }
 0x373   : > { %v13131_v7 = vadd.f32 %v5692_v8, %v5116_v54  ;;  %v4194_v31 = vadd.f32 %v14098_v63, %v14097_v36  ;;  %v4872_v54 = vshll.u32 %v13133_v56, 16  ;;  %v5531_v8 = vshll.u32 %v10814_v12, 16 }
 0x374   : > { %14096 = vst [vmem:[#allocation25_spill] sm:$0xff] %v13128_v55  ;;  %5974 = vmatmul.bf16.gmra.mxu0 %v10389_v33  ;;  %v5033_v15 = vpop.f32.mrf.mxu2  ;;  %v4403_v40 = vpop.f32.mrf.mxu1  ;;  %v4193_v33 = vadd.f32 %v14101_v39, %v14100_v46 }
 0x375   : > { %v5117_v50 = vadd.f32 %v5033_v15, %v4482_v58  ;;  %v4484_v62 = vadd.f32 %v4403_v40, %v4194_v31  ;;  %v5528_v58 = vshrl.u32 %v10814_v12, 16  ;;  %v4256_v15 = vpack.c.b16 %v12926_v14, %v9913_v59  ;;  %v10390_v12 = vld [vmem:[#allocation2 + $0x68] sm:$0xff]  }
 0x376   : > { %v4874_v63 = vrot.slane %v4872_v54, 1  ;;  %v5533_v40 = vrot.slane %v5531_v8, 4  ;;  %v13154_v54 = vld [vmem:[#allocation2 + $0xbc] sm:$0xff] }
 0x377   : > { %5734 = vmatmul.bf16.gmra.mxu3 %v5526_v37  ;;  %v4483_v37 = vadd.f32 %v4400_v4, %v4193_v33  ;;  %v10815_v33 = vld [vmem:[#allocation2 + $0xc4] sm:$0xff]  }
 0x379   : > { %v5937_v20 = vpop.f32.mrf.mxu0 }
 0x37a   : > { %v13139_v18 = vadd.f32 %v5937_v20, %v12975_v5  ;;  %v5695_v38 = vpop.f32.mrf.mxu3  ;;  %v4868_v5 = vshrl.u32 %v13113_v21, 16  ;;  %v5530_v20 = vrot.slane %v5528_v58, 3  ;;  %v14104_v58 = vld [vmem:[#allocation18_spill] sm:$0xff] }
 0x37b   : > { %v13144_v57 = vadd.f32 %v5695_v38, %v5117_v50  ;;  %4452 = vmatmul.bf16.gmra.mxu1 %v4256_v15  ;;  %v14103_v38 = vld [vmem:[#allocation42_spill] sm:$0xff] }
 0x37c   : > { %14099 = vst [vmem:[#allocation26_spill] sm:$0xff] %v13139_v18  ;;  %v5035_v36 = vpop.f32.mrf.mxu2  ;;  %v4870_v1 = vor.u32 %v4868_v5, %v4866_v29  ;;  %v4405_v55 = vpop.f32.mrf.mxu1  ;;  %v5534_v14 = vor.u32 %v5533_v40, %v5530_v20  ;;  %v14106_v5 = vld [vmem:[#allocation41_spill] sm:$0xff] }
 0x37d   : > { %v5118_v31 = vadd.f32 %v5035_v36, %v4483_v37  ;;  %v4880_v36 = vshll.u32 %v13154_v54, 16 }
 0x37e   : > { %v4875_v50 = vsel %vm4695_vm2, %v4870_v1, %v4874_v63  ;;  %v5535_v59 = vsel %vm3742_vm6, %v5525_v60, %v5534_v14  ;;  %v5537_v1 = vshrl.u32 %v10815_v33, 16  ;;  %v5540_v60 = vshll.u32 %v10815_v33, 16  ;;  %v9648_v33 = vld [vmem:[#allocation3 + $0x150] sm:$0xff] }
 0x37f   : > { %6555 = vmatpush.bf16.msrb.mxu1 %v9648_v33 }
 0x381   : > { %v5940_v18 = vpop.f32.mrf.mxu0  ;;  %5077 = vmatmul.bf16.gmra.mxu2 %v4875_v50 }
 0x382   : > { %v13149_v46 = vadd.f32 %v5940_v18, %v12984_v22  ;;  %v5697_v39 = vpop.f32.mrf.mxu3  ;;  %v4196_v22 = vadd.f32 %v14104_v58, %v14103_v38  ;;  %v5542_v38 = vrot.slane %v5540_v60, 4  ;;  %v4554_v58 = vld [vmem:[#allocation2 + $0xc4] sm:$0x1] }
 0x383   : > { %v13152_v4 = vadd.f32 %v5697_v39, %v5118_v31  ;;  %v14107_v31 = vld [vmem:[#allocation60_spill] sm:$0xff]  ;;  %v4876_v39 = vshrl.u32 %v13133_v56, 16  ;;  %v4669_v56 = vunpack.c.l.b16 %v4554_v58  ;;  %v9663_v58 = vld [vmem:[#allocation3 + $0x1c8] sm:$0xff] }
 0x384   : > { %14102 = vst [vmem:[#allocation27_spill] sm:$0xff] %v13149_v46  ;;  %5979 = vmatmul.bf16.gmra.mxu0 %v10390_v12  ;;  %v5038_v21 = vpop.f32.mrf.mxu2  ;;  %v4408_v8 = vpop.f32.mrf.mxu1  ;;  %v4195_v20 = vadd.f32 %v14107_v31, %v14106_v5  ;;  %v14112_v46 = vld [vmem:[#allocation44_spill] sm:$0xff] }
 0x385   : > { %v5119_v29 = vadd.f32 %v5038_v21, %v4484_v62  ;;  %v4486_v37 = vadd.f32 %v4408_v8, %v4196_v22  ;;  %v13168_v21 = vrot.slane %v4880_v36, 1  ;;  %v4878_v22 = vor.u32 %v4876_v39, %v4874_v63  ;;  %v9622_v8 = vld [vmem:[#allocation2 + $0x10] sm:$0xff]  ;;  %v9655_v39 = vld [vmem:[#allocation3 + $0x188] sm:$0xff] }
 0x386   : > { %v4485_v50 = vadd.f32 %v4405_v55, %v4195_v20  ;;  %v9656_v36 = vld [vmem:[#allocation3 + $0x190] sm:$0xff] }
 0x387   : > { %5739 = vmatmul.bf16.gmra.mxu3 %v5535_v59  ;;  %v4883_v55 = vsel %vm4695_vm2, %v4878_v22, %v13168_v21  ;;  %v9664_v20 = vld [vmem:[#allocation3 + $0x1d0] sm:$0xff]  ;;  %7217 = vmatpush.bf16.msrb.mxu2 %v9656_v36 }
 0x388   : > { %7507 = vmatpush.bf16.msrb.mxu3 %v9664_v20  ;;  %v6283_v20 = vshrl.u32 %v9622_v8, 16 }
 0x389   : > { %v5942_v18 = vpop.f32.mrf.mxu0 }
 0x38a   : > { %v13160_v15 = vadd.f32 %v5942_v18, %v12991_v41  ;;  %v5700_v40 = vpop.f32.mrf.mxu3  ;;  %v5539_v41 = vrot.slane %v5537_v1, 3  ;;  %v13170_v18 = vld [vmem:[#allocation2 + $0xc8] sm:$0xff]  }
 0x38b   : > { %v13165_v62 = vadd.f32 %v5700_v40, %v5119_v29  ;;  %14109 = vst [vmem:[#allocation30_spill] sm:$0xff] %v13170_v18  ;;  %v10391_v40 = vld [vmem:[#allocation2 + $0x70] sm:$0xff]   ;;  %v10009_v60 = vunpack.c.h.b16 %v13170_v18  ;;  %7218 = vmatpush.bf16.msrb.mxu2 %v9655_v39  ;;  %v4884_v39 = vshrl.u32 %v13154_v54, 16 }
 0x38c   : > { %14105 = vst [vmem:[#allocation28_spill] sm:$0xff] %v13160_v15  ;;  %v5040_v12 = vpop.f32.mrf.mxu2  ;;  %v4410_v31 = vpop.f32.mrf.mxu1  ;;  %v13172_v15 = vld [vmem:[#allocation2 + $0x18] sm:$0xff]  ;;  %v13179_v63 = vor.u32 %v5542_v38, %v5539_v41  ;;  %7508 = vmatpush.bf16.msrb.mxu3 %v9663_v58 }
 0x38d   : > { %14108 = vst [vmem:[#allocation29_spill] sm:$0xff] %v13165_v62  ;;  %v5120_v59 = vadd.f32 %v5040_v12, %v4485_v50  ;;  %v6285_v12 = vshll.u32 %v9622_v8, 16  ;;  %v14114_v62 = vld [vmem:[#allocation62_spill] sm:$0xff]  ;;  %v6727_v58 = vld [vmem:[#allocation2 + $0x18] sm:$0x8] }
 0x38e   : > { %v5544_v41 = vsel %vm3742_vm6, %v5534_v14, %v13179_v63  ;;  %v9654_v14 = vld [vmem:[#allocation3 + $0x180] sm:$0xff] }
 0x38f   : > { %v6287_v33 = vrot.slane %v6285_v12, 1  ;;  %7219 = vmatpush.bf16.msrb.mxu2 %v9654_v14  ;;  %v10403_v14 = vld [vmem:[#allocation2 + $0x20] sm:$0xff]  }
 0x391   : > { %v5945_v5 = vpop.f32.mrf.mxu0  ;;  %5082 = vmatmul.bf16.gmra.mxu2 %v4883_v55  ;;  %v5329_v55 = vpack.c.b16 %v10009_v60, %v10009_v60  ;;  %v6288_v8 = vor.u32 %v6287_v33, %v6283_v20 }
 0x392   : > { %v13175_v29 = vadd.f32 %v5945_v5, %v12999_v42  ;;  %v5702_v1 = vpop.f32.mrf.mxu3  ;;  %v9647_v42 = vld [vmem:[#allocation3 + $0x148] sm:$0xff]  ;;  %v4694_v5 = vpack.c.b16 %v4669_v56, %v4669_v56 }
 0x393   : > { %v13182_v50 = vadd.f32 %v5702_v1, %v5120_v59  ;;  %v4198_v59 = vadd.f32 %v12891_v10, %v14112_v46  ;;  %6556 = vmatpush.bf16.msrb.mxu1 %v9647_v42  ;;  %v5546_v42 = vshrl.u32 %v5329_v55, 16  ;;  %v5549_v12 = vshll.u32 %v5329_v55, 16 }
 0x394   : > { %14110 = vst [vmem:[#allocation32_spill] sm:$0xff] %v13175_v29  ;;  %5984 = vmatmul.bf16.gmra.mxu0 %v10391_v40  ;;  %v5043_v22 = vpop.f32.mrf.mxu2  ;;  %v6290_v29 = vshll.u32 %v13172_v15, 16  ;;  %v4413_v36 = vpop.f32.mrf.mxu1  ;;  %v4888_v18 = vshll.u32 %v4694_v5, 16  ;;  %v13197_v5 = vld [vmem:[#allocation2 + $0x1c] sm:$0xf] }
 0x395   : > { %14111 = vst [vmem:[#allocation50_spill] sm:$0xff] %v13182_v50  ;;  %v5121_v38 = vadd.f32 %v5043_v22, %v4486_v37  ;;  %v4488_v1 = vadd.f32 %v4413_v36, %v4198_v59  ;;  %v9646_v50 = vld [vmem:[#allocation3 + $0x140] sm:$0xff]  ;;  %v14113_v22 = vld [vmem:[#allocation43_spill] sm:$0xff]  ;;  %v5548_v55 = vrot.slane %v5546_v42, 3  ;;  %v6843_v54 = vunpack.c.l.b16 %v13197_v5 }
 0x396   : > { %v9662_v37 = vld [vmem:[#allocation3 + $0x1c0] sm:$0xff]  ;;  %v6292_v60 = vrot.slane %v6290_v29, 1  ;;  %v4197_v10 = vadd.f32 %v14114_v62, %v14113_v22  ;;  %v4886_v29 = vor.u32 %v4884_v39, %v13168_v21  ;;  %v6842_v22 = vunpack.c.l.b16 %v6727_v58  ;;  %v10392_v21 = vld [vmem:[#allocation2 + $0x78] sm:$0xff]  }
 0x397   : > { %5744 = vmatmul.bf16.gmra.mxu3 %v5544_v41  ;;  %6557 = vmatpush.bf16.msrb.mxu1 %v9646_v50  ;;  %v6925_v39 = vshrl.u32 %v10403_v14, 16 }
 0x398   : > { %7509 = vmatpush.bf16.msrb.mxu3 %v9662_v37  ;;  %v6293_v62 = vsel %vm4695_vm2, %v6288_v8, %v6292_v60  ;;  %v13206_v37 = vld [vmem:[#allocation2 + $0x20] sm:$0xff]  ;;  %v6891_v42 = vpack.c.b16 %v6843_v54, %v6842_v22  ;;  %v6928_v8 = vshll.u32 %v10403_v14, 16 }
 0x399   : > { %v5947_v40 = vpop.f32.mrf.mxu0 }
 0x39a   : > { %v13190_v56 = vadd.f32 %v5947_v40, %v13006_v53  ;;  %v5705_v46 = vpop.f32.mrf.mxu3  ;;  %v4487_v53 = vadd.f32 %v4410_v31, %v4197_v10  ;;  %v4890_v40 = vrot.slane %v4888_v18, 1  ;;  %6558 = vmatmul.bf16.vlgmr.msrb.gmra.mxu1 %v6293_v62  ;;  %v6920_v62 = vshll.u32 %v6891_v42, 16 }
 0x39b   : > { %v13194_v41 = vadd.f32 %v5705_v46, %v5121_v38  ;;  %v5551_v38 = vrot.slane %v5549_v12, 4  ;;  %v9696_v12 = vld [vmem:[#allocation3 + $0x210] sm:$0xff]  ;;  %v6930_v22 = vrot.slane %v6928_v8, 4 }
 0x39c   : > { %v5045_v59 = vpop.f32.mrf.mxu2  ;;  %v4415_v31 = vpop.f32.mrf.mxu1  ;;  %v4891_v20 = vsel %vm4695_vm2, %v4886_v29, %v4890_v40  ;;  %8141 = vmatpush.bf16.msrb.mxu0 %v9696_v12  ;;  %v6917_v40 = vshrl.u32 %v6891_v42, 16  ;;  %v14117_v12 = vld [vmem:[#allocation45_spill] sm:$0xff] }
 0x39d   : > { %v5122_v36 = vadd.f32 %v5045_v59, %v4487_v53  ;;  %v5552_v10 = vor.u32 %v5551_v38, %v5548_v55  ;;  %v14116_v59 = vld [vmem:[#allocation46_spill] sm:$0xff]  ;;  %v6927_v38 = vrot.slane %v6925_v39, 3 }
 0x39e   : > { %v4200_v29 = vadd.f32 %v12931_v35, %v14116_v59  ;;  %v6919_v35 = vrot.slane %v6917_v40, 3  ;;  %v13228_v40 = vld [vmem:[#allocation2 + $0x28] sm:$0xff] }
 0x39f   : > { %v5553_v58 = vsel %vm3742_vm6, %v13179_v63, %v5552_v10  ;;  %v14118_v63 = vld [vmem:[#allocation63_spill] sm:$0xff]  ;;  %v6931_v39 = vor.u32 %v6930_v22, %v6927_v38 }
 0x3a1   : > { %v5950_v50 = vpop.f32.mrf.mxu0  ;;  %5087 = vmatmul.bf16.gmra.mxu2 %v4891_v20 }
 0x3a2   : > { %v13203_v33 = vadd.f32 %v5950_v50, %v13014_v44  ;;  %v5707_v18 = vpop.f32.mrf.mxu3  ;;  %v6298_v44 = vshll.u32 %v13206_v37, 16 }
 0x3a3   : > { %v13208_v46 = vadd.f32 %v5707_v18, %v5122_v36 }
 0x3a4   : > { %14115 = vst [vmem:[#allocation31_spill] sm:$0xff] %v13203_v33  ;;  %5989 = vmatmul.bf16.gmra.mxu0 %v10392_v21  ;;  %v5048_v53 = vpop.f32.mrf.mxu2  ;;  %v4418_v55 = vpop.f32.mrf.mxu1  ;;  %v6294_v21 = vshrl.u32 %v13172_v15, 16  ;;  %v6300_v18 = vrot.slane %v6298_v44, 1 }
 0x3a5   : > { %v5123_v5 = vadd.f32 %v5048_v53, %v4488_v1  ;;  %v4490_v20 = vadd.f32 %v4418_v55, %v4200_v29  ;;  %v4199_v1 = vadd.f32 %v14118_v63, %v14117_v12  ;;  %v10404_v12 = vld [vmem:[#allocation2 + $0x28] sm:$0xff]   ;;  %v6306_v63 = vshll.u32 %v13228_v40, 16 }
 0x3a6   : > { %v6296_v42 = vor.u32 %v6294_v21, %v6292_v60  ;;  %v10393_v60 = vld [vmem:[#allocation2 + $0x80] sm:$0xff]   ;;  %v6937_v21 = vshll.u32 %v10404_v12, 16 }
 0x3a7   : > { %5749 = vmatmul.bf16.gmra.mxu3 %v5553_v58  ;;  %v6922_v58 = vrot.slane %v6920_v62, 4  ;;  %v4489_v59 = vadd.f32 %v4415_v31, %v4199_v1  ;;  %v14119_v1 = vld [vmem:[#allocation48_spill] sm:$0xff] }
 0x3a8   : > { %v6301_v8 = vsel %vm4695_vm2, %v6296_v42, %v6300_v18  ;;  %v6302_v42 = vshrl.u32 %v13206_v37, 16 }
 0x3a9   : > { %v5952_v36 = vpop.f32.mrf.mxu0  ;;  %v6923_v29 = vor.u32 %v6922_v58, %v6919_v35 }
 0x3aa   : > { %v13216_v50 = vadd.f32 %v5952_v36, %v13021_v47  ;;  %v5710_v10 = vpop.f32.mrf.mxu3  ;;  %6563 = vmatmul.bf16.gmra.mxu1 %v6301_v8 }
 0x3ab   : > { %v13221_v53 = vadd.f32 %v5710_v10, %v5123_v5  ;;  %v6932_v55 = vsel %vm3742_vm6, %v6923_v29, %v6931_v39  ;;  %v10012_v5 = vunpack.c.l.b16 %v10403_v14  ;;  %v4202_v10 = vadd.f32 %v12960_v32, %v14119_v1  ;;  %v14120_v29 = vld [vmem:[#allocation47_spill] sm:$0xff]  ;;  %v10724_v1 = vld [vmem:[#allocation2 + $0x24] sm:$0xff]  }
 0x3ac   : > { %v5050_v33 = vpop.f32.mrf.mxu2  ;;  %v4420_v15 = vpop.f32.mrf.mxu1 }
 0x3ad   : > { %v5124_v47 = vadd.f32 %v5050_v33, %v4489_v59  ;;  %v6934_v33 = vshrl.u32 %v10404_v12, 16  ;;  %v7406_v38 = vpack.c.b16 %v10012_v5, %v6843_v54  ;;  %v6308_v54 = vrot.slane %v6306_v63, 1  ;;  %v10394_v63 = vld [vmem:[#allocation2 + $0x88] sm:$0xff]  }
 0x3ae   : > { %v6304_v5 = vor.u32 %v6302_v42, %v6300_v18 }
 0x3af   : > { %v6936_v58 = vrot.slane %v6934_v33, 3 }
 0x3b1   : > { %v5955_v36 = vpop.f32.mrf.mxu0  ;;  %7220 = vmatmul.bf16.vlgmr.msrb.gmra.mxu2 %v6932_v55 }
 0x3b2   : > { %v13225_v44 = vadd.f32 %v5955_v36, %v13029_v3  ;;  %v5712_v31 = vpop.f32.mrf.mxu3  ;;  %v4201_v36 = vadd.f32 %v12945_v27, %v14120_v29  ;;  %v13248_v27 = vld [vmem:[#allocation2 + $0x30] sm:$0xff] }
 0x3b3   : > { %v13230_v62 = vadd.f32 %v5712_v31, %v5124_v47  ;;  %v6939_v47 = vrot.slane %v6937_v21, 4  ;;  %v6309_v31 = vsel %vm4695_vm2, %v6304_v5, %v6308_v54  ;;  %v10405_v21 = vld [vmem:[#allocation2 + $0x30] sm:$0xff]  }
 0x3b4   : > { %5994 = vmatmul.bf16.gmra.mxu0 %v10393_v60  ;;  %v5053_v22 = vpop.f32.mrf.mxu2  ;;  %v4423_v35 = vpop.f32.mrf.mxu1  ;;  %v4491_v32 = vadd.f32 %v4420_v15, %v4201_v36  ;;  %v6943_v15 = vshrl.u32 %v10405_v21, 16  ;;  %v6310_v36 = vshrl.u32 %v13228_v40, 16 }
 0x3b5   : > { %v5125_v3 = vadd.f32 %v5053_v22, %v4490_v20  ;;  %v4492_v8 = vadd.f32 %v4423_v35, %v4202_v10  ;;  %v6940_v60 = vor.u32 %v6939_v47, %v6936_v58  ;;  %v6314_v35 = vshll.u32 %v13248_v27, 16 }
 0x3b6   : > { %v6945_v29 = vrot.slane %v6943_v15, 3 }
 0x3b7   : > { %7510 = vmatmul.bf16.vlgmr.msrb.gmra.mxu3 %v7406_v38  ;;  %v6941_v22 = vsel %vm3742_vm6, %v6931_v39, %v6940_v60 }
 0x3b9   : > { %v5957_v14 = vpop.f32.mrf.mxu0 }
 0x3ba   : > { %v13237_v59 = vadd.f32 %v5957_v14, %v13034_v26  ;;  %v5715_v55 = vpop.f32.mrf.mxu3  ;;  %6568 = vmatmul.bf16.gmra.mxu1 %v6309_v31  ;;  %v6946_v14 = vshll.u32 %v10405_v21, 16  ;;  %v14122_v31 = vld [vmem:[#allocation49_spill] sm:$0xff] }
 0x3bb   : > { %v13241_v20 = vadd.f32 %v5715_v55, %v5125_v3 }
 0x3bc   : > { %v5055_v12 = vpop.f32.mrf.mxu2  ;;  %v4425_v26 = vpop.f32.mrf.mxu1 }
 0x3bd   : > { %v5126_v33 = vadd.f32 %v5055_v12, %v4491_v32  ;;  %v6948_v32 = vrot.slane %v6946_v14, 4  ;;  %v6316_v12 = vrot.slane %v6314_v35, 1  ;;  %v10406_v14 = vld [vmem:[#allocation2 + $0x38] sm:$0xff]   ;;  %v10395_v35 = vld [vmem:[#allocation2 + $0x90] sm:$0xff]  }
 0x3c1   : > { %v5960_v37 = vpop.f32.mrf.mxu0  ;;  %7225 = vmatmul.bf16.gmra.mxu2 %v6941_v22  ;;  %v6312_v22 = vor.u32 %v6310_v36, %v6308_v54  ;;  %v14123_v36 = vld [vmem:[#allocation11_spill] sm:$0xff] }
 0x3c2   : > { %v13245_v38 = vadd.f32 %v5960_v37, %v13046_v48  ;;  %v5717_v3 = vpop.f32.mrf.mxu3  ;;  %v14121_v48 = vld [vmem:[#allocation9_spill] sm:$0xff] }
 0x3c3   : > { %v13250_v18 = vadd.f32 %v5717_v3, %v5126_v33  ;;  %v4204_v42 = vadd.f32 %v12979_v61, %v14121_v48  ;;  %v4203_v33 = vadd.f32 %v12968_v6, %v14122_v31  ;;  %v6317_v3 = vsel %vm4695_vm2, %v6312_v22, %v6316_v12  ;;  %v13268_v6 = vld [vmem:[#allocation2 + $0x38] sm:$0xff] }
 0x3c4   : > { %5999 = vmatmul.bf16.gmra.mxu0 %v10394_v63  ;;  %v5058_v10 = vpop.f32.mrf.mxu2  ;;  %v4428_v47 = vpop.f32.mrf.mxu1  ;;  %v6949_v63 = vor.u32 %v6948_v32, %v6945_v29  ;;  %v6952_v48 = vshrl.u32 %v10406_v14, 16 }
 0x3c5   : > { %v5127_v58 = vadd.f32 %v5058_v10, %v4492_v8  ;;  %v4494_v5 = vadd.f32 %v4428_v47, %v4204_v42  ;;  %v4493_v61 = vadd.f32 %v4425_v26, %v4203_v33  ;;  %v9695_v26 = vld [vmem:[#allocation3 + $0x208] sm:$0xff]  ;;  %v6955_v47 = vshll.u32 %v10406_v14, 16 }
 0x3c6   : > { %v6950_v10 = vsel %vm3742_vm6, %v6940_v60, %v6949_v63  ;;  %v10726_v42 = vld [vmem:[#allocation2 + $0x2c] sm:$0xff]   ;;  %8142 = vmatpush.bf16.msrb.mxu0 %v9695_v26  ;;  %v4206_v60 = vadd.f32 %v12997_v11, %v14123_v36  ;;  %v6954_v33 = vrot.slane %v6952_v48, 3  ;;  %v10728_v36 = vld [vmem:[#allocation2 + $0x34] sm:$0xff]  }
 0x3c7   : > { %7515 = vmatmul.bf16.gmra.mxu3 %v10724_v1 }
 0x3c9   : > { %v5962_v39 = vpop.f32.mrf.mxu0 }
 0x3ca   : > { %v13257_v55 = vadd.f32 %v5962_v39, %v13053_v9  ;;  %v5720_v37 = vpop.f32.mrf.mxu3  ;;  %6573 = vmatmul.bf16.gmra.mxu1 %v6317_v3 }
 0x3cb   : > { %v13261_v8 = vadd.f32 %v5720_v37, %v5127_v58  ;;  %v6318_v37 = vshrl.u32 %v13248_v27, 16 }
 0x3cc   : > { %v5060_v21 = vpop.f32.mrf.mxu2  ;;  %v4430_v9 = vpop.f32.mrf.mxu1 }
 0x3cd   : > { %v5128_v15 = vadd.f32 %v5060_v21, %v4493_v61  ;;  %v6957_v21 = vrot.slane %v6955_v47, 4  ;;  %v6320_v14 = vor.u32 %v6318_v37, %v6316_v12  ;;  %v10407_v47 = vld [vmem:[#allocation2 + $0x40] sm:$0xff]  }
 0x3d1   : > { %v5965_v40 = vpop.f32.mrf.mxu0  ;;  %7230 = vmatmul.bf16.gmra.mxu2 %v6950_v10 }
 0x3d2   : > { %v13265_v1 = vadd.f32 %v5965_v40, %v13066_v16  ;;  %v5722_v58 = vpop.f32.mrf.mxu3  ;;  %v6322_v16 = vshll.u32 %v13268_v6, 16 }
 0x3d3   : > { %v13270_v54 = vadd.f32 %v5722_v58, %v5128_v15  ;;  %v14124_v15 = vld [vmem:[#allocation10_spill] sm:$0xff]  ;;  %v6958_v58 = vor.u32 %v6957_v21, %v6954_v33 }
 0x3d4   : > { %6004 = vmatmul.bf16.gmra.mxu0 %v10395_v35  ;;  %v5063_v39 = vpop.f32.mrf.mxu2  ;;  %v4433_v31 = vpop.f32.mrf.mxu1  ;;  %v6324_v3 = vrot.slane %v6322_v16, 1  ;;  %v4205_v40 = vadd.f32 %v12989_v49, %v14124_v15  ;;  %v13288_v49 = vld [vmem:[#allocation2 + $0x40] sm:$0xff]  ;;  %v10396_v16 = vld [vmem:[#allocation2 + $0x98] sm:$0xff]  }
 0x3d5   : > { %v5129_v29 = vadd.f32 %v5063_v39, %v4494_v5  ;;  %v4496_v61 = vadd.f32 %v4433_v31, %v4206_v60  ;;  %v6959_v39 = vsel %vm3742_vm6, %v6949_v63, %v6958_v58  ;;  %v6330_v31 = vshll.u32 %v13288_v49, 16 }
 0x3d6   : > { %v4495_v11 = vadd.f32 %v4430_v9, %v4205_v40  ;;  %v6325_v26 = vsel %vm4695_vm2, %v6320_v14, %v6324_v3  ;;  %v6961_v9 = vshrl.u32 %v10407_v47, 16  ;;  %v6326_v40 = vshrl.u32 %v13268_v6, 16 }
 0x3d7   : > { %7520 = vmatmul.bf16.gmra.mxu3 %v10726_v42 }
 0x3d8   : > { %v6963_v15 = vrot.slane %v6961_v9, 3 }
 0x3d9   : > { %v5967_v32 = vpop.f32.mrf.mxu0 }
 0x3da   : > { %v13277_v22 = vadd.f32 %v5967_v32, %v13072_v13  ;;  %v5725_v10 = vpop.f32.mrf.mxu3  ;;  %6578 = vmatmul.bf16.gmra.mxu1 %v6325_v26  ;;  %v6964_v32 = vshll.u32 %v10407_v47, 16  ;;  %v14126_v26 = vld [vmem:[#allocation53_spill] sm:$0xff] }
 0x3db   : > { %v13281_v5 = vadd.f32 %v5725_v10, %v5129_v29 }
 0x3dc   : > { %v5065_v35 = vpop.f32.mrf.mxu2  ;;  %v4435_v13 = vpop.f32.mrf.mxu1 }
 0x3dd   : > { %v5130_v48 = vadd.f32 %v5065_v35, %v4495_v11  ;;  %v6966_v11 = vrot.slane %v6964_v32, 4  ;;  %v6332_v35 = vrot.slane %v6330_v31, 1  ;;  %v10408_v32 = vld [vmem:[#allocation2 + $0x48] sm:$0xff]   ;;  %v10397_v31 = vld [vmem:[#allocation2 + $0xa0] sm:$0xff]  }
 0x3e1   : > { %v5970_v27 = vpop.f32.mrf.mxu0  ;;  %7235 = vmatmul.bf16.gmra.mxu2 %v6959_v39  ;;  %v6328_v39 = vor.u32 %v6326_v40, %v6324_v3 }
 0x3e2   : > { %v13285_v42 = vadd.f32 %v5970_v27, %v13084_v34  ;;  %v5727_v29 = vpop.f32.mrf.mxu3  ;;  %v14125_v34 = vld [vmem:[#allocation55_spill] sm:$0xff] }
 0x3e3   : > { %v13290_v12 = vadd.f32 %v5727_v29, %v5130_v48  ;;  %v4208_v37 = vadd.f32 %v13016_v25, %v14125_v34  ;;  %v4207_v48 = vadd.f32 %v13009_v24, %v14126_v26  ;;  %v6333_v29 = vsel %vm4695_vm2, %v6328_v39, %v6332_v35  ;;  %v13308_v24 = vld [vmem:[#allocation2 + $0x48] sm:$0xff]  ;;  %v10730_v34 = vld [vmem:[#allocation2 + $0x3c] sm:$0xff]  }
 0x3e4   : > { %6009 = vmatmul.bf16.gmra.mxu0 %v10396_v16  ;;  %v5068_v60 = vpop.f32.mrf.mxu2  ;;  %v4438_v21 = vpop.f32.mrf.mxu1  ;;  %v6967_v16 = vor.u32 %v6966_v11, %v6963_v15 }
 0x3e5   : > { %v5131_v33 = vadd.f32 %v5068_v60, %v4496_v61  ;;  %v4498_v14 = vadd.f32 %v4438_v21, %v4208_v37  ;;  %v4497_v25 = vadd.f32 %v4435_v13, %v4207_v48  ;;  %v6970_v13 = vshrl.u32 %v10408_v32, 16 }
 0x3e6   : > { %v6968_v60 = vsel %vm3742_vm6, %v6958_v58, %v6967_v16  ;;  %v6338_v21 = vshll.u32 %v13308_v24, 16  ;;  %v6334_v48 = vshrl.u32 %v13288_v49, 16 }
 0x3e7   : > { %7525 = vmatmul.bf16.gmra.mxu3 %v10728_v36  ;;  %v6972_v26 = vrot.slane %v6970_v13, 3 }
 0x3e9   : > { %v5972_v63 = vpop.f32.mrf.mxu0 }
 0x3ea   : > { %v13297_v10 = vadd.f32 %v5972_v63, %v13091_v0  ;;  %v5730_v27 = vpop.f32.mrf.mxu3  ;;  %6583 = vmatmul.bf16.gmra.mxu1 %v6333_v29  ;;  %v6973_v63 = vshll.u32 %v10408_v32, 16  ;;  %v14128_v29 = vld [vmem:[#allocation13_spill] sm:$0xff] }
 0x3eb   : > { %v13301_v61 = vadd.f32 %v5730_v27, %v5131_v33 }
 0x3ec   : > { %v5070_v47 = vpop.f32.mrf.mxu2  ;;  %v4440_v0 = vpop.f32.mrf.mxu1 }
 0x3ed   : > { %v5132_v9 = vadd.f32 %v5070_v47, %v4497_v25  ;;  %v6975_v25 = vrot.slane %v6973_v63, 4  ;;  %v6340_v47 = vrot.slane %v6338_v21, 1  ;;  %v10409_v63 = vld [vmem:[#allocation2 + $0x50] sm:$0xff]   ;;  %v10398_v21 = vld [vmem:[#allocation2 + $0xa8] sm:$0xff]  }
 0x3f1   : > { %v5975_v6 = vpop.f32.mrf.mxu0  ;;  %7240 = vmatmul.bf16.gmra.mxu2 %v6968_v60  ;;  %v6336_v60 = vor.u32 %v6334_v48, %v6332_v35  ;;  %v14129_v48 = vld [vmem:[#allocation59_spill] sm:$0xff] }
 0x3f2   : > { %v13305_v36 = vadd.f32 %v5975_v6, %v13104_v30  ;;  %v5732_v33 = vpop.f32.mrf.mxu3  ;;  %v14127_v30 = vld [vmem:[#allocation15_spill] sm:$0xff] }
 0x3f3   : > { %v13310_v3 = vadd.f32 %v5732_v33, %v5132_v9  ;;  %v4210_v40 = vadd.f32 %v13036_v2, %v14127_v30  ;;  %v4209_v9 = vadd.f32 %v13024_v23, %v14128_v29  ;;  %v6341_v33 = vsel %vm4695_vm2, %v6336_v60, %v6340_v47  ;;  %v13328_v23 = vld [vmem:[#allocation2 + $0x50] sm:$0xff] }
 0x3f4   : > { %6014 = vmatmul.bf16.gmra.mxu0 %v10397_v31  ;;  %v5073_v37 = vpop.f32.mrf.mxu2  ;;  %v4443_v11 = vpop.f32.mrf.mxu1  ;;  %v6976_v31 = vor.u32 %v6975_v25, %v6972_v26  ;;  %v6979_v30 = vshrl.u32 %v10409_v63, 16 }
 0x3f5   : > { %v5133_v15 = vadd.f32 %v5073_v37, %v4498_v14  ;;  %v4500_v39 = vadd.f32 %v4443_v11, %v4210_v40  ;;  %v4499_v2 = vadd.f32 %v4440_v0, %v4209_v9  ;;  %v9694_v0 = vld [vmem:[#allocation3 + $0x200] sm:$0xff]  ;;  %v6982_v11 = vshll.u32 %v10409_v63, 16 }
 0x3f6   : > { %v6977_v37 = vsel %vm3742_vm6, %v6967_v16, %v6976_v31  ;;  %v10732_v40 = vld [vmem:[#allocation2 + $0x44] sm:$0xff]   ;;  %8143 = vmatpush.bf16.msrb.mxu0 %v9694_v0  ;;  %v4212_v16 = vadd.f32 %v13051_v51, %v14129_v48  ;;  %v6981_v9 = vrot.slane %v6979_v30, 3  ;;  %v10734_v48 = vld [vmem:[#allocation2 + $0x4c] sm:$0xff]  }
 0x3f7   : > { %7530 = vmatmul.bf16.gmra.mxu3 %v10730_v34 }
 0x3f9   : > { %v5977_v58 = vpop.f32.mrf.mxu0 }
 0x3fa   : > { %v13317_v27 = vadd.f32 %v5977_v58, %v13111_v28  ;;  %v5735_v6 = vpop.f32.mrf.mxu3  ;;  %6588 = vmatmul.bf16.gmra.mxu1 %v6341_v33 }
 0x3fb   : > { %v13321_v14 = vadd.f32 %v5735_v6, %v5133_v15  ;;  %v6342_v6 = vshrl.u32 %v13308_v24, 16 }
 0x3fc   : > { %v5075_v32 = vpop.f32.mrf.mxu2  ;;  %v4445_v28 = vpop.f32.mrf.mxu1 }
 0x3fd   : > { %v5134_v13 = vadd.f32 %v5075_v32, %v4499_v2  ;;  %v6984_v32 = vrot.slane %v6982_v11, 4  ;;  %v6344_v63 = vor.u32 %v6342_v6, %v6340_v47  ;;  %v10410_v11 = vld [vmem:[#allocation2 + $0x58] sm:$0xff]  }
 0x401   : > { %v5980_v49 = vpop.f32.mrf.mxu0  ;;  %7245 = vmatmul.bf16.gmra.mxu2 %v6977_v37 }
 0x402   : > { %v13325_v34 = vadd.f32 %v5980_v49, %v13124_v43  ;;  %v5737_v15 = vpop.f32.mrf.mxu3  ;;  %v6346_v43 = vshll.u32 %v13328_v23, 16 }
 0x403   : > { %v13330_v35 = vadd.f32 %v5737_v15, %v5134_v13  ;;  %v14130_v13 = vld [vmem:[#allocation16_spill] sm:$0xff]  ;;  %v6985_v15 = vor.u32 %v6984_v32, %v6981_v9 }
 0x404   : > { %6019 = vmatmul.bf16.gmra.mxu0 %v10398_v21  ;;  %v5078_v58 = vpop.f32.mrf.mxu2  ;;  %v4448_v29 = vpop.f32.mrf.mxu1  ;;  %v6348_v33 = vrot.slane %v6346_v43, 1  ;;  %v4211_v49 = vadd.f32 %v13039_v52, %v14130_v13  ;;  %v13348_v52 = vld [vmem:[#allocation2 + $0x58] sm:$0xff]  ;;  %v10399_v43 = vld [vmem:[#allocation2 + $0xb0] sm:$0xff]  }
 0x405   : > { %v5135_v26 = vadd.f32 %v5078_v58, %v4500_v39  ;;  %v4502_v2 = vadd.f32 %v4448_v29, %v4212_v16  ;;  %v6986_v58 = vsel %vm3742_vm6, %v6976_v31, %v6985_v15  ;;  %v6354_v29 = vshll.u32 %v13348_v52, 16 }
 0x406   : > { %v4501_v51 = vadd.f32 %v4445_v28, %v4211_v49  ;;  %v6349_v0 = vsel %vm4695_vm2, %v6344_v63, %v6348_v33  ;;  %v6988_v28 = vshrl.u32 %v10410_v11, 16  ;;  %v6350_v49 = vshrl.u32 %v13328_v23, 16  ;;  %v14134_v23 = vld [vmem:[#allocation22_spill] sm:$0xff] }
 0x407   : > { %7535 = vmatmul.bf16.gmra.mxu3 %v10732_v40 }
 0x408   : > { %v6990_v13 = vrot.slane %v6988_v28, 3 }
 0x409   : > { %v5982_v25 = vpop.f32.mrf.mxu0 }
 0x40a   : > { %v13337_v60 = vadd.f32 %v5982_v25, %v13131_v7  ;;  %v5740_v37 = vpop.f32.mrf.mxu3  ;;  %6593 = vmatmul.bf16.gmra.mxu1 %v6349_v0  ;;  %v6991_v25 = vshll.u32 %v10410_v11, 16  ;;  %v14133_v0 = vld [vmem:[#allocation17_spill] sm:$0xff] }
 0x40b   : > { %v13341_v39 = vadd.f32 %v5740_v37, %v5135_v26 }
 0x40c   : > { %v5080_v21 = vpop.f32.mrf.mxu2  ;;  %v4450_v7 = vpop.f32.mrf.mxu1 }
 0x40d   : > { %v5136_v30 = vadd.f32 %v5080_v21, %v4501_v51  ;;  %v6993_v51 = vrot.slane %v6991_v25, 4  ;;  %v6356_v21 = vrot.slane %v6354_v29, 1  ;;  %v14135_v25 = vld [vmem:[#allocation29_spill] sm:$0xff] }
 0x411   : > { %v5985_v24 = vpop.f32.mrf.mxu0  ;;  %7250 = vmatmul.bf16.gmra.mxu2 %v6986_v58  ;;  %v6352_v58 = vor.u32 %v6350_v49, %v6348_v33  ;;  %v9632_v33 = vld [vmem:[#allocation2 + $0x60] sm:$0xff] }
 0x412   : > { %v13345_v40 = vadd.f32 %v5985_v24, %v13144_v57  ;;  %v5742_v26 = vpop.f32.mrf.mxu3  ;;  %v14131_v57 = vld [vmem:[#allocation61_spill] sm:$0xff] }
 0x413   : > { %v13350_v47 = vadd.f32 %v5742_v26, %v5136_v30  ;;  %v4214_v6 = vadd.f32 %v13069_v45, %v14131_v57  ;;  %v4213_v30 = vadd.f32 %v13061_v17, %v14133_v0  ;;  %v6357_v26 = vsel %vm4695_vm2, %v6352_v58, %v6356_v21  ;;  %v10411_v57 = vld [vmem:[#allocation2 + $0x60] sm:$0xff]  }
 0x414   : > { %6024 = vmatmul.bf16.gmra.mxu0 %v10399_v43  ;;  %v5083_v16 = vpop.f32.mrf.mxu2  ;;  %v4453_v32 = vpop.f32.mrf.mxu1  ;;  %v6994_v43 = vor.u32 %v6993_v51, %v6990_v13  ;;  %v10736_v13 = vld [vmem:[#allocation2 + $0x54] sm:$0xff]   ;;  %v6362_v51 = vshll.u32 %v9632_v33, 16 }
 0x415   : > { %v5137_v9 = vadd.f32 %v5083_v16, %v4502_v2  ;;  %v4504_v63 = vadd.f32 %v4453_v32, %v4214_v6  ;;  %v4503_v45 = vadd.f32 %v4450_v7, %v4213_v30  ;;  %v10400_v7 = vld [vmem:[#allocation2 + $0xb8] sm:$0xff]   ;;  %v6997_v32 = vshrl.u32 %v10411_v57, 16 }
 0x416   : > { %v6995_v17 = vsel %vm3742_vm6, %v6985_v15, %v6994_v43  ;;  %v6358_v15 = vshrl.u32 %v13348_v52, 16 }
 0x417   : > { %7540 = vmatmul.bf16.gmra.mxu3 %v10734_v48  ;;  %v6999_v58 = vrot.slane %v6997_v32, 3 }
 0x419   : > { %v5987_v31 = vpop.f32.mrf.mxu0 }
 0x41a   : > { %v13357_v37 = vadd.f32 %v5987_v31, %v13152_v4  ;;  %v5745_v24 = vpop.f32.mrf.mxu3  ;;  %6598 = vmatmul.bf16.gmra.mxu1 %v6357_v26  ;;  %v4215_v4 = vadd.f32 %v13079_v19, %v14134_v23  ;;  %v7000_v19 = vshll.u32 %v10411_v57, 16  ;;  %v14139_v26 = vld [vmem:[#allocation19_spill] sm:$0xff] }
 0x41b   : > { %v13361_v2 = vadd.f32 %v5745_v24, %v5137_v9 }
 0x41c   : > { %14132 = vst [vmem:[#allocation20_spill] sm:$0xff] %v13357_v37  ;;  %v5085_v11 = vpop.f32.mrf.mxu2  ;;  %v4455_v16 = vpop.f32.mrf.mxu1 }
 0x41d   : > { %v5138_v28 = vadd.f32 %v5085_v11, %v4503_v45  ;;  %v4505_v9 = vadd.f32 %v4455_v16, %v4215_v4  ;;  %v14137_v45 = vld [vmem:[#allocation50_spill] sm:$0xff]  ;;  %v7002_v4 = vrot.slane %v7000_v19, 4 }
 0x41f   : > { %v7003_v57 = vor.u32 %v7002_v4, %v6999_v58 }
 0x421   : > { %v5990_v48 = vpop.f32.mrf.mxu0  ;;  %7255 = vmatmul.bf16.gmra.mxu2 %v6995_v17 }
 0x422   : > { %v13367_v29 = vadd.f32 %v5990_v48, %v14135_v25  ;;  %v5747_v6 = vpop.f32.mrf.mxu3  ;;  %v6360_v25 = vor.u32 %v6358_v15, %v6356_v21 }
 0x423   : > { %v13370_v31 = vadd.f32 %v5747_v6, %v5138_v28  ;;  %v6364_v28 = vrot.slane %v6362_v51, 1  ;;  %v10412_v51 = vld [vmem:[#allocation2 + $0x68] sm:$0xff]  }
 0x424   : > { %14136 = vst [vmem:[#allocation34_spill] sm:$0xff] %v13367_v29  ;;  %6029 = vmatmul.bf16.gmra.mxu0 %v10400_v7  ;;  %v5088_v49 = vpop.f32.mrf.mxu2  ;;  %v6559_v24 = vpop.f32.mrf.mxu1  ;;  %v7006_v58 = vshrl.u32 %v10412_v51, 16 }
 0x425   : > { %v5139_v0 = vadd.f32 %v5088_v49, %v4504_v63  ;;  %v6679_v23 = vadd.f32 %v6559_v24, %v14139_v26  ;;  %v6365_v63 = vsel %vm4695_vm2, %v6360_v25, %v6364_v28  ;;  %v14141_v49 = vld [vmem:[#allocation21_spill] sm:$0xff]  ;;  %v6366_v25 = vshrl.u32 %v9632_v33, 16 }
 0x427   : > { %7545 = vmatmul.bf16.gmra.mxu3 %v10736_v13  ;;  %v7004_v13 = vsel %vm3742_vm6, %v6994_v43, %v7003_v57  ;;  %v7008_v43 = vrot.slane %v7006_v58, 3 }
 0x429   : > { %v5992_v30 = vpop.f32.mrf.mxu0 }
 0x42a   : > { %v13374_v11 = vadd.f32 %v5992_v30, %v14137_v45  ;;  %v5750_v48 = vpop.f32.mrf.mxu3  ;;  %6603 = vmatmul.bf16.gmra.mxu1 %v6365_v63  ;;  %v9633_v30 = vld [vmem:[#allocation2 + $0x68] sm:$0xff]  ;;  %v7009_v45 = vshll.u32 %v10412_v51, 16  ;;  %v14143_v63 = vld [vmem:[#allocation23_spill] sm:$0xff] }
 0x42b   : > { %v13377_v16 = vadd.f32 %v5750_v48, %v5139_v0  ;;  %v10401_v0 = vld [vmem:[#allocation2 + $0xc0] sm:$0xff]   ;;  %v6370_v26 = vshll.u32 %v9633_v30, 16 }
 0x42c   : > { %14138 = vst [vmem:[#allocation52_spill] sm:$0xff] %v13374_v11  ;;  %v5090_v17 = vpop.f32.mrf.mxu2  ;;  %v6561_v32 = vpop.f32.mrf.mxu1 }
 0x42d   : > { %v5140_v7 = vadd.f32 %v5090_v17, %v4505_v9  ;;  %v6680_v19 = vadd.f32 %v6561_v32, %v14141_v49  ;;  %v10738_v9 = vld [vmem:[#allocation2 + $0x5c] sm:$0xff]   ;;  %v7011_v32 = vrot.slane %v7009_v45, 4 }
 0x42f   : > { %v7012_v51 = vor.u32 %v7011_v32, %v7008_v43 }
 0x431   : > { %v5995_v6 = vpop.f32.mrf.mxu0  ;;  %7260 = vmatmul.bf16.gmra.mxu2 %v7004_v13  ;;  %v6372_v13 = vrot.slane %v6370_v26, 1  ;;  %v10413_v26 = vld [vmem:[#allocation2 + $0x70] sm:$0xff]  }
 0x432   : > { %v13381_v52 = vadd.f32 %v5995_v6, %v13194_v41  ;;  %v5752_v24 = vpop.f32.mrf.mxu3 }
 0x433   : > { %v13385_v21 = vadd.f32 %v5752_v24, %v5140_v7 }
 0x434   : > { %14140 = vst [vmem:[#allocation33_spill] sm:$0xff] %v13381_v52  ;;  %6034 = vmatmul.bf16.gmra.mxu0 %v10401_v0  ;;  %v7221_v15 = vpop.f32.mrf.mxu2  ;;  %v6564_v48 = vpop.f32.mrf.mxu1  ;;  %v6368_v0 = vor.u32 %v6366_v25, %v6364_v28  ;;  %v14146_v28 = vld [vmem:[#allocation30_spill] sm:$0xff]  ;;  %v7015_v25 = vshrl.u32 %v10413_v26, 16 }
 0x435   : > { %v7341_v4 = vadd.f32 %v7221_v15, %v6679_v23  ;;  %v6681_v6 = vadd.f32 %v6564_v48, %v14143_v63  ;;  %v13399_v48 = vld [vmem:[#allocation2 + $0x70] sm:$0xff]  ;;  %v10740_v63 = vld [vmem:[#allocation2 + $0x64] sm:$0xff]  }
 0x436   : > { %v6373_v23 = vsel %vm4695_vm2, %v6368_v0, %v6372_v13 }
 0x437   : > { %7550 = vmatmul.bf16.gmra.mxu3 %v10738_v9 }
 0x439   : > { %v5997_v41 = vpop.f32.mrf.mxu0 }
 0x43a   : > { %v13388_v17 = vadd.f32 %v5997_v41, %v13208_v46  ;;  %v7511_v7 = vpop.f32.mrf.mxu3  ;;  %6608 = vmatmul.bf16.gmra.mxu1 %v6373_v23  ;;  %v7013_v46 = vsel %vm3742_vm6, %v7003_v57, %v7012_v51  ;;  %v14145_v41 = vld [vmem:[#allocation24_spill] sm:$0xff]  ;;  %v13405_v57 = vld [vmem:[#allocation2 + $0x24] sm:$0xff] }
 0x43b   : > { %v13391_v49 = vadd.f32 %v7511_v7, %v7341_v4  ;;  %v7018_v7 = vshll.u32 %v10413_v26, 16  ;;  %v7876_v26 = vshll.u32 %v13405_v57, 16 }
 0x43c   : > { %14142 = vst [vmem:[#allocation51_spill] sm:$0xff] %v13388_v17  ;;  %v7223_v24 = vpop.f32.mrf.mxu2  ;;  %v6566_v58 = vpop.f32.mrf.mxu1 }
 0x43d   : > { %v7342_v9 = vadd.f32 %v7223_v24, %v6680_v19  ;;  %v6682_v45 = vadd.f32 %v6566_v58, %v14145_v41  ;;  %v9670_v19 = vld [vmem:[#allocation2 + $0x1c] sm:$0xff]  ;;  %v7017_v58 = vrot.slane %v7015_v25, 3 }
 0x43e   : > { %v7871_v23 = vshll.u32 %v9670_v19, 16  ;;  %v7869_v25 = vshrl.u32 %v9670_v19, 16  ;;  %v10742_v19 = vld [vmem:[#allocation2 + $0x6c] sm:$0xff]  }
 0x441   : > { %v6000_v15 = vpop.f32.mrf.mxu0  ;;  %7265 = vmatmul.bf16.gmra.mxu2 %v7013_v46  ;;  %v6374_v46 = vshrl.u32 %v9633_v30, 16  ;;  %v7878_v30 = vrot.slane %v7876_v26, 1 }
 0x442   : > { %v13395_v33 = vadd.f32 %v6000_v15, %v13221_v53  ;;  %v7513_v4 = vpop.f32.mrf.mxu3  ;;  %v6378_v53 = vshll.u32 %v13399_v48, 16 }
 0x443   : > { %v13402_v43 = vadd.f32 %v7513_v4, %v7342_v9  ;;  %v14147_v9 = vld [vmem:[#allocation25_spill] sm:$0xff] }
 0x444   : > { %14144 = vst [vmem:[#allocation36_spill] sm:$0xff] %v13395_v33  ;;  %6039 = vmatmul.bf16.gmra.mxu0 %v14146_v28  ;;  %v7226_v32 = vpop.f32.mrf.mxu2  ;;  %v6569_v15 = vpop.f32.mrf.mxu1  ;;  %v7020_v28 = vrot.slane %v7018_v7, 4  ;;  %v6380_v33 = vrot.slane %v6378_v53, 1 }
 0x445   : > { %v7343_v0 = vadd.f32 %v7226_v32, %v6681_v6  ;;  %v6683_v4 = vadd.f32 %v6569_v15, %v14147_v9  ;;  %v6376_v6 = vor.u32 %v6374_v46, %v6372_v13  ;;  %v7873_v32 = vrot.slane %v7871_v23, 1  ;;  %v10414_v13 = vld [vmem:[#allocation2 + $0x78] sm:$0xff]  }
 0x446   : > { %v7021_v11 = vor.u32 %v7020_v28, %v7017_v58  ;;  %v13420_v23 = vld [vmem:[#allocation2 + $0x78] sm:$0xff]  ;;  %v7027_v28 = vshll.u32 %v10414_v13, 16 }
 0x447   : > { %7555 = vmatmul.bf16.gmra.mxu3 %v10740_v63  ;;  %v6381_v29 = vsel %vm4695_vm2, %v6376_v6, %v6380_v33 }
 0x448   : > { %v7022_v53 = vsel %vm3742_vm6, %v7012_v51, %v7021_v11  ;;  %v13426_v51 = vld [vmem:[#allocation2 + $0x2c] sm:$0xff] }
 0x449   : > { %v6002_v24 = vpop.f32.mrf.mxu0 }
 0x44a   : > { %v13408_v41 = vadd.f32 %v6002_v24, %v13230_v62  ;;  %v7516_v17 = vpop.f32.mrf.mxu3  ;;  %6613 = vmatmul.bf16.gmra.mxu1 %v6381_v29  ;;  %v7874_v24 = vor.u32 %v7873_v32, %v7869_v25  ;;  %v7024_v29 = vshrl.u32 %v10414_v13, 16  ;;  %v6382_v25 = vshrl.u32 %v13399_v48, 16 }
 0x44b   : > { %v13412_v52 = vadd.f32 %v7516_v17, %v7343_v0  ;;  %v14149_v17 = vld [vmem:[#allocation26_spill] sm:$0xff]  ;;  %v7884_v13 = vshll.u32 %v13426_v51, 16 }
 0x44c   : > { %v7228_v63 = vpop.f32.mrf.mxu2  ;;  %v6571_v15 = vpop.f32.mrf.mxu1  ;;  %v7879_v58 = vsel %vm4695_vm2, %v7874_v24, %v7878_v30 }
 0x44d   : > { %v7344_v37 = vadd.f32 %v7228_v63, %v6682_v45  ;;  %v6684_v0 = vadd.f32 %v6571_v15, %v14149_v17  ;;  %v7026_v63 = vrot.slane %v7024_v29, 3  ;;  %v7029_v15 = vrot.slane %v7027_v28, 4 }
 0x44e   : > { %v7880_v29 = vshrl.u32 %v13405_v57, 16  ;;  %v7886_v48 = vrot.slane %v7884_v13, 1 }
 0x451   : > { %v6005_v62 = vpop.f32.mrf.mxu0  ;;  %7270 = vmatmul.bf16.gmra.mxu2 %v7022_v53 }
 0x452   : > { %v13416_v7 = vadd.f32 %v6005_v62, %v13241_v20  ;;  %v7518_v46 = vpop.f32.mrf.mxu3  ;;  %v6386_v20 = vshll.u32 %v13420_v23, 16 }
 0x453   : > { %v13423_v45 = vadd.f32 %v7518_v46, %v7344_v37  ;;  %v14151_v37 = vld [vmem:[#allocation27_spill] sm:$0xff] }
 0x454   : > { %14148 = vst [vmem:[#allocation54_spill] sm:$0xff] %v13416_v7  ;;  %8144 = vmatmul.bf16.vlgmr.msrb.gmra.mxu0 %v7879_v58  ;;  %v7231_v9 = vpop.f32.mrf.mxu2  ;;  %v6574_v32 = vpop.f32.mrf.mxu1  ;;  %v6388_v53 = vrot.slane %v6386_v20, 1 }
 0x455   : > { %v7345_v26 = vadd.f32 %v7231_v9, %v6683_v4  ;;  %v6685_v24 = vadd.f32 %v6574_v32, %v14151_v37  ;;  %v6384_v4 = vor.u32 %v6382_v25, %v6380_v33  ;;  %v10415_v33 = vld [vmem:[#allocation2 + $0x80] sm:$0xff]  }
 0x456   : > { %v13443_v25 = vld [vmem:[#allocation2 + $0x80] sm:$0xff]  ;;  %v7036_v13 = vshll.u32 %v10415_v33, 16 }
 0x457   : > { %7560 = vmatmul.bf16.gmra.mxu3 %v10742_v19  ;;  %v7030_v19 = vor.u32 %v7029_v15, %v7026_v63  ;;  %v6389_v9 = vsel %vm4695_vm2, %v6384_v4, %v6388_v53 }
 0x459   : > { %v6007_v6 = vpop.f32.mrf.mxu0  ;;  %v7031_v20 = vsel %vm3742_vm6, %v7021_v11, %v7030_v19  ;;  %v13449_v11 = vld [vmem:[#allocation2 + $0x34] sm:$0xff] }
 0x45a   : > { %v13430_v62 = vadd.f32 %v6007_v6, %v13250_v18  ;;  %v7521_v17 = vpop.f32.mrf.mxu3  ;;  %6618 = vmatmul.bf16.gmra.mxu1 %v6389_v9  ;;  %v7882_v6 = vor.u32 %v7880_v29, %v7878_v30  ;;  %v10744_v30 = vld [vmem:[#allocation2 + $0x74] sm:$0xff]  }
 0x45b   : > { %v13434_v58 = vadd.f32 %v7521_v17, %v7345_v26  ;;  %v14153_v26 = vld [vmem:[#allocation28_spill] sm:$0xff] }
 0x45c   : > { %14150 = vst [vmem:[#allocation35_spill] sm:$0xff] %v13430_v62  ;;  %v7233_v46 = vpop.f32.mrf.mxu2  ;;  %v6576_v32 = vpop.f32.mrf.mxu1  ;;  %v7887_v63 = vsel %vm4695_vm2, %v7882_v6, %v7886_v48 }
 0x45d   : > { %v7346_v7 = vadd.f32 %v7233_v46, %v6684_v0  ;;  %v6686_v37 = vadd.f32 %v6576_v32, %v14153_v26  ;;  %v7033_v0 = vshrl.u32 %v10415_v33, 16  ;;  %v7892_v33 = vshll.u32 %v13449_v11, 16 }
 0x45f   : > { %v7035_v29 = vrot.slane %v7033_v0, 3  ;;  %v7888_v0 = vshrl.u32 %v13426_v51, 16 }
 0x461   : > { %v6010_v18 = vpop.f32.mrf.mxu0  ;;  %7275 = vmatmul.bf16.gmra.mxu2 %v7031_v20  ;;  %v7038_v20 = vrot.slane %v7036_v13, 4 }
 0x462   : > { %v13439_v28 = vadd.f32 %v6010_v18, %v13261_v8  ;;  %v7523_v15 = vpop.f32.mrf.mxu3  ;;  %v6394_v8 = vshll.u32 %v13443_v25, 16  ;;  %v6390_v18 = vshrl.u32 %v13420_v23, 16  ;;  %v7894_v23 = vrot.slane %v7892_v33, 1 }
 0x463   : > { %v13446_v57 = vadd.f32 %v7523_v15, %v7346_v7  ;;  %v14154_v7 = vld [vmem:[#allocation32_spill] sm:$0xff] }
 0x464   : > { %14152 = vst [vmem:[#allocation12_spill] sm:$0xff] %v13439_v28  ;;  %8149 = vmatmul.bf16.gmra.mxu0 %v7887_v63  ;;  %v7236_v17 = vpop.f32.mrf.mxu2  ;;  %v6579_v9 = vpop.f32.mrf.mxu1  ;;  %v6396_v26 = vrot.slane %v6394_v8, 1 }
 0x465   : > { %v7347_v4 = vadd.f32 %v7236_v17, %v6685_v24  ;;  %v6687_v32 = vadd.f32 %v6579_v9, %v14154_v7  ;;  %v6392_v24 = vor.u32 %v6390_v18, %v6388_v53  ;;  %v10416_v53 = vld [vmem:[#allocation2 + $0x88] sm:$0xff]  }
 0x466   : > { %v13466_v18 = vld [vmem:[#allocation2 + $0x88] sm:$0xff] }
 0x467   : > { %7565 = vmatmul.bf16.gmra.mxu3 %v10744_v30  ;;  %v7039_v30 = vor.u32 %v7038_v20, %v7035_v29  ;;  %v6397_v28 = vsel %vm4695_vm2, %v6392_v24, %v6396_v26  ;;  %v7045_v20 = vshll.u32 %v10416_v53, 16 }
 0x469   : > { %v6012_v46 = vpop.f32.mrf.mxu0  ;;  %v7040_v8 = vsel %vm3742_vm6, %v7030_v19, %v7039_v30  ;;  %v13472_v19 = vld [vmem:[#allocation2 + $0x3c] sm:$0xff] }
 0x46a   : > { %v13453_v6 = vadd.f32 %v6012_v46, %v13270_v54  ;;  %v7526_v63 = vpop.f32.mrf.mxu3  ;;  %6623 = vmatmul.bf16.gmra.mxu1 %v6397_v28  ;;  %v7890_v46 = vor.u32 %v7888_v0, %v7886_v48  ;;  %v7042_v28 = vshrl.u32 %v10416_v53, 16  ;;  %v10746_v48 = vld [vmem:[#allocation2 + $0x7c] sm:$0xff]   ;;  %v7900_v53 = vshll.u32 %v13472_v19, 16 }
 0x46b   : > { %v13457_v15 = vadd.f32 %v7526_v63, %v7347_v4 }
 0x46c   : > { %v7238_v17 = vpop.f32.mrf.mxu2  ;;  %v6581_v9 = vpop.f32.mrf.mxu1  ;;  %v7895_v29 = vsel %vm4695_vm2, %v7890_v46, %v7894_v23  ;;  %v7044_v24 = vrot.slane %v7042_v28, 3  ;;  %v7047_v46 = vrot.slane %v7045_v20, 4  ;;  %v7896_v28 = vshrl.u32 %v13449_v11, 16 }
 0x46d   : > { %v7348_v62 = vadd.f32 %v7238_v17, %v6686_v37  ;;  %v6688_v4 = vadd.f32 %v6581_v9, %v13190_v56  ;;  %v6398_v17 = vshrl.u32 %v13443_v25, 16  ;;  %v7902_v25 = vrot.slane %v7900_v53, 1 }
 0x471   : > { %v6015_v54 = vpop.f32.mrf.mxu0  ;;  %7280 = vmatmul.bf16.gmra.mxu2 %v7040_v8 }
 0x472   : > { %v13462_v13 = vadd.f32 %v6015_v54, %v13281_v5  ;;  %v7528_v7 = vpop.f32.mrf.mxu3  ;;  %v6402_v5 = vshll.u32 %v13466_v18, 16 }
 0x473   : > { %v13469_v51 = vadd.f32 %v7528_v7, %v7348_v62  ;;  %v14156_v62 = vld [vmem:[#allocation31_spill] sm:$0xff] }
 0x474   : > { %14155 = vst [vmem:[#allocation38_spill] sm:$0xff] %v13462_v13  ;;  %8154 = vmatmul.bf16.gmra.mxu0 %v7895_v29  ;;  %v7241_v37 = vpop.f32.mrf.mxu2  ;;  %v6584_v33 = vpop.f32.mrf.mxu1  ;;  %v6404_v9 = vrot.slane %v6402_v5, 1 }
 0x475   : > { %v7349_v63 = vadd.f32 %v7241_v37, %v6687_v32  ;;  %v6689_v54 = vadd.f32 %v6584_v33, %v14156_v62  ;;  %v6400_v32 = vor.u32 %v6398_v17, %v6396_v26  ;;  %v10417_v26 = vld [vmem:[#allocation2 + $0x90] sm:$0xff]  }
 0x476   : > { %v13489_v17 = vld [vmem:[#allocation2 + $0x90] sm:$0xff] }
 0x477   : > { %7570 = vmatmul.bf16.gmra.mxu3 %v10746_v48  ;;  %v7048_v48 = vor.u32 %v7047_v46, %v7044_v24  ;;  %v6405_v37 = vsel %vm4695_vm2, %v6400_v32, %v6404_v9 }
 0x479   : > { %v6017_v56 = vpop.f32.mrf.mxu0  ;;  %v7049_v5 = vsel %vm3742_vm6, %v7039_v30, %v7048_v48  ;;  %v13495_v30 = vld [vmem:[#allocation2 + $0x44] sm:$0xff] }
 0x47a   : > { %v13476_v0 = vadd.f32 %v6017_v56, %v13290_v12  ;;  %v7531_v8 = vpop.f32.mrf.mxu3  ;;  %6628 = vmatmul.bf16.gmra.mxu1 %v6405_v37  ;;  %v7898_v56 = vor.u32 %v7896_v28, %v7894_v23  ;;  %v10748_v23 = vld [vmem:[#allocation2 + $0x84] sm:$0xff]   ;;  %v6406_v37 = vshrl.u32 %v13466_v18, 16 }
 0x47b   : > { %v13480_v29 = vadd.f32 %v7531_v8, %v7349_v63  ;;  %v7054_v8 = vshll.u32 %v10417_v26, 16 }
 0x47c   : > { %v7243_v7 = vpop.f32.mrf.mxu2  ;;  %v6586_v33 = vpop.f32.mrf.mxu1  ;;  %v7903_v24 = vsel %vm4695_vm2, %v7898_v56, %v7902_v25 }
 0x47d   : > { %v7350_v13 = vadd.f32 %v7243_v7, %v6688_v4  ;;  %v6690_v63 = vadd.f32 %v6586_v33, %v13216_v50  ;;  %v7051_v4 = vshrl.u32 %v10417_v26, 16 }
 0x47f   : > { %v7053_v7 = vrot.slane %v7051_v4, 3  ;;  %v7904_v4 = vshrl.u32 %v13472_v19, 16 }
 0x481   : > { %v6020_v12 = vpop.f32.mrf.mxu0  ;;  %7285 = vmatmul.bf16.gmra.mxu2 %v7049_v5  ;;  %v7908_v5 = vshll.u32 %v13495_v30, 16 }
 0x482   : > { %v13485_v20 = vadd.f32 %v6020_v12, %v13301_v61  ;;  %v7533_v62 = vpop.f32.mrf.mxu3  ;;  %v6410_v61 = vshll.u32 %v13489_v17, 16  ;;  %v7056_v12 = vrot.slane %v7054_v8, 4 }
 0x483   : > { %v13492_v11 = vadd.f32 %v7533_v62, %v7350_v13  ;;  %v7910_v18 = vrot.slane %v7908_v5, 1 }
 0x484   : > { %8159 = vmatmul.bf16.gmra.mxu0 %v7903_v24  ;;  %v7246_v46 = vpop.f32.mrf.mxu2  ;;  %v6589_v32 = vpop.f32.mrf.mxu1  ;;  %v6412_v56 = vrot.slane %v6410_v61, 1  ;;  %v7057_v62 = vor.u32 %v7056_v12, %v7053_v7 }
 0x485   : > { %v7351_v53 = vadd.f32 %v7246_v46, %v6689_v54  ;;  %v6691_v13 = vadd.f32 %v6589_v32, %v13225_v44  ;;  %v6408_v54 = vor.u32 %v6406_v37, %v6404_v9  ;;  %v10418_v9 = vld [vmem:[#allocation2 + $0x98] sm:$0xff]  }
 0x486   : > { %v7058_v61 = vsel %vm3742_vm6, %v7048_v48, %v7057_v62  ;;  %v13512_v32 = vld [vmem:[#allocation2 + $0x98] sm:$0xff]  ;;  %v13518_v48 = vld [vmem:[#allocation2 + $0x4c] sm:$0xff] }
 0x487   : > { %7575 = vmatmul.bf16.gmra.mxu3 %v10748_v23  ;;  %v6413_v23 = vsel %vm4695_vm2, %v6408_v54, %v6412_v56 }
 0x489   : > { %v6022_v50 = vpop.f32.mrf.mxu0 }
 0x48a   : > { %v13499_v28 = vadd.f32 %v6022_v50, %v13310_v3  ;;  %v7536_v33 = vpop.f32.mrf.mxu3  ;;  %6633 = vmatmul.bf16.gmra.mxu1 %v6413_v23  ;;  %v7906_v50 = vor.u32 %v7904_v4, %v7902_v25  ;;  %v10750_v25 = vld [vmem:[#allocation2 + $0x8c] sm:$0xff]   ;;  %v6414_v23 = vshrl.u32 %v13489_v17, 16 }
 0x48b   : > { %v13503_v26 = vadd.f32 %v7536_v33, %v7351_v53  ;;  %v7063_v33 = vshll.u32 %v10418_v9, 16 }
 0x48c   : > { %v7248_v24 = vpop.f32.mrf.mxu2  ;;  %v6591_v44 = vpop.f32.mrf.mxu1  ;;  %v7911_v7 = vsel %vm4695_vm2, %v7906_v50, %v7910_v18 }
 0x48d   : > { %v7352_v46 = vadd.f32 %v7248_v24, %v6690_v63  ;;  %v6692_v53 = vadd.f32 %v6591_v44, %v13237_v59  ;;  %v7060_v63 = vshrl.u32 %v10418_v9, 16 }
 0x48f   : > { %v7062_v24 = vrot.slane %v7060_v63, 3  ;;  %v7912_v63 = vshrl.u32 %v13495_v30, 16 }
 0x491   : > { %v6025_v3 = vpop.f32.mrf.mxu0  ;;  %7290 = vmatmul.bf16.gmra.mxu2 %v7058_v61  ;;  %v7916_v61 = vshll.u32 %v13518_v48, 16 }
 0x492   : > { %v13508_v8 = vadd.f32 %v6025_v3, %v13321_v14  ;;  %v7538_v37 = vpop.f32.mrf.mxu3  ;;  %v6418_v14 = vshll.u32 %v13512_v32, 16  ;;  %v7065_v3 = vrot.slane %v7063_v33, 4 }
 0x493   : > { %v13515_v19 = vadd.f32 %v7538_v37, %v7352_v46  ;;  %v7918_v17 = vrot.slane %v7916_v61, 1 }
 0x494   : > { %8164 = vmatmul.bf16.gmra.mxu0 %v7911_v7  ;;  %v7251_v12 = vpop.f32.mrf.mxu2  ;;  %v6594_v54 = vpop.f32.mrf.mxu1  ;;  %v6420_v50 = vrot.slane %v6418_v14, 1  ;;  %v7066_v37 = vor.u32 %v7065_v3, %v7062_v24 }
 0x495   : > { %v7353_v5 = vadd.f32 %v7251_v12, %v6691_v13  ;;  %v6693_v46 = vadd.f32 %v6594_v54, %v13245_v38  ;;  %v6416_v13 = vor.u32 %v6414_v23, %v6412_v56  ;;  %v10419_v56 = vld [vmem:[#allocation2 + $0xa0] sm:$0xff]  }
 0x496   : > { %v7067_v14 = vsel %vm3742_vm6, %v7057_v62, %v7066_v37  ;;  %v13535_v54 = vld [vmem:[#allocation2 + $0xa0] sm:$0xff]  ;;  %v13541_v62 = vld [vmem:[#allocation2 + $0x54] sm:$0xff] }
 0x497   : > { %7580 = vmatmul.bf16.gmra.mxu3 %v10750_v25  ;;  %v6421_v25 = vsel %vm4695_vm2, %v6416_v13, %v6420_v50 }
 0x499   : > { %v6027_v59 = vpop.f32.mrf.mxu0 }
 0x49a   : > { %v13522_v4 = vadd.f32 %v6027_v59, %v13330_v35  ;;  %v7541_v44 = vpop.f32.mrf.mxu3  ;;  %6638 = vmatmul.bf16.gmra.mxu1 %v6421_v25  ;;  %v7914_v59 = vor.u32 %v7912_v63, %v7910_v18  ;;  %v10752_v18 = vld [vmem:[#allocation2 + $0x94] sm:$0xff]   ;;  %v6422_v25 = vshrl.u32 %v13512_v32, 16 }
 0x49b   : > { %v13526_v9 = vadd.f32 %v7541_v44, %v7353_v5  ;;  %v7072_v44 = vshll.u32 %v10419_v56, 16 }
 0x49c   : > { %v7253_v7 = vpop.f32.mrf.mxu2  ;;  %v6596_v38 = vpop.f32.mrf.mxu1  ;;  %v7919_v24 = vsel %vm4695_vm2, %v7914_v59, %v7918_v17 }
 0x49d   : > { %v7354_v12 = vadd.f32 %v7253_v7, %v6692_v53  ;;  %v6694_v5 = vadd.f32 %v6596_v38, %v13257_v55  ;;  %v7069_v53 = vshrl.u32 %v10419_v56, 16 }
 0x49f   : > { %v7071_v7 = vrot.slane %v7069_v53, 3  ;;  %v7920_v53 = vshrl.u32 %v13518_v48, 16 }
 0x4a1   : > { %v6030_v35 = vpop.f32.mrf.mxu0  ;;  %7295 = vmatmul.bf16.gmra.mxu2 %v7067_v14  ;;  %v7924_v14 = vshll.u32 %v13541_v62, 16 }
 0x4a2   : > { %v13531_v33 = vadd.f32 %v6030_v35, %v13341_v39  ;;  %v7543_v23 = vpop.f32.mrf.mxu3  ;;  %v6426_v39 = vshll.u32 %v13535_v54, 16  ;;  %v7074_v35 = vrot.slane %v7072_v44, 4 }
 0x4a3   : > { %v13538_v30 = vadd.f32 %v7543_v23, %v7354_v12  ;;  %v7926_v32 = vrot.slane %v7924_v14, 1 }
 0x4a4   : > { %8169 = vmatmul.bf16.gmra.mxu0 %v7919_v24  ;;  %v7256_v3 = vpop.f32.mrf.mxu2  ;;  %v6599_v13 = vpop.f32.mrf.mxu1  ;;  %v6428_v59 = vrot.slane %v6426_v39, 1  ;;  %v7075_v23 = vor.u32 %v7074_v35, %v7071_v7 }
 0x4a5   : > { %v7355_v61 = vadd.f32 %v7256_v3, %v6693_v46  ;;  %v6695_v12 = vadd.f32 %v6599_v13, %v13265_v1  ;;  %v6424_v46 = vor.u32 %v6422_v25, %v6420_v50  ;;  %v10420_v50 = vld [vmem:[#allocation2 + $0xa8] sm:$0xff]  }
 0x4a6   : > { %v7076_v39 = vsel %vm3742_vm6, %v7066_v37, %v7075_v23  ;;  %v13558_v13 = vld [vmem:[#allocation2 + $0xa8] sm:$0xff]  ;;  %v13564_v37 = vld [vmem:[#allocation2 + $0x5c] sm:$0xff] }
 0x4a7   : > { %7585 = vmatmul.bf16.gmra.mxu3 %v10752_v18  ;;  %v6429_v18 = vsel %vm4695_vm2, %v6424_v46, %v6428_v59 }
 0x4a9   : > { %v6032_v55 = vpop.f32.mrf.mxu0 }
 0x4aa   : > { %v13545_v63 = vadd.f32 %v6032_v55, %v13350_v47  ;;  %v7546_v38 = vpop.f32.mrf.mxu3  ;;  %6643 = vmatmul.bf16.gmra.mxu1 %v6429_v18  ;;  %v7922_v55 = vor.u32 %v7920_v53, %v7918_v17  ;;  %v10754_v17 = vld [vmem:[#allocation2 + $0x9c] sm:$0xff]   ;;  %v6430_v18 = vshrl.u32 %v13535_v54, 16 }
 0x4ab   : > { %v13549_v56 = vadd.f32 %v7546_v38, %v7355_v61  ;;  %v7081_v38 = vshll.u32 %v10420_v50, 16 }
 0x4ac   : > { %v7258_v24 = vpop.f32.mrf.mxu2  ;;  %v6601_v1 = vpop.f32.mrf.mxu1  ;;  %v7927_v7 = vsel %vm4695_vm2, %v7922_v55, %v7926_v32 }
 0x4ad   : > { %v7356_v3 = vadd.f32 %v7258_v24, %v6694_v5  ;;  %v6696_v61 = vadd.f32 %v6601_v1, %v13277_v22  ;;  %v7078_v5 = vshrl.u32 %v10420_v50, 16 }
 0x4af   : > { %v7080_v24 = vrot.slane %v7078_v5, 3  ;;  %v7928_v5 = vshrl.u32 %v13541_v62, 16 }
 0x4b1   : > { %v6035_v47 = vpop.f32.mrf.mxu0  ;;  %7300 = vmatmul.bf16.gmra.mxu2 %v7076_v39  ;;  %v7932_v39 = vshll.u32 %v13564_v37, 16 }
 0x4b2   : > { %v13554_v44 = vadd.f32 %v6035_v47, %v13361_v2  ;;  %v7548_v25 = vpop.f32.mrf.mxu3  ;;  %v6434_v2 = vshll.u32 %v13558_v13, 16  ;;  %v7083_v47 = vrot.slane %v7081_v38, 4 }
 0x4b3   : > { %v13561_v48 = vadd.f32 %v7548_v25, %v7356_v3  ;;  %v7934_v54 = vrot.slane %v7932_v39, 1 }
 0x4b4   : > { %8174 = vmatmul.bf16.gmra.mxu0 %v7927_v7  ;;  %v7261_v35 = vpop.f32.mrf.mxu2  ;;  %v6604_v46 = vpop.f32.mrf.mxu1  ;;  %v6436_v55 = vrot.slane %v6434_v2, 1  ;;  %v7084_v25 = vor.u32 %v7083_v47, %v7080_v24 }
 0x4b5   : > { %v7357_v14 = vadd.f32 %v7261_v35, %v6695_v12  ;;  %v6697_v3 = vadd.f32 %v6604_v46, %v13285_v42  ;;  %v6432_v12 = vor.u32 %v6430_v18, %v6428_v59  ;;  %v10421_v59 = vld [vmem:[#allocation2 + $0xb0] sm:$0xff]  }
 0x4b6   : > { %v7085_v2 = vsel %vm3742_vm6, %v7075_v23, %v7084_v25  ;;  %v13581_v46 = vld [vmem:[#allocation2 + $0xb0] sm:$0xff]  ;;  %v13587_v23 = vld [vmem:[#allocation2 + $0x64] sm:$0xff] }
 0x4b7   : > { %7590 = vmatmul.bf16.gmra.mxu3 %v10754_v17  ;;  %v6437_v17 = vsel %vm4695_vm2, %v6432_v12, %v6436_v55 }
 0x4b9   : > { %v6037_v22 = vpop.f32.mrf.mxu0 }
 0x4ba   : > { %v13568_v53 = vadd.f32 %v6037_v22, %v13370_v31  ;;  %v7551_v1 = vpop.f32.mrf.mxu3  ;;  %6648 = vmatmul.bf16.gmra.mxu1 %v6437_v17  ;;  %v7930_v22 = vor.u32 %v7928_v5, %v7926_v32  ;;  %v10756_v32 = vld [vmem:[#allocation2 + $0xa4] sm:$0xff]   ;;  %v6438_v17 = vshrl.u32 %v13558_v13, 16 }
 0x4bb   : > { %v13572_v50 = vadd.f32 %v7551_v1, %v7357_v14  ;;  %v7090_v1 = vshll.u32 %v10421_v59, 16 }
 0x4bc   : > { %v7263_v7 = vpop.f32.mrf.mxu2  ;;  %v6606_v42 = vpop.f32.mrf.mxu1  ;;  %v7935_v24 = vsel %vm4695_vm2, %v7930_v22, %v7934_v54 }
 0x4bd   : > { %v7358_v35 = vadd.f32 %v7263_v7, %v6696_v61  ;;  %v6698_v14 = vadd.f32 %v6606_v42, %v13297_v10  ;;  %v7087_v61 = vshrl.u32 %v10421_v59, 16 }
 0x4bf   : > { %v7089_v7 = vrot.slane %v7087_v61, 3  ;;  %v7936_v61 = vshrl.u32 %v13564_v37, 16 }
 0x4c1   : > { %v6040_v31 = vpop.f32.mrf.mxu0  ;;  %7305 = vmatmul.bf16.gmra.mxu2 %v7085_v2  ;;  %v7940_v2 = vshll.u32 %v13587_v23, 16 }
 0x4c2   : > { %v13577_v38 = vadd.f32 %v6040_v31, %v13377_v16  ;;  %v7553_v18 = vpop.f32.mrf.mxu3  ;;  %v6442_v16 = vshll.u32 %v13581_v46, 16  ;;  %v7092_v31 = vrot.slane %v7090_v1, 4 }
 0x4c3   : > { %v13584_v62 = vadd.f32 %v7553_v18, %v7358_v35  ;;  %v7942_v13 = vrot.slane %v7940_v2, 1 }
 0x4c4   : > { %14157 = vst [vmem:[#allocation14_spill] sm:$0xff] %v13577_v38  ;;  %8179 = vmatmul.bf16.gmra.mxu0 %v7935_v24  ;;  %v7266_v47 = vpop.f32.mrf.mxu2  ;;  %v6609_v12 = vpop.f32.mrf.mxu1  ;;  %v6444_v22 = vrot.slane %v6442_v16, 1  ;;  %v7093_v18 = vor.u32 %v7092_v31, %v7089_v7 }
 0x4c5   : > { %v7359_v39 = vadd.f32 %v7266_v47, %v6697_v3  ;;  %v6699_v35 = vadd.f32 %v6609_v12, %v13305_v36  ;;  %v6440_v3 = vor.u32 %v6438_v17, %v6436_v55  ;;  %v10422_v12 = vld [vmem:[#allocation2 + $0xb8] sm:$0xff]  }
 0x4c6   : > { %v7094_v1 = vsel %vm3742_vm6, %v7084_v25, %v7093_v18  ;;  %v7099_v17 = vshll.u32 %v10422_v12, 16  ;;  %v13610_v25 = vld [vmem:[%s13904_s5] ss:$0 sm:$0xff] }
 0x4c7   : > { %7595 = vmatmul.bf16.gmra.mxu3 %v10756_v32  ;;  %v6445_v32 = vsel %vm4695_vm2, %v6440_v3, %v6444_v22  ;;  %v13613_v3 = vld [vmem:[#allocation2 + $0x6c] sm:$0xff] }
 0x4c9   : > { %v6042_v10 = vpop.f32.mrf.mxu0 }
 0x4ca   : > { %v13591_v5 = vadd.f32 %v6042_v10, %v13385_v21  ;;  %v7556_v42 = vpop.f32.mrf.mxu3  ;;  %6653 = vmatmul.bf16.gmra.mxu1 %v6445_v32  ;;  %v7938_v10 = vor.u32 %v7936_v61, %v7934_v54 }
 0x4cb   : > { %v13595_v59 = vadd.f32 %v7556_v42, %v7359_v39  ;;  %v13601_v39 = vld [vmem:[#allocation2 + $0xb8] sm:$0xff] }
 0x4cc   : > { %14158 = vst [vmem:[#allocation37_spill] sm:$0xff] %v13591_v5  ;;  %v7268_v24 = vpop.f32.mrf.mxu2  ;;  %v6611_v36 = vpop.f32.mrf.mxu1  ;;  %v7943_v55 = vsel %vm4695_vm2, %v7938_v10, %v7942_v13  ;;  %v6450_v42 = vshll.u32 %v13601_v39, 16 }
 0x4cd   : > { %v7360_v47 = vadd.f32 %v7268_v24, %v6698_v14  ;;  %v6700_v16 = vadd.f32 %v6611_v36, %v13317_v27  ;;  %v7096_v14 = vshrl.u32 %v10422_v12, 16  ;;  %v10758_v27 = vld [vmem:[#allocation2 + $0xac] sm:$0xff]   ;;  %v7948_v12 = vshll.u32 %v13613_v3, 16 }
 0x4cf   : > { %v7098_v61 = vrot.slane %v7096_v14, 3 }
 0x4d1   : > { %v8145_v21 = vpop.f32.mrf.mxu0  ;;  %7310 = vmatmul.bf16.gmra.mxu2 %v7094_v1  ;;  %v6452_v1 = vrot.slane %v6450_v42, 1 }
 0x4d2   : > { %v7558_v7 = vpop.f32.mrf.mxu3  ;;  %v8265_v54 = vadd.f32 %v8145_v21, %v13391_v49  ;;  %v6446_v49 = vshrl.u32 %v13581_v46, 16 }
 0x4d3   : > { %v13604_v37 = vadd.f32 %v7558_v7, %v7360_v47  ;;  %v7101_v47 = vrot.slane %v7099_v17, 4 }
 0x4d4   : > { %8184 = vmatmul.bf16.gmra.mxu0 %v7943_v55  ;;  %v7271_v31 = vpop.f32.mrf.mxu2  ;;  %v6614_v32 = vpop.f32.mrf.mxu1  ;;  %v8317_v21 = vadd.f32 %v13610_v25, %v8265_v54  ;;  %v6448_v14 = vor.u32 %v6446_v49, %v6444_v22 }
 0x4d5   : > { %v7361_v2 = vadd.f32 %v7271_v31, %v6699_v35  ;;  %v6701_v36 = vadd.f32 %v6614_v32, %v13325_v34  ;;  %v7102_v31 = vor.u32 %v7101_v47, %v7098_v61  ;;  %v7950_v34 = vrot.slane %v7948_v12, 1  ;;  %v10423_v61 = vld [vmem:[#allocation2 + $0xc0] sm:$0xff]  }
 0x4d6   : > { %v8365_v17 = vmax.f32 %v8317_v21, 0.0  ;;  %v6453_v54 = vsel %vm4695_vm2, %v6448_v14, %v6452_v1  ;;  %v13633_v47 = vld [vmem:[#allocation2 + $0xc0] sm:$0xff]  ;;  %v7108_v12 = vshll.u32 %v10423_v61, 16 }
 0x4d7   : > { %7600 = vmatmul.bf16.gmra.mxu3 %v10758_v27  ;;  %v7103_v22 = vsel %vm3742_vm6, %v7093_v18, %v7102_v31  ;;  %v6458_v18 = vshll.u32 %v13633_v47, 16 }
 0x4d9   : > { %v8147_v24 = vpop.f32.mrf.mxu0 }
 0x4da   : > { %v8266_v10 = vadd.f32 %v8147_v24, %v13402_v43  ;;  %v7561_v35 = vpop.f32.mrf.mxu3  ;;  %v7944_v43 = vshrl.u32 %v13587_v23, 16  ;;  %6658 = vmatmul.bf16.gmra.mxu1 %v6453_v54  ;;  %v6460_v54 = vrot.slane %v6458_v18, 1  ;;  %v10424_v18 = vld [vmem:[#allocation2 + $0xc8] sm:$0xff]  }
 0x4db   : > { %v13624_v7 = vadd.f32 %v7561_v35, %v7361_v2 }
 0x4dc   : > { %v8318_v55 = vadd.f32 %v13610_v25, %v8266_v10  ;;  %v7273_v46 = vpop.f32.mrf.mxu2  ;;  %v7946_v5 = vor.u32 %v7944_v43, %v7942_v13  ;;  %v6616_v38 = vpop.f32.mrf.mxu1  ;;  %v7105_v13 = vshrl.u32 %v10423_v61, 16  ;;  %v10760_v10 = vld [vmem:[#allocation2 + $0xb4] sm:$0xff]  }
 0x4dd   : > { %v7362_v42 = vadd.f32 %v7273_v46, %v6700_v16  ;;  %v6702_v2 = vadd.f32 %v6616_v38, %v13337_v60  ;;  %v13640_v60 = vld [vmem:[#allocation2 + $0x74] sm:$0xff]  ;;  %v7110_v46 = vrot.slane %v7108_v12, 4 }
 0x4de   : > { %v8366_v27 = vmax.f32 %v8318_v55, 0.0  ;;  %v7951_v23 = vsel %vm4695_vm2, %v7946_v5, %v7950_v34  ;;  %v7107_v14 = vrot.slane %v7105_v13, 3  ;;  %v6454_v5 = vshrl.u32 %v13601_v39, 16 }
 0x4df   : > { %v7956_v43 = vshll.u32 %v13640_v60, 16 }
 0x4e0   : > { %v10105_v24 = vpack.c.bf16 %v8366_v27, %v8365_v17 }
 0x4e1   : > { %v8150_v32 = vpop.f32.mrf.mxu0  ;;  %7315 = vmatmul.bf16.gmra.mxu2 %v7103_v22 }
 0x4e2   : > { %10106 = vst [vmem:[%s13628_s26] sm:$0xff] %v10105_v24   ;;  %v7563_v49 = vpop.f32.mrf.mxu3  ;;  %v8267_v21 = vadd.f32 %v8150_v32, %v13412_v52  ;;  %v6456_v24 = vor.u32 %v6454_v5, %v6452_v1  ;;  %v7114_v5 = vshrl.u32 %v10424_v18, 16 }
 0x4e3   : > { %v13636_v16 = vadd.f32 %v7563_v49, %v7362_v42  ;;  %v7952_v49 = vshrl.u32 %v13613_v3, 16 }
 0x4e4   : > { %8189 = vmatmul.bf16.gmra.mxu0 %v7951_v23  ;;  %v7276_v35 = vpop.f32.mrf.mxu2  ;;  %v8319_v17 = vadd.f32 %v13610_v25, %v8267_v21  ;;  %v7111_v23 = vor.u32 %v7110_v46, %v7107_v14  ;;  %v6461_v39 = vsel %vm4695_vm2, %v6456_v24, %v6460_v54  ;;  %v9682_v46 = vld [vmem:[#allocation2 + $0x7c] sm:$0xff] }
 0x4e5   : > { %v7363_v55 = vadd.f32 %v7276_v35, %v6701_v36  ;;  %v7954_v35 = vor.u32 %v7952_v49, %v7950_v34 }
 0x4e6   : > { %v8367_v32 = vmax.f32 %v8319_v17, 0.0  ;;  %v7112_v12 = vsel %vm3742_vm6, %v7102_v31, %v7111_v23  ;;  %v7117_v17 = vshll.u32 %v10424_v18, 16  ;;  %v6462_v31 = vshrl.u32 %v13633_v47, 16 }
 0x4e7   : > { %7605 = vmatmul.bf16.gmra.mxu3 %v10760_v10  ;;  %v7960_v47 = vshrl.u32 %v13640_v60, 16 }
 0x4e8   : > { %v7119_v24 = vrot.slane %v7117_v17, 4 }
 0x4e9   : > { %v8152_v38 = vpop.f32.mrf.mxu0 }
 0x4ea   : > { %v8268_v27 = vadd.f32 %v8152_v38, %v13423_v45  ;;  %v7566_v52 = vpop.f32.mrf.mxu3  ;;  %v7958_v45 = vrot.slane %v7956_v43, 1  ;;  %6663 = vmatmul.bf16.gmra.mxu1 %v6461_v39  ;;  %v6464_v39 = vor.u32 %v6462_v31, %v6460_v54 }
 0x4eb   : > { %v13647_v36 = vadd.f32 %v7566_v52, %v7363_v55  ;;  %v9645_v55 = vld [vmem:[#allocation2 + $0xc8] sm:$0xff]  ;;  %v7116_v52 = vrot.slane %v7114_v5, 3  ;;  %v13665_v5 = vld [vmem:[#allocation2 + $0xd0] sm:$0xff]  }
 0x4ec   : > { %v8320_v42 = vadd.f32 %v13610_v25, %v8268_v27  ;;  %v7278_v61 = vpop.f32.mrf.mxu2  ;;  %v7959_v1 = vsel %vm4695_vm2, %v7954_v35, %v7958_v45  ;;  %v6466_v27 = vshll.u32 %v9645_v55, 16  ;;  %v7126_v17 = vshll.u32 %v13665_v5, 16 }
 0x4ed   : > { %v7364_v13 = vadd.f32 %v7278_v61, %v6702_v2  ;;  %v10762_v2 = vld [vmem:[#allocation2 + $0xbc] sm:$0xff]   ;;  %v7964_v61 = vshll.u32 %v9682_v46, 16 }
 0x4ee   : > { %v8368_v22 = vmax.f32 %v8320_v42, 0.0 }
 0x4f0   : > { %v10110_v21 = vpack.c.bf16 %v8368_v22, %v8367_v32  ;;  %v6468_v32 = vrot.slane %v6466_v27, 1  ;;  %v6141_v22 = vld [vmem:[#allocation2 + $0xd0] sm:$0x1]  ;;  %v10764_v27 = vld [vmem:[#allocation2 + $0xc4] sm:$0xff]  }
 0x4f1   : > { %v8155_v10 = vpop.f32.mrf.mxu0  ;;  %7320 = vmatmul.bf16.gmra.mxu2 %v7112_v12  ;;  %v6256_v49 = vunpack.c.l.b16 %v6141_v22  ;;  %v7966_v12 = vrot.slane %v7964_v61, 1 }
 0x4f2   : > { %10536 = vst [vmem:[%s13628_s26 + $0x8] sm:$0xff] %v10110_v21   ;;  %v7568_v38 = vpop.f32.mrf.mxu3  ;;  %v8269_v3 = vadd.f32 %v8155_v10, %v13434_v58  ;;  %v7120_v10 = vor.u32 %v7119_v24, %v7116_v52  ;;  %v6469_v35 = vsel %vm4695_vm2, %v6464_v39, %v6468_v32  ;;  %v9683_v52 = vld [vmem:[#allocation2 + $0x84] sm:$0xff] }
 0x4f3   : > { %v13654_v14 = vadd.f32 %v7568_v38, %v7364_v13 }
 0x4f4   : > { %8194 = vmatmul.bf16.gmra.mxu0 %v7959_v1  ;;  %v8321_v43 = vadd.f32 %v13610_v25, %v8269_v3  ;;  %v7962_v1 = vor.u32 %v7960_v47, %v7958_v45  ;;  %v7121_v38 = vsel %vm3742_vm6, %v7111_v23, %v7120_v10  ;;  %v6281_v3 = vpack.c.b16 %v6256_v49, %v6256_v49 }
 0x4f5   : > { %v6470_v45 = vshrl.u32 %v9645_v55, 16 }
 0x4f6   : > { %v8369_v13 = vmax.f32 %v8321_v43, 0.0  ;;  %v7967_v54 = vsel %vm4695_vm2, %v7962_v1, %v7966_v12  ;;  %v7128_v43 = vrot.slane %v7126_v17, 4  ;;  %v9684_v17 = vld [vmem:[#allocation2 + $0x8c] sm:$0xff] }
 0x4f7   : > { %7610 = vmatmul.bf16.gmra.mxu3 %v10762_v2  ;;  %v7123_v2 = vshrl.u32 %v13665_v5, 16  ;;  %v6472_v22 = vor.u32 %v6470_v45, %v6468_v32 }
 0x4f9   : > { %v8157_v34 = vpop.f32.mrf.mxu0  ;;  %v7125_v23 = vrot.slane %v7123_v2, 3  ;;  %v10765_v2 = vld [vmem:[#allocation2 + $0xcc] sm:$0xff]  }
 0x4fa   : > { %v8270_v42 = vadd.f32 %v8157_v34, %v13446_v57  ;;  %6668 = vmatmul.bf16.gmra.mxu1 %v6469_v35  ;;  %v6474_v34 = vshll.u32 %v6281_v3, 16  ;;  %v7968_v35 = vshrl.u32 %v9682_v46, 16 }
 0x4fc   : > { %v8322_v58 = vadd.f32 %v13610_v25, %v8270_v42  ;;  %v6476_v61 = vrot.slane %v6474_v34, 1 }
 0x4fe   : > { %v8370_v21 = vmax.f32 %v8322_v58, 0.0  ;;  %v7972_v58 = vshll.u32 %v9683_v52, 16 }
 0x500   : > { %v10115_v18 = vpack.c.bf16 %v8370_v21, %v8369_v13  ;;  %v7129_v13 = vor.u32 %v7128_v43, %v7125_v23  ;;  %v6477_v21 = vsel %vm4695_vm2, %v6472_v22, %v6476_v61  ;;  %v7974_v55 = vrot.slane %v7972_v58, 1 }
 0x501   : > { %v8160_v57 = vpop.f32.mrf.mxu0  ;;  %7325 = vmatmul.bf16.gmra.mxu2 %v7121_v38 }
 0x502   : > { %10537 = vst [vmem:[%s13628_s26 + $0x10] sm:$0xff] %v10115_v18   ;;  %v8271_v60 = vadd.f32 %v8160_v57, %v13457_v15  ;;  %v7970_v57 = vor.u32 %v7968_v35, %v7966_v12  ;;  %v7130_v1 = vsel %vm3742_vm6, %v7120_v10, %v7129_v13 }
 0x504   : > { %8199 = vmatmul.bf16.gmra.mxu0 %v7967_v54  ;;  %v8323_v42 = vadd.f32 %v13610_v25, %v8271_v60  ;;  %v7975_v32 = vsel %vm4695_vm2, %v7970_v57, %v7974_v55 }
 0x506   : > { %v8371_v49 = vmax.f32 %v8323_v42, 0.0 }
 0x507   : > { %7615 = vmatmul.bf16.gmra.mxu3 %v10764_v27 }
 0x509   : > { %v8162_v31 = vpop.f32.mrf.mxu0 }
 0x50a   : > { %v8272_v24 = vadd.f32 %v8162_v31, %v13469_v51  ;;  %6673 = vmatmul.bf16.gmra.mxu1 %v6477_v21  ;;  %v6775_v51 = vld [vmem:[#allocation2 + $0xd8] sm:$0xf]  ;;  %v7980_v31 = vshll.u32 %v9684_v17, 16 }
 0x50b   : > { %v6890_v38 = vunpack.c.l.b16 %v6775_v51  ;;  %v7984_v51 = vshrl.u32 %v9684_v17, 16 }
 0x50c   : > { %v8324_v39 = vadd.f32 %v13610_v25, %v8272_v24  ;;  %v7982_v22 = vrot.slane %v7980_v31, 1 }
 0x50d   : > { %v6915_v3 = vpack.c.b16 %v6890_v38, %v6890_v38 }
 0x50e   : > { %v8372_v15 = vmax.f32 %v8324_v39, 0.0  ;;  %v10101_v39 = vunpack.c.h.b16 %v13665_v5 }
 0x50f   : > { %v7132_v46 = vshrl.u32 %v6915_v3, 16  ;;  %v7135_v60 = vshll.u32 %v6915_v3, 16 }
 0x510   : > { %v10120_v47 = vpack.c.bf16 %v8372_v15, %v8371_v49 }
 0x511   : > { %v8165_v18 = vpop.f32.mrf.mxu0  ;;  %7330 = vmatmul.bf16.gmra.mxu2 %v7130_v1  ;;  %v7134_v34 = vrot.slane %v7132_v46, 3  ;;  %v7137_v12 = vrot.slane %v7135_v60, 4  ;;  %v9686_v46 = vld [vmem:[#allocation2 + $0x9c] sm:$0xff] }
 0x512   : > { %10538 = vst [vmem:[%s13628_s26 + $0x18] sm:$0xff] %v10120_v47   ;;  %v8273_v54 = vadd.f32 %v8165_v18, %v13480_v29  ;;  %v7976_v29 = vshrl.u32 %v9683_v52, 16  ;;  %v9685_v47 = vld [vmem:[#allocation2 + $0x94] sm:$0xff] }
 0x513   : > { %v7138_v43 = vor.u32 %v7137_v12, %v7134_v34  ;;  %v7988_v57 = vshll.u32 %v9685_v47, 16  ;;  %v7996_v34 = vshll.u32 %v9686_v46, 16 }
 0x514   : > { %8204 = vmatmul.bf16.gmra.mxu0 %v7975_v32  ;;  %v8325_v10 = vadd.f32 %v13610_v25, %v8273_v54  ;;  %v7978_v15 = vor.u32 %v7976_v29, %v7974_v55  ;;  %v9687_v29 = vld [vmem:[#allocation2 + $0xa4] sm:$0xff] }
 0x515   : > { %v7139_v58 = vsel %vm3742_vm6, %v7129_v13, %v7138_v43  ;;  %v7990_v32 = vrot.slane %v7988_v57, 1  ;;  %v7998_v31 = vrot.slane %v7996_v34, 1  ;;  %v13705_v57 = vpop.f32.mrf.mxu1 }
 0x516   : > { %v8373_v42 = vmax.f32 %v8325_v10, 0.0  ;;  %v7983_v21 = vsel %vm4695_vm2, %v7978_v15, %v7982_v22 }
 0x517   : > { %7620 = vmatmul.bf16.gmra.mxu3 %v10765_v2 }
 0x519   : > { %v8167_v27 = vpop.f32.mrf.mxu0 }
 0x51a   : > { %v8274_v45 = vadd.f32 %v8167_v27, %v13492_v11  ;;  %v7429_v11 = vpack.c.b16 %v6890_v38, %v10101_v39  ;;  %v7986_v38 = vor.u32 %v7984_v51, %v7982_v22 }
 0x51c   : > { %v8326_v23 = vadd.f32 %v13610_v25, %v8274_v45  ;;  %v7992_v45 = vshrl.u32 %v9685_v47, 16 }
 0x51e   : > { %v8374_v24 = vmax.f32 %v8326_v23, 0.0 }
 0x520   : > { %v10125_v61 = vpack.c.bf16 %v8374_v24, %v8373_v42  ;;  %v7994_v42 = vor.u32 %v7992_v45, %v7990_v32 }
 0x521   : > { %v8170_v49 = vpop.f32.mrf.mxu0  ;;  %7335 = vmatmul.bf16.gmra.mxu2 %v7139_v58  ;;  %v8004_v58 = vshll.u32 %v9687_v29, 16 }
 0x522   : > { %10539 = vst [vmem:[%s13628_s26 + $0x20] sm:$0xff] %v10125_v61   ;;  %v8275_v35 = vadd.f32 %v8170_v49, %v13503_v26  ;;  %v7991_v26 = vsel %vm4695_vm2, %v7986_v38, %v7990_v32  ;;  %v7999_v24 = vsel %vm4695_vm2, %v7994_v42, %v7998_v31  ;;  %v8008_v38 = vshrl.u32 %v9687_v29, 16 }
 0x524   : > { %8209 = vmatmul.bf16.gmra.mxu0 %v7983_v21  ;;  %v8327_v18 = vadd.f32 %v13610_v25, %v8275_v35  ;;  %v8000_v21 = vshrl.u32 %v9686_v46, 16 }
 0x526   : > { %v8375_v55 = vmax.f32 %v8327_v18, 0.0 }
 0x527   : > { %7625 = vmatmul.bf16.gmra.mxu3 %v7429_v11  ;;  %v8006_v11 = vrot.slane %v8004_v58, 1 }
 0x529   : > { %v8172_v52 = vpop.f32.mrf.mxu0 }
 0x52a   : > { %v8276_v13 = vadd.f32 %v8172_v52, %v13515_v19  ;;  %v8002_v52 = vor.u32 %v8000_v21, %v7998_v31  ;;  %v9690_v21 = vld [vmem:[#allocation2 + $0xbc] sm:$0xff] }
 0x52c   : > { %v8328_v5 = vadd.f32 %v13610_v25, %v8276_v13  ;;  %v8007_v18 = vsel %vm4695_vm2, %v8002_v52, %v8006_v11  ;;  %v9688_v13 = vld [vmem:[#allocation2 + $0xac] sm:$0xff] }
 0x52d   : > { %v8012_v51 = vshll.u32 %v9688_v13, 16 }
 0x52e   : > { %v8376_v1 = vmax.f32 %v8328_v5, 0.0 }
 0x530   : > { %v10130_v3 = vpack.c.bf16 %v8376_v1, %v8375_v55  ;;  %v13709_v1 = vpop.f32.mrf.mxu2 }
 0x531   : > { %v8175_v54 = vpop.f32.mrf.mxu0 }
 0x532   : > { %10540 = vst [vmem:[%s13628_s26 + $0x28] sm:$0xff] %v10130_v3   ;;  %v8277_v2 = vadd.f32 %v8175_v54, %v13526_v9 }
 0x534   : > { %8214 = vmatmul.bf16.gmra.mxu0 %v7991_v26  ;;  %v8329_v19 = vadd.f32 %v13610_v25, %v8277_v2  ;;  %v8014_v26 = vrot.slane %v8012_v51, 1 }
 0x536   : > { %v8377_v12 = vmax.f32 %v8329_v19, 0.0  ;;  %v13715_v19 = vpop.f32.mrf.mxu1 }
 0x539   : > { %v8177_v60 = vpop.f32.mrf.mxu0 }
 0x53a   : > { %v8278_v27 = vadd.f32 %v8177_v60, %v13538_v30  ;;  %v8010_v60 = vor.u32 %v8008_v38, %v8006_v11 }
 0x53c   : > { %v8330_v17 = vadd.f32 %v13610_v25, %v8278_v27  ;;  %v8015_v27 = vsel %vm4695_vm2, %v8010_v60, %v8014_v26 }
 0x53e   : > { %v8378_v10 = vmax.f32 %v8330_v17, 0.0  ;;  %v9689_v17 = vld [vmem:[#allocation2 + $0xb4] sm:$0xff]  ;;  %v13726_v42 = vpop.f32.mrf.mxu1 }
 0x540   : > { %v10135_v23 = vpack.c.bf16 %v8378_v10, %v8377_v12 }
 0x541   : > { %v8180_v43 = vpop.f32.mrf.mxu0 }
 0x542   : > { %10541 = vst [vmem:[%s13628_s26 + $0x30] sm:$0xff] %v10135_v23   ;;  %v8279_v9 = vadd.f32 %v8180_v43, %v13549_v56  ;;  %v8020_v23 = vshll.u32 %v9689_v17, 16 }
 0x544   : > { %8219 = vmatmul.bf16.gmra.mxu0 %v7999_v24  ;;  %v8331_v30 = vadd.f32 %v13610_v25, %v8279_v9 }
 0x546   : > { %v8379_v49 = vmax.f32 %v8331_v30, 0.0 }
 0x549   : > { %v8182_v22 = vpop.f32.mrf.mxu0 }
 0x54a   : > { %v8280_v61 = vadd.f32 %v8182_v22, %v13561_v48  ;;  %v8016_v22 = vshrl.u32 %v9688_v13, 16 }
 0x54c   : > { %v8332_v39 = vadd.f32 %v13610_v25, %v8280_v61  ;;  %v8018_v58 = vor.u32 %v8016_v22, %v8014_v26 }
 0x54e   : > { %v8380_v15 = vmax.f32 %v8332_v39, 0.0 }
 0x550   : > { %v10140_v35 = vpack.c.bf16 %v8380_v15, %v8379_v49  ;;  %v13735_v15 = vpop.f32.mrf.mxu1 }
 0x551   : > { %v8185_v47 = vpop.f32.mrf.mxu0 }
 0x552   : > { %10542 = vst [vmem:[%s13628_s26 + $0x38] sm:$0xff] %v10140_v35   ;;  %v8281_v56 = vadd.f32 %v8185_v47, %v13572_v50  ;;  %v13712_v50 = vpop.f32.mrf.mxu3 }
 0x554   : > { %8224 = vmatmul.bf16.gmra.mxu0 %v8007_v18  ;;  %v8333_v5 = vadd.f32 %v13610_v25, %v8281_v56  ;;  %v8028_v18 = vshll.u32 %v9690_v21, 16 }
 0x556   : > { %v8381_v3 = vmax.f32 %v8333_v5, 0.0 }
 0x559   : > { %v8187_v48 = vpop.f32.mrf.mxu0 }
 0x55a   : > { %v8282_v55 = vadd.f32 %v8187_v48, %v13584_v62  ;;  %v13718_v62 = vpop.f32.mrf.mxu2  ;;  %v13723_v31 = vpop.f32.mrf.mxu3 }
 0x55c   : > { %v8334_v32 = vadd.f32 %v13610_v25, %v8282_v55  ;;  %v8024_v55 = vshrl.u32 %v9689_v17, 16 }
 0x55e   : > { %v8382_v54 = vmax.f32 %v8334_v32, 0.0  ;;  %v13744_v32 = vpop.f32.mrf.mxu1 }
 0x560   : > { %v10145_v2 = vpack.c.bf16 %v8382_v54, %v8381_v3 }
 0x561   : > { %v8190_v46 = vpop.f32.mrf.mxu0 }
 0x562   : > { %10543 = vst [vmem:[%s13628_s26 + $0x40] sm:$0xff] %v10145_v2   ;;  %v8283_v34 = vadd.f32 %v8190_v46, %v13595_v59  ;;  %v13728_v29 = vpop.f32.mrf.mxu2  ;;  %v8022_v59 = vrot.slane %v8020_v23, 1  ;;  %v9691_v2 = vld [vmem:[#allocation2 + $0xc4] sm:$0xff]  ;;  %v6703_v23 = vadd.f32 %v13705_v57, %v13345_v40 }
 0x564   : > { %8229 = vmatmul.bf16.gmra.mxu0 %v8015_v27  ;;  %v8335_v10 = vadd.f32 %v13610_v25, %v8283_v34  ;;  %v8023_v39 = vsel %vm4695_vm2, %v8018_v58, %v8022_v59  ;;  %v8026_v54 = vor.u32 %v8024_v55, %v8022_v59  ;;  %v7365_v22 = vadd.f32 %v13709_v1, %v6703_v23  ;;  %v14160_v55 = vld [vmem:[#allocation34_spill] sm:$0xff] }
 0x566   : > { %v8383_v24 = vmax.f32 %v8335_v10, 0.0  ;;  %v13755_v17 = vpop.f32.mrf.mxu1 }
 0x569   : > { %v8192_v12 = vpop.f32.mrf.mxu0 }
 0x56a   : > { %v8284_v45 = vadd.f32 %v8192_v12, %v13604_v37  ;;  %v13732_v37 = vpop.f32.mrf.mxu3  ;;  %v13737_v11 = vpop.f32.mrf.mxu2  ;;  %v8036_v12 = vshll.u32 %v9691_v2, 16 }
 0x56c   : > { %v8336_v43 = vadd.f32 %v13610_v25, %v8284_v45 }
 0x56e   : > { %v8384_v9 = vmax.f32 %v8336_v43, 0.0  ;;  %v13771_v57 = vpop.f32.mrf.mxu1 }
 0x570   : > { %v10150_v30 = vpack.c.bf16 %v8384_v9, %v8383_v24  ;;  %v8032_v24 = vshrl.u32 %v9690_v21, 16  ;;  %v8038_v9 = vrot.slane %v8036_v12, 1  ;;  %v14161_v12 = vld [vmem:[#allocation52_spill] sm:$0xff] }
 0x571   : > { %v8195_v61 = vpop.f32.mrf.mxu0 }
 0x572   : > { %10544 = vst [vmem:[%s13628_s26 + $0x48] sm:$0xff] %v10150_v30   ;;  %v8285_v49 = vadd.f32 %v8195_v61, %v13624_v7  ;;  %v13742_v5 = vpop.f32.mrf.mxu3  ;;  %v8030_v7 = vrot.slane %v8028_v18, 1  ;;  %v13747_v38 = vpop.f32.mrf.mxu2  ;;  %v9692_v18 = vld [vmem:[#allocation2 + $0xcc] sm:$0xff] }
 0x574   : > { %8234 = vmatmul.bf16.gmra.mxu0 %v8023_v39  ;;  %v8337_v47 = vadd.f32 %v13610_v25, %v8285_v49  ;;  %v8031_v26 = vsel %vm4695_vm2, %v8026_v54, %v8030_v7  ;;  %v8034_v61 = vor.u32 %v8032_v24, %v8030_v7  ;;  %v6705_v7 = vadd.f32 %v13726_v42, %v14160_v55  ;;  %v9693_v24 = vld [vmem:[#allocation2 + $0xd4] sm:$0xff] }
 0x576   : > { %v8385_v13 = vmax.f32 %v8337_v47, 0.0  ;;  %v8039_v49 = vsel %vm4695_vm2, %v8034_v61, %v8038_v9  ;;  %v13782_v54 = vpop.f32.mrf.mxu1 }
 0x579   : > { %v8197_v35 = vpop.f32.mrf.mxu0 }
 0x57a   : > { %v8286_v52 = vadd.f32 %v8197_v35, %v13636_v16  ;;  %v13751_v46 = vpop.f32.mrf.mxu3  ;;  %v13758_v45 = vpop.f32.mrf.mxu2  ;;  %v7655_v35 = vadd.f32 %v13712_v50, %v7365_v22  ;;  %v8040_v50 = vshrl.u32 %v9691_v2, 16 }
 0x57c   : > { %v8338_v56 = vadd.f32 %v13610_v25, %v8286_v52 }
 0x57e   : > { %v8386_v48 = vmax.f32 %v8338_v56, 0.0 }
 0x580   : > { %v10155_v51 = vpack.c.bf16 %v8386_v48, %v8385_v13 }
 0x581   : > { %v8200_v3 = vpop.f32.mrf.mxu0 }
 0x582   : > { %10545 = vst [vmem:[%s13628_s26 + $0x50] sm:$0xff] %v10155_v51   ;;  %v8287_v16 = vadd.f32 %v8200_v3, %v13647_v36  ;;  %v13766_v39 = vpop.f32.mrf.mxu3  ;;  %v13773_v1 = vpop.f32.mrf.mxu2 }
 0x584   : > { %8239 = vmatmul.bf16.gmra.mxu0 %v8031_v26  ;;  %v8339_v27 = vadd.f32 %v13610_v25, %v8287_v16  ;;  %v7367_v26 = vadd.f32 %v13728_v29, %v6705_v7 }
 0x586   : > { %v8387_v36 = vmax.f32 %v8339_v27, 0.0  ;;  %v7657_v42 = vadd.f32 %v13732_v37, %v7367_v26  ;;  %v14162_v37 = vld [vmem:[#allocation33_spill] sm:$0xff] }
 0x589   : > { %v8202_v60 = vpop.f32.mrf.mxu0 }
 0x58a   : > { %v8288_v34 = vadd.f32 %v8202_v60, %v13654_v14  ;;  %v14159_v14 = vld [vmem:[#allocation20_spill] sm:$0xff]  ;;  %v13778_v48 = vpop.f32.mrf.mxu3  ;;  %v13785_v60 = vpop.f32.mrf.mxu2 }
 0x58b   : > { %v6704_v58 = vadd.f32 %v13715_v19, %v14159_v14 }
 0x58c   : > { %v8340_v10 = vadd.f32 %v13610_v25, %v8288_v34 }
 0x58d   : > { %v7366_v40 = vadd.f32 %v13718_v62, %v6704_v58  ;;  %v8044_v62 = vshll.u32 %v9692_v18, 16  ;;  %v8048_v58 = vshrl.u32 %v9692_v18, 16 }
 0x58e   : > { %v8388_v43 = vmax.f32 %v8340_v10, 0.0  ;;  %v6706_v10 = vadd.f32 %v13735_v15, %v14161_v12  ;;  %v8052_v15 = vshll.u32 %v9693_v24, 16 }
 0x58f   : > { %v7656_v47 = vadd.f32 %v13723_v31, %v7366_v40  ;;  %v8042_v31 = vor.u32 %v8040_v50, %v8038_v9  ;;  %v8046_v34 = vrot.slane %v8044_v62, 1  ;;  %v6639_v9 = vpop.f32.mrf.mxu1  ;;  %v7727_v40 = vld [vmem:[#allocation2 + $0xdc] sm:$0x1]  ;;  %v14163_v50 = vld [vmem:[#allocation51_spill] sm:$0xff] }
 0x590   : > { %v10160_v59 = vpack.c.bf16 %v8388_v43, %v8387_v36  ;;  %v7368_v23 = vadd.f32 %v13737_v11, %v6706_v10  ;;  %v6707_v11 = vadd.f32 %v13744_v32, %v14162_v37  ;;  %v6708_v62 = vadd.f32 %v13755_v17, %v14163_v50 }
 0x591   : > { %v8205_v30 = vpop.f32.mrf.mxu0  ;;  %v8047_v2 = vsel %vm4695_vm2, %v8042_v31, %v8046_v34 }
 0x592   : > { %10546 = vst [vmem:[%s13628_s26 + $0x58] sm:$0xff] %v10160_v59   ;;  %v8289_v21 = vadd.f32 %v8205_v30, %v7655_v35  ;;  %v7588_v43 = vpop.f32.mrf.mxu3  ;;  %v7658_v29 = vadd.f32 %v13742_v5, %v7368_v23  ;;  %v7301_v61 = vpop.f32.mrf.mxu2  ;;  %v7369_v5 = vadd.f32 %v13747_v38, %v6707_v11  ;;  %v7370_v7 = vadd.f32 %v13758_v45, %v6708_v62  ;;  %v14164_v45 = vld [vmem:[#allocation36_spill] sm:$0xff]  ;;  %v14166_v62 = vld [vmem:[#allocation35_spill] sm:$0xff] }
 0x593   : > { %v6709_v23 = vadd.f32 %v13771_v57, %v14164_v45 }
 0x594   : > { %8244 = vmatmul.bf16.gmra.mxu0 %v8039_v49  ;;  %v8341_v19 = vadd.f32 %v13610_v25, %v8289_v21  ;;  %v8050_v21 = vor.u32 %v8048_v58, %v8046_v34  ;;  %v7659_v32 = vadd.f32 %v13751_v46, %v7369_v5  ;;  %v7660_v38 = vadd.f32 %v13766_v39, %v7370_v7  ;;  %v14165_v5 = vld [vmem:[#allocation54_spill] sm:$0xff] }
 0x595   : > { %v7371_v39 = vadd.f32 %v13773_v1, %v6709_v23 }
 0x596   : > { %v8389_v51 = vmax.f32 %v8341_v19, 0.0 }
 0x597   : > { %v6641_v55 = vpop.f32.mrf.mxu1 }
 0x599   : > { %v8207_v52 = vpop.f32.mrf.mxu0 }
 0x59a   : > { %v8290_v56 = vadd.f32 %v8207_v52, %v7656_v47  ;;  %v8054_v47 = vrot.slane %v8052_v15, 1  ;;  %v7591_v19 = vpop.f32.mrf.mxu3  ;;  %v6710_v15 = vadd.f32 %v13782_v54, %v13408_v41  ;;  %v6711_v41 = vadd.f32 %v6639_v9, %v14165_v5 }
 0x59c   : > { %v8342_v13 = vadd.f32 %v13610_v25, %v8290_v56  ;;  %v8055_v18 = vsel %vm4695_vm2, %v8050_v21, %v8054_v47  ;;  %v7372_v58 = vadd.f32 %v13785_v60, %v6710_v15 }
 0x59e   : > { %v8390_v3 = vmax.f32 %v8342_v13, 0.0  ;;  %v7842_v13 = vunpack.c.l.b16 %v7727_v40 }
 0x5a0   : > { %v10165_v16 = vpack.c.bf16 %v8390_v3, %v8389_v51  ;;  %v7303_v51 = vpop.f32.mrf.mxu2  ;;  %v7867_v3 = vpack.c.b16 %v7842_v13, %v7842_v13 }
 0x5a1   : > { %v8210_v27 = vpop.f32.mrf.mxu0 }
 0x5a2   : > { %10547 = vst [vmem:[%s13628_s26 + $0x60] sm:$0xff] %v10165_v16   ;;  %v8291_v36 = vadd.f32 %v8210_v27, %v7657_v42  ;;  %v8056_v16 = vshrl.u32 %v9693_v24, 16  ;;  %v8060_v27 = vshll.u32 %v7867_v3, 16  ;;  %v7593_v12 = vpop.f32.mrf.mxu3 }
 0x5a4   : > { %8249 = vmatmul.bf16.gmra.mxu0 %v8047_v2  ;;  %v8343_v59 = vadd.f32 %v13610_v25, %v8291_v36  ;;  %v6644_v2 = vpop.f32.mrf.mxu1  ;;  %v8058_v46 = vor.u32 %v8056_v16, %v8054_v47  ;;  %v8062_v42 = vrot.slane %v8060_v27, 1 }
 0x5a6   : > { %v8391_v49 = vmax.f32 %v8343_v59, 0.0 }
 0x5a9   : > { %v8212_v22 = vpop.f32.mrf.mxu0 }
 0x5aa   : > { %v8292_v30 = vadd.f32 %v8212_v22, %v7658_v29  ;;  %v7306_v22 = vpop.f32.mrf.mxu2  ;;  %v7596_v37 = vpop.f32.mrf.mxu3 }
 0x5ac   : > { %v8344_v14 = vadd.f32 %v13610_v25, %v8292_v30  ;;  %v8063_v30 = vsel %vm4695_vm2, %v8058_v46, %v8062_v42  ;;  %v6646_v11 = vpop.f32.mrf.mxu1 }
 0x5ae   : > { %v8392_v35 = vmax.f32 %v8344_v14, 0.0  ;;  %v7661_v14 = vadd.f32 %v13778_v48, %v7371_v39 }
 0x5b0   : > { %v10170_v52 = vpack.c.bf16 %v8392_v35, %v8391_v49  ;;  %v7662_v49 = vadd.f32 %v7588_v43, %v7372_v58  ;;  %v14168_v58 = vld [vmem:[#allocation38_spill] sm:$0xff] }
 0x5b1   : > { %v8215_v56 = vpop.f32.mrf.mxu0 }
 0x5b2   : > { %10548 = vst [vmem:[%s13628_s26 + $0x68] sm:$0xff] %v10170_v52   ;;  %v8293_v31 = vadd.f32 %v8215_v56, %v7659_v32  ;;  %v7308_v35 = vpop.f32.mrf.mxu2  ;;  %v7598_v48 = vpop.f32.mrf.mxu3  ;;  %v7373_v56 = vadd.f32 %v7301_v61, %v6711_v41 }
 0x5b4   : > { %8254 = vmatmul.bf16.gmra.mxu0 %v8055_v18  ;;  %v8345_v34 = vadd.f32 %v13610_v25, %v8293_v31  ;;  %v6649_v13 = vpop.f32.mrf.mxu1  ;;  %v6712_v18 = vadd.f32 %v6641_v55, %v14166_v62  ;;  %v7663_v32 = vadd.f32 %v7591_v19, %v7373_v56 }
 0x5b6   : > { %v8393_v36 = vmax.f32 %v8345_v34, 0.0  ;;  %v7374_v7 = vadd.f32 %v7303_v51, %v6712_v18  ;;  %v6714_v51 = vadd.f32 %v6646_v11, %v13453_v6 }
 0x5b8   : > { %v7664_v31 = vadd.f32 %v7593_v12, %v7374_v7 }
 0x5b9   : > { %v8217_v26 = vpop.f32.mrf.mxu0 }
 0x5ba   : > { %v8294_v17 = vadd.f32 %v8217_v26, %v7660_v38  ;;  %v7311_v43 = vpop.f32.mrf.mxu2  ;;  %v7601_v38 = vpop.f32.mrf.mxu3 }
 0x5bc   : > { %v8346_v10 = vadd.f32 %v13610_v25, %v8294_v17  ;;  %v6651_v27 = vpop.f32.mrf.mxu1  ;;  %v14167_v17 = vld [vmem:[#allocation12_spill] sm:$0xff] }
 0x5be   : > { %v8394_v29 = vmax.f32 %v8346_v10, 0.0  ;;  %v6713_v10 = vadd.f32 %v6644_v2, %v14167_v17 }
 0x5c0   : > { %v10175_v24 = vpack.c.bf16 %v8394_v29, %v8393_v36  ;;  %v7375_v42 = vadd.f32 %v7306_v22, %v6713_v10  ;;  %v7376_v36 = vadd.f32 %v7308_v35, %v6714_v51 }
 0x5c1   : > { %v8220_v59 = vpop.f32.mrf.mxu0 }
 0x5c2   : > { %10549 = vst [vmem:[%s13628_s26 + $0x70] sm:$0xff] %v10175_v24   ;;  %v8295_v57 = vadd.f32 %v8220_v59, %v7661_v14  ;;  %v7313_v34 = vpop.f32.mrf.mxu2  ;;  %v7603_v12 = vpop.f32.mrf.mxu3  ;;  %v7665_v23 = vadd.f32 %v7596_v37, %v7375_v42  ;;  %v7666_v59 = vadd.f32 %v7598_v48, %v7376_v36 }
 0x5c4   : > { %8259 = vmatmul.bf16.gmra.mxu0 %v8063_v30  ;;  %v8347_v40 = vadd.f32 %v13610_v25, %v8295_v57  ;;  %v6654_v29 = vpop.f32.mrf.mxu1  ;;  %v6715_v57 = vadd.f32 %v6649_v13, %v14168_v58 }
 0x5c5   : > { %v6717_v18 = vadd.f32 %v6654_v29, %v13485_v20 }
 0x5c6   : > { %v8395_v54 = vmax.f32 %v8347_v40, 0.0 }
 0x5c9   : > { %v8222_v1 = vpop.f32.mrf.mxu0 }
 0x5ca   : > { %v8296_v21 = vadd.f32 %v8222_v1, %v7662_v49  ;;  %v7316_v24 = vpop.f32.mrf.mxu2  ;;  %v7606_v22 = vpop.f32.mrf.mxu3  ;;  %v7377_v1 = vadd.f32 %v7311_v43, %v6715_v57 }
 0x5cc   : > { %v8348_v47 = vadd.f32 %v13610_v25, %v8296_v21  ;;  %v6656_v11 = vpop.f32.mrf.mxu1  ;;  %v6716_v21 = vadd.f32 %v6651_v27, %v13476_v0  ;;  %v7379_v0 = vadd.f32 %v7316_v24, %v6717_v18 }
 0x5ce   : > { %v8396_v52 = vmax.f32 %v8348_v47, 0.0  ;;  %v7667_v47 = vadd.f32 %v7601_v38, %v7377_v1  ;;  %v7378_v5 = vadd.f32 %v7313_v34, %v6716_v21  ;;  %v6718_v38 = vadd.f32 %v6656_v11, %v13499_v28 }
 0x5d0   : > { %v10180_v60 = vpack.c.bf16 %v8396_v52, %v8395_v54  ;;  %v7668_v52 = vadd.f32 %v7603_v12, %v7378_v5 }
 0x5d1   : > { %v8225_v50 = vpop.f32.mrf.mxu0 }
 0x5d2   : > { %10550 = vst [vmem:[%s13628_s26 + $0x78] sm:$0xff] %v10180_v60   ;;  %v8297_v3 = vadd.f32 %v8225_v50, %v7663_v32  ;;  %v7318_v35 = vpop.f32.mrf.mxu2  ;;  %v7608_v54 = vpop.f32.mrf.mxu3 }
 0x5d4   : > { %v8349_v9 = vadd.f32 %v13610_v25, %v8297_v3  ;;  %v6659_v48 = vpop.f32.mrf.mxu1 }
 0x5d6   : > { %v8397_v46 = vmax.f32 %v8349_v9, 0.0  ;;  %v7669_v9 = vadd.f32 %v7606_v22, %v7379_v0 }
 0x5d9   : > { %v8227_v26 = vpop.f32.mrf.mxu0 }
 0x5da   : > { %v8298_v16 = vadd.f32 %v8227_v26, %v7664_v31  ;;  %v7321_v50 = vpop.f32.mrf.mxu2  ;;  %v7611_v3 = vpop.f32.mrf.mxu3 }
 0x5dc   : > { %v8350_v61 = vadd.f32 %v13610_v25, %v8298_v16  ;;  %v6661_v26 = vpop.f32.mrf.mxu1  ;;  %v7380_v16 = vadd.f32 %v7318_v35, %v6718_v38 }
 0x5dd   : > { %v6720_v29 = vadd.f32 %v6661_v26, %v13522_v4 }
 0x5de   : > { %v8398_v55 = vmax.f32 %v8350_v61, 0.0  ;;  %v7670_v34 = vadd.f32 %v7608_v54, %v7380_v16 }
 0x5e0   : > { %v10185_v45 = vpack.c.bf16 %v8398_v55, %v8397_v46 }
 0x5e1   : > { %v8230_v19 = vpop.f32.mrf.mxu0 }
 0x5e2   : > { %10551 = vst [vmem:[%s13628_s26 + $0x80] sm:$0xff] %v10185_v45   ;;  %v8299_v39 = vadd.f32 %v8230_v19, %v7665_v23  ;;  %v7323_v27 = vpop.f32.mrf.mxu2  ;;  %v7613_v46 = vpop.f32.mrf.mxu3  ;;  %v6719_v45 = vadd.f32 %v6659_v48, %v13508_v8  ;;  %v13845_v8 = vld [vmem:[%s13904_s5] ss:$0 sm:$0xff] }
 0x5e3   : > { %v7382_v24 = vadd.f32 %v7323_v27, %v6720_v29 }
 0x5e4   : > { %v8351_v15 = vadd.f32 %v13610_v25, %v8299_v39  ;;  %v6664_v42 = vpop.f32.mrf.mxu1  ;;  %v7381_v12 = vadd.f32 %v7321_v50, %v6719_v45 }
 0x5e5   : > { %v6721_v57 = vadd.f32 %v6664_v42, %v13531_v33 }
 0x5e6   : > { %v8399_v49 = vmax.f32 %v8351_v15, 0.0  ;;  %v7671_v39 = vadd.f32 %v7611_v3, %v7381_v12 }
 0x5e9   : > { %v8232_v30 = vpop.f32.mrf.mxu0 }
 0x5ea   : > { %v8300_v2 = vadd.f32 %v8232_v30, %v7666_v59  ;;  %v7326_v51 = vpop.f32.mrf.mxu2  ;;  %v7616_v59 = vpop.f32.mrf.mxu3 }
 0x5eb   : > { %v7383_v1 = vadd.f32 %v7326_v51, %v6721_v57 }
 0x5ec   : > { %v8352_v14 = vadd.f32 %v13610_v25, %v8300_v2  ;;  %v6666_v15 = vpop.f32.mrf.mxu1  ;;  %v7672_v2 = vadd.f32 %v7613_v46, %v7382_v24  ;;  %v14169_v46 = vld [vmem:[#allocation14_spill] sm:$0xff] }
 0x5ed   : > { %v6722_v21 = vadd.f32 %v6666_v15, %v13545_v63  ;;  %v7673_v5 = vadd.f32 %v7616_v59, %v7383_v1 }
 0x5ee   : > { %v8400_v6 = vmax.f32 %v8352_v14, 0.0 }
 0x5f0   : > { %v10190_v37 = vpack.c.bf16 %v8400_v6, %v8399_v49 }
 0x5f1   : > { %v8235_v40 = vpop.f32.mrf.mxu0 }
 0x5f2   : > { %10552 = vst [vmem:[%s13628_s26 + $0x88] sm:$0xff] %v10190_v37   ;;  %v8301_v41 = vadd.f32 %v8235_v40, %v7667_v47  ;;  %v7618_v11 = vpop.f32.mrf.mxu3 }
 0x5f4   : > { %v8353_v60 = vadd.f32 %v13610_v25, %v8301_v41  ;;  %v6669_v35 = vpop.f32.mrf.mxu1 }
 0x5f5   : > { %v6723_v18 = vadd.f32 %v6669_v35, %v13554_v44 }
 0x5f6   : > { %v8401_v43 = vmax.f32 %v8353_v60, 0.0 }
 0x5f9   : > { %v8237_v56 = vpop.f32.mrf.mxu0 }
 0x5fa   : > { %v8302_v13 = vadd.f32 %v8237_v56, %v7668_v52  ;;  %v7621_v48 = vpop.f32.mrf.mxu3 }
 0x5fc   : > { %v8354_v62 = vadd.f32 %v13610_v25, %v8302_v13  ;;  %v6671_v13 = vpop.f32.mrf.mxu1 }
 0x5fd   : > { %v6724_v3 = vadd.f32 %v6671_v13, %v13568_v53 }
 0x5fe   : > { %v8402_v32 = vmax.f32 %v8354_v62, 0.0 }
 0x600   : > { %v10195_v7 = vpack.c.bf16 %v8402_v32, %v8401_v43 }
 0x601   : > { %v8240_v31 = vpop.f32.mrf.mxu0 }
 0x602   : > { %10553 = vst [vmem:[%s13628_s26 + $0x90] sm:$0xff] %v10195_v7   ;;  %v8303_v61 = vadd.f32 %v8240_v31, %v7669_v9  ;;  %v7623_v31 = vpop.f32.mrf.mxu3 }
 0x604   : > { %v8355_v10 = vadd.f32 %v13610_v25, %v8303_v61  ;;  %v6674_v9 = vpop.f32.mrf.mxu1 }
 0x606   : > { %v8403_v19 = vmax.f32 %v8355_v10, 0.0 }
 0x609   : > { %v8242_v17 = vpop.f32.mrf.mxu0 }
 0x60a   : > { %v8304_v20 = vadd.f32 %v8242_v17, %v7670_v34  ;;  %v7626_v10 = vpop.f32.mrf.mxu3 }
 0x60c   : > { %v8356_v55 = vadd.f32 %v13610_v25, %v8304_v20  ;;  %v7328_v25 = vpop.f32.mrf.mxu2  ;;  %v6676_v45 = vpop.f32.mrf.mxu1 }
 0x60d   : > { %v7384_v41 = vadd.f32 %v7328_v25, %v6722_v21 }
 0x60e   : > { %v8404_v28 = vmax.f32 %v8356_v55, 0.0  ;;  %v6725_v55 = vadd.f32 %v6674_v9, %v14169_v46 }
 0x60f   : > { %v7674_v52 = vadd.f32 %v7618_v11, %v7384_v41 }
 0x610   : > { %v10200_v23 = vpack.c.bf16 %v8404_v28, %v8403_v19 }
 0x611   : > { %v8245_v36 = vpop.f32.mrf.mxu0 }
 0x612   : > { %10554 = vst [vmem:[%s13628_s26 + $0x98] sm:$0xff] %v10200_v23   ;;  %v8305_v30 = vadd.f32 %v8245_v36, %v7671_v39  ;;  %v14170_v23 = vld [vmem:[#allocation37_spill] sm:$0xff]  ;;  %v7628_v24 = vpop.f32.mrf.mxu3 }
 0x613   : > { %v6726_v36 = vadd.f32 %v6676_v45, %v14170_v23 }
 0x614   : > { %v8357_v22 = vadd.f32 %v13845_v8, %v8305_v30  ;;  %v7331_v47 = vpop.f32.mrf.mxu2 }
 0x615   : > { %v7385_v32 = vadd.f32 %v7331_v47, %v6723_v18 }
 0x616   : > { %v8405_v49 = vmax.f32 %v8357_v22, 0.0 }
 0x617   : > { %v7675_v38 = vadd.f32 %v7621_v48, %v7385_v32 }
 0x619   : > { %v8247_v14 = vpop.f32.mrf.mxu0 }
 0x61a   : > { %v8306_v58 = vadd.f32 %v8247_v14, %v7672_v2 }
 0x61c   : > { %v8358_v4 = vadd.f32 %v13845_v8, %v8306_v58  ;;  %v7333_v62 = vpop.f32.mrf.mxu2 }
 0x61d   : > { %v7386_v26 = vadd.f32 %v7333_v62, %v6724_v3 }
 0x61e   : > { %v8406_v6 = vmax.f32 %v8358_v4, 0.0 }
 0x61f   : > { %v7676_v61 = vadd.f32 %v7623_v31, %v7386_v26 }
 0x620   : > { %v10205_v37 = vpack.c.bf16 %v8406_v6, %v8405_v49 }
 0x621   : > { %v8250_v40 = vpop.f32.mrf.mxu0 }
 0x622   : > { %10555 = vst [vmem:[%s13628_s26 + $0xa0] sm:$0xff] %v10205_v37   ;;  %v8307_v54 = vadd.f32 %v8250_v40, %v7673_v5 }
 0x624   : > { %v8359_v33 = vadd.f32 %v13845_v8, %v8307_v54  ;;  %v7336_v27 = vpop.f32.mrf.mxu2 }
 0x625   : > { %v7387_v19 = vadd.f32 %v7336_v27, %v6725_v55 }
 0x626   : > { %v8407_v43 = vmax.f32 %v8359_v33, 0.0 }
 0x627   : > { %v7677_v29 = vadd.f32 %v7626_v10, %v7387_v19 }
 0x629   : > { %v8252_v56 = vpop.f32.mrf.mxu0 }
 0x62a   : > { %v8308_v60 = vadd.f32 %v8252_v56, %v7674_v52 }
 0x62c   : > { %v8360_v50 = vadd.f32 %v13845_v8, %v8308_v60  ;;  %v7338_v51 = vpop.f32.mrf.mxu2 }
 0x62d   : > { %v7388_v39 = vadd.f32 %v7338_v51, %v6726_v36 }
 0x62e   : > { %v8408_v63 = vmax.f32 %v8360_v50, 0.0 }
 0x62f   : > { %v7678_v30 = vadd.f32 %v7628_v24, %v7388_v39 }
 0x630   : > { %v10210_v0 = vpack.c.bf16 %v8408_v63, %v8407_v43 }
 0x631   : > { %v8255_v7 = vpop.f32.mrf.mxu0 }
 0x632   : > { %10556 = vst [vmem:[%s13628_s26 + $0xa8] sm:$0xff] %v10210_v0   ;;  %v8309_v16 = vadd.f32 %v8255_v7, %v7675_v38 }
 0x634   : > { %v8361_v17 = vadd.f32 %v13845_v8, %v8309_v16 }
 0x636   : > { %v8409_v53 = vmax.f32 %v8361_v17, 0.0 }
 0x639   : > { %v8257_v34 = vpop.f32.mrf.mxu0 }
 0x63a   : > { %v8310_v44 = vadd.f32 %v8257_v34, %v7676_v61 }
 0x63c   : > { %v8362_v20 = vadd.f32 %v13845_v8, %v8310_v44 }
 0x63e   : > { %v8410_v42 = vmax.f32 %v8362_v20, 0.0 }
 0x640   : > { %v10215_v28 = vpack.c.bf16 %v8410_v42, %v8409_v53 }
 0x641   : > { %v8260_v12 = vpop.f32.mrf.mxu0 }
 0x642   : > { %10557 = vst [vmem:[%s13628_s26 + $0xb0] sm:$0xff] %v10215_v28   ;;  %v8311_v59 = vadd.f32 %v8260_v12, %v7677_v29 }
 0x644   : > { %v8363_v2 = vadd.f32 %v13845_v8, %v8311_v59 }
 0x646   : > { %v8411_v22 = vmax.f32 %v8363_v2, 0.0 }
 0x649   : > { %v8262_v15 = vpop.f32.mrf.mxu0 }
 0x64a   : > { %v8312_v25 = vadd.f32 %v8262_v15, %v7678_v30 }
 0x64c   : > { %v8364_v14 = vadd.f32 %v13845_v8, %v8312_v25 }
 0x64e   : > { %v8412_v58 = vmax.f32 %v8364_v14, 0.0 }
 0x650   : > { %v10220_v4 = vpack.c.bf16 %v8412_v58, %v8411_v22 }
 0x652   : > { %10558 = vst [vmem:[%s13628_s26 + $0xb8] sm:$0xff] %v10220_v4  }
 0x653   : > { %10953 = shalt.err (!%p10950_p8)
}
 0x654   : > { %s10998_s19 = smov 64   ;;  %s10999_s26 = smov 4  }
 0x655   : > { %10823 = dma.vmem_to_hbm [thread:$0]  (%p11073_p5), %s8523_s9, 3072, %s8525_s14, %s8510_s25, %s10998_s19, %s10998_s19, %s10999_s26  }
 0x656 PF: > { %p10835_p9 = scmp.ge.s32.totalorder %s10992_s24, 2  ;;  %s8539_s10 = sand.u32 1, %s10980_s21  }
 0x657   : > { %s8540_s11 = scalar_lea.sflag [#allocation5], %s8539_s10 }
 0x658   : > { %p10830_p10 = pnand %p10835_p9, %p11077_p6 }
 0x65a   : > { %p10831_p11 = pneg %p10830_p10 }
 0x65c   : > { %10975 = dma.done.wait (%p10831_p11), %s8540_s11, 3072  }
 0x65d   : > { %10977 = vsyncadd (%p10831_p11), %s8540_s11, 4294964224  ;;  %p17_p12 = scmp.ge.s32.totalorder %s11060_s27, 4   ;;  %s14171_s21 = smov %s10984_s22 }
 0x65e   : > { %s14172_s22 = smov %s10988_s23  ;;  %s14173_s23 = smov %s11071_s30 }
 0x65f   : > { %s14174_s24 = smov %s11060_s27  ;;  %19 = sbr.rel (!%p17_p12) target bundleno = 4 (0x4), region = 93 }
 0x664   :  { %8546 = vsyncpa [#allocation4], 1 }
 0x665   :  { %8548 = vsyncpa [#allocation4 + $0x1], 1 }
 0x666   :  { %8549 = vsyncpa [#allocation5], 1 }
 0x667   :  { %8551 = vsyncpa [#allocation5 + $0x1], 1 }

</bundles_post_ra>
